<compile_context>
chip_gen: v7x
topology: tpu7x:2x2x1
jax: 0.10.0
libtpu: 0.0.40
codegen_flags: <defaults>
</compile_context>

<pallas_src>
import math
import functools

import jax
import jax.numpy as jnp
from jax.experimental import pallas as pl
from jax.experimental.pallas import tpu as pltpu

_VMEM_BUDGET = 8 * 1024 * 1024    # per-call working-set target (v7x 64 MiB safe)
_VMEM_LIMIT = 32 * 1024 * 1024    # explicit scoped-VMEM request


# ----------------------------- in-kernel math ------------------------------ #
def _erf(x):
    # Abramowitz & Stegun 7.1.26 polynomial erf, |err| <= 1.5e-7 (f32-exact),
    # built only from ops with guaranteed Mosaic lowerings (exp/mul/add/where).
    a1, a2, a3, a4, a5 = (0.254829592, -0.284496736, 1.421413741,
                          -1.453152027, 1.061405429)
    p = 0.3275911
    ax = jnp.abs(x)
    t = 1.0 / (1.0 + p * ax)
    poly = t * (a1 + t * (a2 + t * (a3 + t * (a4 + t * a5))))
    y = 1.0 - poly * jnp.exp(-ax * ax)
    return jnp.where(x < 0.0, -y, y)


def _gelu_exact(x):
    # matches torch.nn.GELU() default (approximate='none')
    return 0.5 * x * (1.0 + _erf(x * (1.0 / math.sqrt(2.0))))


# ------------------------------- kernels ----------------------------------- #
def _conv_stats_kernel(x_ref, w_ref, conv_ref, sum_ref, sq_ref):
    """Pass 1: bf16 matmul (f32 accum) + per-channel sum / sum-of-squares.

    sum/sq output blocks use a constant index map, so they stay resident in
    VMEM across the grid and act as accumulators (init on step 0 via pl.when).
    Zero-padded im2col rows contribute exactly 0 (no conv bias), so the stats
    stay exact; the wrapper divides by the true row count.
    """
    i = pl.program_id(0)
    acc = jnp.dot(x_ref[...], w_ref[...], preferred_element_type=jnp.float32)
    conv_ref[...] = acc

    @pl.when(i == 0)
    def _():
        sum_ref[...] = jnp.zeros_like(sum_ref)
        sq_ref[...] = jnp.zeros_like(sq_ref)

    sum_ref[...] += jnp.sum(acc, axis=0, keepdims=True)
    sq_ref[...] += jnp.sum(acc * acc, axis=0, keepdims=True)


def _bn_act_kernel(x_ref, scale_ref, shift_ref, *rest, apply_gelu,
                   has_residual):
    """Pass 2: y = x*scale + shift (BN affine) [+ GELU] [+ residual].

    Operates on the lane-dense (N*Ho, Wo*C) view; scale/shift are pre-tiled Wo
    times along the lane axis.  Grid axis is "parallel" (megacore-friendly).
    """
    if has_residual:
        res_ref, o_ref = rest
    else:
        (o_ref,) = rest
    y = x_ref[...] * scale_ref[...] + shift_ref[...]
    if apply_gelu:
        y = _gelu_exact(y)
    if has_residual:
        y = y + res_ref[...]
    o_ref[...] = y.astype(o_ref.dtype)


# ------------------------------ JAX-side glue ------------------------------ #
def _round_up(x, m):
    return (x + m - 1) // m * m


def _pow2_cap(n, cap):
    """Largest power of two <= min(n, cap), at least 8."""
    t = 8
    while t * 2 <= min(n, cap):
        t *= 2
    return t


def _pow2_divisor(n, cap):
    """Largest power-of-two divisor of n that is <= cap."""
    t = 1
    while n % (t * 2) == 0 and t * 2 <= cap:
        t *= 2
    return t


def _im2col(x_nhwc, kh, kw, stride, pad):
    # TODO(synk): 3x3 convs materialize a 9x-expanded patch matrix in HBM; a
    # halo-tiled in-kernel patch build would cut that HBM read traffic further.
    if pad:
        x_nhwc = jnp.pad(x_nhwc, ((0, 0), (pad, pad), (pad, pad), (0, 0)))
    n, hp, wp, c = x_nhwc.shape
    ho = (hp - kh) // stride + 1
    wo = (wp - kw) // stride + 1
    patches = []
    for i in range(kh):
        for j in range(kw):
            patches.append(
                x_nhwc[:, i:i + (ho - 1) * stride + 1:stride,
                          j:j + (wo - 1) * stride + 1:stride, :])
    cols = jnp.concatenate(patches, axis=-1)          # (N,Ho,Wo,KH*KW*C)
    return cols.reshape(n * ho * wo, kh * kw * c), (n, ho, wo)


def conv_bn_act(x_nhwc, w_oihw, gamma, beta, *, stride, pad, gelu,
                residual=None, eps=1e-5):
    """One Conv2d + training-mode BatchNorm2d (+GELU) (+residual add) via two
    fused, pipelined Pallas passes.  Conv bias is omitted on purpose: a
    per-channel shift before batch-stat BN cancels exactly in the forward."""
    cout, cin, kh, kw = w_oihw.shape
    cols, (n, ho, wo) = _im2col(x_nhwc, kh, kw, stride, pad)
    m, k = cols.shape                          # m == n*ho*wo
    m2, wc = n * ho, wo * cout                 # lane-dense elementwise view

    # ---- tile selection (sized against a v7x-safe VMEM budget) ----
    t2 = _pow2_cap(m2, max(8, _VMEM_BUDGET // (wc * 4 * 6)))
    m2_pad = _round_up(m2, t2)
    m_pad = m2_pad * wo
    row_bytes = 4 * k + 8 * cout               # bf16 cols + f32 out, dbl-buffered
    cap1 = max(16, min(512, _VMEM_BUDGET // row_bytes))
    t1 = _pow2_divisor(m_pad, cap1)
    if t1 < 16:                                # keep bf16 sublane tiling happy
        t1 = m_pad
    g1 = m_pad // t1

    # ---- pass 1: conv matmul (bf16 MXU inputs, f32 accum) + batch stats ----
    cols_b = cols.astype(jnp.bfloat16)
    if m_pad > m:                              # zero rows -> contribute 0 to stats
        cols_b = jnp.pad(cols_b, ((0, m_pad - m), (0, 0)))
    # column order matches _im2col: ((kh*KW + kw)*Cin + cin)
    w_col = jnp.transpose(w_oihw, (2, 3, 1, 0)).reshape(kh * kw * cin, cout)
    w_col = w_col.astype(jnp.bfloat16)

    conv_out, csum, csq = pl.pallas_call(
        _conv_stats_kernel,
        out_shape=(jax.ShapeDtypeStruct((m_pad, cout), jnp.float32),
                   jax.ShapeDtypeStruct((1, cout), jnp.float32),
                   jax.ShapeDtypeStruct((1, cout), jnp.float32)),
        grid=(g1,),
        in_specs=[pl.BlockSpec((t1, k), lambda i: (i, 0)),
                  pl.BlockSpec((k, cout), lambda i: (0, 0))],
        out_specs=(pl.BlockSpec((t1, cout), lambda i: (i, 0)),
                   pl.BlockSpec((1, cout), lambda i: (0, 0)),
                   pl.BlockSpec((1, cout), lambda i: (0, 0))),
        compiler_params=pltpu.CompilerParams(
            dimension_semantics=("arbitrary",),
            vmem_limit_bytes=_VMEM_LIMIT),
    )(cols_b, w_col)

    # ---- per-channel BN finalize (O(C) work: plain-JAX glue) ----
    inv_m = 1.0 / float(m)                     # divide by the real row count
    mean = csum * inv_m
    var = jnp.maximum(csq * inv_m - mean * mean, 0.0)   # biased variance
    scale = gamma.reshape(1, cout).astype(jnp.float32) * jax.lax.rsqrt(var + eps)
    shift = beta.reshape(1, cout).astype(jnp.float32) - mean * scale
    scale_t = jnp.tile(scale, (1, wo))         # broadcast across the Wo grouping
    shift_t = jnp.tile(shift, (1, wo))

    # ---- pass 2: BN affine + GELU + residual on the lane-dense view ----
    x2 = conv_out.reshape(m2_pad, wc)          # same bytes, lane-dense rows
    args = [x2, scale_t, shift_t]
    in_specs = [pl.BlockSpec((t2, wc), lambda i: (i, 0)),
                pl.BlockSpec((1, wc), lambda i: (0, 0)),
                pl.BlockSpec((1, wc), lambda i: (0, 0))]
    has_res = residual is not None
    if has_res:
        r2 = residual.reshape(m2, wc).astype(jnp.float32)
        if m2_pad > m2:
            r2 = jnp.pad(r2, ((0, m2_pad - m2), (0, 0)))
        args.append(r2)
        in_specs.append(pl.BlockSpec((t2, wc), lambda i: (i, 0)))

    kernel2 = functools.partial(_bn_act_kernel, apply_gelu=gelu,
                                has_residual=has_res)
    y2 = pl.pallas_call(
        kernel2,
        out_shape=jax.ShapeDtypeStruct((m2_pad, wc), jnp.float32),
        grid=(m2_pad // t2,),
        in_specs=in_specs,
        out_specs=pl.BlockSpec((t2, wc), lambda i: (i, 0)),
        compiler_params=pltpu.CompilerParams(
            dimension_semantics=("parallel",),
            vmem_limit_bytes=_VMEM_LIMIT),
    )(*args)
    return y2[:m2].reshape(n, ho, wo, cout)


# ------------------------------- Stem module ------------------------------- #
def init_stem_params(key, input_channel):
    layers = [32, 64, 128]
    ks = iter(jax.random.split(key, 32))
    p = {}

    def conv_w(co, ci, kh, kw):
        return 0.1 * jax.random.normal(next(ks), (co, ci, kh, kw), jnp.float32)

    def vec(c, scale=0.1, base=0.0):
        return base + scale * jax.random.normal(next(ks), (c,), jnp.float32)

    # conv1 = _conv(input_channel, 32): two (conv3x3 s1 p1 no-bias, BN, GELU)
    p["c1a_w"] = conv_w(layers[0], input_channel, 3, 3)
    p["c1a_g"], p["c1a_b"] = vec(layers[0], base=1.0), vec(layers[0])
    p["c1b_w"] = conv_w(layers[0], layers[0], 3, 3)
    p["c1b_g"], p["c1b_b"] = vec(layers[0], base=1.0), vec(layers[0])
    # conv2 = _resblock(32, 64)  (conv biases omitted: cancelled by train-BN)
    p["c2a_w"] = conv_w(layers[1], layers[0], 3, 3)
    p["c2a_g"], p["c2a_b"] = vec(layers[1], base=1.0), vec(layers[1])
    p["c2b_w"] = conv_w(layers[1], layers[1], 3, 3)
    p["c2b_g"], p["c2b_b"] = vec(layers[1], base=1.0), vec(layers[1])
    # res1 (1x1 s2) + norm1
    p["r1_w"] = conv_w(layers[1], layers[0], 1, 1)
    p["n1_g"], p["n1_b"] = vec(layers[1], base=1.0), vec(layers[1])
    # conv3 = _resblock(64, 128)
    p["c3a_w"] = conv_w(layers[2], layers[1], 3, 3)
    p["c3a_g"], p["c3a_b"] = vec(layers[2], base=1.0), vec(layers[2])
    p["c3b_w"] = conv_w(layers[2], layers[2], 3, 3)
    p["c3b_g"], p["c3b_b"] = vec(layers[2], base=1.0), vec(layers[2])
    # res2 (1x1 s2) + norm2
    p["r2_w"] = conv_w(layers[2], layers[1], 1, 1)
    p["n2_g"], p["n2_b"] = vec(layers[2], base=1.0), vec(layers[2])
    return p


def stem_forward(x_nchw, p):
    x = jnp.transpose(x_nchw, (0, 2, 3, 1)).astype(jnp.float32)  # NCHW -> NHWC

    # x = self.conv1(x)
    x = conv_bn_act(x, p["c1a_w"], p["c1a_g"], p["c1a_b"],
                    stride=1, pad=1, gelu=True)
    x = conv_bn_act(x, p["c1b_w"], p["c1b_g"], p["c1b_b"],
                    stride=1, pad=1, gelu=True)
    tmp = x
    # x = self.conv2(x)
    x = conv_bn_act(x, p["c2a_w"], p["c2a_g"], p["c2a_b"],
                    stride=2, pad=1, gelu=True)
    x = conv_bn_act(x, p["c2b_w"], p["c2b_g"], p["c2b_b"],
                    stride=1, pad=1, gelu=True)
    # _tmp = self.norm1(self.res1(_tmp)); x += _tmp   (residual add fused)
    x = conv_bn_act(tmp, p["r1_w"], p["n1_g"], p["n1_b"],
                    stride=2, pad=0, gelu=False, residual=x)
    # out = self.conv3(x)
    out = conv_bn_act(x, p["c3a_w"], p["c3a_g"], p["c3a_b"],
                      stride=2, pad=1, gelu=True)
    out = conv_bn_act(out, p["c3b_w"], p["c3b_g"], p["c3b_b"],
                      stride=1, pad=1, gelu=True)
    # x = self.norm2(self.res2(x)); out += x   (residual add fused)
    out = conv_bn_act(x, p["r2_w"], p["n2_g"], p["n2_b"],
                      stride=2, pad=0, gelu=False, residual=out)
    return jnp.transpose(out, (0, 3, 1, 2))  # back to NCHW


# TODO(synk): BatchNorm running-stat updates (a training-time side effect that
# does not influence the forward output) are not modeled.

if __name__ == "__main__":
    key = jax.random.PRNGKey(0)
    k_x, k_p = jax.random.split(key)
    N, C, H, W = 2, 4, 16, 16
    x = jax.random.normal(k_x, (N, C, H, W), jnp.float32)
    params = init_stem_params(k_p, input_channel=C)

    out = jax.jit(stem_forward)(x, params)
    out = jax.block_until_ready(out)
    assert out.shape == (N, 128, H // 4, W // 4), out.shape
    assert out.dtype == jnp.float32
    print("KERNEL_OK")
</pallas_src>

<mosaic_0001>
module attributes {stable_mosaic.version = 11 : i64} {
  func.func @_conv_stats_kernel(%arg0: i32, %arg1: memref<512x36xbf16, #tpu.memory_space<vmem>>, %arg2: memref<36x32xbf16, #tpu.memory_space<vmem>>, %arg3: memref<512x32xf32, #tpu.memory_space<vmem>>, %arg4: memref<1x32xf32, #tpu.memory_space<vmem>>, %arg5: memref<1x32xf32, #tpu.memory_space<vmem>>) attributes {dimension_semantics = [#tpu.dimension_semantics<arbitrary>], iteration_bounds = array<i64: 1>, scalar_prefetch = 0 : i64, scratch_operands = 0 : i64, tpu.core_type = #tpu.core_type<tc>, window_params = [{transform_indices = @transform_0, window_bounds = array<i64: 512, 36>}, {pipeline_mode = #tpu.pipeline_mode<synchronous>, transform_indices = @transform_1, window_bounds = array<i64: 36, 32>}, {transform_indices = @transform_2, window_bounds = array<i64: 512, 32>}, {pipeline_mode = #tpu.pipeline_mode<synchronous>, transform_indices = @transform_3, window_bounds = array<i64: 1, 32>}, {pipeline_mode = #tpu.pipeline_mode<synchronous>, transform_indices = @transform_4, window_bounds = array<i64: 1, 32>}]} {
    %c0 = arith.constant 0 : index
    %c0_0 = arith.constant 0 : index
    %0 = vector.load %arg1[%c0, %c0_0] : memref<512x36xbf16, #tpu.memory_space<vmem>>, vector<512x36xbf16>
    %c0_1 = arith.constant 0 : index
    %c0_2 = arith.constant 0 : index
    %1 = vector.load %arg2[%c0_1, %c0_2] : memref<36x32xbf16, #tpu.memory_space<vmem>>, vector<36x32xbf16>
    %cst = arith.constant dense<0.000000e+00> : vector<512x32xf32>
    %2 = tpu.matmul %0, %1, %cst {dimension_numbers = #tpu.dot_dimension_numbers<[1], [0], [0], [1], [0, 0, 1, 1], [], []>} : vector<512x36xbf16>, vector<36x32xbf16>, vector<512x32xf32> -> vector<512x32xf32>
    %c0_3 = arith.constant 0 : index
    %c0_4 = arith.constant 0 : index
    %3 = vector.load %arg3[%c0_3, %c0_4] : memref<512x32xf32, #tpu.memory_space<vmem>>, vector<512x32xf32>
    tpu.vector_store %arg3[%c0_3, %c0_4], %2 {strides = array<i32>} : memref<512x32xf32, #tpu.memory_space<vmem>>, vector<512x32xf32>,
    %c0_i32 = arith.constant 0 : i32
    %4 = arith.cmpi eq, %arg0, %c0_i32 : i32
    %5 = arith.extui %4 : i1 to i32
    %c0_i32_5 = arith.constant 0 : i32
    %6 = arith.cmpi ne, %5, %c0_i32_5 : i32
    scf.if %6 {
      %cst_16 = arith.constant 0.000000e+00 : f32
      %18 = vector.broadcast %cst_16 : f32 to vector<1x32xf32>
      %c0_17 = arith.constant 0 : index
      %c0_18 = arith.constant 0 : index
      %19 = vector.load %arg4[%c0_17, %c0_18] : memref<1x32xf32, #tpu.memory_space<vmem>>, vector<1x32xf32>
      tpu.vector_store %arg4[%c0_17, %c0_18], %18 {strides = array<i32>} : memref<1x32xf32, #tpu.memory_space<vmem>>, vector<1x32xf32>,
      %cst_19 = arith.constant 0.000000e+00 : f32
      %20 = vector.broadcast %cst_19 : f32 to vector<1x32xf32>
      %c0_20 = arith.constant 0 : index
      %c0_21 = arith.constant 0 : index
      %21 = vector.load %arg5[%c0_20, %c0_21] : memref<1x32xf32, #tpu.memory_space<vmem>>, vector<1x32xf32>
      tpu.vector_store %arg5[%c0_20, %c0_21], %20 {strides = array<i32>} : memref<1x32xf32, #tpu.memory_space<vmem>>, vector<1x32xf32>,
    } else {
    }
    %c0_6 = arith.constant 0 : index
    %c0_7 = arith.constant 0 : index
    %7 = vector.load %arg4[%c0_6, %c0_7] : memref<1x32xf32, #tpu.memory_space<vmem>>, vector<1x32xf32>
    %cst_8 = arith.constant dense<0.000000e+00> : vector<32xf32>
    %8 = vector.multi_reduction <add>, %2, %cst_8 [0] : vector<512x32xf32> to vector<32xf32>
    %9 = vector.shape_cast %8 : vector<32xf32> to vector<1x32xf32>
    %10 = arith.addf %7, %9 : vector<1x32xf32>
    %c0_9 = arith.constant 0 : index
    %c0_10 = arith.constant 0 : index
    %11 = vector.load %arg4[%c0_9, %c0_10] : memref<1x32xf32, #tpu.memory_space<vmem>>, vector<1x32xf32>
    tpu.vector_store %arg4[%c0_9, %c0_10], %10 {strides = array<i32>} : memref<1x32xf32, #tpu.memory_space<vmem>>, vector<1x32xf32>,
    %c0_11 = arith.constant 0 : index
    %c0_12 = arith.constant 0 : index
    %12 = vector.load %arg5[%c0_11, %c0_12] : memref<1x32xf32, #tpu.memory_space<vmem>>, vector<1x32xf32>
    %13 = arith.mulf %2, %2 : vector<512x32xf32>
    %cst_13 = arith.constant dense<0.000000e+00> : vector<32xf32>
    %14 = vector.multi_reduction <add>, %13, %cst_13 [0] : vector<512x32xf32> to vector<32xf32>
    %15 = vector.shape_cast %14 : vector<32xf32> to vector<1x32xf32>
    %16 = arith.addf %12, %15 : vector<1x32xf32>
    %c0_14 = arith.constant 0 : index
    %c0_15 = arith.constant 0 : index
    %17 = vector.load %arg5[%c0_14, %c0_15] : memref<1x32xf32, #tpu.memory_space<vmem>>, vector<1x32xf32>
    tpu.vector_store %arg5[%c0_14, %c0_15], %16 {strides = array<i32>} : memref<1x32xf32, #tpu.memory_space<vmem>>, vector<1x32xf32>,
    return
  }
  func.func @transform_0(%arg0: i32) -> (i32, i32) {
    %c0_i32 = arith.constant 0 : i32
    %c0_i32_0 = arith.constant 0 : i32
    return %arg0, %c0_i32 : i32, i32
  }
  func.func @transform_1(%arg0: i32) -> (i32, i32) {
    %c0_i32 = arith.constant 0 : i32
    %c0_i32_0 = arith.constant 0 : i32
    %c0_i32_1 = arith.constant 0 : i32
    return %c0_i32, %c0_i32_0 : i32, i32
  }
  func.func @transform_2(%arg0: i32) -> (i32, i32) {
    %c0_i32 = arith.constant 0 : i32
    %c0_i32_0 = arith.constant 0 : i32
    return %arg0, %c0_i32 : i32, i32
  }
  func.func @transform_3(%arg0: i32) -> (i32, i32) {
    %c0_i32 = arith.constant 0 : i32
    %c0_i32_0 = arith.constant 0 : i32
    %c0_i32_1 = arith.constant 0 : i32
    return %c0_i32, %c0_i32_0 : i32, i32
  }
  func.func @transform_4(%arg0: i32) -> (i32, i32) {
    %c0_i32 = arith.constant 0 : i32
    %c0_i32_0 = arith.constant 0 : i32
    %c0_i32_1 = arith.constant 0 : i32
    return %c0_i32, %c0_i32_0 : i32, i32
  }
}

module attributes {stable_mosaic.version = 11 : i64} {
  func.func @_bn_act_kernel(%arg0: i32, %arg1: memref<32x512xf32, #tpu.memory_space<vmem>>, %arg2: memref<1x512xf32, #tpu.memory_space<vmem>>, %arg3: memref<1x512xf32, #tpu.memory_space<vmem>>, %arg4: memref<32x512xf32, #tpu.memory_space<vmem>>) attributes {dimension_semantics = [#tpu.dimension_semantics<parallel>], iteration_bounds = array<i64: 1>, scalar_prefetch = 0 : i64, scratch_operands = 0 : i64, tpu.core_type = #tpu.core_type<tc>, window_params = [{transform_indices = @transform_0, window_bounds = array<i64: 32, 512>}, {pipeline_mode = #tpu.pipeline_mode<synchronous>, transform_indices = @transform_1, window_bounds = array<i64: 1, 512>}, {pipeline_mode = #tpu.pipeline_mode<synchronous>, transform_indices = @transform_2, window_bounds = array<i64: 1, 512>}, {transform_indices = @transform_3, window_bounds = array<i64: 32, 512>}]} {
    %c0 = arith.constant 0 : index
    %c0_0 = arith.constant 0 : index
    %0 = vector.load %arg1[%c0, %c0_0] : memref<32x512xf32, #tpu.memory_space<vmem>>, vector<32x512xf32>
    %c0_1 = arith.constant 0 : index
    %c0_2 = arith.constant 0 : index
    %1 = vector.load %arg2[%c0_1, %c0_2] : memref<1x512xf32, #tpu.memory_space<vmem>>, vector<1x512xf32>
    %2 = vector.broadcast %1 : vector<1x512xf32> to vector<32x512xf32>
    %3 = arith.mulf %0, %2 : vector<32x512xf32>
    %c0_3 = arith.constant 0 : index
    %c0_4 = arith.constant 0 : index
    %4 = vector.load %arg3[%c0_3, %c0_4] : memref<1x512xf32, #tpu.memory_space<vmem>>, vector<1x512xf32>
    %5 = vector.broadcast %4 : vector<1x512xf32> to vector<32x512xf32>
    %6 = arith.addf %3, %5 : vector<32x512xf32>
    %cst = arith.constant 5.000000e-01 : f32
    %7 = vector.broadcast %cst : f32 to vector<32x512xf32>
    %8 = arith.mulf %7, %6 : vector<32x512xf32>
    %cst_5 = arith.constant 0.707106769 : f32
    %9 = vector.broadcast %cst_5 : f32 to vector<32x512xf32>
    %10 = arith.mulf %6, %9 : vector<32x512xf32>
    %11 = math.absf %10 : vector<32x512xf32>
    %cst_6 = arith.constant 0.327591091 : f32
    %12 = vector.broadcast %cst_6 : f32 to vector<32x512xf32>
    %13 = arith.mulf %12, %11 : vector<32x512xf32>
    %cst_7 = arith.constant 1.000000e+00 : f32
    %14 = vector.broadcast %cst_7 : f32 to vector<32x512xf32>
    %15 = arith.addf %14, %13 : vector<32x512xf32>
    %cst_8 = arith.constant 1.000000e+00 : f32
    %16 = vector.broadcast %cst_8 : f32 to vector<32x512xf32>
    %17 = arith.divf %16, %15 : vector<32x512xf32>
    %cst_9 = arith.constant 1.06140542 : f32
    %18 = vector.broadcast %cst_9 : f32 to vector<32x512xf32>
    %19 = arith.mulf %17, %18 : vector<32x512xf32>
    %cst_10 = arith.constant -1.45315206 : f32
    %20 = vector.broadcast %cst_10 : f32 to vector<32x512xf32>
    %21 = arith.addf %20, %19 : vector<32x512xf32>
    %22 = arith.mulf %17, %21 : vector<32x512xf32>
    %cst_11 = arith.constant 1.42141378 : f32
    %23 = vector.broadcast %cst_11 : f32 to vector<32x512xf32>
    %24 = arith.addf %23, %22 : vector<32x512xf32>
    %25 = arith.mulf %17, %24 : vector<32x512xf32>
    %cst_12 = arith.constant -0.284496725 : f32
    %26 = vector.broadcast %cst_12 : f32 to vector<32x512xf32>
    %27 = arith.addf %26, %25 : vector<32x512xf32>
    %28 = arith.mulf %17, %27 : vector<32x512xf32>
    %cst_13 = arith.constant 0.254829586 : f32
    %29 = vector.broadcast %cst_13 : f32 to vector<32x512xf32>
    %30 = arith.addf %29, %28 : vector<32x512xf32>
    %31 = arith.mulf %17, %30 : vector<32x512xf32>
    %cst_14 = arith.constant 0.000000e+00 : f32
    %32 = vector.broadcast %cst_14 : f32 to vector<32x512xf32>
    %33 = arith.subf %32, %11 : vector<32x512xf32>
    %34 = arith.mulf %33, %11 : vector<32x512xf32>
    %35 = math.exp %34 : vector<32x512xf32>
    %36 = arith.mulf %31, %35 : vector<32x512xf32>
    %cst_15 = arith.constant 1.000000e+00 : f32
    %37 = vector.broadcast %cst_15 : f32 to vector<32x512xf32>
    %38 = arith.subf %37, %36 : vector<32x512xf32>
    %cst_16 = arith.constant 0.000000e+00 : f32
    %39 = vector.broadcast %cst_16 : f32 to vector<32x512xf32>
    %40 = arith.cmpf olt, %10, %39 : vector<32x512xf32>
    %cst_17 = arith.constant 0.000000e+00 : f32
    %41 = vector.broadcast %cst_17 : f32 to vector<32x512xf32>
    %42 = arith.subf %41, %38 : vector<32x512xf32>
    %43 = arith.select %40, %42, %38 : vector<32x512xi1>, vector<32x512xf32>
    %cst_18 = arith.constant 1.000000e+00 : f32
    %44 = vector.broadcast %cst_18 : f32 to vector<32x512xf32>
    %45 = arith.addf %44, %43 : vector<32x512xf32>
    %46 = arith.mulf %8, %45 : vector<32x512xf32>
    %c0_19 = arith.constant 0 : index
    %c0_20 = arith.constant 0 : index
    %47 = vector.load %arg4[%c0_19, %c0_20] : memref<32x512xf32, #tpu.memory_space<vmem>>, vector<32x512xf32>
    tpu.vector_store %arg4[%c0_19, %c0_20], %46 {strides = array<i32>} : memref<32x512xf32, #tpu.memory_space<vmem>>, vector<32x512xf32>,
    return
  }
  func.func @transform_0(%arg0: i32) -> (i32, i32) {
    %c0_i32 = arith.constant 0 : i32
    %c0_i32_0 = arith.constant 0 : i32
    return %arg0, %c0_i32 : i32, i32
  }
  func.func @transform_1(%arg0: i32) -> (i32, i32) {
    %c0_i32 = arith.constant 0 : i32
    %c0_i32_0 = arith.constant 0 : i32
    %c0_i32_1 = arith.constant 0 : i32
    return %c0_i32, %c0_i32_0 : i32, i32
  }
  func.func @transform_2(%arg0: i32) -> (i32, i32) {
    %c0_i32 = arith.constant 0 : i32
    %c0_i32_0 = arith.constant 0 : i32
    %c0_i32_1 = arith.constant 0 : i32
    return %c0_i32, %c0_i32_0 : i32, i32
  }
  func.func @transform_3(%arg0: i32) -> (i32, i32) {
    %c0_i32 = arith.constant 0 : i32
    %c0_i32_0 = arith.constant 0 : i32
    return %arg0, %c0_i32 : i32, i32
  }
}

module attributes {stable_mosaic.version = 11 : i64} {
  func.func @_conv_stats_kernel(%arg0: i32, %arg1: memref<512x288xbf16, #tpu.memory_space<vmem>>, %arg2: memref<288x32xbf16, #tpu.memory_space<vmem>>, %arg3: memref<512x32xf32, #tpu.memory_space<vmem>>, %arg4: memref<1x32xf32, #tpu.memory_space<vmem>>, %arg5: memref<1x32xf32, #tpu.memory_space<vmem>>) attributes {dimension_semantics = [#tpu.dimension_semantics<arbitrary>], iteration_bounds = array<i64: 1>, scalar_prefetch = 0 : i64, scratch_operands = 0 : i64, tpu.core_type = #tpu.core_type<tc>, window_params = [{transform_indices = @transform_0, window_bounds = array<i64: 512, 288>}, {pipeline_mode = #tpu.pipeline_mode<synchronous>, transform_indices = @transform_1, window_bounds = array<i64: 288, 32>}, {transform_indices = @transform_2, window_bounds = array<i64: 512, 32>}, {pipeline_mode = #tpu.pipeline_mode<synchronous>, transform_indices = @transform_3, window_bounds = array<i64: 1, 32>}, {pipeline_mode = #tpu.pipeline_mode<synchronous>, transform_indices = @transform_4, window_bounds = array<i64: 1, 32>}]} {
    %c0 = arith.constant 0 : index
    %c0_0 = arith.constant 0 : index
    %0 = vector.load %arg1[%c0, %c0_0] : memref<512x288xbf16, #tpu.memory_space<vmem>>, vector<512x288xbf16>
    %c0_1 = arith.constant 0 : index
    %c0_2 = arith.constant 0 : index
    %1 = vector.load %arg2[%c0_1, %c0_2] : memref<288x32xbf16, #tpu.memory_space<vmem>>, vector<288x32xbf16>
    %cst = arith.constant dense<0.000000e+00> : vector<512x32xf32>
    %2 = tpu.matmul %0, %1, %cst {dimension_numbers = #tpu.dot_dimension_numbers<[1], [0], [0], [1], [0, 0, 1, 1], [], []>} : vector<512x288xbf16>, vector<288x32xbf16>, vector<512x32xf32> -> vector<512x32xf32>
    %c0_3 = arith.constant 0 : index
    %c0_4 = arith.constant 0 : index
    %3 = vector.load %arg3[%c0_3, %c0_4] : memref<512x32xf32, #tpu.memory_space<vmem>>, vector<512x32xf32>
    tpu.vector_store %arg3[%c0_3, %c0_4], %2 {strides = array<i32>} : memref<512x32xf32, #tpu.memory_space<vmem>>, vector<512x32xf32>,
    %c0_i32 = arith.constant 0 : i32
    %4 = arith.cmpi eq, %arg0, %c0_i32 : i32
    %5 = arith.extui %4 : i1 to i32
    %c0_i32_5 = arith.constant 0 : i32
    %6 = arith.cmpi ne, %5, %c0_i32_5 : i32
    scf.if %6 {
      %cst_16 = arith.constant 0.000000e+00 : f32
      %18 = vector.broadcast %cst_16 : f32 to vector<1x32xf32>
      %c0_17 = arith.constant 0 : index
      %c0_18 = arith.constant 0 : index
      %19 = vector.load %arg4[%c0_17, %c0_18] : memref<1x32xf32, #tpu.memory_space<vmem>>, vector<1x32xf32>
      tpu.vector_store %arg4[%c0_17, %c0_18], %18 {strides = array<i32>} : memref<1x32xf32, #tpu.memory_space<vmem>>, vector<1x32xf32>,
      %cst_19 = arith.constant 0.000000e+00 : f32
      %20 = vector.broadcast %cst_19 : f32 to vector<1x32xf32>
      %c0_20 = arith.constant 0 : index
      %c0_21 = arith.constant 0 : index
      %21 = vector.load %arg5[%c0_20, %c0_21] : memref<1x32xf32, #tpu.memory_space<vmem>>, vector<1x32xf32>
      tpu.vector_store %arg5[%c0_20, %c0_21], %20 {strides = array<i32>} : memref<1x32xf32, #tpu.memory_space<vmem>>, vector<1x32xf32>,
    } else {
    }
    %c0_6 = arith.constant 0 : index
    %c0_7 = arith.constant 0 : index
    %7 = vector.load %arg4[%c0_6, %c0_7] : memref<1x32xf32, #tpu.memory_space<vmem>>, vector<1x32xf32>
    %cst_8 = arith.constant dense<0.000000e+00> : vector<32xf32>
    %8 = vector.multi_reduction <add>, %2, %cst_8 [0] : vector<512x32xf32> to vector<32xf32>
    %9 = vector.shape_cast %8 : vector<32xf32> to vector<1x32xf32>
    %10 = arith.addf %7, %9 : vector<1x32xf32>
    %c0_9 = arith.constant 0 : index
    %c0_10 = arith.constant 0 : index
    %11 = vector.load %arg4[%c0_9, %c0_10] : memref<1x32xf32, #tpu.memory_space<vmem>>, vector<1x32xf32>
    tpu.vector_store %arg4[%c0_9, %c0_10], %10 {strides = array<i32>} : memref<1x32xf32, #tpu.memory_space<vmem>>, vector<1x32xf32>,
    %c0_11 = arith.constant 0 : index
    %c0_12 = arith.constant 0 : index
    %12 = vector.load %arg5[%c0_11, %c0_12] : memref<1x32xf32, #tpu.memory_space<vmem>>, vector<1x32xf32>
    %13 = arith.mulf %2, %2 : vector<512x32xf32>
    %cst_13 = arith.constant dense<0.000000e+00> : vector<32xf32>
    %14 = vector.multi_reduction <add>, %13, %cst_13 [0] : vector<512x32xf32> to vector<32xf32>
    %15 = vector.shape_cast %14 : vector<32xf32> to vector<1x32xf32>
    %16 = arith.addf %12, %15 : vector<1x32xf32>
    %c0_14 = arith.constant 0 : index
    %c0_15 = arith.constant 0 : index
    %17 = vector.load %arg5[%c0_14, %c0_15] : memref<1x32xf32, #tpu.memory_space<vmem>>, vector<1x32xf32>
    tpu.vector_store %arg5[%c0_14, %c0_15], %16 {strides = array<i32>} : memref<1x32xf32, #tpu.memory_space<vmem>>, vector<1x32xf32>,
    return
  }
  func.func @transform_0(%arg0: i32) -> (i32, i32) {
    %c0_i32 = arith.constant 0 : i32
    %c0_i32_0 = arith.constant 0 : i32
    return %arg0, %c0_i32 : i32, i32
  }
  func.func @transform_1(%arg0: i32) -> (i32, i32) {
    %c0_i32 = arith.constant 0 : i32
    %c0_i32_0 = arith.constant 0 : i32
    %c0_i32_1 = arith.constant 0 : i32
    return %c0_i32, %c0_i32_0 : i32, i32
  }
  func.func @transform_2(%arg0: i32) -> (i32, i32) {
    %c0_i32 = arith.constant 0 : i32
    %c0_i32_0 = arith.constant 0 : i32
    return %arg0, %c0_i32 : i32, i32
  }
  func.func @transform_3(%arg0: i32) -> (i32, i32) {
    %c0_i32 = arith.constant 0 : i32
    %c0_i32_0 = arith.constant 0 : i32
    %c0_i32_1 = arith.constant 0 : i32
    return %c0_i32, %c0_i32_0 : i32, i32
  }
  func.func @transform_4(%arg0: i32) -> (i32, i32) {
    %c0_i32 = arith.constant 0 : i32
    %c0_i32_0 = arith.constant 0 : i32
    %c0_i32_1 = arith.constant 0 : i32
    return %c0_i32, %c0_i32_0 : i32, i32
  }
}

module attributes {stable_mosaic.version = 11 : i64} {
  func.func @_conv_stats_kernel(%arg0: i32, %arg1: memref<128x288xbf16, #tpu.memory_space<vmem>>, %arg2: memref<288x64xbf16, #tpu.memory_space<vmem>>, %arg3: memref<128x64xf32, #tpu.memory_space<vmem>>, %arg4: memref<1x64xf32, #tpu.memory_space<vmem>>, %arg5: memref<1x64xf32, #tpu.memory_space<vmem>>) attributes {dimension_semantics = [#tpu.dimension_semantics<arbitrary>], iteration_bounds = array<i64: 1>, scalar_prefetch = 0 : i64, scratch_operands = 0 : i64, tpu.core_type = #tpu.core_type<tc>, window_params = [{transform_indices = @transform_0, window_bounds = array<i64: 128, 288>}, {pipeline_mode = #tpu.pipeline_mode<synchronous>, transform_indices = @transform_1, window_bounds = array<i64: 288, 64>}, {transform_indices = @transform_2, window_bounds = array<i64: 128, 64>}, {pipeline_mode = #tpu.pipeline_mode<synchronous>, transform_indices = @transform_3, window_bounds = array<i64: 1, 64>}, {pipeline_mode = #tpu.pipeline_mode<synchronous>, transform_indices = @transform_4, window_bounds = array<i64: 1, 64>}]} {
    %c0 = arith.constant 0 : index
    %c0_0 = arith.constant 0 : index
    %0 = vector.load %arg1[%c0, %c0_0] : memref<128x288xbf16, #tpu.memory_space<vmem>>, vector<128x288xbf16>
    %c0_1 = arith.constant 0 : index
    %c0_2 = arith.constant 0 : index
    %1 = vector.load %arg2[%c0_1, %c0_2] : memref<288x64xbf16, #tpu.memory_space<vmem>>, vector<288x64xbf16>
    %cst = arith.constant dense<0.000000e+00> : vector<128x64xf32>
    %2 = tpu.matmul %0, %1, %cst {dimension_numbers = #tpu.dot_dimension_numbers<[1], [0], [0], [1], [0, 0, 1, 1], [], []>} : vector<128x288xbf16>, vector<288x64xbf16>, vector<128x64xf32> -> vector<128x64xf32>
    %c0_3 = arith.constant 0 : index
    %c0_4 = arith.constant 0 : index
    %3 = vector.load %arg3[%c0_3, %c0_4] : memref<128x64xf32, #tpu.memory_space<vmem>>, vector<128x64xf32>
    tpu.vector_store %arg3[%c0_3, %c0_4], %2 {strides = array<i32>} : memref<128x64xf32, #tpu.memory_space<vmem>>, vector<128x64xf32>,
    %c0_i32 = arith.constant 0 : i32
    %4 = arith.cmpi eq, %arg0, %c0_i32 : i32
    %5 = arith.extui %4 : i1 to i32
    %c0_i32_5 = arith.constant 0 : i32
    %6 = arith.cmpi ne, %5, %c0_i32_5 : i32
    scf.if %6 {
      %cst_16 = arith.constant 0.000000e+00 : f32
      %18 = vector.broadcast %cst_16 : f32 to vector<1x64xf32>
      %c0_17 = arith.constant 0 : index
      %c0_18 = arith.constant 0 : index
      %19 = vector.load %arg4[%c0_17, %c0_18] : memref<1x64xf32, #tpu.memory_space<vmem>>, vector<1x64xf32>
      tpu.vector_store %arg4[%c0_17, %c0_18], %18 {strides = array<i32>} : memref<1x64xf32, #tpu.memory_space<vmem>>, vector<1x64xf32>,
      %cst_19 = arith.constant 0.000000e+00 : f32
      %20 = vector.broadcast %cst_19 : f32 to vector<1x64xf32>
      %c0_20 = arith.constant 0 : index
      %c0_21 = arith.constant 0 : index
      %21 = vector.load %arg5[%c0_20, %c0_21] : memref<1x64xf32, #tpu.memory_space<vmem>>, vector<1x64xf32>
      tpu.vector_store %arg5[%c0_20, %c0_21], %20 {strides = array<i32>} : memref<1x64xf32, #tpu.memory_space<vmem>>, vector<1x64xf32>,
    } else {
    }
    %c0_6 = arith.constant 0 : index
    %c0_7 = arith.constant 0 : index
    %7 = vector.load %arg4[%c0_6, %c0_7] : memref<1x64xf32, #tpu.memory_space<vmem>>, vector<1x64xf32>
    %cst_8 = arith.constant dense<0.000000e+00> : vector<64xf32>
    %8 = vector.multi_reduction <add>, %2, %cst_8 [0] : vector<128x64xf32> to vector<64xf32>
    %9 = vector.shape_cast %8 : vector<64xf32> to vector<1x64xf32>
    %10 = arith.addf %7, %9 : vector<1x64xf32>
    %c0_9 = arith.constant 0 : index
    %c0_10 = arith.constant 0 : index
    %11 = vector.load %arg4[%c0_9, %c0_10] : memref<1x64xf32, #tpu.memory_space<vmem>>, vector<1x64xf32>
    tpu.vector_store %arg4[%c0_9, %c0_10], %10 {strides = array<i32>} : memref<1x64xf32, #tpu.memory_space<vmem>>, vector<1x64xf32>,
    %c0_11 = arith.constant 0 : index
    %c0_12 = arith.constant 0 : index
    %12 = vector.load %arg5[%c0_11, %c0_12] : memref<1x64xf32, #tpu.memory_space<vmem>>, vector<1x64xf32>
    %13 = arith.mulf %2, %2 : vector<128x64xf32>
    %cst_13 = arith.constant dense<0.000000e+00> : vector<64xf32>
    %14 = vector.multi_reduction <add>, %13, %cst_13 [0] : vector<128x64xf32> to vector<64xf32>
    %15 = vector.shape_cast %14 : vector<64xf32> to vector<1x64xf32>
    %16 = arith.addf %12, %15 : vector<1x64xf32>
    %c0_14 = arith.constant 0 : index
    %c0_15 = arith.constant 0 : index
    %17 = vector.load %arg5[%c0_14, %c0_15] : memref<1x64xf32, #tpu.memory_space<vmem>>, vector<1x64xf32>
    tpu.vector_store %arg5[%c0_14, %c0_15], %16 {strides = array<i32>} : memref<1x64xf32, #tpu.memory_space<vmem>>, vector<1x64xf32>,
    return
  }
  func.func @transform_0(%arg0: i32) -> (i32, i32) {
    %c0_i32 = arith.constant 0 : i32
    %c0_i32_0 = arith.constant 0 : i32
    return %arg0, %c0_i32 : i32, i32
  }
  func.func @transform_1(%arg0: i32) -> (i32, i32) {
    %c0_i32 = arith.constant 0 : i32
    %c0_i32_0 = arith.constant 0 : i32
    %c0_i32_1 = arith.constant 0 : i32
    return %c0_i32, %c0_i32_0 : i32, i32
  }
  func.func @transform_2(%arg0: i32) -> (i32, i32) {
    %c0_i32 = arith.constant 0 : i32
    %c0_i32_0 = arith.constant 0 : i32
    return %arg0, %c0_i32 : i32, i32
  }
  func.func @transform_3(%arg0: i32) -> (i32, i32) {
    %c0_i32 = arith.constant 0 : i32
    %c0_i32_0 = arith.constant 0 : i32
    %c0_i32_1 = arith.constant 0 : i32
    return %c0_i32, %c0_i32_0 : i32, i32
  }
  func.func @transform_4(%arg0: i32) -> (i32, i32) {
    %c0_i32 = arith.constant 0 : i32
    %c0_i32_0 = arith.constant 0 : i32
    %c0_i32_1 = arith.constant 0 : i32
    return %c0_i32, %c0_i32_0 : i32, i32
  }
}

module attributes {stable_mosaic.version = 11 : i64} {
  func.func @_bn_act_kernel(%arg0: i32, %arg1: memref<16x512xf32, #tpu.memory_space<vmem>>, %arg2: memref<1x512xf32, #tpu.memory_space<vmem>>, %arg3: memref<1x512xf32, #tpu.memory_space<vmem>>, %arg4: memref<16x512xf32, #tpu.memory_space<vmem>>) attributes {dimension_semantics = [#tpu.dimension_semantics<parallel>], iteration_bounds = array<i64: 1>, scalar_prefetch = 0 : i64, scratch_operands = 0 : i64, tpu.core_type = #tpu.core_type<tc>, window_params = [{transform_indices = @transform_0, window_bounds = array<i64: 16, 512>}, {pipeline_mode = #tpu.pipeline_mode<synchronous>, transform_indices = @transform_1, window_bounds = array<i64: 1, 512>}, {pipeline_mode = #tpu.pipeline_mode<synchronous>, transform_indices = @transform_2, window_bounds = array<i64: 1, 512>}, {transform_indices = @transform_3, window_bounds = array<i64: 16, 512>}]} {
    %c0 = arith.constant 0 : index
    %c0_0 = arith.constant 0 : index
    %0 = vector.load %arg1[%c0, %c0_0] : memref<16x512xf32, #tpu.memory_space<vmem>>, vector<16x512xf32>
    %c0_1 = arith.constant 0 : index
    %c0_2 = arith.constant 0 : index
    %1 = vector.load %arg2[%c0_1, %c0_2] : memref<1x512xf32, #tpu.memory_space<vmem>>, vector<1x512xf32>
    %2 = vector.broadcast %1 : vector<1x512xf32> to vector<16x512xf32>
    %3 = arith.mulf %0, %2 : vector<16x512xf32>
    %c0_3 = arith.constant 0 : index
    %c0_4 = arith.constant 0 : index
    %4 = vector.load %arg3[%c0_3, %c0_4] : memref<1x512xf32, #tpu.memory_space<vmem>>, vector<1x512xf32>
    %5 = vector.broadcast %4 : vector<1x512xf32> to vector<16x512xf32>
    %6 = arith.addf %3, %5 : vector<16x512xf32>
    %cst = arith.constant 5.000000e-01 : f32
    %7 = vector.broadcast %cst : f32 to vector<16x512xf32>
    %8 = arith.mulf %7, %6 : vector<16x512xf32>
    %cst_5 = arith.constant 0.707106769 : f32
    %9 = vector.broadcast %cst_5 : f32 to vector<16x512xf32>
    %10 = arith.mulf %6, %9 : vector<16x512xf32>
    %11 = math.absf %10 : vector<16x512xf32>
    %cst_6 = arith.constant 0.327591091 : f32
    %12 = vector.broadcast %cst_6 : f32 to vector<16x512xf32>
    %13 = arith.mulf %12, %11 : vector<16x512xf32>
    %cst_7 = arith.constant 1.000000e+00 : f32
    %14 = vector.broadcast %cst_7 : f32 to vector<16x512xf32>
    %15 = arith.addf %14, %13 : vector<16x512xf32>
    %cst_8 = arith.constant 1.000000e+00 : f32
    %16 = vector.broadcast %cst_8 : f32 to vector<16x512xf32>
    %17 = arith.divf %16, %15 : vector<16x512xf32>
    %cst_9 = arith.constant 1.06140542 : f32
    %18 = vector.broadcast %cst_9 : f32 to vector<16x512xf32>
    %19 = arith.mulf %17, %18 : vector<16x512xf32>
    %cst_10 = arith.constant -1.45315206 : f32
    %20 = vector.broadcast %cst_10 : f32 to vector<16x512xf32>
    %21 = arith.addf %20, %19 : vector<16x512xf32>
    %22 = arith.mulf %17, %21 : vector<16x512xf32>
    %cst_11 = arith.constant 1.42141378 : f32
    %23 = vector.broadcast %cst_11 : f32 to vector<16x512xf32>
    %24 = arith.addf %23, %22 : vector<16x512xf32>
    %25 = arith.mulf %17, %24 : vector<16x512xf32>
    %cst_12 = arith.constant -0.284496725 : f32
    %26 = vector.broadcast %cst_12 : f32 to vector<16x512xf32>
    %27 = arith.addf %26, %25 : vector<16x512xf32>
    %28 = arith.mulf %17, %27 : vector<16x512xf32>
    %cst_13 = arith.constant 0.254829586 : f32
    %29 = vector.broadcast %cst_13 : f32 to vector<16x512xf32>
    %30 = arith.addf %29, %28 : vector<16x512xf32>
    %31 = arith.mulf %17, %30 : vector<16x512xf32>
    %cst_14 = arith.constant 0.000000e+00 : f32
    %32 = vector.broadcast %cst_14 : f32 to vector<16x512xf32>
    %33 = arith.subf %32, %11 : vector<16x512xf32>
    %34 = arith.mulf %33, %11 : vector<16x512xf32>
    %35 = math.exp %34 : vector<16x512xf32>
    %36 = arith.mulf %31, %35 : vector<16x512xf32>
    %cst_15 = arith.constant 1.000000e+00 : f32
    %37 = vector.broadcast %cst_15 : f32 to vector<16x512xf32>
    %38 = arith.subf %37, %36 : vector<16x512xf32>
    %cst_16 = arith.constant 0.000000e+00 : f32
    %39 = vector.broadcast %cst_16 : f32 to vector<16x512xf32>
    %40 = arith.cmpf olt, %10, %39 : vector<16x512xf32>
    %cst_17 = arith.constant 0.000000e+00 : f32
    %41 = vector.broadcast %cst_17 : f32 to vector<16x512xf32>
    %42 = arith.subf %41, %38 : vector<16x512xf32>
    %43 = arith.select %40, %42, %38 : vector<16x512xi1>, vector<16x512xf32>
    %cst_18 = arith.constant 1.000000e+00 : f32
    %44 = vector.broadcast %cst_18 : f32 to vector<16x512xf32>
    %45 = arith.addf %44, %43 : vector<16x512xf32>
    %46 = arith.mulf %8, %45 : vector<16x512xf32>
    %c0_19 = arith.constant 0 : index
    %c0_20 = arith.constant 0 : index
    %47 = vector.load %arg4[%c0_19, %c0_20] : memref<16x512xf32, #tpu.memory_space<vmem>>, vector<16x512xf32>
    tpu.vector_store %arg4[%c0_19, %c0_20], %46 {strides = array<i32>} : memref<16x512xf32, #tpu.memory_space<vmem>>, vector<16x512xf32>,
    return
  }
  func.func @transform_0(%arg0: i32) -> (i32, i32) {
    %c0_i32 = arith.constant 0 : i32
    %c0_i32_0 = arith.constant 0 : i32
    return %arg0, %c0_i32 : i32, i32
  }
  func.func @transform_1(%arg0: i32) -> (i32, i32) {
    %c0_i32 = arith.constant 0 : i32
    %c0_i32_0 = arith.constant 0 : i32
    %c0_i32_1 = arith.constant 0 : i32
    return %c0_i32, %c0_i32_0 : i32, i32
  }
  func.func @transform_2(%arg0: i32) -> (i32, i32) {
    %c0_i32 = arith.constant 0 : i32
    %c0_i32_0 = arith.constant 0 : i32
    %c0_i32_1 = arith.constant 0 : i32
    return %c0_i32, %c0_i32_0 : i32, i32
  }
  func.func @transform_3(%arg0: i32) -> (i32, i32) {
    %c0_i32 = arith.constant 0 : i32
    %c0_i32_0 = arith.constant 0 : i32
    return %arg0, %c0_i32 : i32, i32
  }
}

module attributes {stable_mosaic.version = 11 : i64} {
  func.func @_conv_stats_kernel(%arg0: i32, %arg1: memref<128x576xbf16, #tpu.memory_space<vmem>>, %arg2: memref<576x64xbf16, #tpu.memory_space<vmem>>, %arg3: memref<128x64xf32, #tpu.memory_space<vmem>>, %arg4: memref<1x64xf32, #tpu.memory_space<vmem>>, %arg5: memref<1x64xf32, #tpu.memory_space<vmem>>) attributes {dimension_semantics = [#tpu.dimension_semantics<arbitrary>], iteration_bounds = array<i64: 1>, scalar_prefetch = 0 : i64, scratch_operands = 0 : i64, tpu.core_type = #tpu.core_type<tc>, window_params = [{transform_indices = @transform_0, window_bounds = array<i64: 128, 576>}, {pipeline_mode = #tpu.pipeline_mode<synchronous>, transform_indices = @transform_1, window_bounds = array<i64: 576, 64>}, {transform_indices = @transform_2, window_bounds = array<i64: 128, 64>}, {pipeline_mode = #tpu.pipeline_mode<synchronous>, transform_indices = @transform_3, window_bounds = array<i64: 1, 64>}, {pipeline_mode = #tpu.pipeline_mode<synchronous>, transform_indices = @transform_4, window_bounds = array<i64: 1, 64>}]} {
    %c0 = arith.constant 0 : index
    %c0_0 = arith.constant 0 : index
    %0 = vector.load %arg1[%c0, %c0_0] : memref<128x576xbf16, #tpu.memory_space<vmem>>, vector<128x576xbf16>
    %c0_1 = arith.constant 0 : index
    %c0_2 = arith.constant 0 : index
    %1 = vector.load %arg2[%c0_1, %c0_2] : memref<576x64xbf16, #tpu.memory_space<vmem>>, vector<576x64xbf16>
    %cst = arith.constant dense<0.000000e+00> : vector<128x64xf32>
    %2 = tpu.matmul %0, %1, %cst {dimension_numbers = #tpu.dot_dimension_numbers<[1], [0], [0], [1], [0, 0, 1, 1], [], []>} : vector<128x576xbf16>, vector<576x64xbf16>, vector<128x64xf32> -> vector<128x64xf32>
    %c0_3 = arith.constant 0 : index
    %c0_4 = arith.constant 0 : index
    %3 = vector.load %arg3[%c0_3, %c0_4] : memref<128x64xf32, #tpu.memory_space<vmem>>, vector<128x64xf32>
    tpu.vector_store %arg3[%c0_3, %c0_4], %2 {strides = array<i32>} : memref<128x64xf32, #tpu.memory_space<vmem>>, vector<128x64xf32>,
    %c0_i32 = arith.constant 0 : i32
    %4 = arith.cmpi eq, %arg0, %c0_i32 : i32
    %5 = arith.extui %4 : i1 to i32
    %c0_i32_5 = arith.constant 0 : i32
    %6 = arith.cmpi ne, %5, %c0_i32_5 : i32
    scf.if %6 {
      %cst_16 = arith.constant 0.000000e+00 : f32
      %18 = vector.broadcast %cst_16 : f32 to vector<1x64xf32>
      %c0_17 = arith.constant 0 : index
      %c0_18 = arith.constant 0 : index
      %19 = vector.load %arg4[%c0_17, %c0_18] : memref<1x64xf32, #tpu.memory_space<vmem>>, vector<1x64xf32>
      tpu.vector_store %arg4[%c0_17, %c0_18], %18 {strides = array<i32>} : memref<1x64xf32, #tpu.memory_space<vmem>>, vector<1x64xf32>,
      %cst_19 = arith.constant 0.000000e+00 : f32
      %20 = vector.broadcast %cst_19 : f32 to vector<1x64xf32>
      %c0_20 = arith.constant 0 : index
      %c0_21 = arith.constant 0 : index
      %21 = vector.load %arg5[%c0_20, %c0_21] : memref<1x64xf32, #tpu.memory_space<vmem>>, vector<1x64xf32>
      tpu.vector_store %arg5[%c0_20, %c0_21], %20 {strides = array<i32>} : memref<1x64xf32, #tpu.memory_space<vmem>>, vector<1x64xf32>,
    } else {
    }
    %c0_6 = arith.constant 0 : index
    %c0_7 = arith.constant 0 : index
    %7 = vector.load %arg4[%c0_6, %c0_7] : memref<1x64xf32, #tpu.memory_space<vmem>>, vector<1x64xf32>
    %cst_8 = arith.constant dense<0.000000e+00> : vector<64xf32>
    %8 = vector.multi_reduction <add>, %2, %cst_8 [0] : vector<128x64xf32> to vector<64xf32>
    %9 = vector.shape_cast %8 : vector<64xf32> to vector<1x64xf32>
    %10 = arith.addf %7, %9 : vector<1x64xf32>
    %c0_9 = arith.constant 0 : index
    %c0_10 = arith.constant 0 : index
    %11 = vector.load %arg4[%c0_9, %c0_10] : memref<1x64xf32, #tpu.memory_space<vmem>>, vector<1x64xf32>
    tpu.vector_store %arg4[%c0_9, %c0_10], %10 {strides = array<i32>} : memref<1x64xf32, #tpu.memory_space<vmem>>, vector<1x64xf32>,
    %c0_11 = arith.constant 0 : index
    %c0_12 = arith.constant 0 : index
    %12 = vector.load %arg5[%c0_11, %c0_12] : memref<1x64xf32, #tpu.memory_space<vmem>>, vector<1x64xf32>
    %13 = arith.mulf %2, %2 : vector<128x64xf32>
    %cst_13 = arith.constant dense<0.000000e+00> : vector<64xf32>
    %14 = vector.multi_reduction <add>, %13, %cst_13 [0] : vector<128x64xf32> to vector<64xf32>
    %15 = vector.shape_cast %14 : vector<64xf32> to vector<1x64xf32>
    %16 = arith.addf %12, %15 : vector<1x64xf32>
    %c0_14 = arith.constant 0 : index
    %c0_15 = arith.constant 0 : index
    %17 = vector.load %arg5[%c0_14, %c0_15] : memref<1x64xf32, #tpu.memory_space<vmem>>, vector<1x64xf32>
    tpu.vector_store %arg5[%c0_14, %c0_15], %16 {strides = array<i32>} : memref<1x64xf32, #tpu.memory_space<vmem>>, vector<1x64xf32>,
    return
  }
  func.func @transform_0(%arg0: i32) -> (i32, i32) {
    %c0_i32 = arith.constant 0 : i32
    %c0_i32_0 = arith.constant 0 : i32
    return %arg0, %c0_i32 : i32, i32
  }
  func.func @transform_1(%arg0: i32) -> (i32, i32) {
    %c0_i32 = arith.constant 0 : i32
    %c0_i32_0 = arith.constant 0 : i32
    %c0_i32_1 = arith.constant 0 : i32
    return %c0_i32, %c0_i32_0 : i32, i32
  }
  func.func @transform_2(%arg0: i32) -> (i32, i32) {
    %c0_i32 = arith.constant 0 : i32
    %c0_i32_0 = arith.constant 0 : i32
    return %arg0, %c0_i32 : i32, i32
  }
  func.func @transform_3(%arg0: i32) -> (i32, i32) {
    %c0_i32 = arith.constant 0 : i32
    %c0_i32_0 = arith.constant 0 : i32
    %c0_i32_1 = arith.constant 0 : i32
    return %c0_i32, %c0_i32_0 : i32, i32
  }
  func.func @transform_4(%arg0: i32) -> (i32, i32) {
    %c0_i32 = arith.constant 0 : i32
    %c0_i32_0 = arith.constant 0 : i32
    %c0_i32_1 = arith.constant 0 : i32
    return %c0_i32, %c0_i32_0 : i32, i32
  }
}

module attributes {stable_mosaic.version = 11 : i64} {
  func.func @_conv_stats_kernel(%arg0: i32, %arg1: memref<128x32xbf16, #tpu.memory_space<vmem>>, %arg2: memref<32x64xbf16, #tpu.memory_space<vmem>>, %arg3: memref<128x64xf32, #tpu.memory_space<vmem>>, %arg4: memref<1x64xf32, #tpu.memory_space<vmem>>, %arg5: memref<1x64xf32, #tpu.memory_space<vmem>>) attributes {dimension_semantics = [#tpu.dimension_semantics<arbitrary>], iteration_bounds = array<i64: 1>, scalar_prefetch = 0 : i64, scratch_operands = 0 : i64, tpu.core_type = #tpu.core_type<tc>, window_params = [{transform_indices = @transform_0, window_bounds = array<i64: 128, 32>}, {pipeline_mode = #tpu.pipeline_mode<synchronous>, transform_indices = @transform_1, window_bounds = array<i64: 32, 64>}, {transform_indices = @transform_2, window_bounds = array<i64: 128, 64>}, {pipeline_mode = #tpu.pipeline_mode<synchronous>, transform_indices = @transform_3, window_bounds = array<i64: 1, 64>}, {pipeline_mode = #tpu.pipeline_mode<synchronous>, transform_indices = @transform_4, window_bounds = array<i64: 1, 64>}]} {
    %c0 = arith.constant 0 : index
    %c0_0 = arith.constant 0 : index
    %0 = vector.load %arg1[%c0, %c0_0] : memref<128x32xbf16, #tpu.memory_space<vmem>>, vector<128x32xbf16>
    %c0_1 = arith.constant 0 : index
    %c0_2 = arith.constant 0 : index
    %1 = vector.load %arg2[%c0_1, %c0_2] : memref<32x64xbf16, #tpu.memory_space<vmem>>, vector<32x64xbf16>
    %cst = arith.constant dense<0.000000e+00> : vector<128x64xf32>
    %2 = tpu.matmul %0, %1, %cst {dimension_numbers = #tpu.dot_dimension_numbers<[1], [0], [0], [1], [0, 0, 1, 1], [], []>} : vector<128x32xbf16>, vector<32x64xbf16>, vector<128x64xf32> -> vector<128x64xf32>
    %c0_3 = arith.constant 0 : index
    %c0_4 = arith.constant 0 : index
    %3 = vector.load %arg3[%c0_3, %c0_4] : memref<128x64xf32, #tpu.memory_space<vmem>>, vector<128x64xf32>
    tpu.vector_store %arg3[%c0_3, %c0_4], %2 {strides = array<i32>} : memref<128x64xf32, #tpu.memory_space<vmem>>, vector<128x64xf32>,
    %c0_i32 = arith.constant 0 : i32
    %4 = arith.cmpi eq, %arg0, %c0_i32 : i32
    %5 = arith.extui %4 : i1 to i32
    %c0_i32_5 = arith.constant 0 : i32
    %6 = arith.cmpi ne, %5, %c0_i32_5 : i32
    scf.if %6 {
      %cst_16 = arith.constant 0.000000e+00 : f32
      %18 = vector.broadcast %cst_16 : f32 to vector<1x64xf32>
      %c0_17 = arith.constant 0 : index
      %c0_18 = arith.constant 0 : index
      %19 = vector.load %arg4[%c0_17, %c0_18] : memref<1x64xf32, #tpu.memory_space<vmem>>, vector<1x64xf32>
      tpu.vector_store %arg4[%c0_17, %c0_18], %18 {strides = array<i32>} : memref<1x64xf32, #tpu.memory_space<vmem>>, vector<1x64xf32>,
      %cst_19 = arith.constant 0.000000e+00 : f32
      %20 = vector.broadcast %cst_19 : f32 to vector<1x64xf32>
      %c0_20 = arith.constant 0 : index
      %c0_21 = arith.constant 0 : index
      %21 = vector.load %arg5[%c0_20, %c0_21] : memref<1x64xf32, #tpu.memory_space<vmem>>, vector<1x64xf32>
      tpu.vector_store %arg5[%c0_20, %c0_21], %20 {strides = array<i32>} : memref<1x64xf32, #tpu.memory_space<vmem>>, vector<1x64xf32>,
    } else {
    }
    %c0_6 = arith.constant 0 : index
    %c0_7 = arith.constant 0 : index
    %7 = vector.load %arg4[%c0_6, %c0_7] : memref<1x64xf32, #tpu.memory_space<vmem>>, vector<1x64xf32>
    %cst_8 = arith.constant dense<0.000000e+00> : vector<64xf32>
    %8 = vector.multi_reduction <add>, %2, %cst_8 [0] : vector<128x64xf32> to vector<64xf32>
    %9 = vector.shape_cast %8 : vector<64xf32> to vector<1x64xf32>
    %10 = arith.addf %7, %9 : vector<1x64xf32>
    %c0_9 = arith.constant 0 : index
    %c0_10 = arith.constant 0 : index
    %11 = vector.load %arg4[%c0_9, %c0_10] : memref<1x64xf32, #tpu.memory_space<vmem>>, vector<1x64xf32>
    tpu.vector_store %arg4[%c0_9, %c0_10], %10 {strides = array<i32>} : memref<1x64xf32, #tpu.memory_space<vmem>>, vector<1x64xf32>,
    %c0_11 = arith.constant 0 : index
    %c0_12 = arith.constant 0 : index
    %12 = vector.load %arg5[%c0_11, %c0_12] : memref<1x64xf32, #tpu.memory_space<vmem>>, vector<1x64xf32>
    %13 = arith.mulf %2, %2 : vector<128x64xf32>
    %cst_13 = arith.constant dense<0.000000e+00> : vector<64xf32>
    %14 = vector.multi_reduction <add>, %13, %cst_13 [0] : vector<128x64xf32> to vector<64xf32>
    %15 = vector.shape_cast %14 : vector<64xf32> to vector<1x64xf32>
    %16 = arith.addf %12, %15 : vector<1x64xf32>
    %c0_14 = arith.constant 0 : index
    %c0_15 = arith.constant 0 : index
    %17 = vector.load %arg5[%c0_14, %c0_15] : memref<1x64xf32, #tpu.memory_space<vmem>>, vector<1x64xf32>
    tpu.vector_store %arg5[%c0_14, %c0_15], %16 {strides = array<i32>} : memref<1x64xf32, #tpu.memory_space<vmem>>, vector<1x64xf32>,
    return
  }
  func.func @transform_0(%arg0: i32) -> (i32, i32) {
    %c0_i32 = arith.constant 0 : i32
    %c0_i32_0 = arith.constant 0 : i32
    return %arg0, %c0_i32 : i32, i32
  }
  func.func @transform_1(%arg0: i32) -> (i32, i32) {
    %c0_i32 = arith.constant 0 : i32
    %c0_i32_0 = arith.constant 0 : i32
    %c0_i32_1 = arith.constant 0 : i32
    return %c0_i32, %c0_i32_0 : i32, i32
  }
  func.func @transform_2(%arg0: i32) -> (i32, i32) {
    %c0_i32 = arith.constant 0 : i32
    %c0_i32_0 = arith.constant 0 : i32
    return %arg0, %c0_i32 : i32, i32
  }
  func.func @transform_3(%arg0: i32) -> (i32, i32) {
    %c0_i32 = arith.constant 0 : i32
    %c0_i32_0 = arith.constant 0 : i32
    %c0_i32_1 = arith.constant 0 : i32
    return %c0_i32, %c0_i32_0 : i32, i32
  }
  func.func @transform_4(%arg0: i32) -> (i32, i32) {
    %c0_i32 = arith.constant 0 : i32
    %c0_i32_0 = arith.constant 0 : i32
    %c0_i32_1 = arith.constant 0 : i32
    return %c0_i32, %c0_i32_0 : i32, i32
  }
}

module attributes {stable_mosaic.version = 11 : i64} {
  func.func @_bn_act_kernel(%arg0: i32, %arg1: memref<16x512xf32, #tpu.memory_space<vmem>>, %arg2: memref<1x512xf32, #tpu.memory_space<vmem>>, %arg3: memref<1x512xf32, #tpu.memory_space<vmem>>, %arg4: memref<16x512xf32, #tpu.memory_space<vmem>>, %arg5: memref<16x512xf32, #tpu.memory_space<vmem>>) attributes {dimension_semantics = [#tpu.dimension_semantics<parallel>], iteration_bounds = array<i64: 1>, scalar_prefetch = 0 : i64, scratch_operands = 0 : i64, tpu.core_type = #tpu.core_type<tc>, window_params = [{transform_indices = @transform_0, window_bounds = array<i64: 16, 512>}, {pipeline_mode = #tpu.pipeline_mode<synchronous>, transform_indices = @transform_1, window_bounds = array<i64: 1, 512>}, {pipeline_mode = #tpu.pipeline_mode<synchronous>, transform_indices = @transform_2, window_bounds = array<i64: 1, 512>}, {transform_indices = @transform_3, window_bounds = array<i64: 16, 512>}, {transform_indices = @transform_4, window_bounds = array<i64: 16, 512>}]} {
    %c0 = arith.constant 0 : index
    %c0_0 = arith.constant 0 : index
    %0 = vector.load %arg1[%c0, %c0_0] : memref<16x512xf32, #tpu.memory_space<vmem>>, vector<16x512xf32>
    %c0_1 = arith.constant 0 : index
    %c0_2 = arith.constant 0 : index
    %1 = vector.load %arg2[%c0_1, %c0_2] : memref<1x512xf32, #tpu.memory_space<vmem>>, vector<1x512xf32>
    %2 = vector.broadcast %1 : vector<1x512xf32> to vector<16x512xf32>
    %3 = arith.mulf %0, %2 : vector<16x512xf32>
    %c0_3 = arith.constant 0 : index
    %c0_4 = arith.constant 0 : index
    %4 = vector.load %arg3[%c0_3, %c0_4] : memref<1x512xf32, #tpu.memory_space<vmem>>, vector<1x512xf32>
    %5 = vector.broadcast %4 : vector<1x512xf32> to vector<16x512xf32>
    %6 = arith.addf %3, %5 : vector<16x512xf32>
    %c0_5 = arith.constant 0 : index
    %c0_6 = arith.constant 0 : index
    %7 = vector.load %arg4[%c0_5, %c0_6] : memref<16x512xf32, #tpu.memory_space<vmem>>, vector<16x512xf32>
    %8 = arith.addf %6, %7 : vector<16x512xf32>
    %c0_7 = arith.constant 0 : index
    %c0_8 = arith.constant 0 : index
    %9 = vector.load %arg5[%c0_7, %c0_8] : memref<16x512xf32, #tpu.memory_space<vmem>>, vector<16x512xf32>
    tpu.vector_store %arg5[%c0_7, %c0_8], %8 {strides = array<i32>} : memref<16x512xf32, #tpu.memory_space<vmem>>, vector<16x512xf32>,
    return
  }
  func.func @transform_0(%arg0: i32) -> (i32, i32) {
    %c0_i32 = arith.constant 0 : i32
    %c0_i32_0 = arith.constant 0 : i32
    return %arg0, %c0_i32 : i32, i32
  }
  func.func @transform_1(%arg0: i32) -> (i32, i32) {
    %c0_i32 = arith.constant 0 : i32
    %c0_i32_0 = arith.constant 0 : i32
    %c0_i32_1 = arith.constant 0 : i32
    return %c0_i32, %c0_i32_0 : i32, i32
  }
  func.func @transform_2(%arg0: i32) -> (i32, i32) {
    %c0_i32 = arith.constant 0 : i32
    %c0_i32_0 = arith.constant 0 : i32
    %c0_i32_1 = arith.constant 0 : i32
    return %c0_i32, %c0_i32_0 : i32, i32
  }
  func.func @transform_3(%arg0: i32) -> (i32, i32) {
    %c0_i32 = arith.constant 0 : i32
    %c0_i32_0 = arith.constant 0 : i32
    return %arg0, %c0_i32 : i32, i32
  }
  func.func @transform_4(%arg0: i32) -> (i32, i32) {
    %c0_i32 = arith.constant 0 : i32
    %c0_i32_0 = arith.constant 0 : i32
    return %arg0, %c0_i32 : i32, i32
  }
}

module attributes {stable_mosaic.version = 11 : i64} {
  func.func @_conv_stats_kernel(%arg0: i32, %arg1: memref<32x576xbf16, #tpu.memory_space<vmem>>, %arg2: memref<576x128xbf16, #tpu.memory_space<vmem>>, %arg3: memref<32x128xf32, #tpu.memory_space<vmem>>, %arg4: memref<1x128xf32, #tpu.memory_space<vmem>>, %arg5: memref<1x128xf32, #tpu.memory_space<vmem>>) attributes {dimension_semantics = [#tpu.dimension_semantics<arbitrary>], iteration_bounds = array<i64: 1>, scalar_prefetch = 0 : i64, scratch_operands = 0 : i64, tpu.core_type = #tpu.core_type<tc>, window_params = [{transform_indices = @transform_0, window_bounds = array<i64: 32, 576>}, {pipeline_mode = #tpu.pipeline_mode<synchronous>, transform_indices = @transform_1, window_bounds = array<i64: 576, 128>}, {transform_indices = @transform_2, window_bounds = array<i64: 32, 128>}, {pipeline_mode = #tpu.pipeline_mode<synchronous>, transform_indices = @transform_3, window_bounds = array<i64: 1, 128>}, {pipeline_mode = #tpu.pipeline_mode<synchronous>, transform_indices = @transform_4, window_bounds = array<i64: 1, 128>}]} {
    %c0 = arith.constant 0 : index
    %c0_0 = arith.constant 0 : index
    %0 = vector.load %arg1[%c0, %c0_0] : memref<32x576xbf16, #tpu.memory_space<vmem>>, vector<32x576xbf16>
    %c0_1 = arith.constant 0 : index
    %c0_2 = arith.constant 0 : index
    %1 = vector.load %arg2[%c0_1, %c0_2] : memref<576x128xbf16, #tpu.memory_space<vmem>>, vector<576x128xbf16>
    %cst = arith.constant dense<0.000000e+00> : vector<32x128xf32>
    %2 = tpu.matmul %0, %1, %cst {dimension_numbers = #tpu.dot_dimension_numbers<[1], [0], [0], [1], [0, 0, 1, 1], [], []>} : vector<32x576xbf16>, vector<576x128xbf16>, vector<32x128xf32> -> vector<32x128xf32>
    %c0_3 = arith.constant 0 : index
    %c0_4 = arith.constant 0 : index
    %3 = vector.load %arg3[%c0_3, %c0_4] : memref<32x128xf32, #tpu.memory_space<vmem>>, vector<32x128xf32>
    tpu.vector_store %arg3[%c0_3, %c0_4], %2 {strides = array<i32>} : memref<32x128xf32, #tpu.memory_space<vmem>>, vector<32x128xf32>,
    %c0_i32 = arith.constant 0 : i32
    %4 = arith.cmpi eq, %arg0, %c0_i32 : i32
    %5 = arith.extui %4 : i1 to i32
    %c0_i32_5 = arith.constant 0 : i32
    %6 = arith.cmpi ne, %5, %c0_i32_5 : i32
    scf.if %6 {
      %cst_16 = arith.constant 0.000000e+00 : f32
      %18 = vector.broadcast %cst_16 : f32 to vector<1x128xf32>
      %c0_17 = arith.constant 0 : index
      %c0_18 = arith.constant 0 : index
      %19 = vector.load %arg4[%c0_17, %c0_18] : memref<1x128xf32, #tpu.memory_space<vmem>>, vector<1x128xf32>
      tpu.vector_store %arg4[%c0_17, %c0_18], %18 {strides = array<i32>} : memref<1x128xf32, #tpu.memory_space<vmem>>, vector<1x128xf32>,
      %cst_19 = arith.constant 0.000000e+00 : f32
      %20 = vector.broadcast %cst_19 : f32 to vector<1x128xf32>
      %c0_20 = arith.constant 0 : index
      %c0_21 = arith.constant 0 : index
      %21 = vector.load %arg5[%c0_20, %c0_21] : memref<1x128xf32, #tpu.memory_space<vmem>>, vector<1x128xf32>
      tpu.vector_store %arg5[%c0_20, %c0_21], %20 {strides = array<i32>} : memref<1x128xf32, #tpu.memory_space<vmem>>, vector<1x128xf32>,
    } else {
    }
    %c0_6 = arith.constant 0 : index
    %c0_7 = arith.constant 0 : index
    %7 = vector.load %arg4[%c0_6, %c0_7] : memref<1x128xf32, #tpu.memory_space<vmem>>, vector<1x128xf32>
    %cst_8 = arith.constant dense<0.000000e+00> : vector<128xf32>
    %8 = vector.multi_reduction <add>, %2, %cst_8 [0] : vector<32x128xf32> to vector<128xf32>
    %9 = vector.shape_cast %8 : vector<128xf32> to vector<1x128xf32>
    %10 = arith.addf %7, %9 : vector<1x128xf32>
    %c0_9 = arith.constant 0 : index
    %c0_10 = arith.constant 0 : index
    %11 = vector.load %arg4[%c0_9, %c0_10] : memref<1x128xf32, #tpu.memory_space<vmem>>, vector<1x128xf32>
    tpu.vector_store %arg4[%c0_9, %c0_10], %10 {strides = array<i32>} : memref<1x128xf32, #tpu.memory_space<vmem>>, vector<1x128xf32>,
    %c0_11 = arith.constant 0 : index
    %c0_12 = arith.constant 0 : index
    %12 = vector.load %arg5[%c0_11, %c0_12] : memref<1x128xf32, #tpu.memory_space<vmem>>, vector<1x128xf32>
    %13 = arith.mulf %2, %2 : vector<32x128xf32>
    %cst_13 = arith.constant dense<0.000000e+00> : vector<128xf32>
    %14 = vector.multi_reduction <add>, %13, %cst_13 [0] : vector<32x128xf32> to vector<128xf32>
    %15 = vector.shape_cast %14 : vector<128xf32> to vector<1x128xf32>
    %16 = arith.addf %12, %15 : vector<1x128xf32>
    %c0_14 = arith.constant 0 : index
    %c0_15 = arith.constant 0 : index
    %17 = vector.load %arg5[%c0_14, %c0_15] : memref<1x128xf32, #tpu.memory_space<vmem>>, vector<1x128xf32>
    tpu.vector_store %arg5[%c0_14, %c0_15], %16 {strides = array<i32>} : memref<1x128xf32, #tpu.memory_space<vmem>>, vector<1x128xf32>,
    return
  }
  func.func @transform_0(%arg0: i32) -> (i32, i32) {
    %c0_i32 = arith.constant 0 : i32
    %c0_i32_0 = arith.constant 0 : i32
    return %arg0, %c0_i32 : i32, i32
  }
  func.func @transform_1(%arg0: i32) -> (i32, i32) {
    %c0_i32 = arith.constant 0 : i32
    %c0_i32_0 = arith.constant 0 : i32
    %c0_i32_1 = arith.constant 0 : i32
    return %c0_i32, %c0_i32_0 : i32, i32
  }
  func.func @transform_2(%arg0: i32) -> (i32, i32) {
    %c0_i32 = arith.constant 0 : i32
    %c0_i32_0 = arith.constant 0 : i32
    return %arg0, %c0_i32 : i32, i32
  }
  func.func @transform_3(%arg0: i32) -> (i32, i32) {
    %c0_i32 = arith.constant 0 : i32
    %c0_i32_0 = arith.constant 0 : i32
    %c0_i32_1 = arith.constant 0 : i32
    return %c0_i32, %c0_i32_0 : i32, i32
  }
  func.func @transform_4(%arg0: i32) -> (i32, i32) {
    %c0_i32 = arith.constant 0 : i32
    %c0_i32_0 = arith.constant 0 : i32
    %c0_i32_1 = arith.constant 0 : i32
    return %c0_i32, %c0_i32_0 : i32, i32
  }
}

module attributes {stable_mosaic.version = 11 : i64} {
  func.func @_bn_act_kernel(%arg0: i32, %arg1: memref<8x512xf32, #tpu.memory_space<vmem>>, %arg2: memref<1x512xf32, #tpu.memory_space<vmem>>, %arg3: memref<1x512xf32, #tpu.memory_space<vmem>>, %arg4: memref<8x512xf32, #tpu.memory_space<vmem>>) attributes {dimension_semantics = [#tpu.dimension_semantics<parallel>], iteration_bounds = array<i64: 1>, scalar_prefetch = 0 : i64, scratch_operands = 0 : i64, tpu.core_type = #tpu.core_type<tc>, window_params = [{transform_indices = @transform_0, window_bounds = array<i64: 8, 512>}, {pipeline_mode = #tpu.pipeline_mode<synchronous>, transform_indices = @transform_1, window_bounds = array<i64: 1, 512>}, {pipeline_mode = #tpu.pipeline_mode<synchronous>, transform_indices = @transform_2, window_bounds = array<i64: 1, 512>}, {transform_indices = @transform_3, window_bounds = array<i64: 8, 512>}]} {
    %c0 = arith.constant 0 : index
    %c0_0 = arith.constant 0 : index
    %0 = vector.load %arg1[%c0, %c0_0] : memref<8x512xf32, #tpu.memory_space<vmem>>, vector<8x512xf32>
    %c0_1 = arith.constant 0 : index
    %c0_2 = arith.constant 0 : index
    %1 = vector.load %arg2[%c0_1, %c0_2] : memref<1x512xf32, #tpu.memory_space<vmem>>, vector<1x512xf32>
    %2 = vector.broadcast %1 : vector<1x512xf32> to vector<8x512xf32>
    %3 = arith.mulf %0, %2 : vector<8x512xf32>
    %c0_3 = arith.constant 0 : index
    %c0_4 = arith.constant 0 : index
    %4 = vector.load %arg3[%c0_3, %c0_4] : memref<1x512xf32, #tpu.memory_space<vmem>>, vector<1x512xf32>
    %5 = vector.broadcast %4 : vector<1x512xf32> to vector<8x512xf32>
    %6 = arith.addf %3, %5 : vector<8x512xf32>
    %cst = arith.constant 5.000000e-01 : f32
    %7 = vector.broadcast %cst : f32 to vector<8x512xf32>
    %8 = arith.mulf %7, %6 : vector<8x512xf32>
    %cst_5 = arith.constant 0.707106769 : f32
    %9 = vector.broadcast %cst_5 : f32 to vector<8x512xf32>
    %10 = arith.mulf %6, %9 : vector<8x512xf32>
    %11 = math.absf %10 : vector<8x512xf32>
    %cst_6 = arith.constant 0.327591091 : f32
    %12 = vector.broadcast %cst_6 : f32 to vector<8x512xf32>
    %13 = arith.mulf %12, %11 : vector<8x512xf32>
    %cst_7 = arith.constant 1.000000e+00 : f32
    %14 = vector.broadcast %cst_7 : f32 to vector<8x512xf32>
    %15 = arith.addf %14, %13 : vector<8x512xf32>
    %cst_8 = arith.constant 1.000000e+00 : f32
    %16 = vector.broadcast %cst_8 : f32 to vector<8x512xf32>
    %17 = arith.divf %16, %15 : vector<8x512xf32>
    %cst_9 = arith.constant 1.06140542 : f32
    %18 = vector.broadcast %cst_9 : f32 to vector<8x512xf32>
    %19 = arith.mulf %17, %18 : vector<8x512xf32>
    %cst_10 = arith.constant -1.45315206 : f32
    %20 = vector.broadcast %cst_10 : f32 to vector<8x512xf32>
    %21 = arith.addf %20, %19 : vector<8x512xf32>
    %22 = arith.mulf %17, %21 : vector<8x512xf32>
    %cst_11 = arith.constant 1.42141378 : f32
    %23 = vector.broadcast %cst_11 : f32 to vector<8x512xf32>
    %24 = arith.addf %23, %22 : vector<8x512xf32>
    %25 = arith.mulf %17, %24 : vector<8x512xf32>
    %cst_12 = arith.constant -0.284496725 : f32
    %26 = vector.broadcast %cst_12 : f32 to vector<8x512xf32>
    %27 = arith.addf %26, %25 : vector<8x512xf32>
    %28 = arith.mulf %17, %27 : vector<8x512xf32>
    %cst_13 = arith.constant 0.254829586 : f32
    %29 = vector.broadcast %cst_13 : f32 to vector<8x512xf32>
    %30 = arith.addf %29, %28 : vector<8x512xf32>
    %31 = arith.mulf %17, %30 : vector<8x512xf32>
    %cst_14 = arith.constant 0.000000e+00 : f32
    %32 = vector.broadcast %cst_14 : f32 to vector<8x512xf32>
    %33 = arith.subf %32, %11 : vector<8x512xf32>
    %34 = arith.mulf %33, %11 : vector<8x512xf32>
    %35 = math.exp %34 : vector<8x512xf32>
    %36 = arith.mulf %31, %35 : vector<8x512xf32>
    %cst_15 = arith.constant 1.000000e+00 : f32
    %37 = vector.broadcast %cst_15 : f32 to vector<8x512xf32>
    %38 = arith.subf %37, %36 : vector<8x512xf32>
    %cst_16 = arith.constant 0.000000e+00 : f32
    %39 = vector.broadcast %cst_16 : f32 to vector<8x512xf32>
    %40 = arith.cmpf olt, %10, %39 : vector<8x512xf32>
    %cst_17 = arith.constant 0.000000e+00 : f32
    %41 = vector.broadcast %cst_17 : f32 to vector<8x512xf32>
    %42 = arith.subf %41, %38 : vector<8x512xf32>
    %43 = arith.select %40, %42, %38 : vector<8x512xi1>, vector<8x512xf32>
    %cst_18 = arith.constant 1.000000e+00 : f32
    %44 = vector.broadcast %cst_18 : f32 to vector<8x512xf32>
    %45 = arith.addf %44, %43 : vector<8x512xf32>
    %46 = arith.mulf %8, %45 : vector<8x512xf32>
    %c0_19 = arith.constant 0 : index
    %c0_20 = arith.constant 0 : index
    %47 = vector.load %arg4[%c0_19, %c0_20] : memref<8x512xf32, #tpu.memory_space<vmem>>, vector<8x512xf32>
    tpu.vector_store %arg4[%c0_19, %c0_20], %46 {strides = array<i32>} : memref<8x512xf32, #tpu.memory_space<vmem>>, vector<8x512xf32>,
    return
  }
  func.func @transform_0(%arg0: i32) -> (i32, i32) {
    %c0_i32 = arith.constant 0 : i32
    %c0_i32_0 = arith.constant 0 : i32
    return %arg0, %c0_i32 : i32, i32
  }
  func.func @transform_1(%arg0: i32) -> (i32, i32) {
    %c0_i32 = arith.constant 0 : i32
    %c0_i32_0 = arith.constant 0 : i32
    %c0_i32_1 = arith.constant 0 : i32
    return %c0_i32, %c0_i32_0 : i32, i32
  }
  func.func @transform_2(%arg0: i32) -> (i32, i32) {
    %c0_i32 = arith.constant 0 : i32
    %c0_i32_0 = arith.constant 0 : i32
    %c0_i32_1 = arith.constant 0 : i32
    return %c0_i32, %c0_i32_0 : i32, i32
  }
  func.func @transform_3(%arg0: i32) -> (i32, i32) {
    %c0_i32 = arith.constant 0 : i32
    %c0_i32_0 = arith.constant 0 : i32
    return %arg0, %c0_i32 : i32, i32
  }
}

module attributes {stable_mosaic.version = 11 : i64} {
  func.func @_conv_stats_kernel(%arg0: i32, %arg1: memref<32x1152xbf16, #tpu.memory_space<vmem>>, %arg2: memref<1152x128xbf16, #tpu.memory_space<vmem>>, %arg3: memref<32x128xf32, #tpu.memory_space<vmem>>, %arg4: memref<1x128xf32, #tpu.memory_space<vmem>>, %arg5: memref<1x128xf32, #tpu.memory_space<vmem>>) attributes {dimension_semantics = [#tpu.dimension_semantics<arbitrary>], iteration_bounds = array<i64: 1>, scalar_prefetch = 0 : i64, scratch_operands = 0 : i64, tpu.core_type = #tpu.core_type<tc>, window_params = [{transform_indices = @transform_0, window_bounds = array<i64: 32, 1152>}, {pipeline_mode = #tpu.pipeline_mode<synchronous>, transform_indices = @transform_1, window_bounds = array<i64: 1152, 128>}, {transform_indices = @transform_2, window_bounds = array<i64: 32, 128>}, {pipeline_mode = #tpu.pipeline_mode<synchronous>, transform_indices = @transform_3, window_bounds = array<i64: 1, 128>}, {pipeline_mode = #tpu.pipeline_mode<synchronous>, transform_indices = @transform_4, window_bounds = array<i64: 1, 128>}]} {
    %c0 = arith.constant 0 : index
    %c0_0 = arith.constant 0 : index
    %0 = vector.load %arg1[%c0, %c0_0] : memref<32x1152xbf16, #tpu.memory_space<vmem>>, vector<32x1152xbf16>
    %c0_1 = arith.constant 0 : index
    %c0_2 = arith.constant 0 : index
    %1 = vector.load %arg2[%c0_1, %c0_2] : memref<1152x128xbf16, #tpu.memory_space<vmem>>, vector<1152x128xbf16>
    %cst = arith.constant dense<0.000000e+00> : vector<32x128xf32>
    %2 = tpu.matmul %0, %1, %cst {dimension_numbers = #tpu.dot_dimension_numbers<[1], [0], [0], [1], [0, 0, 1, 1], [], []>} : vector<32x1152xbf16>, vector<1152x128xbf16>, vector<32x128xf32> -> vector<32x128xf32>
    %c0_3 = arith.constant 0 : index
    %c0_4 = arith.constant 0 : index
    %3 = vector.load %arg3[%c0_3, %c0_4] : memref<32x128xf32, #tpu.memory_space<vmem>>, vector<32x128xf32>
    tpu.vector_store %arg3[%c0_3, %c0_4], %2 {strides = array<i32>} : memref<32x128xf32, #tpu.memory_space<vmem>>, vector<32x128xf32>,
    %c0_i32 = arith.constant 0 : i32
    %4 = arith.cmpi eq, %arg0, %c0_i32 : i32
    %5 = arith.extui %4 : i1 to i32
    %c0_i32_5 = arith.constant 0 : i32
    %6 = arith.cmpi ne, %5, %c0_i32_5 : i32
    scf.if %6 {
      %cst_16 = arith.constant 0.000000e+00 : f32
      %18 = vector.broadcast %cst_16 : f32 to vector<1x128xf32>
      %c0_17 = arith.constant 0 : index
      %c0_18 = arith.constant 0 : index
      %19 = vector.load %arg4[%c0_17, %c0_18] : memref<1x128xf32, #tpu.memory_space<vmem>>, vector<1x128xf32>
      tpu.vector_store %arg4[%c0_17, %c0_18], %18 {strides = array<i32>} : memref<1x128xf32, #tpu.memory_space<vmem>>, vector<1x128xf32>,
      %cst_19 = arith.constant 0.000000e+00 : f32
      %20 = vector.broadcast %cst_19 : f32 to vector<1x128xf32>
      %c0_20 = arith.constant 0 : index
      %c0_21 = arith.constant 0 : index
      %21 = vector.load %arg5[%c0_20, %c0_21] : memref<1x128xf32, #tpu.memory_space<vmem>>, vector<1x128xf32>
      tpu.vector_store %arg5[%c0_20, %c0_21], %20 {strides = array<i32>} : memref<1x128xf32, #tpu.memory_space<vmem>>, vector<1x128xf32>,
    } else {
    }
    %c0_6 = arith.constant 0 : index
    %c0_7 = arith.constant 0 : index
    %7 = vector.load %arg4[%c0_6, %c0_7] : memref<1x128xf32, #tpu.memory_space<vmem>>, vector<1x128xf32>
    %cst_8 = arith.constant dense<0.000000e+00> : vector<128xf32>
    %8 = vector.multi_reduction <add>, %2, %cst_8 [0] : vector<32x128xf32> to vector<128xf32>
    %9 = vector.shape_cast %8 : vector<128xf32> to vector<1x128xf32>
    %10 = arith.addf %7, %9 : vector<1x128xf32>
    %c0_9 = arith.constant 0 : index
    %c0_10 = arith.constant 0 : index
    %11 = vector.load %arg4[%c0_9, %c0_10] : memref<1x128xf32, #tpu.memory_space<vmem>>, vector<1x128xf32>
    tpu.vector_store %arg4[%c0_9, %c0_10], %10 {strides = array<i32>} : memref<1x128xf32, #tpu.memory_space<vmem>>, vector<1x128xf32>,
    %c0_11 = arith.constant 0 : index
    %c0_12 = arith.constant 0 : index
    %12 = vector.load %arg5[%c0_11, %c0_12] : memref<1x128xf32, #tpu.memory_space<vmem>>, vector<1x128xf32>
    %13 = arith.mulf %2, %2 : vector<32x128xf32>
    %cst_13 = arith.constant dense<0.000000e+00> : vector<128xf32>
    %14 = vector.multi_reduction <add>, %13, %cst_13 [0] : vector<32x128xf32> to vector<128xf32>
    %15 = vector.shape_cast %14 : vector<128xf32> to vector<1x128xf32>
    %16 = arith.addf %12, %15 : vector<1x128xf32>
    %c0_14 = arith.constant 0 : index
    %c0_15 = arith.constant 0 : index
    %17 = vector.load %arg5[%c0_14, %c0_15] : memref<1x128xf32, #tpu.memory_space<vmem>>, vector<1x128xf32>
    tpu.vector_store %arg5[%c0_14, %c0_15], %16 {strides = array<i32>} : memref<1x128xf32, #tpu.memory_space<vmem>>, vector<1x128xf32>,
    return
  }
  func.func @transform_0(%arg0: i32) -> (i32, i32) {
    %c0_i32 = arith.constant 0 : i32
    %c0_i32_0 = arith.constant 0 : i32
    return %arg0, %c0_i32 : i32, i32
  }
  func.func @transform_1(%arg0: i32) -> (i32, i32) {
    %c0_i32 = arith.constant 0 : i32
    %c0_i32_0 = arith.constant 0 : i32
    %c0_i32_1 = arith.constant 0 : i32
    return %c0_i32, %c0_i32_0 : i32, i32
  }
  func.func @transform_2(%arg0: i32) -> (i32, i32) {
    %c0_i32 = arith.constant 0 : i32
    %c0_i32_0 = arith.constant 0 : i32
    return %arg0, %c0_i32 : i32, i32
  }
  func.func @transform_3(%arg0: i32) -> (i32, i32) {
    %c0_i32 = arith.constant 0 : i32
    %c0_i32_0 = arith.constant 0 : i32
    %c0_i32_1 = arith.constant 0 : i32
    return %c0_i32, %c0_i32_0 : i32, i32
  }
  func.func @transform_4(%arg0: i32) -> (i32, i32) {
    %c0_i32 = arith.constant 0 : i32
    %c0_i32_0 = arith.constant 0 : i32
    %c0_i32_1 = arith.constant 0 : i32
    return %c0_i32, %c0_i32_0 : i32, i32
  }
}

module attributes {stable_mosaic.version = 11 : i64} {
  func.func @_conv_stats_kernel(%arg0: i32, %arg1: memref<32x64xbf16, #tpu.memory_space<vmem>>, %arg2: memref<64x128xbf16, #tpu.memory_space<vmem>>, %arg3: memref<32x128xf32, #tpu.memory_space<vmem>>, %arg4: memref<1x128xf32, #tpu.memory_space<vmem>>, %arg5: memref<1x128xf32, #tpu.memory_space<vmem>>) attributes {dimension_semantics = [#tpu.dimension_semantics<arbitrary>], iteration_bounds = array<i64: 1>, scalar_prefetch = 0 : i64, scratch_operands = 0 : i64, tpu.core_type = #tpu.core_type<tc>, window_params = [{transform_indices = @transform_0, window_bounds = array<i64: 32, 64>}, {pipeline_mode = #tpu.pipeline_mode<synchronous>, transform_indices = @transform_1, window_bounds = array<i64: 64, 128>}, {transform_indices = @transform_2, window_bounds = array<i64: 32, 128>}, {pipeline_mode = #tpu.pipeline_mode<synchronous>, transform_indices = @transform_3, window_bounds = array<i64: 1, 128>}, {pipeline_mode = #tpu.pipeline_mode<synchronous>, transform_indices = @transform_4, window_bounds = array<i64: 1, 128>}]} {
    %c0 = arith.constant 0 : index
    %c0_0 = arith.constant 0 : index
    %0 = vector.load %arg1[%c0, %c0_0] : memref<32x64xbf16, #tpu.memory_space<vmem>>, vector<32x64xbf16>
    %c0_1 = arith.constant 0 : index
    %c0_2 = arith.constant 0 : index
    %1 = vector.load %arg2[%c0_1, %c0_2] : memref<64x128xbf16, #tpu.memory_space<vmem>>, vector<64x128xbf16>
    %cst = arith.constant dense<0.000000e+00> : vector<32x128xf32>
    %2 = tpu.matmul %0, %1, %cst {dimension_numbers = #tpu.dot_dimension_numbers<[1], [0], [0], [1], [0, 0, 1, 1], [], []>} : vector<32x64xbf16>, vector<64x128xbf16>, vector<32x128xf32> -> vector<32x128xf32>
    %c0_3 = arith.constant 0 : index
    %c0_4 = arith.constant 0 : index
    %3 = vector.load %arg3[%c0_3, %c0_4] : memref<32x128xf32, #tpu.memory_space<vmem>>, vector<32x128xf32>
    tpu.vector_store %arg3[%c0_3, %c0_4], %2 {strides = array<i32>} : memref<32x128xf32, #tpu.memory_space<vmem>>, vector<32x128xf32>,
    %c0_i32 = arith.constant 0 : i32
    %4 = arith.cmpi eq, %arg0, %c0_i32 : i32
    %5 = arith.extui %4 : i1 to i32
    %c0_i32_5 = arith.constant 0 : i32
    %6 = arith.cmpi ne, %5, %c0_i32_5 : i32
    scf.if %6 {
      %cst_16 = arith.constant 0.000000e+00 : f32
      %18 = vector.broadcast %cst_16 : f32 to vector<1x128xf32>
      %c0_17 = arith.constant 0 : index
      %c0_18 = arith.constant 0 : index
      %19 = vector.load %arg4[%c0_17, %c0_18] : memref<1x128xf32, #tpu.memory_space<vmem>>, vector<1x128xf32>
      tpu.vector_store %arg4[%c0_17, %c0_18], %18 {strides = array<i32>} : memref<1x128xf32, #tpu.memory_space<vmem>>, vector<1x128xf32>,
      %cst_19 = arith.constant 0.000000e+00 : f32
      %20 = vector.broadcast %cst_19 : f32 to vector<1x128xf32>
      %c0_20 = arith.constant 0 : index
      %c0_21 = arith.constant 0 : index
      %21 = vector.load %arg5[%c0_20, %c0_21] : memref<1x128xf32, #tpu.memory_space<vmem>>, vector<1x128xf32>
      tpu.vector_store %arg5[%c0_20, %c0_21], %20 {strides = array<i32>} : memref<1x128xf32, #tpu.memory_space<vmem>>, vector<1x128xf32>,
    } else {
    }
    %c0_6 = arith.constant 0 : index
    %c0_7 = arith.constant 0 : index
    %7 = vector.load %arg4[%c0_6, %c0_7] : memref<1x128xf32, #tpu.memory_space<vmem>>, vector<1x128xf32>
    %cst_8 = arith.constant dense<0.000000e+00> : vector<128xf32>
    %8 = vector.multi_reduction <add>, %2, %cst_8 [0] : vector<32x128xf32> to vector<128xf32>
    %9 = vector.shape_cast %8 : vector<128xf32> to vector<1x128xf32>
    %10 = arith.addf %7, %9 : vector<1x128xf32>
    %c0_9 = arith.constant 0 : index
    %c0_10 = arith.constant 0 : index
    %11 = vector.load %arg4[%c0_9, %c0_10] : memref<1x128xf32, #tpu.memory_space<vmem>>, vector<1x128xf32>
    tpu.vector_store %arg4[%c0_9, %c0_10], %10 {strides = array<i32>} : memref<1x128xf32, #tpu.memory_space<vmem>>, vector<1x128xf32>,
    %c0_11 = arith.constant 0 : index
    %c0_12 = arith.constant 0 : index
    %12 = vector.load %arg5[%c0_11, %c0_12] : memref<1x128xf32, #tpu.memory_space<vmem>>, vector<1x128xf32>
    %13 = arith.mulf %2, %2 : vector<32x128xf32>
    %cst_13 = arith.constant dense<0.000000e+00> : vector<128xf32>
    %14 = vector.multi_reduction <add>, %13, %cst_13 [0] : vector<32x128xf32> to vector<128xf32>
    %15 = vector.shape_cast %14 : vector<128xf32> to vector<1x128xf32>
    %16 = arith.addf %12, %15 : vector<1x128xf32>
    %c0_14 = arith.constant 0 : index
    %c0_15 = arith.constant 0 : index
    %17 = vector.load %arg5[%c0_14, %c0_15] : memref<1x128xf32, #tpu.memory_space<vmem>>, vector<1x128xf32>
    tpu.vector_store %arg5[%c0_14, %c0_15], %16 {strides = array<i32>} : memref<1x128xf32, #tpu.memory_space<vmem>>, vector<1x128xf32>,
    return
  }
  func.func @transform_0(%arg0: i32) -> (i32, i32) {
    %c0_i32 = arith.constant 0 : i32
    %c0_i32_0 = arith.constant 0 : i32
    return %arg0, %c0_i32 : i32, i32
  }
  func.func @transform_1(%arg0: i32) -> (i32, i32) {
    %c0_i32 = arith.constant 0 : i32
    %c0_i32_0 = arith.constant 0 : i32
    %c0_i32_1 = arith.constant 0 : i32
    return %c0_i32, %c0_i32_0 : i32, i32
  }
  func.func @transform_2(%arg0: i32) -> (i32, i32) {
    %c0_i32 = arith.constant 0 : i32
    %c0_i32_0 = arith.constant 0 : i32
    return %arg0, %c0_i32 : i32, i32
  }
  func.func @transform_3(%arg0: i32) -> (i32, i32) {
    %c0_i32 = arith.constant 0 : i32
    %c0_i32_0 = arith.constant 0 : i32
    %c0_i32_1 = arith.constant 0 : i32
    return %c0_i32, %c0_i32_0 : i32, i32
  }
  func.func @transform_4(%arg0: i32) -> (i32, i32) {
    %c0_i32 = arith.constant 0 : i32
    %c0_i32_0 = arith.constant 0 : i32
    %c0_i32_1 = arith.constant 0 : i32
    return %c0_i32, %c0_i32_0 : i32, i32
  }
}

module attributes {stable_mosaic.version = 11 : i64} {
  func.func @_bn_act_kernel(%arg0: i32, %arg1: memref<8x512xf32, #tpu.memory_space<vmem>>, %arg2: memref<1x512xf32, #tpu.memory_space<vmem>>, %arg3: memref<1x512xf32, #tpu.memory_space<vmem>>, %arg4: memref<8x512xf32, #tpu.memory_space<vmem>>, %arg5: memref<8x512xf32, #tpu.memory_space<vmem>>) attributes {dimension_semantics = [#tpu.dimension_semantics<parallel>], iteration_bounds = array<i64: 1>, scalar_prefetch = 0 : i64, scratch_operands = 0 : i64, tpu.core_type = #tpu.core_type<tc>, window_params = [{transform_indices = @transform_0, window_bounds = array<i64: 8, 512>}, {pipeline_mode = #tpu.pipeline_mode<synchronous>, transform_indices = @transform_1, window_bounds = array<i64: 1, 512>}, {pipeline_mode = #tpu.pipeline_mode<synchronous>, transform_indices = @transform_2, window_bounds = array<i64: 1, 512>}, {transform_indices = @transform_3, window_bounds = array<i64: 8, 512>}, {transform_indices = @transform_4, window_bounds = array<i64: 8, 512>}]} {
    %c0 = arith.constant 0 : index
    %c0_0 = arith.constant 0 : index
    %0 = vector.load %arg1[%c0, %c0_0] : memref<8x512xf32, #tpu.memory_space<vmem>>, vector<8x512xf32>
    %c0_1 = arith.constant 0 : index
    %c0_2 = arith.constant 0 : index
    %1 = vector.load %arg2[%c0_1, %c0_2] : memref<1x512xf32, #tpu.memory_space<vmem>>, vector<1x512xf32>
    %2 = vector.broadcast %1 : vector<1x512xf32> to vector<8x512xf32>
    %3 = arith.mulf %0, %2 : vector<8x512xf32>
    %c0_3 = arith.constant 0 : index
    %c0_4 = arith.constant 0 : index
    %4 = vector.load %arg3[%c0_3, %c0_4] : memref<1x512xf32, #tpu.memory_space<vmem>>, vector<1x512xf32>
    %5 = vector.broadcast %4 : vector<1x512xf32> to vector<8x512xf32>
    %6 = arith.addf %3, %5 : vector<8x512xf32>
    %c0_5 = arith.constant 0 : index
    %c0_6 = arith.constant 0 : index
    %7 = vector.load %arg4[%c0_5, %c0_6] : memref<8x512xf32, #tpu.memory_space<vmem>>, vector<8x512xf32>
    %8 = arith.addf %6, %7 : vector<8x512xf32>
    %c0_7 = arith.constant 0 : index
    %c0_8 = arith.constant 0 : index
    %9 = vector.load %arg5[%c0_7, %c0_8] : memref<8x512xf32, #tpu.memory_space<vmem>>, vector<8x512xf32>
    tpu.vector_store %arg5[%c0_7, %c0_8], %8 {strides = array<i32>} : memref<8x512xf32, #tpu.memory_space<vmem>>, vector<8x512xf32>,
    return
  }
  func.func @transform_0(%arg0: i32) -> (i32, i32) {
    %c0_i32 = arith.constant 0 : i32
    %c0_i32_0 = arith.constant 0 : i32
    return %arg0, %c0_i32 : i32, i32
  }
  func.func @transform_1(%arg0: i32) -> (i32, i32) {
    %c0_i32 = arith.constant 0 : i32
    %c0_i32_0 = arith.constant 0 : i32
    %c0_i32_1 = arith.constant 0 : i32
    return %c0_i32, %c0_i32_0 : i32, i32
  }
  func.func @transform_2(%arg0: i32) -> (i32, i32) {
    %c0_i32 = arith.constant 0 : i32
    %c0_i32_0 = arith.constant 0 : i32
    %c0_i32_1 = arith.constant 0 : i32
    return %c0_i32, %c0_i32_0 : i32, i32
  }
  func.func @transform_3(%arg0: i32) -> (i32, i32) {
    %c0_i32 = arith.constant 0 : i32
    %c0_i32_0 = arith.constant 0 : i32
    return %arg0, %c0_i32 : i32, i32
  }
  func.func @transform_4(%arg0: i32) -> (i32, i32) {
    %c0_i32 = arith.constant 0 : i32
    %c0_i32_0 = arith.constant 0 : i32
    return %arg0, %c0_i32 : i32, i32
  }
}

</mosaic_0001>

<bundles_post_ra>
// kernel: stem_forward.17
= control target key start
LH: loop header
LB: loop body
LE: loop exit
PB: predicated region body
PF: predicated region fallthrough
CT: control target
= control target key end

     0   :  { %v32_v0 = vlaneseq  ;;  %s1054_s1 = inlined_call_operand.vmem [shape: f32[1,512], index: 1, kind: input, shape index: {}]   ;;  %s1055_s2 = inlined_call_operand.vmem [shape: f32[1,512], index: 2, kind: input, shape index: {}]   ;;  %s1056_s0 = inlined_call_operand.vmem [shape: f32[32,512], index: 0, kind: input, shape index: {}]   ;;  %s1057_s3 = inlined_call_operand.vmem [shape: f32[32,512], index: 3, kind: output, shape index: {}]  }
   0x1   :  { %v30_v2 = vld [vmem:[%s1054_s1] sm:$0xf]  ;;  %v15_v9 = vld [vmem:[%s1056_s0 + $0x8] sm:$0xff]  ;;  %v16_v14 = vld [vmem:[%s1056_s0 + $0x10] sm:$0xff] }
   0x2   :  { %v33_v1 = vshrl.u32 %v32_v0, 7  ;;  %v68_v3 = vld [vmem:[%s1055_s2] sm:$0xf]  ;;  %v17_v15 = vld [vmem:[%s1056_s0 + $0x18] sm:$0xff]  ;;  %v19_v27 = vld [vmem:[%s1056_s0 + $0x28] sm:$0xff] }
   0x3   :  { %v14_v8 = vld [vmem:[%s1056_s0] sm:$0xff]  ;;  %v20_v32 = vld [vmem:[%s1056_s0 + $0x30] sm:$0xff]  ;;  %v21_v33 = vld [vmem:[%s1056_s0 + $0x38] sm:$0xff] }
   0x4   :  { %v34_v4 = vsub.s32 0, %v33_v1  ;;  %v38_v5 = vsub.s32 1, %v33_v1  ;;  %v42_v6 = vsub.s32 2, %v33_v1  ;;  %v46_v7 = vsub.s32 3, %v33_v1  ;;  %v18_v26 = vld [vmem:[%s1056_s0 + $0x20] sm:$0xff] }
   0x6   :  { %v654_v10 = vrot.slane %v30_v2, %v34_v4  ;;  %v656_v11 = vrot.slane %v68_v3, %v34_v4  ;;  %v658_v12 = vrot.slane %v30_v2, %v38_v5  ;;  %v660_v13 = vrot.slane %v68_v3, %v38_v5 }
   0x7   :  { %v668_v16 = vrot.slane %v30_v2, %v42_v6  ;;  %v670_v17 = vrot.slane %v68_v3, %v42_v6  ;;  %v672_v18 = vrot.slane %v30_v2, %v46_v7  ;;  %v674_v19 = vrot.slane %v68_v3, %v46_v7 }
   0x8   :  { %v52_v20 = vmul.f32 %v654_v10, %v14_v8  ;;  %v53_v21 = vmul.f32 %v658_v12, %v15_v9  ;;  %v56_v36 = vmul.f32 %v654_v10, %v18_v26  ;;  %v57_v37 = vmul.f32 %v658_v12, %v19_v27  ;;  %v22_v26 = vld [vmem:[%s1056_s0 + $0x40] sm:$0xff] }
   0x9   :  { %v54_v22 = vmul.f32 %v668_v16, %v16_v14  ;;  %v55_v23 = vmul.f32 %v672_v18, %v17_v15  ;;  %v58_v42 = vmul.f32 %v668_v16, %v20_v32  ;;  %v59_v43 = vmul.f32 %v672_v18, %v21_v33 }
   0xa   :  { %v90_v24 = vadd.f32 %v656_v11, %v52_v20  ;;  %v91_v25 = vadd.f32 %v660_v13, %v53_v21  ;;  %v94_v49 = vadd.f32 %v656_v11, %v56_v36  ;;  %v95_v50 = vadd.f32 %v660_v13, %v57_v37 }
   0xb   :  { %v92_v28 = vadd.f32 %v670_v17, %v54_v22  ;;  %v93_v29 = vadd.f32 %v674_v19, %v55_v23  ;;  %v96_v57 = vadd.f32 %v670_v17, %v58_v42  ;;  %v716_v60 = vadd.f32 %v674_v19, %v59_v43 }
   0xc   :  { %v690_v30 = vmul.f32 0.70710677, %v90_v24  ;;  %v692_v31 = vmul.f32 0.70710677, %v91_v25  ;;  %v718_v61 = vmul.f32 0.5, %v90_v24  ;;  %v720_v62 = vmul.f32 0.5, %v91_v25 }
   0xd   :  { %v700_v34 = vmul.f32 0.70710677, %v92_v28  ;;  %v702_v35 = vmul.f32 0.70710677, %v93_v29  ;;  %v722_v63 = vmul.f32 0.70710677, %v94_v49 }
   0xe   :  { %v138_v38 = vand.u32 2147483647, %v690_v30  ;;  %v139_v39 = vand.u32 2147483647, %v692_v31  ;;  %v724_v0 = vmul.f32 0.5, %v92_v28  ;;  %v731_v9 = vmul.f32 0.5, %v93_v29 }
   0xf   :  { %v140_v40 = vand.u32 2147483647, %v700_v34  ;;  %v141_v41 = vand.u32 2147483647, %v702_v35  ;;  %v726_v3 = vmul.f32 0.70710677, %v95_v50 }
  0x10   :  { %v154_v44 = vmul.f32 0.3275911, %v138_v38  ;;  %v362_v45 = vsub.f32 0.0, %v138_v38  ;;  %v155_v46 = vmul.f32 0.3275911, %v139_v39  ;;  %v363_v47 = vsub.f32 0.0, %v139_v39 }
  0x11   :  { %v156_v48 = vmul.f32 0.3275911, %v140_v40  ;;  %v364_v53 = vsub.f32 0.0, %v140_v40  ;;  %v157_v54 = vmul.f32 0.3275911, %v141_v41  ;;  %v365_v56 = vsub.f32 0.0, %v141_v41 }
  0x12   :  { %v170_v51 = vadd.f32 1.0, %v154_v44  ;;  %v171_v52 = vadd.f32 1.0, %v155_v46  ;;  %v378_v55 = vmul.f32 %v362_v45, %v138_v38  ;;  %v379_v58 = vmul.f32 %v363_v47, %v139_v39 }
  0x13   :  { %v172_v59 = vadd.f32 1.0, %v156_v48  ;;  %v380_v1 = vmul.f32 %v364_v53, %v140_v40  ;;  %v173_v2 = vadd.f32 1.0, %v157_v54  ;;  %v381_v5 = vmul.f32 %v365_v56, %v141_v41 }
  0x14   :  { %558 = vrcp.f32 %v170_v51  ;;  %v394_v4 = vmul.f32 1.442695, %v378_v55  ;;  %v142_v6 = vand.u32 2147483647, %v722_v63  ;;  %v729_v7 = vmul.f32 0.70710677, %v96_v57 }
  0x15   :  { %560 = vrcp.f32 %v171_v52  ;;  %v396_v8 = vmul.f32 1.442695, %v379_v58  ;;  %v143_v14 = vand.u32 2147483647, %v726_v3  ;;  %v734_v15 = vmul.f32 0.5, %v94_v49  ;;  %v23_v55 = vld [vmem:[%s1056_s0 + $0x48] sm:$0xff] }
  0x16   :  { %562 = vrcp.f32 %v172_v59  ;;  %v158_v20 = vmul.f32 0.3275911, %v142_v6  ;;  %v366_v21 = vsub.f32 0.0, %v142_v6  ;;  %v144_v22 = vand.u32 2147483647, %v729_v7 }
  0x17   :  { %v398_v23 = vmul.f32 1.442695, %v380_v1  ;;  %564 = vrcp.f32 %v173_v2  ;;  %v159_v24 = vmul.f32 0.3275911, %v143_v14  ;;  %v367_v25 = vsub.f32 0.0, %v143_v14 }
  0x18   :  { %566 = vpow2.f32 %v394_v4  ;;  %v400_v27 = vmul.f32 1.442695, %v381_v5  ;;  %v174_v28 = vadd.f32 1.0, %v158_v20  ;;  %v160_v29 = vmul.f32 0.3275911, %v144_v22 }
  0x19   :  { %v382_v32 = vmul.f32 %v366_v21, %v142_v6  ;;  %v175_v33 = vadd.f32 1.0, %v159_v24  ;;  %v368_v36 = vsub.f32 0.0, %v144_v22  ;;  %v741_v37 = vmul.f32 0.70710677, %v716_v60 }
  0x1a   :  { %568 = vrcp.f32 %v174_v28  ;;  %v383_v38 = vmul.f32 %v367_v25, %v143_v14  ;;  %v176_v39 = vadd.f32 1.0, %v160_v29  ;;  %v60_v40 = vmul.f32 %v654_v10, %v22_v26 }
  0x1b   :  { %v746_v42 = vmul.f32 0.5, %v95_v50  ;;  %570 = vrcp.f32 %v175_v33  ;;  %v748_v43 = vmul.f32 0.5, %v96_v57  ;;  %v145_v44 = vand.u32 2147483647, %v741_v37 }
  0x1c   :  { %572 = vpow2.f32 %v396_v8  ;;  %v384_v47 = vmul.f32 %v368_v36, %v144_v22  ;;  %v755_v48 = vadd.f32 %v656_v11, %v60_v40  ;;  %v402_v51 = vmul.f32 1.442695, %v382_v32 }
  0x1d   :  { %574 = vpow2.f32 %v398_v23  ;;  %v161_v50 = vmul.f32 0.3275911, %v145_v44  ;;  %v404_v53 = vmul.f32 1.442695, %v383_v38  ;;  %v369_v54 = vsub.f32 0.0, %v145_v44 }
  0x1e   :  { %v744_v41 = vpop.eup %558  ;;  %576 = vrcp.f32 %v176_v39  ;;  %v764_v59 = vmul.f32 0.70710677, %v755_v48  ;;  %v406_v4 = vmul.f32 1.442695, %v384_v47  ;;  %v61_v20 = vmul.f32 %v658_v12, %v23_v55 }
  0x1f   :  { %v751_v45 = vpop.eup %560  ;;  %v218_v46 = vmul.f32 1.0614054, %v744_v41  ;;  %578 = vpow2.f32 %v400_v27  ;;  %v177_v58 = vadd.f32 1.0, %v161_v50  ;;  %v385_v5 = vmul.f32 %v369_v54, %v145_v44 }
  0x20   :  { %v219_v49 = vmul.f32 1.0614054, %v751_v45  ;;  %v761_v56 = vpop.eup %562  ;;  %v146_v14 = vand.u32 2147483647, %v764_v59  ;;  %v783_v44 = vadd.f32 %v660_v13, %v61_v20  ;;  %vm458_vm0 = vcmp.lt.f32.partialorder %v690_v30, 0.0 }
  0x21   :  { %v234_v52 = vadd.f32 -1.4531521, %v218_v46  ;;  %v220_v2 = vmul.f32 1.0614054, %v761_v56  ;;  %v768_v6 = vpop.eup %564  ;;  %580 = vrcp.f32 %v177_v58  ;;  %v408_v26 = vmul.f32 1.442695, %v385_v5 }
  0x22   :  { %v235_v57 = vadd.f32 -1.4531521, %v219_v49  ;;  %v567_v21 = vpop.eup %566  ;;  %v221_v24 = vmul.f32 1.0614054, %v768_v6  ;;  %582 = vpow2.f32 %v402_v51  ;;  %v162_v27 = vmul.f32 0.3275911, %v146_v14 }
  0x23   :  { %v250_v1 = vmul.f32 %v744_v41, %v234_v52  ;;  %v236_v23 = vadd.f32 -1.4531521, %v220_v2  ;;  %584 = vpow2.f32 %v404_v53  ;;  %v370_v55 = vsub.f32 0.0, %v146_v14 }
  0x24   :  { %v251_v8 = vmul.f32 %v751_v45, %v235_v57  ;;  %v774_v28 = vpop.eup %568  ;;  %v237_v33 = vadd.f32 -1.4531521, %v221_v24  ;;  %586 = vpow2.f32 %v406_v4  ;;  %v178_v40 = vadd.f32 1.0, %v162_v27 }
  0x25   :  { %v266_v22 = vadd.f32 1.4214138, %v250_v1  ;;  %v252_v32 = vmul.f32 %v761_v56, %v236_v23  ;;  %v778_v36 = vpop.eup %570  ;;  %v222_v39 = vmul.f32 1.0614054, %v774_v28  ;;  %588 = vpow2.f32 %v408_v26 }
  0x26   :  { %v267_v25 = vadd.f32 1.4214138, %v251_v8  ;;  %v573_v46 = vpop.eup %572  ;;  %v253_v51 = vmul.f32 %v768_v6, %v237_v33  ;;  %v223_v50 = vmul.f32 1.0614054, %v778_v36  ;;  %590 = vrcp.f32 %v178_v40 }
  0x27   :  { %v282_v29 = vmul.f32 %v744_v41, %v266_v22  ;;  %v268_v49 = vadd.f32 1.4214138, %v252_v32  ;;  %v575_v52 = vpop.eup %574  ;;  %v238_v54 = vadd.f32 -1.4531521, %v222_v39  ;;  %vm459_vm1 = vcmp.lt.f32.partialorder %v692_v31, 0.0 }
  0x28   :  { %v283_v38 = vmul.f32 %v751_v45, %v267_v25  ;;  %v787_v57 = vpop.eup %576  ;;  %v269_v2 = vadd.f32 1.4214138, %v253_v51  ;;  %v239_v4 = vadd.f32 -1.4531521, %v223_v50  ;;  %vm460_vm2 = vcmp.lt.f32.partialorder %v700_v34, 0.0 }
  0x29   :  { %v298_v47 = vadd.f32 -0.28449672, %v282_v29  ;;  %v284_v1 = vmul.f32 %v761_v56, %v268_v49  ;;  %v579_v5 = vpop.eup %578  ;;  %v254_v20 = vmul.f32 %v774_v28, %v238_v54  ;;  %v224_v22 = vmul.f32 1.0614054, %v787_v57 }
  0x2a   :  { %v299_v53 = vadd.f32 -0.28449672, %v283_v38  ;;  %v285_v25 = vmul.f32 %v768_v6, %v269_v2  ;;  %v255_v26 = vmul.f32 %v778_v36, %v239_v4  ;;  %v386_v38 = vmul.f32 %v370_v55, %v146_v14 }
  0x2b   :  { %v314_v58 = vmul.f32 %v744_v41, %v298_v47  ;;  %v300_v24 = vadd.f32 -0.28449672, %v284_v1  ;;  %v798_v27 = vpop.eup %580  ;;  %v270_v32 = vadd.f32 1.4214138, %v254_v20  ;;  %v240_v33 = vadd.f32 -1.4531521, %v224_v22 }
  0x2c   :  { %v315_v8 = vmul.f32 %v751_v45, %v299_v53  ;;  %v583_v39 = vpop.eup %582  ;;  %v301_v40 = vadd.f32 -0.28449672, %v285_v25  ;;  %v271_v51 = vadd.f32 1.4214138, %v255_v26  ;;  %v225_v1 = vmul.f32 1.0614054, %v798_v27 }
  0x2d   :  { %v330_v23 = vadd.f32 0.2548296, %v314_v58  ;;  %v316_v49 = vmul.f32 %v761_v56, %v300_v24  ;;  %v585_v50 = vpop.eup %584  ;;  %v286_v54 = vmul.f32 %v774_v28, %v270_v32  ;;  %v256_v58 = vmul.f32 %v787_v57, %v240_v33 }
  0x2e   :  { %v331_v29 = vadd.f32 0.2548296, %v315_v8  ;;  %v807_v2 = vpop.eup %586  ;;  %v287_v4 = vmul.f32 %v778_v36, %v271_v51  ;;  %vm461_vm3 = vcmp.lt.f32.partialorder %v702_v35, 0.0  ;;  %v241_v22 = vadd.f32 -1.4531521, %v225_v1 }
  0x2f   :  { %v346_v47 = vmul.f32 %v744_v41, %v330_v23  ;;  %v332_v55 = vadd.f32 0.2548296, %v316_v49  ;;  %v317_v41 = vmul.f32 %v768_v6, %v301_v40  ;;  %v272_v20 = vadd.f32 1.4214138, %v256_v58 }
  0x30   :  { %v347_v53 = vmul.f32 %v751_v45, %v331_v29  ;;  %v302_v45 = vadd.f32 -0.28449672, %v286_v54  ;;  %v303_v26 = vadd.f32 -0.28449672, %v287_v4  ;;  %v813_v29 = vpop.eup %588  ;;  %vm462_vm4 = vcmp.lt.f32.partialorder %v722_v63, 0.0 }
  0x31   :  { %v426_v14 = vmul.f32 %v567_v21, %v346_v47  ;;  %v348_v24 = vmul.f32 %v761_v56, %v332_v55  ;;  %v333_v25 = vadd.f32 0.2548296, %v317_v41  ;;  %v288_v33 = vmul.f32 %v787_v57, %v272_v20  ;;  %v822_v56 = vpop.eup %590 }
  0x32   :  { %v427_v8 = vmul.f32 %v573_v46, %v347_v53  ;;  %v318_v21 = vmul.f32 %v774_v28, %v302_v45  ;;  %v817_v47 = vmul.f32 1.442695, %v386_v38  ;;  %v319_v51 = vmul.f32 %v778_v36, %v303_v26 }
  0x33   :  { %v442_v23 = vsub.f32 1.0, %v426_v14  ;;  %v428_v49 = vmul.f32 %v575_v52, %v348_v24  ;;  %v349_v40 = vmul.f32 %v768_v6, %v333_v25  ;;  %vm463_vm5 = vcmp.lt.f32.partialorder %v726_v3, 0.0 }
  0x34   :  { %v443_v32 = vsub.f32 1.0, %v427_v8  ;;  %v334_v54 = vadd.f32 0.2548296, %v318_v21  ;;  %v304_v58 = vadd.f32 -0.28449672, %v288_v33  ;;  %v257_v1 = vmul.f32 %v798_v27, %v241_v22 }
  0x35   :  { %v474_v46 = vsub.f32 0.0, %v442_v23  ;;  %v444_v14 = vsub.f32 1.0, %v428_v49  ;;  %v429_v52 = vmul.f32 %v579_v5, %v349_v40  ;;  %v335_v55 = vadd.f32 0.2548296, %v319_v51 }
  0x36   :  { %v475_v53 = vsub.f32 0.0, %v443_v32  ;;  %v350_v4 = vmul.f32 %v774_v28, %v334_v54  ;;  %v320_v8 = vmul.f32 %v787_v57, %v304_v58  ;;  %vm464_vm6 = vcmp.lt.f32.partialorder %v729_v7, 0.0 }
  0x37   :  { %v490_v38 = vsel %vm458_vm0, %v474_v46, %v442_v23  ;;  %v476_v20 = vsub.f32 0.0, %v444_v14  ;;  %v445_v24 = vsub.f32 1.0, %v429_v52  ;;  %v351_v25 = vmul.f32 %v778_v36, %v335_v55 }
  0x38   :  { %v506_v6 = vadd.f32 1.0, %v490_v38  ;;  %v491_v41 = vsel %vm459_vm1, %v475_v53, %v443_v32  ;;  %v430_v22 = vmul.f32 %v583_v39, %v350_v4  ;;  %v336_v5 = vadd.f32 0.2548296, %v320_v8  ;;  %v24_v39 = vld [vmem:[%s1056_s0 + $0x50] sm:$0xff] }
  0x39   :  { %v507_v45 = vadd.f32 1.0, %v491_v41  ;;  %v273_v23 = vadd.f32 1.4214138, %v257_v1  ;;  %v492_v31 = vsel %vm460_vm2, %v476_v20, %v444_v14  ;;  %v477_v28 = vsub.f32 0.0, %v445_v24  ;;  %v25_v20 = vld [vmem:[%s1056_s0 + $0x58] sm:$0xff] }
  0x3a   :  { %v522_v30 = vmul.f32 %v506_v6, %v718_v61  ;;  %v431_v32 = vmul.f32 %v585_v50, %v351_v25  ;;  %v508_v21 = vadd.f32 1.0, %v492_v31  ;;  %v446_v36 = vsub.f32 1.0, %v430_v22 }
  0x3b   :  { %v523_v26 = vmul.f32 %v507_v45, %v720_v62  ;;  %v352_v33 = vmul.f32 %v787_v57, %v336_v5  ;;  %v289_v61 = vmul.f32 %v798_v27, %v273_v23  ;;  %v493_v34 = vsel %vm461_vm3, %v477_v28, %v445_v24 }
  0x3c   :  { %538 = vst [vmem:[%s1057_s3] sm:$0xff] %v522_v30  ;;  %v447_v62 = vsub.f32 1.0, %v431_v32  ;;  %v226_v50 = vmul.f32 1.0614054, %v822_v56  ;;  %v853_v46 = vmul.f32 0.70710677, %v783_v44  ;;  %v524_v57 = vmul.f32 %v508_v21, %v724_v0 }
  0x3d   :  { %539 = vst [vmem:[%s1057_s3 + $0x8] sm:$0xff] %v523_v26  ;;  %v509_v49 = vadd.f32 1.0, %v493_v34  ;;  %v478_v40 = vsub.f32 0.0, %v446_v36  ;;  %v432_v51 = vmul.f32 %v807_v2, %v352_v33  ;;  %v305_v54 = vadd.f32 -0.28449672, %v289_v61 }
  0x3e   :  { %v479_v53 = vsub.f32 0.0, %v447_v62  ;;  %v242_v58 = vadd.f32 -1.4531521, %v226_v50  ;;  %v62_v1 = vmul.f32 %v668_v16, %v24_v39  ;;  %540 = vst [vmem:[%s1057_s3 + $0x10] sm:$0xff] %v524_v57  ;;  %v147_v0 = vand.u32 2147483647, %v853_v46 }
  0x3f   :  { %v525_v35 = vmul.f32 %v509_v49, %v731_v9  ;;  %v494_v38 = vsel %vm462_vm4, %v478_v40, %v446_v36  ;;  %v448_v14 = vsub.f32 1.0, %v432_v51  ;;  %v321_v55 = vmul.f32 %v798_v27, %v305_v54 }
  0x40   :  { %v510_v52 = vadd.f32 1.0, %v494_v38  ;;  %v495_v2 = vsel %vm463_vm5, %v479_v53, %v447_v62  ;;  %v258_v6 = vmul.f32 %v822_v56, %v242_v58  ;;  %592 = vpow2.f32 %v817_v47  ;;  %v26_v47 = vld [vmem:[%s1056_s0 + $0x60] sm:$0xff] }
  0x41   :  { %541 = vst [vmem:[%s1057_s3 + $0x18] sm:$0xff] %v525_v35  ;;  %v511_v41 = vadd.f32 1.0, %v495_v2  ;;  %v480_v9 = vsub.f32 0.0, %v448_v14  ;;  %v163_v63 = vmul.f32 0.3275911, %v147_v0  ;;  %v875_v3 = vadd.f32 %v670_v17, %v62_v1 }
  0x42   :  { %v526_v4 = vmul.f32 %v510_v52, %v734_v15  ;;  %v337_v8 = vadd.f32 0.2548296, %v321_v55  ;;  %v274_v45 = vadd.f32 1.4214138, %v258_v6  ;;  %v64_v28 = vmul.f32 %v654_v10, %v26_v47 }
  0x43   :  { %v527_v24 = vmul.f32 %v511_v41, %v746_v42  ;;  %v496_v25 = vsel %vm464_vm6, %v480_v9, %v448_v14  ;;  %v179_v30 = vadd.f32 1.0, %v163_v63  ;;  %v895_v7 = vmul.f32 0.70710677, %v875_v3  ;;  %v29_v9 = vld [vmem:[%s1056_s0 + $0x78] sm:$0xff] }
  0x44   :  { %542 = vst [vmem:[%s1057_s3 + $0x20] sm:$0xff] %v526_v4  ;;  %v512_v15 = vadd.f32 1.0, %v496_v25  ;;  %v353_v22 = vmul.f32 %v798_v27, %v337_v8  ;;  %v290_v5 = vmul.f32 %v822_v56, %v274_v45  ;;  %v63_v42 = vmul.f32 %v672_v18, %v25_v20 }
  0x45   :  { %543 = vst [vmem:[%s1057_s3 + $0x28] sm:$0xff] %v527_v24  ;;  %594 = vrcp.f32 %v179_v30  ;;  %v148_v27 = vand.u32 2147483647, %v895_v7  ;;  %v910_v33 = vadd.f32 %v656_v11, %v64_v28  ;;  %vm465_vm7 = vcmp.lt.f32.partialorder %v741_v37, 0.0 }
  0x46   :  { %v528_v23 = vmul.f32 %v512_v15, %v748_v43  ;;  %v433_v26 = vmul.f32 %v813_v29, %v353_v22  ;;  %v306_v31 = vadd.f32 -0.28449672, %v290_v5  ;;  %v903_v32 = vadd.f32 %v674_v19, %v63_v42  ;;  %v27_v43 = vld [vmem:[%s1056_s0 + $0x68] sm:$0xff] }
  0x47   :  { %v371_v10 = vsub.f32 0.0, %v147_v0  ;;  %v164_v29 = vmul.f32 0.3275911, %v148_v27  ;;  %v920_v62 = vmul.f32 0.70710677, %v910_v33  ;;  %v113_v11 = vmul.f32 0.5, %v716_v60 }
  0x48   :  { %544 = vst [vmem:[%s1057_s3 + $0x30] sm:$0xff] %v528_v23  ;;  %v449_v21 = vsub.f32 1.0, %v433_v26  ;;  %v322_v36 = vmul.f32 %v822_v56, %v306_v31  ;;  %v917_v61 = vmul.f32 0.70710677, %v903_v32  ;;  %v65_v40 = vmul.f32 %v658_v12, %v27_v43 }
  0x49   :  { %v180_v57 = vadd.f32 1.0, %v164_v29  ;;  %v150_v53 = vand.u32 2147483647, %v920_v62  ;;  %v387_v58 = vmul.f32 %v371_v10, %v147_v0  ;;  %vm466_vm8 = vcmp.lt.f32.partialorder %v764_v59, 0.0  ;;  %v28_v0 = vld [vmem:[%s1056_s0 + $0x70] sm:$0xff] }
  0x4a   :  { %v481_v39 = vsub.f32 0.0, %v449_v21  ;;  %v338_v34 = vadd.f32 0.2548296, %v322_v36  ;;  %v593_v50 = vpop.eup %592  ;;  %v149_v49 = vand.u32 2147483647, %v917_v61  ;;  %v930_v2 = vadd.f32 %v660_v13, %v65_v40 }
  0x4b   :  { %596 = vrcp.f32 %v180_v57  ;;  %v166_v38 = vmul.f32 0.3275911, %v150_v53  ;;  %v412_v6 = vmul.f32 1.442695, %v387_v58  ;;  %v372_v41 = vsub.f32 0.0, %v148_v27 }
  0x4c   :  { %v497_v51 = vsel %vm465_vm7, %v481_v39, %v449_v21  ;;  %v354_v37 = vmul.f32 %v822_v56, %v338_v34  ;;  %v165_v1 = vmul.f32 0.3275911, %v149_v49  ;;  %v941_v13 = vmul.f32 0.70710677, %v930_v2 }
  0x4d   :  { %v513_v54 = vadd.f32 1.0, %v497_v51  ;;  %v182_v56 = vadd.f32 1.0, %v166_v38  ;;  %v114_v63 = vmul.f32 0.5, %v755_v48  ;;  %v373_v45 = vsub.f32 0.0, %v149_v49 }
  0x4e   :  { %v434_v35 = vmul.f32 %v593_v50, %v354_v37  ;;  %v181_v60 = vadd.f32 1.0, %v165_v1  ;;  %v374_v20 = vsub.f32 0.0, %v150_v53  ;;  %v151_v24 = vand.u32 2147483647, %v941_v13 }
  0x4f   :  { %v927_v14 = vpop.eup %594  ;;  %v529_v52 = vmul.f32 %v513_v54, %v113_v11  ;;  %v66_v25 = vmul.f32 %v668_v16, %v28_v0  ;;  %v67_v15 = vmul.f32 %v672_v18, %v29_v9  ;;  %v388_v5 = vmul.f32 %v372_v41, %v148_v27 }
  0x50   :  { %v450_v55 = vsub.f32 1.0, %v434_v35  ;;  %v227_v12 = vmul.f32 1.0614054, %v927_v14  ;;  %598 = vrcp.f32 %v181_v60  ;;  %v167_v48 = vmul.f32 0.3275911, %v151_v24 }
  0x51   :  { %545 = vst [vmem:[%s1057_s3 + $0x38] sm:$0xff] %v529_v52  ;;  %600 = vrcp.f32 %v182_v56  ;;  %v954_v23 = vadd.f32 %v670_v17, %v66_v25  ;;  %v957_v26 = vadd.f32 %v674_v19, %v67_v15  ;;  %v389_v59 = vmul.f32 %v373_v45, %v149_v49 }
  0x52   :  { %v482_v4 = vsub.f32 0.0, %v450_v55  ;;  %v243_v8 = vadd.f32 -1.4531521, %v227_v12  ;;  %602 = vpow2.f32 %v412_v6  ;;  %v390_v28 = vmul.f32 %v374_v20, %v150_v53 }
  0x53   :  { %v183_v21 = vadd.f32 1.0, %v167_v48  ;;  %v964_v27 = vmul.f32 0.70710677, %v954_v23  ;;  %v414_v17 = vmul.f32 1.442695, %v388_v5  ;;  %v375_v54 = vsub.f32 0.0, %v151_v24 }
  0x54   :  { %v498_v30 = vsel %vm466_vm8, %v482_v4, %v450_v55  ;;  %v259_v47 = vmul.f32 %v927_v14, %v243_v8  ;;  %v970_v19 = vmul.f32 0.70710677, %v957_v26  ;;  %v416_v34 = vmul.f32 1.442695, %v389_v59 }
  0x55   :  { %v514_v22 = vadd.f32 1.0, %v498_v30  ;;  %v959_v31 = vpop.eup %596  ;;  %604 = vrcp.f32 %v183_v21  ;;  %v152_v29 = vand.u32 2147483647, %v964_v27  ;;  %v418_v50 = vmul.f32 1.442695, %v390_v28 }
  0x56   :  { %v275_v42 = vadd.f32 1.4214138, %v259_v47  ;;  %v228_v18 = vmul.f32 1.0614054, %v959_v31  ;;  %v153_v11 = vand.u32 2147483647, %v970_v19  ;;  %606 = vpow2.f32 %v414_v17 }
  0x57   :  { %v530_v16 = vmul.f32 %v514_v22, %v114_v63  ;;  %v168_v37 = vmul.f32 0.3275911, %v152_v29  ;;  %608 = vpow2.f32 %v416_v34  ;;  %v391_v9 = vmul.f32 %v375_v54, %v151_v24 }
  0x58   :  { %v291_v36 = vmul.f32 %v927_v14, %v275_v42  ;;  %v244_v10 = vadd.f32 -1.4531521, %v228_v18  ;;  %v169_v58 = vmul.f32 0.3275911, %v153_v11  ;;  %610 = vpow2.f32 %v418_v50 }
  0x59   :  { %546 = vst [vmem:[%s1057_s3 + $0x40] sm:$0xff] %v530_v16  ;;  %v184_v55 = vadd.f32 1.0, %v168_v37  ;;  %v376_v25 = vsub.f32 0.0, %v152_v29  ;;  %vm467_vm9 = vcmp.lt.f32.partialorder %v853_v46, 0.0  ;;  %v420_v22 = vmul.f32 1.442695, %v391_v9 }
  0x5a   :  { %v307_v43 = vadd.f32 -0.28449672, %v291_v36  ;;  %v973_v39 = vpop.eup %598  ;;  %v260_v40 = vmul.f32 %v959_v31, %v244_v10  ;;  %v185_v12 = vadd.f32 1.0, %v169_v58  ;;  %v377_v16 = vsub.f32 0.0, %v153_v11 }
  0x5b   :  { %v976_v57 = vpop.eup %600  ;;  %v229_v51 = vmul.f32 1.0614054, %v973_v39  ;;  %612 = vrcp.f32 %v184_v55  ;;  %v115_v28 = vmul.f32 0.5, %v783_v44  ;;  %v392_v10 = vmul.f32 %v376_v25, %v152_v29 }
  0x5c   :  { %v323_v49 = vmul.f32 %v927_v14, %v307_v43  ;;  %v230_v53 = vmul.f32 1.0614054, %v976_v57  ;;  %v276_v35 = vadd.f32 1.4214138, %v260_v40  ;;  %v603_v52 = vpop.eup %602  ;;  %614 = vrcp.f32 %v185_v12 }
  0x5d   :  { %v245_v38 = vadd.f32 -1.4531521, %v229_v51  ;;  %v116_v50 = vmul.f32 0.5, %v875_v3  ;;  %616 = vpow2.f32 %v420_v22  ;;  %v393_v44 = vmul.f32 %v377_v16, %v153_v11 }
  0x5e   :  { %v339_v1 = vadd.f32 0.2548296, %v323_v49  ;;  %v246_v60 = vadd.f32 -1.4531521, %v230_v53  ;;  %v292_v0 = vmul.f32 %v959_v31, %v276_v35  ;;  %vm468_vm10 = vcmp.lt.f32.partialorder %v895_v7, 0.0 }
  0x5f   :  { %v261_v6 = vmul.f32 %v973_v39, %v245_v38  ;;  %v986_v45 = vpop.eup %604  ;;  %v117_v11 = vmul.f32 0.5, %v903_v32  ;;  %vm469_vm11 = vcmp.lt.f32.partialorder %v917_v61, 0.0  ;;  %vm470_vm12 = vcmp.lt.f32.partialorder %v920_v62, 0.0 }
  0x60   :  { %v355_v56 = vmul.f32 %v927_v14, %v339_v1  ;;  %v262_v41 = vmul.f32 %v976_v57, %v246_v60  ;;  %v308_v4 = vadd.f32 -0.28449672, %v292_v0  ;;  %v231_v15 = vmul.f32 1.0614054, %v986_v45  ;;  %v607_v59 = vpop.eup %606 }
  0x61   :  { %v277_v8 = vadd.f32 1.4214138, %v261_v6  ;;  %v609_v34 = vpop.eup %608  ;;  %vm471_vm13 = vcmp.lt.f32.partialorder %v941_v13, 0.0  ;;  %vm472_vm14 = vcmp.lt.f32.partialorder %v964_v27, 0.0  ;;  %vm473_vm15 = vcmp.lt.f32.partialorder %v970_v19, 0.0 }
  0x62   :  { %v435_v63 = vmul.f32 %v603_v52, %v355_v56  ;;  %v278_v20 = vadd.f32 1.4214138, %v262_v41  ;;  %v324_v14 = vmul.f32 %v959_v31, %v308_v4  ;;  %v247_v36 = vadd.f32 -1.4531521, %v231_v15  ;;  %v611_v51 = vpop.eup %610 }
  0x63   :  { %v293_v47 = vmul.f32 %v973_v39, %v277_v8  ;;  %v422_v52 = vmul.f32 1.442695, %v392_v10  ;;  %v424_v41 = vmul.f32 1.442695, %v393_v44 }
  0x64   :  { %v451_v30 = vsub.f32 1.0, %v435_v63  ;;  %v294_v24 = vmul.f32 %v976_v57, %v278_v20  ;;  %v340_v48 = vadd.f32 0.2548296, %v324_v14  ;;  %v263_v40 = vmul.f32 %v986_v45, %v247_v36 }
  0x65   :  { %v309_v42 = vadd.f32 -0.28449672, %v293_v47  ;;  %v999_v54 = vpop.eup %612  ;;  %618 = vpow2.f32 %v422_v52 }
  0x66   :  { %v483_v5 = vsub.f32 0.0, %v451_v30  ;;  %v310_v21 = vadd.f32 -0.28449672, %v294_v24  ;;  %v356_v17 = vmul.f32 %v959_v31, %v340_v48  ;;  %v279_v29 = vadd.f32 1.4214138, %v263_v40  ;;  %v1002_v1 = vpop.eup %614 }
  0x67   :  { %v325_v43 = vmul.f32 %v973_v39, %v309_v42  ;;  %v232_v38 = vmul.f32 1.0614054, %v999_v54  ;;  %v233_v12 = vmul.f32 1.0614054, %v1002_v1  ;;  %620 = vpow2.f32 %v424_v41 }
  0x68   :  { %v499_v18 = vsel %vm467_vm9, %v483_v5, %v451_v30  ;;  %v326_v49 = vmul.f32 %v976_v57, %v310_v21  ;;  %v436_v37 = vmul.f32 %v607_v59, %v356_v17  ;;  %v295_v55 = vmul.f32 %v986_v45, %v279_v29  ;;  %v617_v5 = vpop.eup %616 }
  0x69   :  { %v515_v46 = vadd.f32 1.0, %v499_v18  ;;  %v341_v53 = vadd.f32 0.2548296, %v325_v43  ;;  %v248_v6 = vadd.f32 -1.4531521, %v232_v38  ;;  %v118_v42 = vmul.f32 0.5, %v910_v33 }
  0x6a   :  { %v342_v31 = vadd.f32 0.2548296, %v326_v49  ;;  %v452_v35 = vsub.f32 1.0, %v436_v37  ;;  %v311_v9 = vadd.f32 -0.28449672, %v295_v55  ;;  %v119_v37 = vmul.f32 0.5, %v930_v2 }
  0x6b   :  { %v531_v58 = vmul.f32 %v515_v46, %v115_v28  ;;  %v357_v3 = vmul.f32 %v973_v39, %v341_v53  ;;  %v249_v63 = vadd.f32 -1.4531521, %v233_v12  ;;  %v264_v32 = vmul.f32 %v999_v54, %v248_v6 }
  0x6c   :  { %v358_v60 = vmul.f32 %v976_v57, %v342_v31  ;;  %v484_v56 = vsub.f32 0.0, %v452_v35  ;;  %v327_v25 = vmul.f32 %v986_v45, %v311_v9  ;;  %v120_v2 = vmul.f32 0.5, %v954_v23 }
  0x6d   :  { %547 = vst [vmem:[%s1057_s3 + $0x48] sm:$0xff] %v531_v58  ;;  %v437_v0 = vmul.f32 %v609_v34, %v357_v3  ;;  %v265_v30 = vmul.f32 %v1002_v1, %v249_v63  ;;  %v280_v47 = vadd.f32 1.4214138, %v264_v32 }
  0x6e   :  { %v438_v39 = vmul.f32 %v611_v51, %v358_v60  ;;  %v500_v4 = vsel %vm468_vm10, %v484_v56, %v452_v35  ;;  %v343_v22 = vadd.f32 0.2548296, %v327_v25 }
  0x6f   :  { %v453_v8 = vsub.f32 1.0, %v437_v0  ;;  %v516_v57 = vadd.f32 1.0, %v500_v4  ;;  %v281_v7 = vadd.f32 1.4214138, %v265_v30  ;;  %v296_v16 = vmul.f32 %v999_v54, %v280_v47 }
  0x70   :  { %v454_v20 = vsub.f32 1.0, %v438_v39  ;;  %v359_v28 = vmul.f32 %v986_v45, %v343_v22 }
  0x71   :  { %v485_v14 = vsub.f32 0.0, %v453_v8  ;;  %v532_v15 = vmul.f32 %v516_v57, %v116_v50  ;;  %v297_v21 = vmul.f32 %v1002_v1, %v281_v7  ;;  %v312_v18 = vadd.f32 -0.28449672, %v296_v16  ;;  %v619_v50 = vpop.eup %618 }
  0x72   :  { %v486_v24 = vsub.f32 0.0, %v454_v20  ;;  %v439_v43 = vmul.f32 %v617_v5, %v359_v28  ;;  %v621_v51 = vpop.eup %620 }
  0x73   :  { %v501_v48 = vsel %vm469_vm11, %v485_v14, %v453_v8  ;;  %548 = vst [vmem:[%s1057_s3 + $0x50] sm:$0xff] %v532_v15  ;;  %v313_v61 = vadd.f32 -0.28449672, %v297_v21  ;;  %v328_v33 = vmul.f32 %v999_v54, %v312_v18 }
  0x74   :  { %v517_v59 = vadd.f32 1.0, %v501_v48  ;;  %v502_v62 = vsel %vm470_vm12, %v486_v24, %v454_v20  ;;  %v455_v34 = vsub.f32 1.0, %v439_v43 }
  0x75   :  { %v518_v36 = vadd.f32 1.0, %v502_v62  ;;  %v329_v46 = vmul.f32 %v1002_v1, %v313_v61  ;;  %v344_v45 = vadd.f32 0.2548296, %v328_v33 }
  0x76   :  { %v533_v17 = vmul.f32 %v517_v59, %v117_v11  ;;  %v487_v49 = vsub.f32 0.0, %v455_v34 }
  0x77   :  { %v534_v10 = vmul.f32 %v518_v36, %v118_v42  ;;  %v345_v40 = vadd.f32 0.2548296, %v329_v46  ;;  %v360_v53 = vmul.f32 %v999_v54, %v344_v45 }
  0x78   :  { %549 = vst [vmem:[%s1057_s3 + $0x58] sm:$0xff] %v533_v17  ;;  %v503_v44 = vsel %vm471_vm13, %v487_v49, %v455_v34 }
  0x79   :  { %550 = vst [vmem:[%s1057_s3 + $0x60] sm:$0xff] %v534_v10  ;;  %v361_v58 = vmul.f32 %v1002_v1, %v345_v40  ;;  %v519_v31 = vadd.f32 1.0, %v503_v44  ;;  %v440_v29 = vmul.f32 %v619_v50, %v360_v53  ;;  %v121_v1 = vmul.f32 0.5, %v957_v26 }
  0x7b   :  { %v441_v35 = vmul.f32 %v621_v51, %v361_v58  ;;  %v535_v3 = vmul.f32 %v519_v31, %v119_v37  ;;  %v456_v38 = vsub.f32 1.0, %v440_v29 }
  0x7d   :  { %v457_v52 = vsub.f32 1.0, %v441_v35  ;;  %551 = vst [vmem:[%s1057_s3 + $0x68] sm:$0xff] %v535_v3  ;;  %v488_v13 = vsub.f32 0.0, %v456_v38 }
  0x7f   :  { %v489_v54 = vsub.f32 0.0, %v457_v52  ;;  %v504_v11 = vsel %vm472_vm14, %v488_v13, %v456_v38 }
  0x80   :  { %v520_v60 = vadd.f32 1.0, %v504_v11 }
  0x81   :  { %v505_v55 = vsel %vm473_vm15, %v489_v54, %v457_v52 }
  0x82   :  { %v521_v12 = vadd.f32 1.0, %v505_v55  ;;  %v536_v56 = vmul.f32 %v520_v60, %v120_v2 }
  0x84   :  { %v537_v0 = vmul.f32 %v521_v12, %v121_v1  ;;  %552 = vst [vmem:[%s1057_s3 + $0x70] sm:$0xff] %v536_v56 }
  0x86   :  { %553 = vst [vmem:[%s1057_s3 + $0x78] sm:$0xff] %v537_v0 }

// kernel: stem_forward.16
= control target key start
LH: loop header
LB: loop body
LE: loop exit
PB: predicated region body
PF: predicated region fallthrough
CT: control target
= control target key end

     0   :  { %vm259_vm0 = vcmask 293888   ;;  %vm356_vm1 = vcmask 1041408   ;;  %vm718_vm2 = vcmask 253952   ;;  %vm649_vm3 = vcmask 261120   ;;  %s2047_s1 = inlined_call_operand.vmem [shape: bf16[36,32], index: 1, kind: input, shape index: {}]   ;;  %s2048_s0 = inlined_call_operand.vmem [shape: bf16[512,36], index: 0, kind: input, shape index: {}]   ;;  %s2049_s3 = inlined_call_operand.vmem [shape: f32[1,32], index: 3, kind: output, shape index: {1}]   ;;  %s2050_s4 = inlined_call_operand.vmem [shape: f32[1,32], index: 4, kind: output, shape index: {2}]   ;;  %s2051_s2 = inlined_call_operand.vmem [shape: f32[512,32], index: 2, kind: output, shape index: {0}]  }
   0x1   :  { %v1251_v0 = vld [vmem:[%s2047_s1] sm:$0xff]   ;;  %v1252_v1 = vld [vmem:[%s2047_s1 + $0x8] sm:$0xff]   ;;  %v1253_v2 = vld [vmem:[%s2047_s1 + $0x10] ss:$0 sps:$4 sm:$0x33]   ;;  %v1286_v36 = vmov 0.0  }
   0x2   :  { %1172 = vmatprep.subr.bf16.mxu0 %v1251_v0  ;;  %v1254_v3 = vld [vmem:[%s2048_s0] sm:$0xff]   ;;  %1242 = vmatprep.subr.bf16.mxu1 %v1251_v0  ;;  %v358_v4 = vsel %vm356_vm1, %v1253_v2, 0  ;;  %v1255_v5 = vld [vmem:[%s2048_s0 + $0x8] sm:$0xff]   ;;  %v1256_v6 = vld [vmem:[%s2048_s0 + $0x10] sm:$0xff]   ;;  %719 = vst.msk [vmem:[%s2049_s3] sm:$0x1] %vm718_vm2, %v1286_v36 }
   0x3   :  { %1173 = vmatpush3.bf16.msra.mxu0 %v1251_v0  ;;  %1245 = vmatpush3.bf16.msra.mxu1 %v1251_v0  ;;  %v1257_v7 = vld [vmem:[%s2048_s0 + $0x18] sm:$0xff]   ;;  %v1258_v8 = vld [vmem:[%s2048_s0 + $0x20] sm:$0xff]   ;;  %v1271_v10 = vld [vmem:[%s2048_s0 + $0x88] sm:$0xff]   ;;  %720 = vst.msk [vmem:[%s2050_s4] sm:$0x1] %vm718_vm2, %v1286_v36 }
   0x4   :  { %1174 = vmatprep.subr.bf16.mxu0 %v1252_v1  ;;  %1178 = vmatprep.mubr.msk.bf16.mxu0 %vm259_vm0, %v1254_v3  ;;  %v1270_v9 = vld [vmem:[%s2048_s0 + $0x80] sm:$0xff]   ;;  %v1272_v11 = vld [vmem:[%s2048_s0 + $0x90] sm:$0xff]   ;;  %v1259_v12 = vld [vmem:[%s2048_s0 + $0x28] sm:$0xff]  }
   0x5   :  { %1243 = vmatprep.subr.bf16.mxu1 %v1252_v1  ;;  %1210 = vmatprep.mubr.msk.bf16.mxu1 %vm259_vm0, %v1270_v9  ;;  %v1260_v13 = vld [vmem:[%s2048_s0 + $0x30] sm:$0xff]   ;;  %v1273_v14 = vld [vmem:[%s2048_s0 + $0x98] sm:$0xff]   ;;  %v1274_v15 = vld [vmem:[%s2048_s0 + $0xa0] sm:$0xff]  }
   0x6   :  { %v1261_v16 = vld [vmem:[%s2048_s0 + $0x38] sm:$0xff]   ;;  %v1275_v17 = vld [vmem:[%s2048_s0 + $0xa8] sm:$0xff]   ;;  %v1262_v18 = vld [vmem:[%s2048_s0 + $0x40] sm:$0xff]  }
   0x7   :  { %1175 = vmatpush3.bf16.msra.mxu0 %v1252_v1  ;;  %1246 = vmatpush3.bf16.msra.mxu1 %v1252_v1  ;;  %v1276_v19 = vld [vmem:[%s2048_s0 + $0xb0] sm:$0xff]   ;;  %v1263_v20 = vld [vmem:[%s2048_s0 + $0x48] sm:$0xff]   ;;  %v1277_v21 = vld [vmem:[%s2048_s0 + $0xb8] sm:$0xff]  }
   0x8   :  { %1248 = vmatprep.subr.msk.bf16.mxu0 %vm356_vm1, %v1253_v2  ;;  %1249 = vmatprep.subr.msk.bf16.mxu1 %vm356_vm1, %v1253_v2  ;;  %v1264_v22 = vld [vmem:[%s2048_s0 + $0x50] sm:$0xff]   ;;  %v1278_v23 = vld [vmem:[%s2048_s0 + $0xc0] sm:$0xff]   ;;  %v1265_v24 = vld [vmem:[%s2048_s0 + $0x58] sm:$0xff]  }
   0x9   :  { %v1279_v25 = vld [vmem:[%s2048_s0 + $0xc8] sm:$0xff]   ;;  %v1266_v26 = vld [vmem:[%s2048_s0 + $0x60] sm:$0xff]   ;;  %v1280_v27 = vld [vmem:[%s2048_s0 + $0xd0] sm:$0xff]  }
   0xa   :  { %v1267_v28 = vld [vmem:[%s2048_s0 + $0x68] sm:$0xff]   ;;  %v1281_v29 = vld [vmem:[%s2048_s0 + $0xd8] sm:$0xff]   ;;  %v1268_v30 = vld [vmem:[%s2048_s0 + $0x70] sm:$0xff]  }
   0xb   :  { %1177 = vmatpush3.bf16.msra.mxu0 %v358_v4  ;;  %1247 = vmatpush3.bf16.msra.mxu1 %v358_v4  ;;  %v1282_v31 = vld [vmem:[%s2048_s0 + $0xe0] sm:$0xff]   ;;  %v1269_v32 = vld [vmem:[%s2048_s0 + $0x78] sm:$0xff]   ;;  %v1283_v33 = vld [vmem:[%s2048_s0 + $0xe8] sm:$0xff]  }
   0xc   :  { %v1284_v34 = vld [vmem:[%s2048_s0 + $0xf0] sm:$0xff]   ;;  %v1285_v35 = vld [vmem:[%s2048_s0 + $0xf8] sm:$0xff]  }
   0xe   :  { %1179 = vmatmul.mubr.msk.bf16.vlgmr.msra.gmra.mrb[0].mxu0 %vm259_vm0, %v1255_v5  ;;  %1211 = vmatmul.mubr.msk.bf16.vlgmr.msra.gmra.mrb[0].mxu1 %vm259_vm0, %v1271_v10 }
   0xf   :  { %1182 = vmatprep.mubr.msk.bf16.mxu0 %vm259_vm0, %v1256_v6  ;;  %1214 = vmatprep.mubr.msk.bf16.mxu1 %vm259_vm0, %v1272_v11 }
  0x16   :  { %1183 = vmatmul.mubr.msk.bf16.gmra.mrb[4].mxu0 %vm259_vm0, %v1257_v7  ;;  %1215 = vmatmul.mubr.msk.bf16.gmra.mrb[4].mxu1 %vm259_vm0, %v1273_v14 }
  0x17   :  { %1186 = vmatprep.mubr.msk.bf16.mxu0 %vm259_vm0, %v1258_v8  ;;  %1218 = vmatprep.mubr.msk.bf16.mxu1 %vm259_vm0, %v1274_v15 }
  0x1e   :  { %1187 = vmatmul.mubr.msk.bf16.gmra.mrb[8].mxu0 %vm259_vm0, %v1259_v12  ;;  %1219 = vmatmul.mubr.msk.bf16.gmra.mrb[8].mxu1 %vm259_vm0, %v1275_v17 }
  0x1f   :  { %1190 = vmatprep.mubr.msk.bf16.mxu0 %vm259_vm0, %v1260_v13  ;;  %1222 = vmatprep.mubr.msk.bf16.mxu1 %vm259_vm0, %v1276_v19 }
  0x26   :  { %1191 = vmatmul.mubr.msk.bf16.gmra.mrb[12].mxu0 %vm259_vm0, %v1261_v16  ;;  %1223 = vmatmul.mubr.msk.bf16.gmra.mrb[12].mxu1 %vm259_vm0, %v1277_v21 }
  0x27   :  { %1194 = vmatprep.mubr.msk.bf16.mxu0 %vm259_vm0, %v1262_v18  ;;  %1226 = vmatprep.mubr.msk.bf16.mxu1 %vm259_vm0, %v1278_v23 }
  0x2e   :  { %1195 = vmatmul.mubr.msk.bf16.gmra.mrb[16].mxu0 %vm259_vm0, %v1263_v20  ;;  %1227 = vmatmul.mubr.msk.bf16.gmra.mrb[16].mxu1 %vm259_vm0, %v1279_v25 }
  0x2f   :  { %1198 = vmatprep.mubr.msk.bf16.mxu0 %vm259_vm0, %v1264_v22  ;;  %1230 = vmatprep.mubr.msk.bf16.mxu1 %vm259_vm0, %v1280_v27 }
  0x36   :  { %1199 = vmatmul.mubr.msk.bf16.gmra.mrb[20].mxu0 %vm259_vm0, %v1265_v24  ;;  %1231 = vmatmul.mubr.msk.bf16.gmra.mrb[20].mxu1 %vm259_vm0, %v1281_v29 }
  0x37   :  { %1202 = vmatprep.mubr.msk.bf16.mxu0 %vm259_vm0, %v1266_v26  ;;  %1234 = vmatprep.mubr.msk.bf16.mxu1 %vm259_vm0, %v1282_v31 }
  0x3e   :  { %1203 = vmatmul.mubr.msk.bf16.gmra.mrb[24].mxu0 %vm259_vm0, %v1267_v28  ;;  %1235 = vmatmul.mubr.msk.bf16.gmra.mrb[24].mxu1 %vm259_vm0, %v1283_v33 }
  0x3f   :  { %1206 = vmatprep.mubr.msk.bf16.mxu0 %vm259_vm0, %v1268_v30  ;;  %1238 = vmatprep.mubr.msk.bf16.mxu1 %vm259_vm0, %v1284_v34 }
  0x46   :  { %1207 = vmatmul.mubr.msk.bf16.gmra.mrb[28].mxu0 %vm259_vm0, %v1269_v32  ;;  %1239 = vmatmul.mubr.msk.bf16.gmra.mrb[28].mxu1 %vm259_vm0, %v1285_v35 }
  0xe1   :  { %v1180_v37 = vpop.f32.mrb[0].mxu0  ;;  %v1480_v56 = vpop.f32.mrb[0].mxu1 }
  0xe2   :  { %652 = vst.msk [vmem:[%s2051_s2 + $0x10] sm:$0xff] %vm649_vm3, %v1180_v37  ;;  %v394_v38 = vpop.f32.mrb[1].mxu0  ;;  %v861_v42 = vmul.f32 %v1180_v37, %v1180_v37  ;;  %v725_v47 = vsel %vm649_vm3, %v1180_v37, 0.0  ;;  %684 = vst.msk [vmem:[%s2051_s2 + $0x110] sm:$0xff] %vm649_vm3, %v1480_v56  ;;  %v1491_v60 = vpop.f32.mrb[1].mxu1 }
  0xe3   :  { %650 = vst.msk [vmem:[%s2051_s2] sm:$0xff] %vm649_vm3, %v394_v38  ;;  %v859_v39 = vmul.f32 %v394_v38, %v394_v38  ;;  %v1181_v40 = vpop.f32.mrb[2].mxu0  ;;  %v722_v43 = vsel %vm649_vm3, %v394_v38, 0.0  ;;  %682 = vst.msk [vmem:[%s2051_s2 + $0x100] sm:$0xff] %vm649_vm3, %v1491_v60  ;;  %v1504_v1 = vpop.f32.mrb[2].mxu1 }
  0xe4   :  { %653 = vst.msk [vmem:[%s2051_s2 + $0x18] sm:$0xff] %vm649_vm3, %v1181_v40  ;;  %v397_v41 = vpop.f32.mrb[3].mxu0  ;;  %v862_v49 = vmul.f32 %v1181_v40, %v1181_v40  ;;  %v926_v53 = vsel %vm649_vm3, %v861_v42, 0.0  ;;  %v727_v54 = vsel %vm649_vm3, %v1181_v40, 0.0  ;;  %685 = vst.msk [vmem:[%s2051_s2 + $0x118] sm:$0xff] %vm649_vm3, %v1504_v1  ;;  %v1515_v5 = vpop.f32.mrb[3].mxu1 }
  0xe5   :  { %651 = vst.msk [vmem:[%s2051_s2 + $0x8] sm:$0xff] %vm649_vm3, %v397_v41  ;;  %v723_v44 = vsel %vm649_vm3, %v397_v41, 0.0  ;;  %v860_v45 = vmul.f32 %v397_v41, %v397_v41  ;;  %v923_v48 = vsel %vm649_vm3, %v859_v39, 0.0  ;;  %683 = vst.msk [vmem:[%s2051_s2 + $0x108] sm:$0xff] %vm649_vm3, %v1515_v5 }
  0xe6   :  { %v724_v46 = vadd.f32 %v723_v44, %v722_v43  ;;  %v928_v61 = vsel %vm649_vm3, %v862_v49, 0.0 }
  0xe7   :  { %v924_v50 = vsel %vm649_vm3, %v860_v45, 0.0 }
  0xe8   :  { %v726_v51 = vadd.f32 %v725_v47, %v724_v46  ;;  %v925_v52 = vadd.f32 %v924_v50, %v923_v48 }
  0xe9   :  { %v1184_v55 = vpop.f32.mrb[4].mxu0  ;;  %v1532_v20 = vpop.f32.mrb[4].mxu1 }
  0xea   :  { %v927_v57 = vadd.f32 %v926_v53, %v925_v52  ;;  %656 = vst.msk [vmem:[%s2051_s2 + $0x30] sm:$0xff] %vm649_vm3, %v1184_v55  ;;  %v410_v58 = vpop.f32.mrb[5].mxu0  ;;  %v728_v59 = vadd.f32 %v727_v54, %v726_v51  ;;  %v865_v6 = vmul.f32 %v1184_v55, %v1184_v55  ;;  %v733_v12 = vsel %vm649_vm3, %v1184_v55, 0.0  ;;  %688 = vst.msk [vmem:[%s2051_s2 + $0x130] sm:$0xff] %vm649_vm3, %v1532_v20  ;;  %v1543_v24 = vpop.f32.mrb[5].mxu1 }
  0xeb   :  { %654 = vst.msk [vmem:[%s2051_s2 + $0x20] sm:$0xff] %vm649_vm3, %v410_v58  ;;  %v729_v62 = vsel %vm649_vm3, %v410_v58, 0.0  ;;  %v863_v63 = vmul.f32 %v410_v58, %v410_v58  ;;  %v1185_v0 = vpop.f32.mrb[6].mxu0  ;;  %686 = vst.msk [vmem:[%s2051_s2 + $0x120] sm:$0xff] %vm649_vm3, %v1543_v24  ;;  %v1556_v29 = vpop.f32.mrb[6].mxu1 }
  0xec   :  { %v730_v2 = vadd.f32 %v729_v62, %v728_v59  ;;  %v929_v3 = vadd.f32 %v928_v61, %v927_v57  ;;  %657 = vst.msk [vmem:[%s2051_s2 + $0x38] sm:$0xff] %vm649_vm3, %v1185_v0  ;;  %v413_v4 = vpop.f32.mrb[7].mxu0  ;;  %v866_v13 = vmul.f32 %v1185_v0, %v1185_v0  ;;  %v934_v17 = vsel %vm649_vm3, %v865_v6, 0.0  ;;  %689 = vst.msk [vmem:[%s2051_s2 + $0x138] sm:$0xff] %vm649_vm3, %v1556_v29  ;;  %v1567_v33 = vpop.f32.mrb[7].mxu1 }
  0xed   :  { %v930_v7 = vsel %vm649_vm3, %v863_v63, 0.0  ;;  %655 = vst.msk [vmem:[%s2051_s2 + $0x28] sm:$0xff] %vm649_vm3, %v413_v4  ;;  %v731_v8 = vsel %vm649_vm3, %v413_v4, 0.0  ;;  %v864_v9 = vmul.f32 %v413_v4, %v413_v4  ;;  %v735_v18 = vsel %vm649_vm3, %v1185_v0, 0.0  ;;  %687 = vst.msk [vmem:[%s2051_s2 + $0x128] sm:$0xff] %vm649_vm3, %v1567_v33 }
  0xee   :  { %v931_v10 = vadd.f32 %v930_v7, %v929_v3  ;;  %v732_v11 = vadd.f32 %v731_v8, %v730_v2  ;;  %v936_v25 = vsel %vm649_vm3, %v866_v13, 0.0 }
  0xef   :  { %v932_v14 = vsel %vm649_vm3, %v864_v9, 0.0 }
  0xf0   :  { %v734_v15 = vadd.f32 %v733_v12, %v732_v11  ;;  %v933_v16 = vadd.f32 %v932_v14, %v931_v10 }
  0xf1   :  { %v1188_v19 = vpop.f32.mrb[8].mxu0  ;;  %v1584_v48 = vpop.f32.mrb[8].mxu1 }
  0xf2   :  { %v935_v21 = vadd.f32 %v934_v17, %v933_v16  ;;  %660 = vst.msk [vmem:[%s2051_s2 + $0x50] sm:$0xff] %vm649_vm3, %v1188_v19  ;;  %v426_v22 = vpop.f32.mrb[9].mxu0  ;;  %v736_v23 = vadd.f32 %v735_v18, %v734_v15  ;;  %v869_v34 = vmul.f32 %v1188_v19, %v1188_v19  ;;  %v741_v40 = vsel %vm649_vm3, %v1188_v19, 0.0  ;;  %692 = vst.msk [vmem:[%s2051_s2 + $0x150] sm:$0xff] %vm649_vm3, %v1584_v48  ;;  %v1595_v52 = vpop.f32.mrb[9].mxu1 }
  0xf3   :  { %658 = vst.msk [vmem:[%s2051_s2 + $0x40] sm:$0xff] %vm649_vm3, %v426_v22  ;;  %v737_v26 = vsel %vm649_vm3, %v426_v22, 0.0  ;;  %v867_v27 = vmul.f32 %v426_v22, %v426_v22  ;;  %v1189_v28 = vpop.f32.mrb[10].mxu0  ;;  %690 = vst.msk [vmem:[%s2051_s2 + $0x140] sm:$0xff] %vm649_vm3, %v1595_v52  ;;  %v1608_v58 = vpop.f32.mrb[10].mxu1 }
  0xf4   :  { %v738_v30 = vadd.f32 %v737_v26, %v736_v23  ;;  %v937_v31 = vadd.f32 %v936_v25, %v935_v21  ;;  %661 = vst.msk [vmem:[%s2051_s2 + $0x58] sm:$0xff] %vm649_vm3, %v1189_v28  ;;  %v429_v32 = vpop.f32.mrb[11].mxu0  ;;  %v870_v41 = vmul.f32 %v1189_v28, %v1189_v28  ;;  %v942_v45 = vsel %vm649_vm3, %v869_v34, 0.0  ;;  %693 = vst.msk [vmem:[%s2051_s2 + $0x158] sm:$0xff] %vm649_vm3, %v1608_v58  ;;  %v1619_v63 = vpop.f32.mrb[11].mxu1 }
  0xf5   :  { %v938_v35 = vsel %vm649_vm3, %v867_v27, 0.0  ;;  %659 = vst.msk [vmem:[%s2051_s2 + $0x48] sm:$0xff] %vm649_vm3, %v429_v32  ;;  %v739_v36 = vsel %vm649_vm3, %v429_v32, 0.0  ;;  %v868_v37 = vmul.f32 %v429_v32, %v429_v32  ;;  %v743_v46 = vsel %vm649_vm3, %v1189_v28, 0.0  ;;  %691 = vst.msk [vmem:[%s2051_s2 + $0x148] sm:$0xff] %vm649_vm3, %v1619_v63 }
  0xf6   :  { %v939_v38 = vadd.f32 %v938_v35, %v937_v31  ;;  %v740_v39 = vadd.f32 %v739_v36, %v738_v30  ;;  %v944_v53 = vsel %vm649_vm3, %v870_v41, 0.0 }
  0xf7   :  { %v940_v42 = vsel %vm649_vm3, %v868_v37, 0.0 }
  0xf8   :  { %v742_v43 = vadd.f32 %v741_v40, %v740_v39  ;;  %v941_v44 = vadd.f32 %v940_v42, %v939_v38 }
  0xf9   :  { %v1192_v47 = vpop.f32.mrb[12].mxu0  ;;  %v1636_v16 = vpop.f32.mrb[12].mxu1 }
  0xfa   :  { %v943_v49 = vadd.f32 %v942_v45, %v941_v44  ;;  %664 = vst.msk [vmem:[%s2051_s2 + $0x70] sm:$0xff] %vm649_vm3, %v1192_v47  ;;  %v442_v50 = vpop.f32.mrb[13].mxu0  ;;  %v744_v51 = vadd.f32 %v743_v46, %v742_v43  ;;  %v873_v0 = vmul.f32 %v1192_v47, %v1192_v47  ;;  %v749_v8 = vsel %vm649_vm3, %v1192_v47, 0.0  ;;  %696 = vst.msk [vmem:[%s2051_s2 + $0x170] sm:$0xff] %vm649_vm3, %v1636_v16  ;;  %v1647_v21 = vpop.f32.mrb[13].mxu1 }
  0xfb   :  { %662 = vst.msk [vmem:[%s2051_s2 + $0x60] sm:$0xff] %vm649_vm3, %v442_v50  ;;  %v745_v54 = vsel %vm649_vm3, %v442_v50, 0.0  ;;  %v871_v55 = vmul.f32 %v442_v50, %v442_v50  ;;  %v1193_v57 = vpop.f32.mrb[14].mxu0  ;;  %694 = vst.msk [vmem:[%s2051_s2 + $0x160] sm:$0xff] %vm649_vm3, %v1647_v21  ;;  %v1660_v27 = vpop.f32.mrb[14].mxu1 }
  0xfc   :  { %v746_v59 = vadd.f32 %v745_v54, %v744_v51  ;;  %v945_v61 = vadd.f32 %v944_v53, %v943_v49  ;;  %665 = vst.msk [vmem:[%s2051_s2 + $0x78] sm:$0xff] %vm649_vm3, %v1193_v57  ;;  %v445_v62 = vpop.f32.mrb[15].mxu0  ;;  %v874_v9 = vmul.f32 %v1193_v57, %v1193_v57  ;;  %v950_v13 = vsel %vm649_vm3, %v873_v0, 0.0  ;;  %697 = vst.msk [vmem:[%s2051_s2 + $0x178] sm:$0xff] %vm649_vm3, %v1660_v27  ;;  %v1671_v32 = vpop.f32.mrb[15].mxu1 }
  0xfd   :  { %v946_v2 = vsel %vm649_vm3, %v871_v55, 0.0  ;;  %663 = vst.msk [vmem:[%s2051_s2 + $0x68] sm:$0xff] %vm649_vm3, %v445_v62  ;;  %v747_v3 = vsel %vm649_vm3, %v445_v62, 0.0  ;;  %v872_v4 = vmul.f32 %v445_v62, %v445_v62  ;;  %v751_v14 = vsel %vm649_vm3, %v1193_v57, 0.0  ;;  %695 = vst.msk [vmem:[%s2051_s2 + $0x168] sm:$0xff] %vm649_vm3, %v1671_v32 }
  0xfe   :  { %v947_v6 = vadd.f32 %v946_v2, %v945_v61  ;;  %v748_v7 = vadd.f32 %v747_v3, %v746_v59  ;;  %v952_v22 = vsel %vm649_vm3, %v874_v9, 0.0 }
  0xff   :  { %v948_v10 = vsel %vm649_vm3, %v872_v4, 0.0 }
 0x100   :  { %v750_v11 = vadd.f32 %v749_v8, %v748_v7  ;;  %v949_v12 = vadd.f32 %v948_v10, %v947_v6 }
 0x101   :  { %v1196_v15 = vpop.f32.mrb[16].mxu0  ;;  %v1688_v49 = vpop.f32.mrb[16].mxu1 }
 0x102   :  { %v951_v17 = vadd.f32 %v950_v13, %v949_v12  ;;  %668 = vst.msk [vmem:[%s2051_s2 + $0x90] sm:$0xff] %vm649_vm3, %v1196_v15  ;;  %v458_v18 = vpop.f32.mrb[17].mxu0  ;;  %v752_v19 = vadd.f32 %v751_v14, %v750_v11  ;;  %v877_v34 = vmul.f32 %v1196_v15, %v1196_v15  ;;  %v757_v40 = vsel %vm649_vm3, %v1196_v15, 0.0  ;;  %700 = vst.msk [vmem:[%s2051_s2 + $0x190] sm:$0xff] %vm649_vm3, %v1688_v49  ;;  %v1699_v54 = vpop.f32.mrb[17].mxu1 }
 0x103   :  { %666 = vst.msk [vmem:[%s2051_s2 + $0x80] sm:$0xff] %vm649_vm3, %v458_v18  ;;  %v753_v23 = vsel %vm649_vm3, %v458_v18, 0.0  ;;  %v875_v25 = vmul.f32 %v458_v18, %v458_v18  ;;  %v1197_v26 = vpop.f32.mrb[18].mxu0  ;;  %698 = vst.msk [vmem:[%s2051_s2 + $0x180] sm:$0xff] %vm649_vm3, %v1699_v54  ;;  %v1712_v62 = vpop.f32.mrb[18].mxu1 }
 0x104   :  { %v754_v28 = vadd.f32 %v753_v23, %v752_v19  ;;  %v953_v30 = vadd.f32 %v952_v22, %v951_v17  ;;  %669 = vst.msk [vmem:[%s2051_s2 + $0x98] sm:$0xff] %vm649_vm3, %v1197_v26  ;;  %v461_v31 = vpop.f32.mrb[19].mxu0  ;;  %v878_v41 = vmul.f32 %v1197_v26, %v1197_v26  ;;  %v958_v45 = vsel %vm649_vm3, %v877_v34, 0.0  ;;  %701 = vst.msk [vmem:[%s2051_s2 + $0x198] sm:$0xff] %vm649_vm3, %v1712_v62  ;;  %v1723_v4 = vpop.f32.mrb[19].mxu1 }
 0x105   :  { %v954_v35 = vsel %vm649_vm3, %v875_v25, 0.0  ;;  %667 = vst.msk [vmem:[%s2051_s2 + $0x88] sm:$0xff] %vm649_vm3, %v461_v31  ;;  %v755_v36 = vsel %vm649_vm3, %v461_v31, 0.0  ;;  %v876_v37 = vmul.f32 %v461_v31, %v461_v31  ;;  %v759_v46 = vsel %vm649_vm3, %v1197_v26, 0.0  ;;  %699 = vst.msk [vmem:[%s2051_s2 + $0x188] sm:$0xff] %vm649_vm3, %v1723_v4 }
 0x106   :  { %v955_v38 = vadd.f32 %v954_v35, %v953_v30  ;;  %v756_v39 = vadd.f32 %v755_v36, %v754_v28  ;;  %v960_v55 = vsel %vm649_vm3, %v878_v41, 0.0 }
 0x107   :  { %v956_v42 = vsel %vm649_vm3, %v876_v37, 0.0 }
 0x108   :  { %v758_v43 = vadd.f32 %v757_v40, %v756_v39  ;;  %v957_v44 = vadd.f32 %v956_v42, %v955_v38 }
 0x109   :  { %v1200_v47 = vpop.f32.mrb[20].mxu0  ;;  %v1740_v23 = vpop.f32.mrb[20].mxu1 }
 0x10a   :  { %v959_v50 = vadd.f32 %v958_v45, %v957_v44  ;;  %672 = vst.msk [vmem:[%s2051_s2 + $0xb0] sm:$0xff] %vm649_vm3, %v1200_v47  ;;  %v474_v51 = vpop.f32.mrb[21].mxu0  ;;  %v760_v53 = vadd.f32 %v759_v46, %v758_v43  ;;  %v881_v6 = vmul.f32 %v1200_v47, %v1200_v47  ;;  %v765_v12 = vsel %vm649_vm3, %v1200_v47, 0.0  ;;  %704 = vst.msk [vmem:[%s2051_s2 + $0x1b0] sm:$0xff] %vm649_vm3, %v1740_v23  ;;  %v1751_v30 = vpop.f32.mrb[21].mxu1 }
 0x10b   :  { %670 = vst.msk [vmem:[%s2051_s2 + $0xa0] sm:$0xff] %vm649_vm3, %v474_v51  ;;  %v761_v57 = vsel %vm649_vm3, %v474_v51, 0.0  ;;  %v879_v59 = vmul.f32 %v474_v51, %v474_v51  ;;  %v1201_v61 = vpop.f32.mrb[22].mxu0  ;;  %702 = vst.msk [vmem:[%s2051_s2 + $0x1a0] sm:$0xff] %vm649_vm3, %v1751_v30  ;;  %v1764_v37 = vpop.f32.mrb[22].mxu1 }
 0x10c   :  { %v762_v0 = vadd.f32 %v761_v57, %v760_v53  ;;  %v961_v2 = vadd.f32 %v960_v55, %v959_v50  ;;  %673 = vst.msk [vmem:[%s2051_s2 + $0xb8] sm:$0xff] %vm649_vm3, %v1201_v61  ;;  %v477_v3 = vpop.f32.mrb[23].mxu0  ;;  %v882_v13 = vmul.f32 %v1201_v61, %v1201_v61  ;;  %v966_v18 = vsel %vm649_vm3, %v881_v6, 0.0  ;;  %705 = vst.msk [vmem:[%s2051_s2 + $0x1b8] sm:$0xff] %vm649_vm3, %v1764_v37  ;;  %v1775_v41 = vpop.f32.mrb[23].mxu1 }
 0x10d   :  { %v962_v7 = vsel %vm649_vm3, %v879_v59, 0.0  ;;  %671 = vst.msk [vmem:[%s2051_s2 + $0xa8] sm:$0xff] %vm649_vm3, %v477_v3  ;;  %v763_v8 = vsel %vm649_vm3, %v477_v3, 0.0  ;;  %v880_v9 = vmul.f32 %v477_v3, %v477_v3  ;;  %v767_v19 = vsel %vm649_vm3, %v1201_v61, 0.0  ;;  %703 = vst.msk [vmem:[%s2051_s2 + $0x1a8] sm:$0xff] %vm649_vm3, %v1775_v41 }
 0x10e   :  { %v963_v10 = vadd.f32 %v962_v7, %v961_v2  ;;  %v764_v11 = vadd.f32 %v763_v8, %v762_v0  ;;  %v968_v31 = vsel %vm649_vm3, %v882_v13, 0.0 }
 0x10f   :  { %v964_v14 = vsel %vm649_vm3, %v880_v9, 0.0 }
 0x110   :  { %v766_v15 = vadd.f32 %v765_v12, %v764_v11  ;;  %v965_v17 = vadd.f32 %v964_v14, %v963_v10 }
 0x111   :  { %v1204_v22 = vpop.f32.mrb[24].mxu0  ;;  %v1792_v2 = vpop.f32.mrb[24].mxu1 }
 0x112   :  { %v967_v25 = vadd.f32 %v966_v18, %v965_v17  ;;  %676 = vst.msk [vmem:[%s2051_s2 + $0xd0] sm:$0xff] %vm649_vm3, %v1204_v22  ;;  %v490_v26 = vpop.f32.mrb[25].mxu0  ;;  %v768_v28 = vadd.f32 %v767_v19, %v766_v15  ;;  %v885_v42 = vmul.f32 %v1204_v22, %v1204_v22  ;;  %v773_v50 = vsel %vm649_vm3, %v1204_v22, 0.0  ;;  %708 = vst.msk [vmem:[%s2051_s2 + $0x1d0] sm:$0xff] %vm649_vm3, %v1792_v2  ;;  %v1803_v8 = vpop.f32.mrb[25].mxu1 }
 0x113   :  { %674 = vst.msk [vmem:[%s2051_s2 + $0xc0] sm:$0xff] %vm649_vm3, %v490_v26  ;;  %v769_v34 = vsel %vm649_vm3, %v490_v26, 0.0  ;;  %v883_v35 = vmul.f32 %v490_v26, %v490_v26  ;;  %v1205_v36 = vpop.f32.mrb[26].mxu0  ;;  %706 = vst.msk [vmem:[%s2051_s2 + $0x1c0] sm:$0xff] %vm649_vm3, %v1803_v8  ;;  %v1816_v13 = vpop.f32.mrb[26].mxu1 }
 0x114   :  { %v770_v38 = vadd.f32 %v769_v34, %v768_v28  ;;  %v969_v39 = vadd.f32 %v968_v31, %v967_v25  ;;  %677 = vst.msk [vmem:[%s2051_s2 + $0xd8] sm:$0xff] %vm649_vm3, %v1205_v36  ;;  %v493_v40 = vpop.f32.mrb[27].mxu0  ;;  %v886_v51 = vmul.f32 %v1205_v36, %v1205_v36  ;;  %v974_v59 = vsel %vm649_vm3, %v885_v42, 0.0  ;;  %709 = vst.msk [vmem:[%s2051_s2 + $0x1d8] sm:$0xff] %vm649_vm3, %v1816_v13  ;;  %v1827_v18 = vpop.f32.mrb[27].mxu1 }
 0x115   :  { %v970_v43 = vsel %vm649_vm3, %v883_v35, 0.0  ;;  %675 = vst.msk [vmem:[%s2051_s2 + $0xc8] sm:$0xff] %vm649_vm3, %v493_v40  ;;  %v771_v44 = vsel %vm649_vm3, %v493_v40, 0.0  ;;  %v884_v45 = vmul.f32 %v493_v40, %v493_v40  ;;  %v775_v61 = vsel %vm649_vm3, %v1205_v36, 0.0  ;;  %707 = vst.msk [vmem:[%s2051_s2 + $0x1c8] sm:$0xff] %vm649_vm3, %v1827_v18 }
 0x116   :  { %v971_v46 = vadd.f32 %v970_v43, %v969_v39  ;;  %v772_v47 = vadd.f32 %v771_v44, %v770_v38  ;;  %v976_v9 = vsel %vm649_vm3, %v886_v51, 0.0  ;;  %v891_v38 = vmul.f32 %v1491_v60, %v1491_v60 }
 0x117   :  { %v972_v53 = vsel %vm649_vm3, %v884_v45, 0.0  ;;  %v785_v44 = vsel %vm649_vm3, %v1491_v60, 0.0 }
 0x118   :  { %v774_v55 = vadd.f32 %v773_v50, %v772_v47  ;;  %v973_v57 = vadd.f32 %v972_v53, %v971_v46  ;;  %v986_v53 = vsel %vm649_vm3, %v891_v38, 0.0 }
 0x119   :  { %v1208_v0 = vpop.f32.mrb[28].mxu0  ;;  %v1848_v45 = vpop.f32.mrb[28].mxu1 }
 0x11a   :  { %v975_v3 = vadd.f32 %v974_v59, %v973_v57  ;;  %680 = vst.msk [vmem:[%s2051_s2 + $0xf0] sm:$0xff] %vm649_vm3, %v1208_v0  ;;  %v506_v6 = vpop.f32.mrb[29].mxu0  ;;  %v776_v7 = vadd.f32 %v775_v61, %v774_v55  ;;  %v889_v19 = vmul.f32 %v1208_v0, %v1208_v0  ;;  %v781_v34 = vsel %vm649_vm3, %v1208_v0, 0.0  ;;  %712 = vst.msk [vmem:[%s2051_s2 + $0x1f0] sm:$0xff] %vm649_vm3, %v1848_v45  ;;  %v1855_v50 = vpop.f32.mrb[29].mxu1 }
 0x11b   :  { %678 = vst.msk [vmem:[%s2051_s2 + $0xe0] sm:$0xff] %vm649_vm3, %v506_v6  ;;  %v777_v10 = vsel %vm649_vm3, %v506_v6, 0.0  ;;  %v887_v11 = vmul.f32 %v506_v6, %v506_v6  ;;  %v1209_v12 = vpop.f32.mrb[30].mxu0  ;;  %v892_v55 = vmul.f32 %v1515_v5, %v1515_v5  ;;  %710 = vst.msk [vmem:[%s2051_s2 + $0x1e0] sm:$0xff] %vm649_vm3, %v1855_v50  ;;  %v1866_v60 = vpop.f32.mrb[30].mxu1  ;;  %v893_v0 = vmul.f32 %v1480_v56, %v1480_v56 }
 0x11c   :  { %v778_v14 = vadd.f32 %v777_v10, %v776_v7  ;;  %v977_v15 = vadd.f32 %v976_v9, %v975_v3  ;;  %681 = vst.msk [vmem:[%s2051_s2 + $0xf8] sm:$0xff] %vm649_vm3, %v1209_v12  ;;  %v509_v17 = vpop.f32.mrb[31].mxu0  ;;  %v890_v35 = vmul.f32 %v1209_v12, %v1209_v12  ;;  %v982_v42 = vsel %vm649_vm3, %v889_v19, 0.0  ;;  %713 = vst.msk [vmem:[%s2051_s2 + $0x1f8] sm:$0xff] %vm649_vm3, %v1866_v60  ;;  %v1873_v61 = vpop.f32.mrb[31].mxu1 }
 0x11d   :  { %v978_v22 = vsel %vm649_vm3, %v887_v11, 0.0  ;;  %679 = vst.msk [vmem:[%s2051_s2 + $0xe8] sm:$0xff] %vm649_vm3, %v509_v17  ;;  %v779_v25 = vsel %vm649_vm3, %v509_v17, 0.0  ;;  %v888_v26 = vmul.f32 %v509_v17, %v509_v17  ;;  %v783_v43 = vsel %vm649_vm3, %v1209_v12, 0.0  ;;  %711 = vst.msk [vmem:[%s2051_s2 + $0x1e8] sm:$0xff] %vm649_vm3, %v1873_v61 }
 0x11e   :  { %v979_v28 = vadd.f32 %v978_v22, %v977_v15  ;;  %v780_v31 = vadd.f32 %v779_v25, %v778_v14  ;;  %v984_v51 = vsel %vm649_vm3, %v890_v35, 0.0  ;;  %v787_v3 = vsel %vm649_vm3, %v1515_v5, 0.0 }
 0x11f   :  { %v980_v36 = vsel %vm649_vm3, %v888_v26, 0.0  ;;  %v789_v9 = vsel %vm649_vm3, %v1480_v56, 0.0  ;;  %v894_v10 = vmul.f32 %v1504_v1, %v1504_v1  ;;  %v988_v11 = vsel %vm649_vm3, %v892_v55, 0.0 }
 0x120   :  { %v782_v39 = vadd.f32 %v781_v34, %v780_v31  ;;  %v981_v40 = vadd.f32 %v980_v36, %v979_v28  ;;  %v895_v12 = vmul.f32 %v1543_v24, %v1543_v24  ;;  %v990_v15 = vsel %vm649_vm3, %v893_v0, 0.0 }
 0x121   :  { %v791_v17 = vsel %vm649_vm3, %v1504_v1, 0.0  ;;  %v793_v19 = vsel %vm649_vm3, %v1543_v24, 0.0  ;;  %v992_v25 = vsel %vm649_vm3, %v894_v10, 0.0  ;;  %v896_v28 = vmul.f32 %v1567_v33, %v1567_v33 }
 0x122   :  { %v983_v46 = vadd.f32 %v982_v42, %v981_v40  ;;  %v784_v47 = vadd.f32 %v783_v43, %v782_v39  ;;  %v994_v26 = vsel %vm649_vm3, %v895_v12, 0.0  ;;  %v897_v35 = vmul.f32 %v1532_v20, %v1532_v20 }
 0x123   :  { %v795_v1 = vsel %vm649_vm3, %v1567_v33, 0.0  ;;  %v797_v24 = vsel %vm649_vm3, %v1532_v20, 0.0  ;;  %v898_v39 = vmul.f32 %v1556_v29, %v1556_v29  ;;  %v996_v40 = vsel %vm649_vm3, %v896_v28, 0.0 }
 0x124   :  { %v786_v57 = vadd.f32 %v785_v44, %v784_v47  ;;  %v985_v59 = vadd.f32 %v984_v51, %v983_v46  ;;  %v899_v42 = vmul.f32 %v1595_v52, %v1595_v52  ;;  %v998_v46 = vsel %vm649_vm3, %v897_v35, 0.0 }
 0x125   :  { %v799_v33 = vsel %vm649_vm3, %v1556_v29, 0.0  ;;  %v801_v47 = vsel %vm649_vm3, %v1595_v52, 0.0  ;;  %v803_v29 = vsel %vm649_vm3, %v1619_v63, 0.0  ;;  %v805_v52 = vsel %vm649_vm3, %v1584_v48, 0.0 }
 0x126   :  { %v987_v6 = vadd.f32 %v986_v53, %v985_v59  ;;  %v788_v7 = vadd.f32 %v787_v3, %v786_v57  ;;  %v1000_v53 = vsel %vm649_vm3, %v898_v39, 0.0  ;;  %v1002_v55 = vsel %vm649_vm3, %v899_v42, 0.0 }
 0x127   :  { %v900_v57 = vmul.f32 %v1619_v63, %v1619_v63  ;;  %v901_v3 = vmul.f32 %v1584_v48, %v1584_v48  ;;  %v807_v63 = vsel %vm649_vm3, %v1608_v58, 0.0  ;;  %v905_v28 = vmul.f32 %v1636_v16, %v1636_v16 }
 0x128   :  { %v790_v5 = vadd.f32 %v789_v9, %v788_v7  ;;  %v989_v14 = vadd.f32 %v988_v11, %v987_v6  ;;  %v902_v9 = vmul.f32 %v1608_v58, %v1608_v58  ;;  %v903_v11 = vmul.f32 %v1647_v21, %v1647_v21 }
 0x129   :  { %v1004_v10 = vsel %vm649_vm3, %v900_v57, 0.0  ;;  %v811_v58 = vsel %vm649_vm3, %v1671_v32, 0.0  ;;  %v906_v35 = vmul.f32 %v1660_v27, %v1660_v27  ;;  %v1014_v39 = vsel %vm649_vm3, %v905_v28, 0.0 }
 0x12a   :  { %v991_v22 = vadd.f32 %v990_v15, %v989_v14  ;;  %v792_v56 = vadd.f32 %v791_v17, %v790_v5  ;;  %v1006_v14 = vsel %vm649_vm3, %v901_v3, 0.0  ;;  %v809_v15 = vsel %vm649_vm3, %v1647_v21, 0.0 }
 0x12b   :  { %v813_v21 = vsel %vm649_vm3, %v1636_v16, 0.0 }
 0x12c   :  { %v794_v31 = vadd.f32 %v793_v19, %v792_v56  ;;  %v993_v34 = vadd.f32 %v992_v25, %v991_v22  ;;  %v1008_v19 = vsel %vm649_vm3, %v902_v9, 0.0  ;;  %v1010_v22 = vsel %vm649_vm3, %v903_v11, 0.0 }
 0x12d   :  { %v904_v56 = vmul.f32 %v1671_v32, %v1671_v32  ;;  %v815_v32 = vsel %vm649_vm3, %v1660_v27, 0.0  ;;  %v819_v27 = vsel %vm649_vm3, %v1723_v4, 0.0 }
 0x12e   :  { %v995_v36 = vadd.f32 %v994_v26, %v993_v34  ;;  %v796_v38 = vadd.f32 %v795_v1, %v794_v31 }
 0x12f   :  { %v1012_v1 = vsel %vm649_vm3, %v904_v56, 0.0 }
 0x130   :  { %v798_v43 = vadd.f32 %v797_v24, %v796_v38  ;;  %v997_v44 = vadd.f32 %v996_v40, %v995_v36  ;;  %v907_v36 = vmul.f32 %v1699_v54, %v1699_v54  ;;  %v817_v40 = vsel %vm649_vm3, %v1699_v54, 0.0 }
 0x131   :  { %v821_v54 = vsel %vm649_vm3, %v1688_v49, 0.0 }
 0x132   :  { %v999_v51 = vadd.f32 %v998_v46, %v997_v44  ;;  %v800_v20 = vadd.f32 %v799_v33, %v798_v43  ;;  %v1016_v43 = vsel %vm649_vm3, %v906_v35, 0.0  ;;  %v1018_v44 = vsel %vm649_vm3, %v907_v36, 0.0 }
 0x133   :  { %v908_v46 = vmul.f32 %v1723_v4, %v1723_v4  ;;  %v823_v4 = vsel %vm649_vm3, %v1712_v62, 0.0  ;;  %v917_v35 = vmul.f32 %v1792_v2, %v1792_v2 }
 0x134   :  { %v802_v59 = vadd.f32 %v801_v47, %v800_v20  ;;  %v1001_v0 = vadd.f32 %v1000_v53, %v999_v51  ;;  %v909_v51 = vmul.f32 %v1688_v49, %v1688_v49 }
 0x135   :  { %v1020_v57 = vsel %vm649_vm3, %v908_v46, 0.0 }
 0x136   :  { %v1003_v6 = vadd.f32 %v1002_v55, %v1001_v0  ;;  %v804_v7 = vadd.f32 %v803_v29, %v802_v59  ;;  %v910_v55 = vmul.f32 %v1712_v62, %v1712_v62  ;;  %v911_v59 = vmul.f32 %v1751_v30, %v1751_v30 }
 0x137   :  { %v1022_v29 = vsel %vm649_vm3, %v909_v51, 0.0  ;;  %v827_v62 = vsel %vm649_vm3, %v1775_v41, 0.0 }
 0x138   :  { %v806_v12 = vadd.f32 %v805_v52, %v804_v7  ;;  %v1005_v5 = vadd.f32 %v1004_v10, %v1003_v6  ;;  %v825_v6 = vsel %vm649_vm3, %v1751_v30, 0.0  ;;  %v1024_v52 = vsel %vm649_vm3, %v910_v55, 0.0 }
 0x139   :  { %v1026_v9 = vsel %vm649_vm3, %v911_v59, 0.0  ;;  %v912_v10 = vmul.f32 %v1775_v41, %v1775_v41  ;;  %v829_v30 = vsel %vm649_vm3, %v1740_v23, 0.0  ;;  %v831_v41 = vsel %vm649_vm3, %v1764_v37, 0.0 }
 0x13a   :  { %v1007_v17 = vadd.f32 %v1006_v14, %v1005_v5  ;;  %v808_v48 = vadd.f32 %v807_v63, %v806_v12  ;;  %v913_v5 = vmul.f32 %v1740_v23, %v1740_v23 }
 0x13c   :  { %v810_v25 = vadd.f32 %v809_v15, %v808_v48  ;;  %v1009_v26 = vadd.f32 %v1008_v19, %v1007_v17  ;;  %v914_v15 = vmul.f32 %v1764_v37, %v1764_v37  ;;  %v1028_v17 = vsel %vm649_vm3, %v912_v10, 0.0 }
 0x13d   :  { %v915_v48 = vmul.f32 %v1803_v8, %v1803_v8  ;;  %v1030_v56 = vsel %vm649_vm3, %v913_v5, 0.0  ;;  %v835_v37 = vsel %vm649_vm3, %v1827_v18, 0.0 }
 0x13e   :  { %v1011_v31 = vadd.f32 %v1010_v22, %v1009_v26  ;;  %v812_v34 = vadd.f32 %v811_v58, %v810_v25  ;;  %v833_v25 = vsel %vm649_vm3, %v1803_v8, 0.0  ;;  %v1032_v28 = vsel %vm649_vm3, %v914_v15, 0.0 }
 0x13f   :  { %v1034_v58 = vsel %vm649_vm3, %v915_v48, 0.0  ;;  %v837_v8 = vsel %vm649_vm3, %v1792_v2, 0.0 }
 0x140   :  { %v814_v38 = vadd.f32 %v813_v21, %v812_v34  ;;  %v1013_v24 = vadd.f32 %v1012_v1, %v1011_v31  ;;  %v916_v31 = vmul.f32 %v1827_v18, %v1827_v18  ;;  %v839_v18 = vsel %vm649_vm3, %v1816_v13, 0.0 }
 0x142   :  { %v1015_v42 = vadd.f32 %v1014_v39, %v1013_v24  ;;  %v816_v16 = vadd.f32 %v815_v32, %v814_v38  ;;  %v918_v38 = vmul.f32 %v1816_v13, %v1816_v13  ;;  %v1036_v24 = vsel %vm649_vm3, %v916_v31, 0.0 }
 0x143   :  { %v919_v39 = vmul.f32 %v1855_v50, %v1855_v50  ;;  %v843_v13 = vsel %vm649_vm3, %v1873_v61, 0.0 }
 0x144   :  { %v818_v33 = vadd.f32 %v817_v40, %v816_v16  ;;  %v1017_v47 = vadd.f32 %v1016_v43, %v1015_v42  ;;  %v1038_v42 = vsel %vm649_vm3, %v917_v35, 0.0  ;;  %v841_v16 = vsel %vm649_vm3, %v1855_v50, 0.0 }
 0x145   :  { %v1042_v46 = vsel %vm649_vm3, %v919_v39, 0.0  ;;  %v845_v50 = vsel %vm649_vm3, %v1848_v45, 0.0 }
 0x146   :  { %v1019_v20 = vadd.f32 %v1018_v44, %v1017_v47  ;;  %v820_v53 = vadd.f32 %v819_v27, %v818_v33  ;;  %v1040_v44 = vsel %vm649_vm3, %v918_v38, 0.0  ;;  %v920_v33 = vmul.f32 %v1873_v61, %v1873_v61 }
 0x147   :  { %v921_v27 = vmul.f32 %v1848_v45, %v1848_v45 }
 0x148   :  { %v822_v0 = vadd.f32 %v821_v54, %v820_v53  ;;  %v1021_v3 = vadd.f32 %v1020_v57, %v1019_v20  ;;  %v922_v54 = vmul.f32 %v1866_v60, %v1866_v60  ;;  %v1044_v55 = vsel %vm649_vm3, %v920_v33, 0.0 }
 0x14a   :  { %v1023_v7 = vadd.f32 %v1022_v29, %v1021_v3  ;;  %v824_v49 = vadd.f32 %v823_v4, %v822_v0  ;;  %v1046_v0 = vsel %vm649_vm3, %v921_v27, 0.0  ;;  %v847_v3 = vsel %vm649_vm3, %v1866_v60, 0.0 }
 0x14b   :  { %v1048_v61 = vsel %vm649_vm3, %v922_v54, 0.0 }
 0x14c   :  { %v826_v11 = vadd.f32 %v825_v6, %v824_v49  ;;  %v1025_v12 = vadd.f32 %v1024_v52, %v1023_v7 }
 0x14e   :  { %v1027_v14 = vadd.f32 %v1026_v9, %v1025_v12  ;;  %v828_v63 = vadd.f32 %v827_v62, %v826_v11  ;;  %v721_v62 = vld [vmem:[%s2049_s3] sm:$0x1] }
 0x150   :  { %v830_v19 = vadd.f32 %v829_v30, %v828_v63  ;;  %v1029_v22 = vadd.f32 %v1028_v17, %v1027_v14  ;;  %v858_v63 = vld [vmem:[%s2050_s4] sm:$0x1] }
 0x152   :  { %v1031_v26 = vadd.f32 %v1030_v56, %v1029_v22  ;;  %v832_v23 = vadd.f32 %v831_v41, %v830_v19 }
 0x154   :  { %v834_v34 = vadd.f32 %v833_v25, %v832_v23  ;;  %v1033_v21 = vadd.f32 %v1032_v28, %v1031_v26 }
 0x156   :  { %v1035_v1 = vadd.f32 %v1034_v58, %v1033_v21  ;;  %v836_v36 = vadd.f32 %v835_v37, %v834_v34 }
 0x158   :  { %v838_v32 = vadd.f32 %v837_v8, %v836_v36  ;;  %v1037_v40 = vadd.f32 %v1036_v24, %v1035_v1 }
 0x15a   :  { %v1039_v43 = vadd.f32 %v1038_v42, %v1037_v40  ;;  %v840_v2 = vadd.f32 %v839_v18, %v838_v32 }
 0x15c   :  { %v842_v47 = vadd.f32 %v841_v16, %v840_v2  ;;  %v1041_v51 = vadd.f32 %v1040_v44, %v1039_v43 }
 0x15e   :  { %v1043_v20 = vadd.f32 %v1042_v46, %v1041_v51  ;;  %v844_v53 = vadd.f32 %v843_v13, %v842_v47 }
 0x160   :  { %v846_v57 = vadd.f32 %v845_v50, %v844_v53  ;;  %v1045_v59 = vadd.f32 %v1044_v55, %v1043_v20 }
 0x162   :  { %v848_v29 = vadd.f32 %v847_v3, %v846_v57  ;;  %v1047_v4 = vadd.f32 %v1046_v0, %v1045_v59 }
 0x164   :  { %v849_v6 = vrot.slane %v848_v29, 4  ;;  %v1049_v7 = vadd.f32 %v1048_v61, %v1047_v4 }
 0x166   :  { %v850_v49 = vadd.f32 %v849_v6, %v848_v29  ;;  %v1050_v45 = vrot.slane %v1049_v7, 4 }
 0x168   :  { %v851_v52 = vrot.slane %v850_v49, 2  ;;  %v1051_v9 = vadd.f32 %v1050_v45, %v1049_v7 }
 0x16a   :  { %v852_v10 = vadd.f32 %v851_v52, %v850_v49  ;;  %v1052_v11 = vrot.slane %v1051_v9, 2 }
 0x16c   :  { %v853_v12 = vrot.slane %v852_v10, 1  ;;  %v1053_v5 = vadd.f32 %v1052_v11, %v1051_v9 }
 0x16e   :  { %v854_v14 = vadd.f32 %v853_v12, %v852_v10  ;;  %v1054_v60 = vrot.slane %v1053_v5, 1 }
 0x170   :  { %v855_v30 = vadd.f32 %v854_v14, %v721_v62  ;;  %v1055_v15 = vadd.f32 %v1054_v60, %v1053_v5 }
 0x172   :  { %857 = vst.msk [vmem:[%s2049_s3] sm:$0x1] %vm718_vm2, %v855_v30  ;;  %v1056_v17 = vadd.f32 %v1055_v15, %v858_v63 }
 0x174   :  { %1057 = vst.msk [vmem:[%s2050_s4] sm:$0x1] %vm718_vm2, %v1056_v17 }

// kernel: stem_forward.18
= control target key start
LH: loop header
LB: loop body
LE: loop exit
PB: predicated region body
PF: predicated region fallthrough
CT: control target
= control target key end

     0   :  { %v2290_v0 = vmov 0   ;;  %vm767_vm0 = vcmask 261120   ;;  %vm1510_vm1 = vcmask 253952   ;;  %s3363_s1 = inlined_call_operand.vmem [shape: bf16[288,32], index: 1, kind: input, shape index: {}]   ;;  %s3364_s0 = inlined_call_operand.vmem [shape: bf16[512,288], index: 0, kind: input, shape index: {}]   ;;  %s3365_s2 = inlined_call_operand.vmem [shape: f32[512,32], index: 2, kind: output, shape index: {0}]   ;;  %s3366_s3 = inlined_call_operand.vmem [shape: f32[1,32], index: 3, kind: output, shape index: {1}]   ;;  %s3367_s4 = inlined_call_operand.vmem [shape: f32[1,32], index: 4, kind: output, shape index: {2}]  }
   0x1   :  { %864 = vmatprep.subr.bf16.mxu0 %v2290_v0  ;;  %2110 = vmatprep.subr.bf16.mxu1 %v2290_v0  ;;  %v2144_v1 = vld [vmem:[%s3363_s1] sm:$0xff]   ;;  %v2145_v2 = vld [vmem:[%s3363_s1 + $0x8] sm:$0xff]   ;;  %v2146_v3 = vld [vmem:[%s3363_s1 + $0x10] sm:$0xff]  }
   0x2   :  { %865 = vmatpush1.bf16.msra.mxu0 %v2144_v1  ;;  %2126 = vmatpush1.bf16.msra.mxu1 %v2144_v1  ;;  %v2147_v4 = vld [vmem:[%s3363_s1 + $0x18] sm:$0xff]   ;;  %v2148_v5 = vld [vmem:[%s3363_s1 + $0x20] sm:$0xff]   ;;  %v2149_v7 = vld [vmem:[%s3363_s1 + $0x28] sm:$0xff]  }
   0x3   :  { %866 = vmatprep.subr.bf16.mxu0 %v2290_v0  ;;  %2111 = vmatprep.subr.bf16.mxu1 %v2290_v0  ;;  %v2162_v6 = vld [vmem:[%s3364_s0 + $0x4] ss:$12 sps:$4 sm:$0xff]   ;;  %v2151_v10 = vld [vmem:[%s3363_s1 + $0x38] sm:$0xff]   ;;  %v2153_v12 = vld [vmem:[%s3363_s1 + $0x48] sm:$0xff]  }
   0x4   :  { %v2165_v8 = vld [vmem:[%s3364_s0 + $0x244] ss:$12 sps:$4 sm:$0xff]   ;;  %896 = vmatprep.mubr.bf16.mxu0 %v2162_v6  ;;  %v2155_v14 = vld [vmem:[%s3363_s1 + $0x58] sm:$0xff]   ;;  %v2157_v16 = vld [vmem:[%s3363_s1 + $0x68] sm:$0xff]  }
   0x5   :  { %1088 = vmatprep.mubr.bf16.mxu1 %v2165_v8  ;;  %v2150_v9 = vld [vmem:[%s3363_s1 + $0x30] sm:$0xff]   ;;  %v2152_v11 = vld [vmem:[%s3363_s1 + $0x40] sm:$0xff]   ;;  %v2159_v18 = vld [vmem:[%s3363_s1 + $0x78] sm:$0xff]  }
   0x6   :  { %867 = vmatpush1.bf16.msra.mxu0 %v2145_v2  ;;  %2127 = vmatpush1.bf16.msra.mxu1 %v2145_v2  ;;  %v2154_v13 = vld [vmem:[%s3363_s1 + $0x50] sm:$0xff]   ;;  %v2156_v15 = vld [vmem:[%s3363_s1 + $0x60] sm:$0xff]   ;;  %v2166_v22 = vld [vmem:[%s3364_s0 + $0x1c] ss:$12 sps:$4 sm:$0xff]  }
   0x7   :  { %868 = vmatprep.subr.bf16.mxu0 %v2290_v0  ;;  %2112 = vmatprep.subr.bf16.mxu1 %v2290_v0  ;;  %v2158_v17 = vld [vmem:[%s3363_s1 + $0x70] sm:$0xff]   ;;  %v2184_v19 = vld [vmem:[%s3363_s1 + $0x80] sm:$0xff]   ;;  %v2168_v23 = vld [vmem:[%s3364_s0 + $0x25c] ss:$12 sps:$4 sm:$0xff]  }
   0x8   :  { %v2160_v20 = vld [vmem:[%s3364_s0] ss:$12 sps:$4 sm:$0xff]   ;;  %v2170_v25 = vld [vmem:[%s3364_s0 + $0x18] ss:$12 sps:$4 sm:$0xff]   ;;  %v2176_v29 = vld [vmem:[%s3364_s0 + $0x30] ss:$12 sps:$4 sm:$0xff]  }
   0x9   :  { %v2163_v21 = vld [vmem:[%s3364_s0 + $0x240] ss:$12 sps:$4 sm:$0xff]   ;;  %v2171_v26 = vld [vmem:[%s3364_s0 + $0x258] ss:$12 sps:$4 sm:$0xff]   ;;  %v2177_v30 = vld [vmem:[%s3364_s0 + $0x270] ss:$12 sps:$4 sm:$0xff]  }
   0xa   :  { %869 = vmatpush1.bf16.msra.mxu0 %v2146_v3  ;;  %2128 = vmatpush1.bf16.msra.mxu1 %v2146_v3  ;;  %v2209_v24 = vld [vmem:[%s3363_s1 + $0x88] sm:$0xff]   ;;  %v2172_v27 = vld [vmem:[%s3364_s0 + $0x34] ss:$12 sps:$4 sm:$0xff]   ;;  %v2185_v35 = vld [vmem:[%s3364_s0 + $0x64] ss:$12 sps:$4 sm:$0xff]  }
   0xb   :  { %870 = vmatprep.subr.bf16.mxu0 %v2290_v0  ;;  %2113 = vmatprep.subr.bf16.mxu1 %v2290_v0  ;;  %v2174_v28 = vld [vmem:[%s3364_s0 + $0x274] ss:$12 sps:$4 sm:$0xff]   ;;  %v2178_v31 = vld [vmem:[%s3364_s0 + $0x4c] ss:$12 sps:$4 sm:$0xff]   ;;  %v2187_v36 = vld [vmem:[%s3364_s0 + $0x2a4] ss:$12 sps:$4 sm:$0xff]  }
   0xc   :  { %v2180_v32 = vld [vmem:[%s3364_s0 + $0x28c] ss:$12 sps:$4 sm:$0xff]   ;;  %v2182_v33 = vld [vmem:[%s3364_s0 + $0x48] ss:$12 sps:$4 sm:$0xff]   ;;  %v2201_v45 = vld [vmem:[%s3364_s0 + $0x90] ss:$12 sps:$4 sm:$0xff]  }
   0xd   :  { %v2183_v34 = vld [vmem:[%s3364_s0 + $0x288] ss:$12 sps:$4 sm:$0xff]   ;;  %v2189_v37 = vld [vmem:[%s3364_s0 + $0x60] ss:$12 sps:$4 sm:$0xff]   ;;  %v2195_v41 = vld [vmem:[%s3364_s0 + $0x78] ss:$12 sps:$4 sm:$0xff]  }
   0xe   :  { %871 = vmatpush1.bf16.msra.mxu0 %v2147_v4  ;;  %2129 = vmatpush1.bf16.msra.mxu1 %v2147_v4  ;;  %v2190_v38 = vld [vmem:[%s3364_s0 + $0x2a0] ss:$12 sps:$4 sm:$0xff]   ;;  %v2191_v39 = vld [vmem:[%s3364_s0 + $0x7c] ss:$12 sps:$4 sm:$0xff]   ;;  %v2196_v42 = vld [vmem:[%s3364_s0 + $0x2b8] ss:$12 sps:$4 sm:$0xff]  }
   0xf   :  { %872 = vmatprep.subr.bf16.mxu0 %v2290_v0  ;;  %2114 = vmatprep.subr.bf16.mxu1 %v2290_v0  ;;  %v2193_v40 = vld [vmem:[%s3364_s0 + $0x2bc] ss:$12 sps:$4 sm:$0xff]   ;;  %v2197_v43 = vld [vmem:[%s3364_s0 + $0x94] ss:$12 sps:$4 sm:$0xff]   ;;  %v2203_v47 = vld [vmem:[%s3364_s0 + $0xac] ss:$12 sps:$4 sm:$0xff]  }
  0x10   :  { %v2199_v44 = vld [vmem:[%s3364_s0 + $0x2d4] ss:$12 sps:$4 sm:$0xff]   ;;  %v2202_v46 = vld [vmem:[%s3364_s0 + $0x2d0] ss:$12 sps:$4 sm:$0xff]   ;;  %v2205_v48 = vld [vmem:[%s3364_s0 + $0x2ec] ss:$12 sps:$4 sm:$0xff]  }
  0x11   :  { %v2207_v49 = vld [vmem:[%s3364_s0 + $0xa8] ss:$12 sps:$4 sm:$0xff]   ;;  %v2210_v51 = vld [vmem:[%s3364_s0 + $0xc4] ss:$12 sps:$4 sm:$0xff]   ;;  %v2213_v53 = vld [vmem:[%s3364_s0 + $0xc0] ss:$12 sps:$4 sm:$0xff]  }
  0x12   :  { %873 = vmatpush1.bf16.msra.mxu0 %v2148_v5  ;;  %2130 = vmatpush1.bf16.msra.mxu1 %v2148_v5  ;;  %v2208_v50 = vld [vmem:[%s3364_s0 + $0x2e8] ss:$12 sps:$4 sm:$0xff]   ;;  %v2214_v54 = vld [vmem:[%s3364_s0 + $0x20] ss:$12 sps:$4 sm:$0xff]   ;;  %v2217_v56 = vld [vmem:[%s3364_s0 + $0x38] ss:$12 sps:$4 sm:$0xff]  }
  0x13   :  { %874 = vmatprep.subr.bf16.mxu0 %v2290_v0  ;;  %2115 = vmatprep.subr.bf16.mxu1 %v2290_v0  ;;  %v2212_v52 = vld [vmem:[%s3364_s0 + $0x8] ss:$12 sps:$4 sm:$0xff]   ;;  %v2218_v57 = vld [vmem:[%s3364_s0 + $0xd8] ss:$12 sps:$4 sm:$0xff]   ;;  %v2219_v58 = vld [vmem:[%s3364_s0 + $0x50] ss:$12 sps:$4 sm:$0xff]  }
  0x14   :  { %v2215_v55 = vld [vmem:[%s3364_s0 + $0xdc] ss:$12 sps:$4 sm:$0xff]   ;;  %v2220_v59 = vld [vmem:[%s3364_s0 + $0xf4] ss:$12 sps:$4 sm:$0xff]   ;;  %v2225_v63 = vld [vmem:[%s3364_s0 + $0x10c] ss:$12 sps:$4 sm:$0xff]  }
  0x15   :  { %v2222_v60 = vld [vmem:[%s3364_s0 + $0x68] ss:$12 sps:$4 sm:$0xff]   ;;  %v2223_v61 = vld [vmem:[%s3364_s0 + $0xf0] ss:$12 sps:$4 sm:$0xff]   ;;  %v2224_v62 = vld [vmem:[%s3364_s0 + $0x80] ss:$12 sps:$4 sm:$0xff]  }
  0x16   :  { %875 = vmatpush1.bf16.msra.mxu0 %v2149_v7  ;;  %2131 = vmatpush1.bf16.msra.mxu1 %v2149_v7  ;;  %v2228_v1 = vld [vmem:[%s3364_s0 + $0x108] ss:$12 sps:$4 sm:$0xff]   ;;  %v2229_v2 = vld [vmem:[%s3364_s0 + $0xb0] ss:$12 sps:$4 sm:$0xff]   ;;  %v2233_v5 = vld [vmem:[%s3364_s0 + $0x120] ss:$12 sps:$4 sm:$0xff]  }
  0x17   :  { %876 = vmatprep.subr.bf16.mxu0 %v2290_v0  ;;  %2116 = vmatprep.subr.bf16.mxu1 %v2290_v0  ;;  %v2230_v3 = vld [vmem:[%s3364_s0 + $0x124] ss:$12 sps:$4 sm:$0xff]   ;;  %v2232_v4 = vld [vmem:[%s3364_s0 + $0xc8] ss:$12 sps:$4 sm:$0xff]   ;;  %v2234_v6 = vld [vmem:[%s3364_s0 + $0xe0] ss:$12 sps:$4 sm:$0xff]  }
  0x18   :  { %v2235_v7 = vld [vmem:[%s3364_s0 + $0x13c] ss:$12 sps:$4 sm:$0xff]   ;;  %v2237_v8 = vld [vmem:[%s3364_s0 + $0xf8] ss:$12 sps:$4 sm:$0xff]  }
  0x1a   :  { %877 = vmatpush1.bf16.msra.mxu0 %v2150_v9  ;;  %2132 = vmatpush1.bf16.msra.mxu1 %v2150_v9  ;;  %v2238_v9 = vld [vmem:[%s3364_s0 + $0x138] ss:$12 sps:$4 sm:$0xff]  }
  0x1b   :  { %878 = vmatprep.subr.bf16.mxu0 %v2290_v0  ;;  %2117 = vmatprep.subr.bf16.mxu1 %v2290_v0 }
  0x1e   :  { %879 = vmatpush1.bf16.msra.mxu0 %v2151_v10  ;;  %2133 = vmatpush1.bf16.msra.mxu1 %v2151_v10  ;;  %v2239_v10 = vld [vmem:[%s3364_s0 + $0x110] ss:$12 sps:$4 sm:$0xff]  }
  0x1f   :  { %880 = vmatprep.subr.bf16.mxu0 %v2290_v0  ;;  %2118 = vmatprep.subr.bf16.mxu1 %v2290_v0 }
  0x22   :  { %881 = vmatpush1.bf16.msra.mxu0 %v2152_v11  ;;  %2134 = vmatpush1.bf16.msra.mxu1 %v2152_v11  ;;  %v2240_v11 = vld [vmem:[%s3364_s0 + $0x154] ss:$12 sps:$4 sm:$0xff]  }
  0x23   :  { %882 = vmatprep.subr.bf16.mxu0 %v2290_v0  ;;  %2119 = vmatprep.subr.bf16.mxu1 %v2290_v0 }
  0x26   :  { %883 = vmatpush1.bf16.msra.mxu0 %v2153_v12  ;;  %2135 = vmatpush1.bf16.msra.mxu1 %v2153_v12  ;;  %v2242_v12 = vld [vmem:[%s3364_s0 + $0x128] ss:$12 sps:$4 sm:$0xff]  }
  0x27   :  { %884 = vmatprep.subr.bf16.mxu0 %v2290_v0  ;;  %2120 = vmatprep.subr.bf16.mxu1 %v2290_v0 }
  0x2a   :  { %885 = vmatpush1.bf16.msra.mxu0 %v2154_v13  ;;  %2136 = vmatpush1.bf16.msra.mxu1 %v2154_v13  ;;  %v2243_v13 = vld [vmem:[%s3364_s0 + $0x150] ss:$12 sps:$4 sm:$0xff]  }
  0x2b   :  { %886 = vmatprep.subr.bf16.mxu0 %v2290_v0  ;;  %2121 = vmatprep.subr.bf16.mxu1 %v2290_v0 }
  0x2e   :  { %887 = vmatpush1.bf16.msra.mxu0 %v2155_v14  ;;  %2137 = vmatpush1.bf16.msra.mxu1 %v2155_v14  ;;  %v2244_v14 = vld [vmem:[%s3364_s0 + $0x140] ss:$12 sps:$4 sm:$0xff]  }
  0x2f   :  { %888 = vmatprep.subr.bf16.mxu0 %v2290_v0  ;;  %2122 = vmatprep.subr.bf16.mxu1 %v2290_v0 }
  0x32   :  { %889 = vmatpush1.bf16.msra.mxu0 %v2156_v15  ;;  %2138 = vmatpush1.bf16.msra.mxu1 %v2156_v15  ;;  %v2245_v15 = vld [vmem:[%s3364_s0 + $0x16c] ss:$12 sps:$4 sm:$0xff]  }
  0x33   :  { %890 = vmatprep.subr.bf16.mxu0 %v2290_v0  ;;  %2123 = vmatprep.subr.bf16.mxu1 %v2290_v0 }
  0x36   :  { %891 = vmatpush1.bf16.msra.mxu0 %v2157_v16  ;;  %2139 = vmatpush1.bf16.msra.mxu1 %v2157_v16  ;;  %v2247_v16 = vld [vmem:[%s3364_s0 + $0x158] ss:$12 sps:$4 sm:$0xff]  }
  0x37   :  { %892 = vmatprep.subr.bf16.mxu0 %v2290_v0  ;;  %2124 = vmatprep.subr.bf16.mxu1 %v2290_v0 }
  0x3a   :  { %893 = vmatpush1.bf16.msra.mxu0 %v2158_v17  ;;  %2140 = vmatpush1.bf16.msra.mxu1 %v2158_v17  ;;  %v2248_v17 = vld [vmem:[%s3364_s0 + $0x168] ss:$12 sps:$4 sm:$0xff]  }
  0x3b   :  { %894 = vmatprep.subr.bf16.mxu0 %v2290_v0  ;;  %2125 = vmatprep.subr.bf16.mxu1 %v2290_v0  ;;  %v2227_v0 = vld [vmem:[%s3364_s0 + $0x98] ss:$12 sps:$4 sm:$0xff]  }
  0x3e   :  { %895 = vmatpush1.bf16.msra.mxu0 %v2159_v18  ;;  %2141 = vmatpush1.bf16.msra.mxu1 %v2159_v18  ;;  %v2249_v18 = vld [vmem:[%s3364_s0 + $0x170] ss:$12 sps:$4 sm:$0xff]  }
  0x3f   :  { %2042 = vmatprep.subr.bf16.mxu1 %v2184_v19 }
  0x41   :  { %897 = vmatmul.mubr.bf16.vlgmr.msra.gmra.mrb[0].mxu0 %v2160_v20  ;;  %1089 = vmatmul.mubr.bf16.vlgmr.msra.gmra.mrb[0].mxu1 %v2163_v21  ;;  %v2252_v20 = vld [vmem:[%s3364_s0 + $0x188] ss:$12 sps:$4 sm:$0xff]   ;;  %v2253_v21 = vld [vmem:[%s3364_s0 + $0x180] ss:$12 sps:$4 sm:$0xff]  }
  0x42   :  { %904 = vmatprep.mubr.bf16.mxu0 %v2166_v22  ;;  %1096 = vmatprep.mubr.bf16.mxu1 %v2168_v23  ;;  %v2254_v22 = vld [vmem:[%s3364_s0 + $0x1a0] ss:$12 sps:$4 sm:$0xff]   ;;  %v2255_v23 = vld [vmem:[%s3364_s0 + $0x19c] ss:$12 sps:$4 sm:$0xff]  }
  0x43   :  { %2043 = vmatpush3.bf16.msra.mxu1 %v2184_v19  ;;  %v2250_v19 = vld [vmem:[%s3364_s0 + $0x184] ss:$12 sps:$4 sm:$0xff]  }
  0x44   :  { %2044 = vmatprep.subr.bf16.mxu1 %v2209_v24 }
  0x47   :  { %2045 = vmatpush3.bf16.msra.mxu1 %v2209_v24  ;;  %v2257_v24 = vld [vmem:[%s3364_s0 + $0x1b8] ss:$12 sps:$4 sm:$0xff]  }
  0x49   :  { %905 = vmatmul.mubr.bf16.gmra.mrb[4].mxu0 %v2170_v25  ;;  %1097 = vmatmul.mubr.bf16.gmra.mrb[4].mxu1 %v2171_v26  ;;  %v2258_v25 = vld [vmem:[%s3364_s0 + $0x198] ss:$12 sps:$4 sm:$0xff]   ;;  %v2259_v26 = vld [vmem:[%s3364_s0 + $0x1d0] ss:$12 sps:$4 sm:$0xff]  }
  0x4a   :  { %912 = vmatprep.mubr.bf16.mxu0 %v2172_v27  ;;  %1104 = vmatprep.mubr.bf16.mxu1 %v2174_v28  ;;  %v2260_v27 = vld [vmem:[%s3364_s0 + $0x1b4] ss:$12 sps:$4 sm:$0xff]  }
  0x4b   :  { %v2262_v28 = vld [vmem:[%s3364_s0 + $0x1e8] ss:$12 sps:$4 sm:$0xff]  }
  0x51   :  { %913 = vmatmul.mubr.bf16.gmra.mrb[8].mxu0 %v2176_v29  ;;  %1105 = vmatmul.mubr.bf16.gmra.mrb[8].mxu1 %v2177_v30  ;;  %v2263_v29 = vld [vmem:[%s3364_s0 + $0x1b0] ss:$12 sps:$4 sm:$0xff]   ;;  %v2264_v30 = vld [vmem:[%s3364_s0 + $0x200] ss:$12 sps:$4 sm:$0xff]  }
  0x52   :  { %920 = vmatprep.mubr.bf16.mxu0 %v2178_v31  ;;  %1112 = vmatprep.mubr.bf16.mxu1 %v2180_v32  ;;  %v2265_v31 = vld [vmem:[%s3364_s0 + $0x1cc] ss:$12 sps:$4 sm:$0xff]  }
  0x53   :  { %v2267_v32 = vld [vmem:[%s3364_s0 + $0x218] ss:$12 sps:$4 sm:$0xff]  }
  0x59   :  { %921 = vmatmul.mubr.bf16.gmra.mrb[12].mxu0 %v2182_v33  ;;  %1113 = vmatmul.mubr.bf16.gmra.mrb[12].mxu1 %v2183_v34  ;;  %v2268_v33 = vld [vmem:[%s3364_s0 + $0x1c8] ss:$12 sps:$4 sm:$0xff]   ;;  %v2269_v34 = vld [vmem:[%s3364_s0 + $0x230] ss:$12 sps:$4 sm:$0xff]  }
  0x5a   :  { %928 = vmatprep.mubr.bf16.mxu0 %v2185_v35  ;;  %1120 = vmatprep.mubr.bf16.mxu1 %v2187_v36  ;;  %v2270_v35 = vld [vmem:[%s3364_s0 + $0x1e4] ss:$12 sps:$4 sm:$0xff]   ;;  %v2272_v36 = vld [vmem:[%s3364_s0 + $0x248] ss:$12 sps:$4 sm:$0xff]  }
  0x61   :  { %929 = vmatmul.mubr.bf16.gmra.mrb[16].mxu0 %v2189_v37  ;;  %1121 = vmatmul.mubr.bf16.gmra.mrb[16].mxu1 %v2190_v38  ;;  %v2273_v37 = vld [vmem:[%s3364_s0 + $0x1e0] ss:$12 sps:$4 sm:$0xff]  }
  0x62   :  { %936 = vmatprep.mubr.bf16.mxu0 %v2191_v39  ;;  %1128 = vmatprep.mubr.bf16.mxu1 %v2193_v40  ;;  %v2274_v38 = vld [vmem:[%s3364_s0 + $0x260] ss:$12 sps:$4 sm:$0xff]   ;;  %v2275_v39 = vld [vmem:[%s3364_s0 + $0x1fc] ss:$12 sps:$4 sm:$0xff]   ;;  %v2277_v40 = vld [vmem:[%s3364_s0 + $0x278] ss:$12 sps:$4 sm:$0xff]  }
  0x69   :  { %937 = vmatmul.mubr.bf16.gmra.mrb[20].mxu0 %v2195_v41  ;;  %1129 = vmatmul.mubr.bf16.gmra.mrb[20].mxu1 %v2196_v42  ;;  %v2278_v41 = vld [vmem:[%s3364_s0 + $0x1f8] ss:$12 sps:$4 sm:$0xff]   ;;  %v2279_v42 = vld [vmem:[%s3364_s0 + $0x290] ss:$12 sps:$4 sm:$0xff]  }
  0x6a   :  { %944 = vmatprep.mubr.bf16.mxu0 %v2197_v43  ;;  %1136 = vmatprep.mubr.bf16.mxu1 %v2199_v44  ;;  %v2280_v43 = vld [vmem:[%s3364_s0 + $0x214] ss:$12 sps:$4 sm:$0xff]  }
  0x6b   :  { %v2282_v44 = vld [vmem:[%s3364_s0 + $0x2a8] ss:$12 sps:$4 sm:$0xff]  }
  0x71   :  { %945 = vmatmul.mubr.bf16.gmra.mrb[24].mxu0 %v2201_v45  ;;  %1137 = vmatmul.mubr.bf16.gmra.mrb[24].mxu1 %v2202_v46  ;;  %v2283_v45 = vld [vmem:[%s3364_s0 + $0x210] ss:$12 sps:$4 sm:$0xff]   ;;  %v2284_v46 = vld [vmem:[%s3364_s0 + $0x2c0] ss:$12 sps:$4 sm:$0xff]  }
  0x72   :  { %952 = vmatprep.mubr.bf16.mxu0 %v2203_v47  ;;  %1144 = vmatprep.mubr.bf16.mxu1 %v2205_v48  ;;  %v2285_v47 = vld [vmem:[%s3364_s0 + $0x22c] ss:$12 sps:$4 sm:$0xff]  }
  0x73   :  { %v2287_v48 = vld [vmem:[%s3364_s0 + $0x2d8] ss:$12 sps:$4 sm:$0xff]  }
  0x79   :  { %953 = vmatmul.mubr.bf16.gmra.mrb[28].mxu0 %v2207_v49  ;;  %1145 = vmatmul.mubr.bf16.gmra.mrb[28].mxu1 %v2208_v50  ;;  %v2288_v49 = vld [vmem:[%s3364_s0 + $0x228] ss:$12 sps:$4 sm:$0xff]   ;;  %v2289_v50 = vld [vmem:[%s3364_s0 + $0x2f0] ss:$12 sps:$4 sm:$0xff]  }
  0x7a   :  { %960 = vmatprep.mubr.bf16.mxu0 %v2210_v51  ;;  %2046 = vmatprep.mubr.msk.bf16.mxu1 %vm767_vm0, %v2212_v52 }
  0x81   :  { %961 = vmatmul.mubr.bf16.gmra.mrb[32].mxu0 %v2213_v53  ;;  %2047 = vmatmul.mubr.msk.bf16.vlgmr.msra.gmra.mrb[32].mxu1 %vm767_vm0, %v2214_v54 }
  0x82   :  { %968 = vmatprep.mubr.bf16.mxu0 %v2215_v55  ;;  %2050 = vmatprep.mubr.msk.bf16.mxu1 %vm767_vm0, %v2217_v56 }
  0x89   :  { %969 = vmatmul.mubr.bf16.gmra.mrb[36].mxu0 %v2218_v57  ;;  %2051 = vmatmul.mubr.msk.bf16.gmra.mrb[36].mxu1 %vm767_vm0, %v2219_v58 }
  0x8a   :  { %976 = vmatprep.mubr.bf16.mxu0 %v2220_v59  ;;  %2054 = vmatprep.mubr.msk.bf16.mxu1 %vm767_vm0, %v2222_v60 }
  0x91   :  { %977 = vmatmul.mubr.bf16.gmra.mrb[40].mxu0 %v2223_v61  ;;  %2055 = vmatmul.mubr.msk.bf16.gmra.mrb[40].mxu1 %vm767_vm0, %v2224_v62 }
  0x92   :  { %984 = vmatprep.mubr.bf16.mxu0 %v2225_v63  ;;  %2058 = vmatprep.mubr.msk.bf16.mxu1 %vm767_vm0, %v2227_v0 }
  0x99   :  { %985 = vmatmul.mubr.bf16.gmra.mrb[44].mxu0 %v2228_v1  ;;  %2059 = vmatmul.mubr.msk.bf16.gmra.mrb[44].mxu1 %vm767_vm0, %v2229_v2 }
  0x9a   :  { %992 = vmatprep.mubr.bf16.mxu0 %v2230_v3  ;;  %2062 = vmatprep.mubr.msk.bf16.mxu1 %vm767_vm0, %v2232_v4 }
  0xa1   :  { %993 = vmatmul.mubr.bf16.gmra.mrb[48].mxu0 %v2233_v5  ;;  %2063 = vmatmul.mubr.msk.bf16.gmra.mrb[48].mxu1 %vm767_vm0, %v2234_v6 }
  0xa2   :  { %1000 = vmatprep.mubr.bf16.mxu0 %v2235_v7  ;;  %2066 = vmatprep.mubr.msk.bf16.mxu1 %vm767_vm0, %v2237_v8 }
  0xa9   :  { %1001 = vmatmul.mubr.bf16.gmra.mrb[52].mxu0 %v2238_v9  ;;  %2067 = vmatmul.mubr.msk.bf16.gmra.mrb[52].mxu1 %vm767_vm0, %v2239_v10 }
  0xaa   :  { %1008 = vmatprep.mubr.bf16.mxu0 %v2240_v11  ;;  %2070 = vmatprep.mubr.msk.bf16.mxu1 %vm767_vm0, %v2242_v12 }
  0xb1   :  { %1009 = vmatmul.mubr.bf16.gmra.mrb[56].mxu0 %v2243_v13  ;;  %2071 = vmatmul.mubr.msk.bf16.gmra.mrb[56].mxu1 %vm767_vm0, %v2244_v14 }
  0xb2   :  { %1016 = vmatprep.mubr.bf16.mxu0 %v2245_v15  ;;  %2074 = vmatprep.mubr.msk.bf16.mxu1 %vm767_vm0, %v2247_v16 }
  0xb9   :  { %1017 = vmatmul.mubr.bf16.gmra.mrb[60].mxu0 %v2248_v17  ;;  %2075 = vmatmul.mubr.msk.bf16.gmra.mrb[60].mxu1 %vm767_vm0, %v2249_v18 }
  0xba   :  { %1024 = vmatprep.mubr.bf16.mxu0 %v2250_v19  ;;  %2078 = vmatprep.mubr.msk.bf16.mxu1 %vm767_vm0, %v2252_v20 }
  0xc1   :  { %1025 = vmatmul.mubr.bf16.gmra.mrb[64].mxu0 %v2253_v21  ;;  %2079 = vmatmul.mubr.msk.bf16.gmra.mrb[64].mxu1 %vm767_vm0, %v2254_v22 }
  0xc2   :  { %1032 = vmatprep.mubr.bf16.mxu0 %v2255_v23  ;;  %2082 = vmatprep.mubr.msk.bf16.mxu1 %vm767_vm0, %v2257_v24 }
  0xc9   :  { %1033 = vmatmul.mubr.bf16.gmra.mrb[68].mxu0 %v2258_v25  ;;  %2083 = vmatmul.mubr.msk.bf16.gmra.mrb[68].mxu1 %vm767_vm0, %v2259_v26 }
  0xca   :  { %1040 = vmatprep.mubr.bf16.mxu0 %v2260_v27  ;;  %2086 = vmatprep.mubr.msk.bf16.mxu1 %vm767_vm0, %v2262_v28 }
  0xd1   :  { %1041 = vmatmul.mubr.bf16.gmra.mrb[72].mxu0 %v2263_v29  ;;  %2087 = vmatmul.mubr.msk.bf16.gmra.mrb[72].mxu1 %vm767_vm0, %v2264_v30 }
  0xd2   :  { %1048 = vmatprep.mubr.bf16.mxu0 %v2265_v31  ;;  %2090 = vmatprep.mubr.msk.bf16.mxu1 %vm767_vm0, %v2267_v32 }
  0xd9   :  { %1049 = vmatmul.mubr.bf16.gmra.mrb[76].mxu0 %v2268_v33  ;;  %2091 = vmatmul.mubr.msk.bf16.gmra.mrb[76].mxu1 %vm767_vm0, %v2269_v34 }
  0xda   :  { %1056 = vmatprep.mubr.bf16.mxu0 %v2270_v35  ;;  %2094 = vmatprep.mubr.msk.bf16.mxu1 %vm767_vm0, %v2272_v36 }
  0xe1   :  { %1057 = vmatmul.mubr.bf16.gmra.mrb[80].mxu0 %v2273_v37  ;;  %2095 = vmatmul.mubr.msk.bf16.gmra.mrb[80].mxu1 %vm767_vm0, %v2274_v38 }
  0xe2   :  { %1064 = vmatprep.mubr.bf16.mxu0 %v2275_v39  ;;  %2098 = vmatprep.mubr.msk.bf16.mxu1 %vm767_vm0, %v2277_v40 }
  0xe9   :  { %1065 = vmatmul.mubr.bf16.gmra.mrb[84].mxu0 %v2278_v41  ;;  %2099 = vmatmul.mubr.msk.bf16.gmra.mrb[84].mxu1 %vm767_vm0, %v2279_v42 }
  0xea   :  { %1072 = vmatprep.mubr.bf16.mxu0 %v2280_v43  ;;  %2102 = vmatprep.mubr.msk.bf16.mxu1 %vm767_vm0, %v2282_v44 }
  0xf1   :  { %1073 = vmatmul.mubr.bf16.gmra.mrb[88].mxu0 %v2283_v45  ;;  %2103 = vmatmul.mubr.msk.bf16.gmra.mrb[88].mxu1 %vm767_vm0, %v2284_v46 }
  0xf2   :  { %1080 = vmatprep.mubr.bf16.mxu0 %v2285_v47  ;;  %2106 = vmatprep.mubr.msk.bf16.mxu1 %vm767_vm0, %v2287_v48 }
  0xf9   :  { %1081 = vmatmul.mubr.bf16.gmra.mrb[92].mxu0 %v2288_v49  ;;  %2107 = vmatmul.mubr.msk.bf16.gmra.mrb[92].mxu1 %vm767_vm0, %v2289_v50 }
 0x114   :  { %v2723_v51 = vpop.f32.mrb[0].mxu0  ;;  %v2725_v52 = vpop.f32.mrb[0].mxu1 }
 0x115   :  { %v900_v53 = vpop.f32.mrb[1].mxu0  ;;  %v1092_v54 = vpop.f32.mrb[1].mxu1 }
 0x116   :  { %v2727_v55 = vpop.f32.mrb[2].mxu0  ;;  %v2729_v56 = vpop.f32.mrb[2].mxu1 }
 0x117   :  { %v903_v57 = vpop.f32.mrb[3].mxu0  ;;  %v1095_v58 = vpop.f32.mrb[3].mxu1 }
 0x11c   :  { %v906_v59 = vpop.f32.mrb[4].mxu0  ;;  %v2731_v60 = vpop.f32.mrb[4].mxu1 }
 0x11d   :  { %v908_v61 = vpop.f32.mrb[5].mxu0  ;;  %v1100_v62 = vpop.f32.mrb[5].mxu1 }
 0x11e   :  { %v909_v63 = vpop.f32.mrb[6].mxu0  ;;  %v2733_v0 = vpop.f32.mrb[6].mxu1 }
 0x11f   :  { %v911_v1 = vpop.f32.mrb[7].mxu0  ;;  %v1103_v2 = vpop.f32.mrb[7].mxu1 }
 0x124   :  { %v2735_v3 = vpop.f32.mrb[8].mxu0  ;;  %v2737_v4 = vpop.f32.mrb[8].mxu1 }
 0x125   :  { %v916_v5 = vpop.f32.mrb[9].mxu0  ;;  %v1108_v6 = vpop.f32.mrb[9].mxu1 }
 0x126   :  { %v2739_v7 = vpop.f32.mrb[10].mxu0  ;;  %v2741_v8 = vpop.f32.mrb[10].mxu1 }
 0x127   :  { %v919_v9 = vpop.f32.mrb[11].mxu0  ;;  %v1111_v10 = vpop.f32.mrb[11].mxu1 }
 0x12c   :  { %v2743_v11 = vpop.f32.mrb[12].mxu0  ;;  %v2745_v12 = vpop.f32.mrb[12].mxu1 }
 0x12d   :  { %v924_v13 = vpop.f32.mrb[13].mxu0  ;;  %v1116_v14 = vpop.f32.mrb[13].mxu1 }
 0x12e   :  { %v2747_v15 = vpop.f32.mrb[14].mxu0  ;;  %v2749_v16 = vpop.f32.mrb[14].mxu1 }
 0x12f   :  { %v927_v17 = vpop.f32.mrb[15].mxu0  ;;  %v1119_v18 = vpop.f32.mrb[15].mxu1 }
 0x134   :  { %v2751_v19 = vpop.f32.mrb[16].mxu0  ;;  %v2753_v20 = vpop.f32.mrb[16].mxu1 }
 0x135   :  { %v932_v21 = vpop.f32.mrb[17].mxu0  ;;  %v1124_v22 = vpop.f32.mrb[17].mxu1 }
 0x136   :  { %v2755_v23 = vpop.f32.mrb[18].mxu0  ;;  %v2757_v24 = vpop.f32.mrb[18].mxu1 }
 0x137   :  { %v935_v25 = vpop.f32.mrb[19].mxu0  ;;  %v1127_v26 = vpop.f32.mrb[19].mxu1 }
 0x13c   :  { %v2759_v27 = vpop.f32.mrb[20].mxu0  ;;  %v2761_v28 = vpop.f32.mrb[20].mxu1 }
 0x13d   :  { %v940_v29 = vpop.f32.mrb[21].mxu0  ;;  %v1132_v30 = vpop.f32.mrb[21].mxu1 }
 0x13e   :  { %v2763_v31 = vpop.f32.mrb[22].mxu0  ;;  %v2765_v32 = vpop.f32.mrb[22].mxu1 }
 0x13f   :  { %v943_v33 = vpop.f32.mrb[23].mxu0  ;;  %v1135_v34 = vpop.f32.mrb[23].mxu1 }
 0x144   :  { %v2767_v35 = vpop.f32.mrb[24].mxu0  ;;  %v2769_v36 = vpop.f32.mrb[24].mxu1 }
 0x145   :  { %v948_v37 = vpop.f32.mrb[25].mxu0  ;;  %v1140_v38 = vpop.f32.mrb[25].mxu1 }
 0x146   :  { %v2771_v39 = vpop.f32.mrb[26].mxu0  ;;  %v2773_v40 = vpop.f32.mrb[26].mxu1 }
 0x147   :  { %v951_v41 = vpop.f32.mrb[27].mxu0  ;;  %v1143_v42 = vpop.f32.mrb[27].mxu1 }
 0x14c   :  { %v2775_v43 = vpop.f32.mrb[28].mxu0  ;;  %v2777_v44 = vpop.f32.mrb[28].mxu1 }
 0x14d   :  { %v956_v45 = vpop.f32.mrb[29].mxu0  ;;  %v1148_v46 = vpop.f32.mrb[29].mxu1 }
 0x14e   :  { %v2779_v47 = vpop.f32.mrb[30].mxu0  ;;  %v2781_v48 = vpop.f32.mrb[30].mxu1 }
 0x14f   :  { %v959_v49 = vpop.f32.mrb[31].mxu0  ;;  %v1151_v50 = vpop.f32.mrb[31].mxu1 }
 0x154   :  { %v2783_v53 = vpop.f32.mrb[32].mxu0  ;;  %v2048_v54 = vpop.f32.mrb[32].mxu1 }
 0x155   :  { %v1196_v57 = vadd.f32 %v2048_v54, %v906_v59  ;;  %v964_v58 = vpop.f32.mrb[33].mxu0  ;;  %v1187_v61 = vpop.f32.mrb[33].mxu1 }
 0x156   :  { %v1188_v62 = vadd.f32 %v1187_v61, %v2723_v51  ;;  %v2786_v1 = vpop.f32.mrb[34].mxu0  ;;  %v2049_v2 = vpop.f32.mrb[34].mxu1 }
 0x157   :  { %1444 = vst.msk [vmem:[%s3365_s2 + $0x10] sm:$0xff] %vm767_vm0, %v1196_v57  ;;  %v1199_v5 = vadd.f32 %v2049_v2, %v909_v63  ;;  %v967_v6 = vpop.f32.mrb[35].mxu0  ;;  %v1190_v9 = vpop.f32.mrb[35].mxu1  ;;  %v1653_v51 = vmul.f32 %v1196_v57, %v1196_v57 }
 0x158   :  { %1442 = vst.msk [vmem:[%s3365_s2] sm:$0xff] %vm767_vm0, %v1188_v62  ;;  %v1651_v59 = vmul.f32 %v1188_v62, %v1188_v62  ;;  %v1191_v10 = vadd.f32 %v1190_v9, %v2727_v55  ;;  %v1514_v13 = vsel %vm767_vm0, %v1188_v62, 0.0  ;;  %v1517_v55 = vsel %vm767_vm0, %v1196_v57, 0.0 }
 0x159   :  { %1445 = vst.msk [vmem:[%s3365_s2 + $0x18] sm:$0xff] %vm767_vm0, %v1199_v5  ;;  %v1654_v17 = vmul.f32 %v1199_v5, %v1199_v5  ;;  %v1718_v38 = vsel %vm767_vm0, %v1653_v51, 0.0  ;;  %v1519_v41 = vsel %vm767_vm0, %v1199_v5, 0.0 }
 0x15a   :  { %1443 = vst.msk [vmem:[%s3365_s2 + $0x8] sm:$0xff] %vm767_vm0, %v1191_v10  ;;  %v1515_v63 = vsel %vm767_vm0, %v1191_v10, 0.0  ;;  %v1652_v14 = vmul.f32 %v1191_v10, %v1191_v10  ;;  %v1715_v21 = vsel %vm767_vm0, %v1651_v59, 0.0 }
 0x15b   :  { %v1516_v18 = vadd.f32 %v1515_v63, %v1514_v13  ;;  %v1720_v49 = vsel %vm767_vm0, %v1654_v17, 0.0 }
 0x15c   :  { %v1716_v22 = vsel %vm767_vm0, %v1652_v14, 0.0  ;;  %v2810_v25 = vpop.f32.mrb[36].mxu0  ;;  %v2052_v26 = vpop.f32.mrb[36].mxu1  ;;  %v2291_v14 = vmov 0.0  }
 0x15d   :  { %v1518_v29 = vadd.f32 %v1517_v55, %v1516_v18  ;;  %v1717_v30 = vadd.f32 %v1716_v22, %v1715_v21  ;;  %v1212_v33 = vadd.f32 %v2052_v26, %v2743_v11  ;;  %v972_v34 = vpop.f32.mrb[37].mxu0  ;;  %v1203_v37 = vpop.f32.mrb[37].mxu1  ;;  %1511 = vst.msk [vmem:[%s3366_s3] sm:$0x1] %vm1510_vm1, %v2291_v14  ;;  %1512 = vst.msk [vmem:[%s3367_s4] sm:$0x1] %vm1510_vm1, %v2291_v14 }
 0x15e   :  { %v1204_v42 = vadd.f32 %v1203_v37, %v2735_v3  ;;  %v2816_v45 = vpop.f32.mrb[38].mxu0  ;;  %v2053_v46 = vpop.f32.mrb[38].mxu1 }
 0x15f   :  { %v1719_v50 = vadd.f32 %v1718_v38, %v1717_v30  ;;  %1448 = vst.msk [vmem:[%s3365_s2 + $0x30] sm:$0xff] %vm767_vm0, %v1212_v33  ;;  %v1520_v11 = vadd.f32 %v1519_v41, %v1518_v29  ;;  %v975_v54 = vpop.f32.mrb[39].mxu0  ;;  %v1206_v57 = vpop.f32.mrb[39].mxu1  ;;  %v1215_v61 = vadd.f32 %v2053_v46, %v2747_v15  ;;  %v1657_v6 = vmul.f32 %v1212_v33, %v1212_v33 }
 0x160   :  { %1446 = vst.msk [vmem:[%s3365_s2 + $0x20] sm:$0xff] %vm767_vm0, %v1204_v42  ;;  %v1521_v3 = vsel %vm767_vm0, %v1204_v42, 0.0  ;;  %v1655_v58 = vmul.f32 %v1204_v42, %v1204_v42  ;;  %v1207_v62 = vadd.f32 %v1206_v57, %v2739_v7  ;;  %v1525_v51 = vsel %vm767_vm0, %v1212_v33, 0.0 }
 0x161   :  { %v1522_v2 = vadd.f32 %v1521_v3, %v1520_v11  ;;  %v1721_v5 = vadd.f32 %v1720_v49, %v1719_v50  ;;  %1449 = vst.msk [vmem:[%s3365_s2 + $0x38] sm:$0xff] %vm767_vm0, %v1215_v61  ;;  %v1658_v17 = vmul.f32 %v1215_v61, %v1215_v61  ;;  %v1527_v29 = vsel %vm767_vm0, %v1215_v61, 0.0 }
 0x162   :  { %v1722_v9 = vsel %vm767_vm0, %v1655_v58, 0.0  ;;  %1447 = vst.msk [vmem:[%s3365_s2 + $0x28] sm:$0xff] %vm767_vm0, %v1207_v62  ;;  %v1523_v15 = vsel %vm767_vm0, %v1207_v62, 0.0  ;;  %v1656_v10 = vmul.f32 %v1207_v62, %v1207_v62  ;;  %v1726_v38 = vsel %vm767_vm0, %v1657_v6, 0.0 }
 0x163   :  { %v1723_v59 = vadd.f32 %v1722_v9, %v1721_v5  ;;  %v1524_v7 = vadd.f32 %v1523_v15, %v1522_v2  ;;  %v1728_v54 = vsel %vm767_vm0, %v1658_v17, 0.0 }
 0x164   :  { %v2841_v13 = vpop.f32.mrb[40].mxu0  ;;  %v2056_v63 = vpop.f32.mrb[40].mxu1  ;;  %v1724_v55 = vsel %vm767_vm0, %v1656_v10, 0.0 }
 0x165   :  { %v1526_v18 = vadd.f32 %v1525_v51, %v1524_v7  ;;  %v1228_v21 = vadd.f32 %v2056_v63, %v2759_v27  ;;  %v980_v22 = vpop.f32.mrb[41].mxu0  ;;  %v1219_v26 = vpop.f32.mrb[41].mxu1  ;;  %v1725_v30 = vadd.f32 %v1724_v55, %v1723_v59 }
 0x166   :  { %v1220_v33 = vadd.f32 %v1219_v26, %v2751_v19  ;;  %v2855_v34 = vpop.f32.mrb[42].mxu0  ;;  %v2057_v37 = vpop.f32.mrb[42].mxu1 }
 0x167   :  { %1452 = vst.msk [vmem:[%s3365_s2 + $0x50] sm:$0xff] %vm767_vm0, %v1228_v21  ;;  %v1528_v41 = vadd.f32 %v1527_v29, %v1526_v18  ;;  %v1231_v27 = vadd.f32 %v2057_v37, %v2763_v31  ;;  %v983_v42 = vpop.f32.mrb[43].mxu0  ;;  %v1222_v46 = vpop.f32.mrb[43].mxu1  ;;  %v1727_v49 = vadd.f32 %v1726_v38, %v1725_v30  ;;  %v1533_v2 = vsel %vm767_vm0, %v1228_v21, 0.0 }
 0x168   :  { %1450 = vst.msk [vmem:[%s3365_s2 + $0x40] sm:$0xff] %vm767_vm0, %v1220_v33  ;;  %v1529_v19 = vsel %vm767_vm0, %v1220_v33, 0.0  ;;  %v1659_v50 = vmul.f32 %v1220_v33, %v1220_v33  ;;  %v1223_v11 = vadd.f32 %v1222_v46, %v2755_v23  ;;  %v1661_v23 = vmul.f32 %v1228_v21, %v1228_v21 }
 0x169   :  { %v1530_v57 = vadd.f32 %v1529_v19, %v1528_v41  ;;  %1453 = vst.msk [vmem:[%s3365_s2 + $0x58] sm:$0xff] %vm767_vm0, %v1231_v27  ;;  %v1729_v31 = vadd.f32 %v1728_v54, %v1727_v49  ;;  %v1662_v59 = vmul.f32 %v1231_v27, %v1231_v27  ;;  %v1535_v14 = vsel %vm767_vm0, %v1231_v27, 0.0 }
 0x16a   :  { %v1730_v3 = vsel %vm767_vm0, %v1659_v50, 0.0  ;;  %1451 = vst.msk [vmem:[%s3365_s2 + $0x48] sm:$0xff] %vm767_vm0, %v1223_v11  ;;  %v1531_v58 = vsel %vm767_vm0, %v1223_v11, 0.0  ;;  %v1660_v61 = vmul.f32 %v1223_v11, %v1223_v11  ;;  %v1734_v22 = vsel %vm767_vm0, %v1661_v23, 0.0 }
 0x16b   :  { %v1532_v62 = vadd.f32 %v1531_v58, %v1530_v57  ;;  %v1731_v5 = vadd.f32 %v1730_v3, %v1729_v31  ;;  %v1736_v41 = vsel %vm767_vm0, %v1662_v59, 0.0 }
 0x16c   :  { %v1732_v6 = vsel %vm767_vm0, %v1660_v61, 0.0  ;;  %v2882_v9 = vpop.f32.mrb[44].mxu0  ;;  %v2060_v15 = vpop.f32.mrb[44].mxu1 }
 0x16d   :  { %v1534_v7 = vadd.f32 %v1533_v2, %v1532_v62  ;;  %v1244_v10 = vadd.f32 %v2060_v15, %v2775_v43  ;;  %v988_v51 = vpop.f32.mrb[45].mxu0  ;;  %v1235_v63 = vpop.f32.mrb[45].mxu1  ;;  %v1733_v17 = vadd.f32 %v1732_v6, %v1731_v5 }
 0x16e   :  { %v1236_v18 = vadd.f32 %v1235_v63, %v2767_v35  ;;  %v2887_v55 = vpop.f32.mrb[46].mxu0  ;;  %v2061_v21 = vpop.f32.mrb[46].mxu1 }
 0x16f   :  { %1456 = vst.msk [vmem:[%s3365_s2 + $0x70] sm:$0xff] %vm767_vm0, %v1244_v10  ;;  %v1536_v26 = vadd.f32 %v1535_v14, %v1534_v7  ;;  %v1247_v43 = vadd.f32 %v2061_v21, %v2779_v47  ;;  %v991_v29 = vpop.f32.mrb[47].mxu0  ;;  %v1238_v30 = vpop.f32.mrb[47].mxu1  ;;  %v1735_v33 = vadd.f32 %v1734_v22, %v1733_v17  ;;  %v1541_v50 = vsel %vm767_vm0, %v1244_v10, 0.0 }
 0x170   :  { %1454 = vst.msk [vmem:[%s3365_s2 + $0x60] sm:$0xff] %vm767_vm0, %v1236_v18  ;;  %v1537_v35 = vsel %vm767_vm0, %v1236_v18, 0.0  ;;  %v1663_v37 = vmul.f32 %v1236_v18, %v1236_v18  ;;  %v1239_v38 = vadd.f32 %v1238_v30, %v2771_v39  ;;  %v1665_v39 = vmul.f32 %v1244_v10, %v1244_v10 }
 0x171   :  { %v1538_v27 = vadd.f32 %v1537_v35, %v1536_v26  ;;  %1457 = vst.msk [vmem:[%s3365_s2 + $0x78] sm:$0xff] %vm767_vm0, %v1247_v43  ;;  %v1737_v47 = vadd.f32 %v1736_v41, %v1735_v33  ;;  %v1666_v3 = vmul.f32 %v1247_v43, %v1247_v43  ;;  %v1543_v2 = vsel %vm767_vm0, %v1247_v43, 0.0 }
 0x172   :  { %v1738_v42 = vsel %vm767_vm0, %v1663_v37, 0.0  ;;  %1455 = vst.msk [vmem:[%s3365_s2 + $0x68] sm:$0xff] %vm767_vm0, %v1239_v38  ;;  %v1539_v46 = vsel %vm767_vm0, %v1239_v38, 0.0  ;;  %v1664_v49 = vmul.f32 %v1239_v38, %v1239_v38  ;;  %v1742_v7 = vsel %vm767_vm0, %v1665_v39, 0.0 }
 0x173   :  { %v1540_v19 = vadd.f32 %v1539_v46, %v1538_v27  ;;  %v1739_v11 = vadd.f32 %v1738_v42, %v1737_v47  ;;  %v1744_v21 = vsel %vm767_vm0, %v1666_v3, 0.0 }
 0x174   :  { %v1740_v54 = vsel %vm767_vm0, %v1664_v49, 0.0  ;;  %v2914_v57 = vpop.f32.mrb[48].mxu0  ;;  %v2064_v31 = vpop.f32.mrb[48].mxu1 }
 0x175   :  { %v1542_v58 = vadd.f32 %v1541_v50, %v1540_v19  ;;  %v1260_v61 = vadd.f32 %v2064_v31, %v2810_v25  ;;  %v996_v23 = vpop.f32.mrb[49].mxu0  ;;  %v1251_v62 = vpop.f32.mrb[49].mxu1  ;;  %v1741_v5 = vadd.f32 %v1740_v54, %v1739_v11 }
 0x176   :  { %v1252_v6 = vadd.f32 %v1251_v62, %v2783_v53  ;;  %v2919_v15 = vpop.f32.mrb[50].mxu0  ;;  %v2065_v59 = vpop.f32.mrb[50].mxu1 }
 0x177   :  { %1460 = vst.msk [vmem:[%s3365_s2 + $0x90] sm:$0xff] %vm767_vm0, %v1260_v61  ;;  %v1544_v10 = vadd.f32 %v1543_v2, %v1542_v58  ;;  %v1263_v25 = vadd.f32 %v2065_v59, %v2816_v45  ;;  %v999_v51 = vpop.f32.mrb[51].mxu0  ;;  %v1254_v63 = vpop.f32.mrb[51].mxu1  ;;  %v1743_v14 = vadd.f32 %v1742_v7, %v1741_v5  ;;  %v1549_v33 = vsel %vm767_vm0, %v1260_v61, 0.0 }
 0x178   :  { %1458 = vst.msk [vmem:[%s3365_s2 + $0x80] sm:$0xff] %vm767_vm0, %v1252_v6  ;;  %v1545_v53 = vsel %vm767_vm0, %v1252_v6, 0.0  ;;  %v1667_v17 = vmul.f32 %v1252_v6, %v1252_v6  ;;  %v1255_v18 = vadd.f32 %v1254_v63, %v2786_v1  ;;  %v1669_v1 = vmul.f32 %v1260_v61, %v1260_v61 }
 0x179   :  { %v1546_v22 = vadd.f32 %v1545_v53, %v1544_v10  ;;  %1461 = vst.msk [vmem:[%s3365_s2 + $0x98] sm:$0xff] %vm767_vm0, %v1263_v25  ;;  %v1745_v45 = vadd.f32 %v1744_v21, %v1743_v14  ;;  %v1670_v27 = vmul.f32 %v1263_v25, %v1263_v25  ;;  %v1551_v39 = vsel %vm767_vm0, %v1263_v25, 0.0 }
 0x17a   :  { %v1746_v26 = vsel %vm767_vm0, %v1667_v17, 0.0  ;;  %1459 = vst.msk [vmem:[%s3365_s2 + $0x88] sm:$0xff] %vm767_vm0, %v1255_v18  ;;  %v1547_v43 = vsel %vm767_vm0, %v1255_v18, 0.0  ;;  %v1668_v29 = vmul.f32 %v1255_v18, %v1255_v18  ;;  %v1750_v31 = vsel %vm767_vm0, %v1669_v1, 0.0 }
 0x17b   :  { %v1548_v30 = vadd.f32 %v1547_v43, %v1546_v22  ;;  %v1747_v35 = vadd.f32 %v1746_v26, %v1745_v45  ;;  %v1752_v5 = vsel %vm767_vm0, %v1670_v27, 0.0 }
 0x17c   :  { %v1748_v37 = vsel %vm767_vm0, %v1668_v29, 0.0  ;;  %v1002_v38 = vpop.f32.mrb[52].mxu0  ;;  %v2068_v41 = vpop.f32.mrb[52].mxu1 }
 0x17d   :  { %v1550_v47 = vadd.f32 %v1549_v33, %v1548_v30  ;;  %v1276_v42 = vadd.f32 %v2068_v41, %v2882_v9  ;;  %v1004_v46 = vpop.f32.mrb[53].mxu0  ;;  %v1267_v49 = vpop.f32.mrb[53].mxu1  ;;  %v1749_v19 = vadd.f32 %v1748_v37, %v1747_v35 }
 0x17e   :  { %v1268_v50 = vadd.f32 %v1267_v49, %v2841_v13  ;;  %v1005_v11 = vpop.f32.mrb[54].mxu0  ;;  %v2069_v54 = vpop.f32.mrb[54].mxu1 }
 0x17f   :  { %1464 = vst.msk [vmem:[%s3365_s2 + $0xb0] sm:$0xff] %vm767_vm0, %v1276_v42  ;;  %v1552_v3 = vadd.f32 %v1551_v39, %v1550_v47  ;;  %v1279_v58 = vadd.f32 %v2069_v54, %v2887_v55  ;;  %v1007_v9 = vpop.f32.mrb[55].mxu0  ;;  %v1270_v61 = vpop.f32.mrb[55].mxu1  ;;  %v1751_v23 = vadd.f32 %v1750_v31, %v1749_v19  ;;  %v1557_v51 = vsel %vm767_vm0, %v1276_v42, 0.0 }
 0x180   :  { %1462 = vst.msk [vmem:[%s3365_s2 + $0xa0] sm:$0xff] %vm767_vm0, %v1268_v50  ;;  %v1553_v13 = vsel %vm767_vm0, %v1268_v50, 0.0  ;;  %v1671_v62 = vmul.f32 %v1268_v50, %v1268_v50  ;;  %v1271_v2 = vadd.f32 %v1270_v61, %v2855_v34  ;;  %v1673_v34 = vmul.f32 %v1276_v42, %v1276_v42 }
 0x181   :  { %v1554_v6 = vadd.f32 %v1553_v13, %v1552_v3  ;;  %1465 = vst.msk [vmem:[%s3365_s2 + $0xb8] sm:$0xff] %vm767_vm0, %v1279_v58  ;;  %v1753_v55 = vadd.f32 %v1752_v5, %v1751_v23  ;;  %v1674_v18 = vmul.f32 %v1279_v58, %v1279_v58  ;;  %v1559_v43 = vsel %vm767_vm0, %v1279_v58, 0.0 }
 0x182   :  { %v1754_v59 = vsel %vm767_vm0, %v1671_v62, 0.0  ;;  %1463 = vst.msk [vmem:[%s3365_s2 + $0xa8] sm:$0xff] %vm767_vm0, %v1271_v2  ;;  %v1555_v7 = vsel %vm767_vm0, %v1271_v2, 0.0  ;;  %v1672_v10 = vmul.f32 %v1271_v2, %v1271_v2  ;;  %v1758_v35 = vsel %vm767_vm0, %v1673_v34, 0.0 }
 0x183   :  { %v1556_v25 = vadd.f32 %v1555_v7, %v1554_v6  ;;  %v1755_v63 = vadd.f32 %v1754_v59, %v1753_v55  ;;  %v1760_v49 = vsel %vm767_vm0, %v1674_v18, 0.0 }
 0x184   :  { %v1756_v14 = vsel %vm767_vm0, %v1672_v10, 0.0  ;;  %v1010_v53 = vpop.f32.mrb[56].mxu0  ;;  %v2072_v17 = vpop.f32.mrb[56].mxu1 }
 0x185   :  { %v1558_v21 = vadd.f32 %v1557_v51, %v1556_v25  ;;  %v1292_v22 = vadd.f32 %v2072_v17, %v1002_v38  ;;  %v1012_v45 = vpop.f32.mrb[57].mxu0  ;;  %v1283_v26 = vpop.f32.mrb[57].mxu1  ;;  %v1757_v29 = vadd.f32 %v1756_v14, %v1755_v63 }
 0x186   :  { %v1284_v1 = vadd.f32 %v1283_v26, %v2914_v57  ;;  %v1013_v30 = vpop.f32.mrb[58].mxu0  ;;  %v2073_v33 = vpop.f32.mrb[58].mxu1 }
 0x187   :  { %1468 = vst.msk [vmem:[%s3365_s2 + $0xd0] sm:$0xff] %vm767_vm0, %v1292_v22  ;;  %v1560_v37 = vadd.f32 %v1559_v43, %v1558_v21  ;;  %v1295_v41 = vadd.f32 %v2073_v33, %v1005_v11  ;;  %v1015_v27 = vpop.f32.mrb[59].mxu0  ;;  %v1286_v38 = vpop.f32.mrb[59].mxu1  ;;  %v1759_v47 = vadd.f32 %v1758_v35, %v1757_v29  ;;  %v1565_v3 = vsel %vm767_vm0, %v1292_v22, 0.0 }
 0x188   :  { %1466 = vst.msk [vmem:[%s3365_s2 + $0xc0] sm:$0xff] %vm767_vm0, %v1284_v1  ;;  %v1561_v57 = vsel %vm767_vm0, %v1284_v1, 0.0  ;;  %v1675_v42 = vmul.f32 %v1284_v1, %v1284_v1  ;;  %v1287_v46 = vadd.f32 %v1286_v38, %v2919_v15  ;;  %v1677_v15 = vmul.f32 %v1292_v22, %v1292_v22 }
 0x189   :  { %v1562_v39 = vadd.f32 %v1561_v57, %v1560_v37  ;;  %1469 = vst.msk [vmem:[%s3365_s2 + $0xd8] sm:$0xff] %vm767_vm0, %v1295_v41  ;;  %v1761_v19 = vadd.f32 %v1760_v49, %v1759_v47  ;;  %v1678_v13 = vmul.f32 %v1295_v41, %v1295_v41  ;;  %v1567_v55 = vsel %vm767_vm0, %v1295_v41, 0.0 }
 0x18a   :  { %v1762_v50 = vsel %vm767_vm0, %v1675_v42, 0.0  ;;  %1467 = vst.msk [vmem:[%s3365_s2 + $0xc8] sm:$0xff] %vm767_vm0, %v1287_v46  ;;  %v1563_v11 = vsel %vm767_vm0, %v1287_v46, 0.0  ;;  %v1676_v54 = vmul.f32 %v1287_v46, %v1287_v46  ;;  %v1766_v25 = vsel %vm767_vm0, %v1677_v15, 0.0 }
 0x18b   :  { %v1564_v31 = vadd.f32 %v1563_v11, %v1562_v39  ;;  %v1763_v58 = vadd.f32 %v1762_v50, %v1761_v19  ;;  %v1768_v45 = vsel %vm767_vm0, %v1678_v13, 0.0 }
 0x18c   :  { %v1764_v9 = vsel %vm767_vm0, %v1676_v54, 0.0  ;;  %v1018_v61 = vpop.f32.mrb[60].mxu0  ;;  %v2076_v23 = vpop.f32.mrb[60].mxu1 }
 0x18d   :  { %v1566_v62 = vadd.f32 %v1565_v3, %v1564_v31  ;;  %v1308_v2 = vadd.f32 %v2076_v23, %v1018_v61  ;;  %v1020_v5 = vpop.f32.mrb[61].mxu0  ;;  %v1299_v6 = vpop.f32.mrb[61].mxu1  ;;  %v1765_v59 = vadd.f32 %v1764_v9, %v1763_v58 }
 0x18e   :  { %v1300_v7 = vadd.f32 %v1299_v6, %v1010_v53  ;;  %v1021_v10 = vpop.f32.mrb[62].mxu0  ;;  %v2077_v34 = vpop.f32.mrb[62].mxu1 }
 0x18f   :  { %1472 = vst.msk [vmem:[%s3365_s2 + $0xf0] sm:$0xff] %vm767_vm0, %v1308_v2  ;;  %v1568_v51 = vadd.f32 %v1567_v55, %v1566_v62  ;;  %v1311_v63 = vadd.f32 %v2077_v34, %v1021_v10  ;;  %v1023_v14 = vpop.f32.mrb[63].mxu0  ;;  %v1302_v17 = vpop.f32.mrb[63].mxu1  ;;  %v1767_v18 = vadd.f32 %v1766_v25, %v1765_v59  ;;  %v1573_v37 = vsel %vm767_vm0, %v1308_v2, 0.0 }
 0x190   :  { %1470 = vst.msk [vmem:[%s3365_s2 + $0xe0] sm:$0xff] %vm767_vm0, %v1300_v7  ;;  %v1569_v53 = vsel %vm767_vm0, %v1300_v7, 0.0  ;;  %v1679_v21 = vmul.f32 %v1300_v7, %v1300_v7  ;;  %v1303_v22 = vadd.f32 %v1302_v17, %v1013_v30  ;;  %v1681_v30 = vmul.f32 %v1308_v2, %v1308_v2 }
 0x191   :  { %v1570_v26 = vadd.f32 %v1569_v53, %v1568_v51  ;;  %1473 = vst.msk [vmem:[%s3365_s2 + $0xf8] sm:$0xff] %vm767_vm0, %v1311_v63  ;;  %v1769_v43 = vadd.f32 %v1768_v45, %v1767_v18  ;;  %v1682_v57 = vmul.f32 %v1311_v63, %v1311_v63  ;;  %v1575_v39 = vsel %vm767_vm0, %v1311_v63, 0.0 }
 0x192   :  { %v1770_v29 = vsel %vm767_vm0, %v1679_v21, 0.0  ;;  %1471 = vst.msk [vmem:[%s3365_s2 + $0xe8] sm:$0xff] %vm767_vm0, %v1303_v22  ;;  %v1571_v1 = vsel %vm767_vm0, %v1303_v22, 0.0  ;;  %v1680_v33 = vmul.f32 %v1303_v22, %v1303_v22  ;;  %v1774_v15 = vsel %vm767_vm0, %v1681_v30, 0.0 }
 0x193   :  { %v1572_v35 = vadd.f32 %v1571_v1, %v1570_v26  ;;  %v1771_v41 = vadd.f32 %v1770_v29, %v1769_v43  ;;  %v1776_v62 = vsel %vm767_vm0, %v1682_v57, 0.0 }
 0x194   :  { %v1772_v27 = vsel %vm767_vm0, %v1680_v33, 0.0  ;;  %v1026_v38 = vpop.f32.mrb[64].mxu0  ;;  %v2080_v47 = vpop.f32.mrb[64].mxu1 }
 0x195   :  { %v1574_v42 = vadd.f32 %v1573_v37, %v1572_v35  ;;  %v1028_v46 = vpop.f32.mrb[65].mxu0  ;;  %v1315_v49 = vpop.f32.mrb[65].mxu1  ;;  %v1773_v19 = vadd.f32 %v1772_v27, %v1771_v41 }
 0x196   :  { %v1316_v50 = vadd.f32 %v1315_v49, %v1026_v38  ;;  %v1029_v11 = vpop.f32.mrb[66].mxu0  ;;  %v2081_v54 = vpop.f32.mrb[66].mxu1 }
 0x197   :  { %v1576_v31 = vadd.f32 %v1575_v39, %v1574_v42  ;;  %v1031_v3 = vpop.f32.mrb[67].mxu0  ;;  %v1318_v58 = vpop.f32.mrb[67].mxu1  ;;  %v1775_v9 = vadd.f32 %v1774_v15, %v1773_v19 }
 0x198   :  { %1474 = vst.msk [vmem:[%s3365_s2 + $0x100] sm:$0xff] %vm767_vm0, %v1316_v50  ;;  %v1577_v61 = vsel %vm767_vm0, %v1316_v50, 0.0  ;;  %v1683_v23 = vmul.f32 %v1316_v50, %v1316_v50  ;;  %v1319_v13 = vadd.f32 %v1318_v58, %v1029_v11 }
 0x199   :  { %v1578_v2 = vadd.f32 %v1577_v61, %v1576_v31  ;;  %v1777_v5 = vadd.f32 %v1776_v62, %v1775_v9 }
 0x19a   :  { %v1778_v6 = vsel %vm767_vm0, %v1683_v23, 0.0  ;;  %1475 = vst.msk [vmem:[%s3365_s2 + $0x108] sm:$0xff] %vm767_vm0, %v1319_v13  ;;  %v1579_v55 = vsel %vm767_vm0, %v1319_v13, 0.0  ;;  %v1684_v59 = vmul.f32 %v1319_v13, %v1319_v13 }
 0x19b   :  { %v1580_v7 = vadd.f32 %v1579_v55, %v1578_v2  ;;  %v1779_v10 = vadd.f32 %v1778_v6, %v1777_v5 }
 0x19c   :  { %v1780_v34 = vsel %vm767_vm0, %v1684_v59, 0.0  ;;  %v1034_v25 = vpop.f32.mrb[68].mxu0  ;;  %v2084_v51 = vpop.f32.mrb[68].mxu1 }
 0x19d   :  { %v1324_v63 = vadd.f32 %v2080_v47, %v1034_v25  ;;  %v1036_v14 = vpop.f32.mrb[69].mxu0  ;;  %v1331_v17 = vpop.f32.mrb[69].mxu1  ;;  %v1781_v18 = vadd.f32 %v1780_v34, %v1779_v10 }
 0x19e   :  { %v1037_v53 = vpop.f32.mrb[70].mxu0  ;;  %v2085_v21 = vpop.f32.mrb[70].mxu1 }
 0x19f   :  { %1476 = vst.msk [vmem:[%s3365_s2 + $0x110] sm:$0xff] %vm767_vm0, %v1324_v63  ;;  %v1581_v22 = vsel %vm767_vm0, %v1324_v63, 0.0  ;;  %v1685_v45 = vmul.f32 %v1324_v63, %v1324_v63  ;;  %v1327_v26 = vadd.f32 %v2081_v54, %v1037_v53  ;;  %v1039_v43 = vpop.f32.mrb[71].mxu0  ;;  %v1334_v29 = vpop.f32.mrb[71].mxu1 }
 0x1a0   :  { %v1582_v1 = vadd.f32 %v1581_v22, %v1580_v7 }
 0x1a1   :  { %v1782_v33 = vsel %vm767_vm0, %v1685_v45, 0.0  ;;  %1477 = vst.msk [vmem:[%s3365_s2 + $0x118] sm:$0xff] %vm767_vm0, %v1327_v26  ;;  %v1583_v30 = vsel %vm767_vm0, %v1327_v26, 0.0  ;;  %v1686_v35 = vmul.f32 %v1327_v26, %v1327_v26 }
 0x1a2   :  { %v1783_v37 = vadd.f32 %v1782_v33, %v1781_v18  ;;  %v1584_v41 = vadd.f32 %v1583_v30, %v1582_v1 }
 0x1a3   :  { %v1784_v27 = vsel %vm767_vm0, %v1686_v35, 0.0 }
 0x1a4   :  { %v1785_v38 = vadd.f32 %v1784_v27, %v1783_v37  ;;  %v1042_v47 = vpop.f32.mrb[72].mxu0  ;;  %v3051_v57 = vpop.f32.mrb[72].mxu1 }
 0x1a5   :  { %v1332_v42 = vadd.f32 %v1331_v17, %v1042_v47  ;;  %v1044_v46 = vpop.f32.mrb[73].mxu0  ;;  %v1347_v49 = vpop.f32.mrb[73].mxu1 }
 0x1a6   :  { %v1045_v39 = vpop.f32.mrb[74].mxu0  ;;  %v3053_v19 = vpop.f32.mrb[74].mxu1 }
 0x1a7   :  { %1478 = vst.msk [vmem:[%s3365_s2 + $0x120] sm:$0xff] %vm767_vm0, %v1332_v42  ;;  %v1585_v50 = vsel %vm767_vm0, %v1332_v42, 0.0  ;;  %v1687_v11 = vmul.f32 %v1332_v42, %v1332_v42  ;;  %v1335_v54 = vadd.f32 %v1334_v29, %v1045_v39  ;;  %v1047_v15 = vpop.f32.mrb[75].mxu0  ;;  %v1350_v31 = vpop.f32.mrb[75].mxu1 }
 0x1a8   :  { %v1586_v3 = vadd.f32 %v1585_v50, %v1584_v41 }
 0x1a9   :  { %v1786_v58 = vsel %vm767_vm0, %v1687_v11, 0.0  ;;  %1479 = vst.msk [vmem:[%s3365_s2 + $0x128] sm:$0xff] %vm767_vm0, %v1335_v54  ;;  %v1587_v9 = vsel %vm767_vm0, %v1335_v54, 0.0  ;;  %v1688_v61 = vmul.f32 %v1335_v54, %v1335_v54 }
 0x1aa   :  { %v1787_v23 = vadd.f32 %v1786_v58, %v1785_v38  ;;  %v1588_v13 = vadd.f32 %v1587_v9, %v1586_v3 }
 0x1ab   :  { %v1788_v62 = vsel %vm767_vm0, %v1688_v61, 0.0 }
 0x1ac   :  { %v1789_v2 = vadd.f32 %v1788_v62, %v1787_v23  ;;  %v1050_v5 = vpop.f32.mrb[76].mxu0  ;;  %v3067_v6 = vpop.f32.mrb[76].mxu1 }
 0x1ad   :  { %v1340_v55 = vadd.f32 %v2084_v51, %v1050_v5  ;;  %v1052_v59 = vpop.f32.mrb[77].mxu0  ;;  %v3069_v7 = vpop.f32.mrb[77].mxu1 }
 0x1ae   :  { %v1053_v10 = vpop.f32.mrb[78].mxu0  ;;  %v3071_v34 = vpop.f32.mrb[78].mxu1 }
 0x1af   :  { %1480 = vst.msk [vmem:[%s3365_s2 + $0x130] sm:$0xff] %vm767_vm0, %v1340_v55  ;;  %v1589_v25 = vsel %vm767_vm0, %v1340_v55, 0.0  ;;  %v1689_v63 = vmul.f32 %v1340_v55, %v1340_v55  ;;  %v1343_v14 = vadd.f32 %v2085_v21, %v1053_v10  ;;  %v1055_v17 = vpop.f32.mrb[79].mxu0  ;;  %v3078_v18 = vpop.f32.mrb[79].mxu1 }
 0x1b0   :  { %v1590_v53 = vadd.f32 %v1589_v25, %v1588_v13 }
 0x1b1   :  { %v1790_v51 = vsel %vm767_vm0, %v1689_v63, 0.0  ;;  %1481 = vst.msk [vmem:[%s3365_s2 + $0x138] sm:$0xff] %vm767_vm0, %v1343_v14  ;;  %v1591_v22 = vsel %vm767_vm0, %v1343_v14, 0.0  ;;  %v1690_v45 = vmul.f32 %v1343_v14, %v1343_v14 }
 0x1b2   :  { %v1791_v26 = vadd.f32 %v1790_v51, %v1789_v2  ;;  %v1592_v43 = vadd.f32 %v1591_v22, %v1590_v53 }
 0x1b3   :  { %v1792_v29 = vsel %vm767_vm0, %v1690_v45, 0.0 }
 0x1b4   :  { %v1793_v1 = vadd.f32 %v1792_v29, %v1791_v26  ;;  %v1058_v21 = vpop.f32.mrb[80].mxu0  ;;  %v2096_v33 = vpop.f32.mrb[80].mxu1 }
 0x1b5   :  { %v1348_v30 = vadd.f32 %v1347_v49, %v1058_v21  ;;  %v3088_v35 = vadd.f32 %v2096_v33, %v2731_v60  ;;  %v1060_v37 = vpop.f32.mrb[81].mxu0  ;;  %v1379_v41 = vpop.f32.mrb[81].mxu1 }
 0x1b6   :  { %v3091_v27 = vadd.f32 %v1379_v41, %v2725_v52  ;;  %v1061_v38 = vpop.f32.mrb[82].mxu0  ;;  %v2097_v47 = vpop.f32.mrb[82].mxu1 }
 0x1b7   :  { %1482 = vst.msk [vmem:[%s3365_s2 + $0x140] sm:$0xff] %vm767_vm0, %v1348_v30  ;;  %v1593_v42 = vsel %vm767_vm0, %v1348_v30, 0.0  ;;  %v1691_v46 = vmul.f32 %v1348_v30, %v1348_v30  ;;  %1492 = vst.msk [vmem:[%s3365_s2 + $0x190] sm:$0xff] %vm767_vm0, %v3088_v35  ;;  %v1063_v60 = vpop.f32.mrb[83].mxu0  ;;  %v1382_v49 = vpop.f32.mrb[83].mxu1  ;;  %v1351_v39 = vadd.f32 %v1350_v31, %v1061_v38  ;;  %v3110_v11 = vadd.f32 %v2097_v47, %v2733_v0 }
 0x1b8   :  { %v1594_v52 = vadd.f32 %v1593_v42, %v1592_v43  ;;  %1490 = vst.msk [vmem:[%s3365_s2 + $0x180] sm:$0xff] %vm767_vm0, %v3091_v27  ;;  %v3113_v54 = vadd.f32 %v1382_v49, %v2729_v56 }
 0x1b9   :  { %v1794_v50 = vsel %vm767_vm0, %v1691_v46, 0.0  ;;  %1483 = vst.msk [vmem:[%s3365_s2 + $0x148] sm:$0xff] %vm767_vm0, %v1351_v39  ;;  %v1595_v3 = vsel %vm767_vm0, %v1351_v39, 0.0  ;;  %v1692_v58 = vmul.f32 %v1351_v39, %v1351_v39  ;;  %1493 = vst.msk [vmem:[%s3365_s2 + $0x198] sm:$0xff] %vm767_vm0, %v3110_v11 }
 0x1ba   :  { %v1795_v15 = vadd.f32 %v1794_v50, %v1793_v1  ;;  %v1596_v9 = vadd.f32 %v1595_v3, %v1594_v52  ;;  %1491 = vst.msk [vmem:[%s3365_s2 + $0x188] sm:$0xff] %vm767_vm0, %v3113_v54 }
 0x1bb   :  { %v1796_v56 = vsel %vm767_vm0, %v1692_v58, 0.0 }
 0x1bc   :  { %v1066_v0 = vpop.f32.mrb[84].mxu0  ;;  %v2100_v31 = vpop.f32.mrb[84].mxu1  ;;  %v1797_v61 = vadd.f32 %v1796_v56, %v1795_v15 }
 0x1bd   :  { %v1356_v23 = vadd.f32 %v3051_v57, %v1066_v0  ;;  %v3133_v13 = vadd.f32 %v2100_v31, %v2745_v12  ;;  %v1068_v62 = vpop.f32.mrb[85].mxu0  ;;  %v1395_v2 = vpop.f32.mrb[85].mxu1 }
 0x1be   :  { %v3136_v5 = vadd.f32 %v1395_v2, %v2737_v4  ;;  %v1069_v55 = vpop.f32.mrb[86].mxu0  ;;  %v2101_v59 = vpop.f32.mrb[86].mxu1 }
 0x1bf   :  { %1484 = vst.msk [vmem:[%s3365_s2 + $0x150] sm:$0xff] %vm767_vm0, %v1356_v23  ;;  %v1597_v10 = vsel %vm767_vm0, %v1356_v23, 0.0  ;;  %v1693_v25 = vmul.f32 %v1356_v23, %v1356_v23  ;;  %1496 = vst.msk [vmem:[%s3365_s2 + $0x1b0] sm:$0xff] %vm767_vm0, %v3133_v13  ;;  %v1071_v12 = vpop.f32.mrb[87].mxu0  ;;  %v1398_v57 = vpop.f32.mrb[87].mxu1  ;;  %v1359_v63 = vadd.f32 %v3053_v19, %v1069_v55  ;;  %v3156_v17 = vadd.f32 %v2101_v59, %v2749_v16 }
 0x1c0   :  { %v1598_v4 = vadd.f32 %v1597_v10, %v1596_v9  ;;  %1494 = vst.msk [vmem:[%s3365_s2 + $0x1a0] sm:$0xff] %vm767_vm0, %v3136_v5  ;;  %v3159_v53 = vadd.f32 %v1398_v57, %v2741_v8  ;;  %v1699_v12 = vmul.f32 %v3091_v27, %v3091_v27 }
 0x1c1   :  { %v1798_v14 = vsel %vm767_vm0, %v1693_v25, 0.0  ;;  %1485 = vst.msk [vmem:[%s3365_s2 + $0x158] sm:$0xff] %vm767_vm0, %v1359_v63  ;;  %v1599_v22 = vsel %vm767_vm0, %v1359_v63, 0.0  ;;  %v1694_v45 = vmul.f32 %v1359_v63, %v1359_v63  ;;  %1497 = vst.msk [vmem:[%s3365_s2 + $0x1b8] sm:$0xff] %vm767_vm0, %v3156_v17 }
 0x1c2   :  { %v1799_v51 = vadd.f32 %v1798_v14, %v1797_v61  ;;  %v1600_v26 = vadd.f32 %v1599_v22, %v1598_v4  ;;  %1495 = vst.msk [vmem:[%s3365_s2 + $0x1a8] sm:$0xff] %vm767_vm0, %v3159_v53 }
 0x1c3   :  { %v1800_v8 = vsel %vm767_vm0, %v1694_v45, 0.0  ;;  %v1701_v45 = vmul.f32 %v3088_v35, %v3088_v35 }
 0x1c4   :  { %v1074_v16 = vpop.f32.mrb[88].mxu0  ;;  %v2104_v19 = vpop.f32.mrb[88].mxu1  ;;  %v1801_v43 = vadd.f32 %v1800_v8, %v1799_v51  ;;  %v1611_v8 = vsel %vm767_vm0, %v3113_v54, 0.0 }
 0x1c5   :  { %v1364_v29 = vadd.f32 %v3069_v7, %v1074_v16  ;;  %v3179_v1 = vadd.f32 %v2104_v19, %v2761_v28  ;;  %v1076_v21 = vpop.f32.mrb[89].mxu0  ;;  %v1411_v33 = vpop.f32.mrb[89].mxu1 }
 0x1c6   :  { %v3182_v30 = vadd.f32 %v1411_v33, %v2753_v20  ;;  %v1077_v37 = vpop.f32.mrb[90].mxu0  ;;  %v2105_v41 = vpop.f32.mrb[90].mxu1 }
 0x1c7   :  { %1486 = vst.msk [vmem:[%s3365_s2 + $0x160] sm:$0xff] %vm767_vm0, %v1364_v29  ;;  %v1601_v38 = vsel %vm767_vm0, %v1364_v29, 0.0  ;;  %v1695_v47 = vmul.f32 %v1364_v29, %v1364_v29  ;;  %1500 = vst.msk [vmem:[%s3365_s2 + $0x1d0] sm:$0xff] %vm767_vm0, %v3179_v1  ;;  %v1079_v28 = vpop.f32.mrb[91].mxu0  ;;  %v1414_v7 = vpop.f32.mrb[91].mxu1  ;;  %v1367_v42 = vadd.f32 %v3078_v18, %v1077_v37  ;;  %v3202_v60 = vadd.f32 %v2105_v41, %v2765_v32 }
 0x1c8   :  { %v1602_v20 = vadd.f32 %v1601_v38, %v1600_v26  ;;  %1498 = vst.msk [vmem:[%s3365_s2 + $0x1c0] sm:$0xff] %vm767_vm0, %v3182_v30  ;;  %v3205_v49 = vadd.f32 %v1414_v7, %v2757_v24  ;;  %v1810_v26 = vsel %vm767_vm0, %v1699_v12, 0.0  ;;  %v1814_v37 = vsel %vm767_vm0, %v1701_v45, 0.0 }
 0x1c9   :  { %v1802_v46 = vsel %vm767_vm0, %v1695_v47, 0.0  ;;  %1487 = vst.msk [vmem:[%s3365_s2 + $0x168] sm:$0xff] %vm767_vm0, %v1367_v42  ;;  %v1603_v39 = vsel %vm767_vm0, %v1367_v42, 0.0  ;;  %v1696_v50 = vmul.f32 %v1367_v42, %v1367_v42  ;;  %1501 = vst.msk [vmem:[%s3365_s2 + $0x1d8] sm:$0xff] %vm767_vm0, %v3202_v60  ;;  %v1615_v41 = vsel %vm767_vm0, %v3110_v11, 0.0 }
 0x1ca   :  { %v1803_v52 = vadd.f32 %v1802_v46, %v1801_v43  ;;  %v1604_v15 = vadd.f32 %v1603_v39, %v1602_v20  ;;  %1499 = vst.msk [vmem:[%s3365_s2 + $0x1c8] sm:$0xff] %vm767_vm0, %v3205_v49  ;;  %v1702_v43 = vmul.f32 %v3110_v11, %v3110_v11  ;;  %v1704_v7 = vmul.f32 %v3159_v53, %v3159_v53 }
 0x1cb   :  { %v1804_v24 = vsel %vm767_vm0, %v1696_v50, 0.0  ;;  %v1705_v46 = vmul.f32 %v3133_v13, %v3133_v13 }
 0x1cc   :  { %v1082_v32 = vpop.f32.mrb[92].mxu0  ;;  %v2108_v18 = vpop.f32.mrb[92].mxu1  ;;  %v1805_v3 = vadd.f32 %v1804_v24, %v1803_v52  ;;  %v1816_v28 = vsel %vm767_vm0, %v1702_v43, 0.0  ;;  %v1619_v52 = vsel %vm767_vm0, %v3159_v53, 0.0  ;;  %v1820_v24 = vsel %vm767_vm0, %v1704_v7, 0.0 }
 0x1cd   :  { %v1372_v58 = vadd.f32 %v3067_v6, %v1082_v32  ;;  %v3225_v9 = vadd.f32 %v2108_v18, %v2777_v44  ;;  %v1084_v56 = vpop.f32.mrb[93].mxu0  ;;  %v1427_v0 = vpop.f32.mrb[93].mxu1  ;;  %v1707_v53 = vmul.f32 %v3182_v30, %v3182_v30 }
 0x1ce   :  { %v3228_v31 = vadd.f32 %v1427_v0, %v2769_v36  ;;  %v1085_v61 = vpop.f32.mrb[94].mxu0  ;;  %v2109_v23 = vpop.f32.mrb[94].mxu1 }
 0x1cf   :  { %1488 = vst.msk [vmem:[%s3365_s2 + $0x170] sm:$0xff] %vm767_vm0, %v1372_v58  ;;  %v1605_v62 = vsel %vm767_vm0, %v1372_v58, 0.0  ;;  %v1697_v2 = vmul.f32 %v1372_v58, %v1372_v58  ;;  %1504 = vst.msk [vmem:[%s3365_s2 + $0x1f0] sm:$0xff] %vm767_vm0, %v3225_v9  ;;  %v1087_v44 = vpop.f32.mrb[95].mxu0  ;;  %v1430_v6 = vpop.f32.mrb[95].mxu1  ;;  %v1375_v55 = vadd.f32 %v3071_v34, %v1085_v61  ;;  %v3248_v10 = vadd.f32 %v2109_v23, %v2781_v48 }
 0x1d0   :  { %v1606_v36 = vadd.f32 %v1605_v62, %v1604_v15  ;;  %1502 = vst.msk [vmem:[%s3365_s2 + $0x1e0] sm:$0xff] %vm767_vm0, %v3228_v31  ;;  %v3251_v25 = vadd.f32 %v1430_v6, %v2773_v40  ;;  %v1609_v40 = vsel %vm767_vm0, %v3091_v27, 0.0  ;;  %v1700_v48 = vmul.f32 %v3113_v54, %v3113_v54 }
 0x1d1   :  { %v1806_v59 = vsel %vm767_vm0, %v1697_v2, 0.0  ;;  %1489 = vst.msk [vmem:[%s3365_s2 + $0x178] sm:$0xff] %vm767_vm0, %v1375_v55  ;;  %v1607_v4 = vsel %vm767_vm0, %v1375_v55, 0.0  ;;  %v1698_v34 = vmul.f32 %v1375_v55, %v1375_v55  ;;  %1505 = vst.msk [vmem:[%s3365_s2 + $0x1f8] sm:$0xff] %vm767_vm0, %v3248_v10  ;;  %v1613_v27 = vsel %vm767_vm0, %v3088_v35, 0.0 }
 0x1d2   :  { %v1807_v57 = vadd.f32 %v1806_v59, %v1805_v3  ;;  %v1608_v63 = vadd.f32 %v1607_v4, %v1606_v36  ;;  %1503 = vst.msk [vmem:[%s3365_s2 + $0x1e8] sm:$0xff] %vm767_vm0, %v3251_v25  ;;  %v1812_v29 = vsel %vm767_vm0, %v1700_v48, 0.0  ;;  %v1703_v54 = vmul.f32 %v3136_v5, %v3136_v5 }
 0x1d3   :  { %v1808_v14 = vsel %vm767_vm0, %v1698_v34, 0.0  ;;  %v1617_v35 = vsel %vm767_vm0, %v3136_v5, 0.0  ;;  %v1621_v15 = vsel %vm767_vm0, %v3133_v13, 0.0  ;;  %v1706_v5 = vmul.f32 %v3156_v17, %v3156_v17 }
 0x1d4   :  { %v1610_v51 = vadd.f32 %v1609_v40, %v1608_v63  ;;  %v1809_v22 = vadd.f32 %v1808_v14, %v1807_v57  ;;  %v1818_v11 = vsel %vm767_vm0, %v1703_v54, 0.0  ;;  %v1822_v3 = vsel %vm767_vm0, %v1705_v46, 0.0 }
 0x1d5   :  { %v1623_v58 = vsel %vm767_vm0, %v3156_v17, 0.0  ;;  %v1824_v61 = vsel %vm767_vm0, %v1706_v5, 0.0  ;;  %v1625_v13 = vsel %vm767_vm0, %v3182_v30, 0.0  ;;  %v1708_v23 = vmul.f32 %v3205_v49, %v3205_v49 }
 0x1d6   :  { %v1612_v16 = vadd.f32 %v1611_v8, %v1610_v51  ;;  %v1811_v19 = vadd.f32 %v1810_v26, %v1809_v22  ;;  %v1709_v44 = vmul.f32 %v3179_v1, %v3179_v1  ;;  %v1826_v17 = vsel %vm767_vm0, %v1707_v53, 0.0 }
 0x1d7   :  { %v1627_v6 = vsel %vm767_vm0, %v3205_v49, 0.0  ;;  %v1629_v59 = vsel %vm767_vm0, %v3179_v1, 0.0  ;;  %v1710_v30 = vmul.f32 %v3202_v60, %v3202_v60  ;;  %v1828_v12 = vsel %vm767_vm0, %v1708_v23, 0.0 }
 0x1d8   :  { %v1614_v21 = vadd.f32 %v1613_v27, %v1612_v16  ;;  %v1813_v33 = vadd.f32 %v1812_v29, %v1811_v19  ;;  %v1830_v34 = vsel %vm767_vm0, %v1709_v44, 0.0  ;;  %v1631_v63 = vsel %vm767_vm0, %v3202_v60, 0.0 }
 0x1d9   :  { %v1711_v49 = vmul.f32 %v3228_v31, %v3228_v31  ;;  %v1832_v14 = vsel %vm767_vm0, %v1710_v30, 0.0  ;;  %v1633_v1 = vsel %vm767_vm0, %v3228_v31, 0.0  ;;  %v1712_v51 = vmul.f32 %v3251_v25, %v3251_v25 }
 0x1da   :  { %v1616_v38 = vadd.f32 %v1615_v41, %v1614_v21  ;;  %v1815_v47 = vadd.f32 %v1814_v37, %v1813_v33  ;;  %v1713_v26 = vmul.f32 %v3225_v9, %v3225_v9  ;;  %v1635_v8 = vsel %vm767_vm0, %v3251_v25, 0.0 }
 0x1db   :  { %v1834_v60 = vsel %vm767_vm0, %v1711_v49, 0.0  ;;  %v1637_v27 = vsel %vm767_vm0, %v3225_v9, 0.0  ;;  %v1714_v31 = vmul.f32 %v3248_v10, %v3248_v10  ;;  %v1836_v43 = vsel %vm767_vm0, %v1712_v51, 0.0 }
 0x1dc   :  { %v1618_v20 = vadd.f32 %v1617_v35, %v1616_v38  ;;  %v1817_v42 = vadd.f32 %v1816_v28, %v1815_v47  ;;  %v1838_v33 = vsel %vm767_vm0, %v1713_v26, 0.0  ;;  %v1639_v37 = vsel %vm767_vm0, %v3248_v10, 0.0 }
 0x1dd   :  { %v1840_v25 = vsel %vm767_vm0, %v1714_v31, 0.0 }
 0x1de   :  { %v1620_v39 = vadd.f32 %v1619_v52, %v1618_v20  ;;  %v1819_v50 = vadd.f32 %v1818_v11, %v1817_v42  ;;  %v1513_v52 = vld [vmem:[%s3366_s3] sm:$0x1] }
 0x1e0   :  { %v1821_v32 = vadd.f32 %v1820_v24, %v1819_v50  ;;  %v1622_v18 = vadd.f32 %v1621_v15, %v1620_v39  ;;  %v1650_v50 = vld [vmem:[%s3367_s4] sm:$0x1] }
 0x1e2   :  { %v1624_v56 = vadd.f32 %v1623_v58, %v1622_v18  ;;  %v1823_v0 = vadd.f32 %v1822_v3, %v1821_v32 }
 0x1e4   :  { %v1626_v62 = vadd.f32 %v1625_v13, %v1624_v56  ;;  %v1825_v2 = vadd.f32 %v1824_v61, %v1823_v0 }
 0x1e6   :  { %v1628_v36 = vadd.f32 %v1627_v6, %v1626_v62  ;;  %v1827_v55 = vadd.f32 %v1826_v17, %v1825_v2 }
 0x1e8   :  { %v1630_v57 = vadd.f32 %v1629_v59, %v1628_v36  ;;  %v1829_v4 = vadd.f32 %v1828_v12, %v1827_v55 }
 0x1ea   :  { %v1632_v40 = vadd.f32 %v1631_v63, %v1630_v57  ;;  %v1831_v48 = vadd.f32 %v1830_v34, %v1829_v4 }
 0x1ec   :  { %v1634_v22 = vadd.f32 %v1633_v1, %v1632_v40  ;;  %v1833_v45 = vadd.f32 %v1832_v14, %v1831_v48 }
 0x1ee   :  { %v1636_v16 = vadd.f32 %v1635_v8, %v1634_v22  ;;  %v1835_v19 = vadd.f32 %v1834_v60, %v1833_v45 }
 0x1f0   :  { %v1638_v29 = vadd.f32 %v1637_v27, %v1636_v16  ;;  %v1837_v21 = vadd.f32 %v1836_v43, %v1835_v19 }
 0x1f2   :  { %v1640_v41 = vadd.f32 %v1639_v37, %v1638_v29  ;;  %v1839_v54 = vadd.f32 %v1838_v33, %v1837_v21 }
 0x1f4   :  { %v1641_v38 = vrot.slane %v1640_v41, 4  ;;  %v1841_v47 = vadd.f32 %v1840_v25, %v1839_v54 }
 0x1f6   :  { %v1642_v28 = vadd.f32 %v1641_v38, %v1640_v41  ;;  %v1842_v9 = vrot.slane %v1841_v47, 4 }
 0x1f8   :  { %v1643_v35 = vrot.slane %v1642_v28, 2  ;;  %v1843_v7 = vadd.f32 %v1842_v9, %v1841_v47 }
 0x1fa   :  { %v1644_v20 = vadd.f32 %v1643_v35, %v1642_v28  ;;  %v1844_v42 = vrot.slane %v1843_v7, 2 }
 0x1fc   :  { %v1645_v46 = vrot.slane %v1644_v20, 1  ;;  %v1845_v11 = vadd.f32 %v1844_v42, %v1843_v7 }
 0x1fe   :  { %v1646_v39 = vadd.f32 %v1645_v46, %v1644_v20  ;;  %v1846_v10 = vrot.slane %v1845_v11, 1 }
 0x200   :  { %v1647_v15 = vadd.f32 %v1646_v39, %v1513_v52  ;;  %v1847_v5 = vadd.f32 %v1846_v10, %v1845_v11 }
 0x202   :  { %1649 = vst.msk [vmem:[%s3366_s3] sm:$0x1] %vm1510_vm1, %v1647_v15  ;;  %v1848_v24 = vadd.f32 %v1847_v5, %v1650_v50 }
 0x204   :  { %1849 = vst.msk [vmem:[%s3367_s4] sm:$0x1] %vm1510_vm1, %v1848_v24 }

// kernel: stem_forward.20
= control target key start
LH: loop header
LB: loop body
LE: loop exit
PB: predicated region body
PF: predicated region fallthrough
CT: control target
= control target key end

     0   :  { %vm311_vm0 = vcmask 261120   ;;  %vm551_vm1 = vcmask 516096   ;;  %v874_v42 = vmov 0.0   ;;  %vm530_vm2 = vcmask 523264   ;;  %s1164_s1 = inlined_call_operand.vmem [shape: bf16[288,64], index: 1, kind: input, shape index: {}]   ;;  %s1165_s0 = inlined_call_operand.vmem [shape: bf16[128,288], index: 0, kind: input, shape index: {}]   ;;  %s1166_s3 = inlined_call_operand.vmem [shape: f32[1,64], index: 3, kind: output, shape index: {1}]   ;;  %s1167_s4 = inlined_call_operand.vmem [shape: f32[1,64], index: 4, kind: output, shape index: {2}]   ;;  %s1168_s2 = inlined_call_operand.vmem [shape: f32[128,64], index: 2, kind: output, shape index: {0}]  }
   0x1   :  { %v824_v0 = vld [vmem:[%s1164_s1 + $0x40] sm:$0xff]   ;;  %v826_v2 = vld [vmem:[%s1164_s1 + $0x48] sm:$0xff]   ;;  %v828_v4 = vld [vmem:[%s1164_s1 + $0x50] sm:$0xff]   ;;  %552 = vst.msk [vmem:[%s1166_s3] sm:$0x1] %vm551_vm1, %v874_v42 }
   0x2   :  { %v825_v1 = vld [vmem:[%s1164_s1] sm:$0xff]   ;;  %713 = vmatprep.subr.bf16.mxu0 %v824_v0  ;;  %807 = vmatprep.subr.bf16.mxu1 %v824_v0  ;;  %v827_v3 = vld [vmem:[%s1164_s1 + $0x8] sm:$0xff]   ;;  %v829_v5 = vld [vmem:[%s1164_s1 + $0x10] sm:$0xff]   ;;  %553 = vst.msk [vmem:[%s1167_s4] sm:$0x1] %vm551_vm1, %v874_v42 }
   0x3   :  { %714 = vmatpush3.bf16.msra.mxu0 %v825_v1  ;;  %815 = vmatpush3.bf16.msra.mxu1 %v825_v1  ;;  %v830_v6 = vld [vmem:[%s1164_s1 + $0x58] sm:$0xff]   ;;  %v832_v8 = vld [vmem:[%s1164_s1 + $0x60] sm:$0xff]   ;;  %v834_v10 = vld [vmem:[%s1164_s1 + $0x68] sm:$0xff]  }
   0x4   :  { %715 = vmatprep.subr.bf16.mxu0 %v826_v2  ;;  %808 = vmatprep.subr.bf16.mxu1 %v826_v2  ;;  %v831_v7 = vld [vmem:[%s1164_s1 + $0x18] sm:$0xff]   ;;  %v833_v9 = vld [vmem:[%s1164_s1 + $0x20] sm:$0xff]   ;;  %v835_v13 = vld [vmem:[%s1164_s1 + $0x28] sm:$0xff]  }
   0x5   :  { %v842_v11 = vld [vmem:[%s1165_s0 + $0x4] ss:$12 sps:$4 sm:$0xff]   ;;  %v845_v12 = vld [vmem:[%s1165_s0 + $0x94] ss:$12 sps:$4 sm:$0xff]   ;;  %v838_v16 = vld [vmem:[%s1164_s1 + $0x78] sm:$0xff]  }
   0x6   :  { %v836_v14 = vld [vmem:[%s1164_s1 + $0x70] sm:$0xff]   ;;  %368 = vmatprep.mubr.bf16.mxu0 %v842_v11  ;;  %416 = vmatprep.mubr.bf16.mxu1 %v845_v12  ;;  %v839_v17 = vld [vmem:[%s1164_s1 + $0x38] sm:$0xff]   ;;  %v840_v18 = vld [vmem:[%s1165_s0] ss:$12 sps:$4 sm:$0xff]  }
   0x7   :  { %716 = vmatpush3.bf16.msra.mxu0 %v827_v3  ;;  %816 = vmatpush3.bf16.msra.mxu1 %v827_v3  ;;  %v837_v15 = vld [vmem:[%s1164_s1 + $0x30] sm:$0xff]   ;;  %v846_v19 = vld [vmem:[%s1164_s1 + $0x80] sm:$0xff]   ;;  %v847_v21 = vld [vmem:[%s1165_s0 + $0x1c] ss:$12 sps:$4 sm:$0xff]  }
   0x8   :  { %717 = vmatprep.subr.bf16.mxu0 %v828_v4  ;;  %809 = vmatprep.subr.bf16.mxu1 %v828_v4  ;;  %v843_v20 = vld [vmem:[%s1165_s0 + $0x90] ss:$12 sps:$4 sm:$0xff]   ;;  %v849_v22 = vld [vmem:[%s1165_s0 + $0xac] ss:$12 sps:$4 sm:$0xff]   ;;  %v852_v25 = vld [vmem:[%s1165_s0 + $0xa8] ss:$12 sps:$4 sm:$0xff]  }
   0x9   :  { %v853_v23 = vld [vmem:[%s1164_s1 + $0x88] sm:$0xff]   ;;  %v851_v24 = vld [vmem:[%s1165_s0 + $0x18] ss:$12 sps:$4 sm:$0xff]   ;;  %v854_v26 = vld [vmem:[%s1165_s0 + $0x34] ss:$12 sps:$4 sm:$0xff]  }
   0xa   :  { %v856_v27 = vld [vmem:[%s1165_s0 + $0x8] ss:$12 sps:$4 sm:$0xff]   ;;  %v857_v28 = vld [vmem:[%s1165_s0 + $0x30] ss:$12 sps:$4 sm:$0xff]   ;;  %v858_v29 = vld [vmem:[%s1165_s0 + $0x20] ss:$12 sps:$4 sm:$0xff]  }
   0xb   :  { %718 = vmatpush3.bf16.msra.mxu0 %v829_v5  ;;  %817 = vmatpush3.bf16.msra.mxu1 %v829_v5  ;;  %v859_v30 = vld [vmem:[%s1165_s0 + $0x4c] ss:$12 sps:$4 sm:$0xff]   ;;  %v862_v32 = vld [vmem:[%s1165_s0 + $0x48] ss:$12 sps:$4 sm:$0xff]   ;;  %v863_v33 = vld [vmem:[%s1165_s0 + $0x50] ss:$12 sps:$4 sm:$0xff]  }
   0xc   :  { %719 = vmatprep.subr.bf16.mxu0 %v830_v6  ;;  %810 = vmatprep.subr.bf16.mxu1 %v830_v6  ;;  %v861_v31 = vld [vmem:[%s1165_s0 + $0x38] ss:$12 sps:$4 sm:$0xff]   ;;  %v866_v35 = vld [vmem:[%s1165_s0 + $0x68] ss:$12 sps:$4 sm:$0xff]   ;;  %v867_v36 = vld [vmem:[%s1165_s0 + $0x60] ss:$12 sps:$4 sm:$0xff]  }
   0xd   :  { %v864_v34 = vld [vmem:[%s1165_s0 + $0x64] ss:$12 sps:$4 sm:$0xff]   ;;  %v868_v37 = vld [vmem:[%s1165_s0 + $0x80] ss:$12 sps:$4 sm:$0xff]   ;;  %v869_v38 = vld [vmem:[%s1165_s0 + $0x7c] ss:$12 sps:$4 sm:$0xff]  }
   0xe   :  { %v871_v39 = vld [vmem:[%s1165_s0 + $0x98] ss:$12 sps:$4 sm:$0xff]   ;;  %v873_v41 = vld [vmem:[%s1165_s0 + $0xb0] ss:$12 sps:$4 sm:$0xff]  }
   0xf   :  { %720 = vmatpush3.bf16.msra.mxu0 %v831_v7  ;;  %818 = vmatpush3.bf16.msra.mxu1 %v831_v7  ;;  %v872_v40 = vld [vmem:[%s1165_s0 + $0x78] ss:$12 sps:$4 sm:$0xff]  }
  0x10   :  { %721 = vmatprep.subr.bf16.mxu0 %v832_v8  ;;  %811 = vmatprep.subr.bf16.mxu1 %v832_v8 }
  0x13   :  { %722 = vmatpush3.bf16.msra.mxu0 %v833_v9  ;;  %819 = vmatpush3.bf16.msra.mxu1 %v833_v9 }
  0x14   :  { %723 = vmatprep.subr.bf16.mxu0 %v834_v10  ;;  %812 = vmatprep.subr.bf16.mxu1 %v834_v10 }
  0x17   :  { %724 = vmatpush3.bf16.msra.mxu0 %v835_v13  ;;  %820 = vmatpush3.bf16.msra.mxu1 %v835_v13 }
  0x18   :  { %725 = vmatprep.subr.bf16.mxu0 %v836_v14  ;;  %813 = vmatprep.subr.bf16.mxu1 %v836_v14 }
  0x1b   :  { %726 = vmatpush3.bf16.msra.mxu0 %v837_v15  ;;  %821 = vmatpush3.bf16.msra.mxu1 %v837_v15 }
  0x1c   :  { %727 = vmatprep.subr.bf16.mxu0 %v838_v16  ;;  %814 = vmatprep.subr.bf16.mxu1 %v838_v16 }
  0x1f   :  { %728 = vmatpush3.bf16.msra.mxu0 %v839_v17  ;;  %822 = vmatpush3.bf16.msra.mxu1 %v839_v17 }
  0x20   :  { %787 = vmatprep.subr.bf16.mxu1 %v846_v19 }
  0x22   :  { %369 = vmatmul.mubr.bf16.vlgmr.msra.gmra.mrb[0].mxu0 %v840_v18  ;;  %417 = vmatmul.mubr.bf16.vlgmr.msra.gmra.mrb[0].mxu1 %v843_v20 }
  0x23   :  { %788 = vmatpush3.bf16.msra.mxu1 %v846_v19  ;;  %376 = vmatprep.mubr.bf16.mxu0 %v847_v21 }
  0x24   :  { %424 = vmatprep.mubr.bf16.mxu1 %v849_v22  ;;  %789 = vmatprep.subr.bf16.mxu1 %v853_v23 }
  0x27   :  { %790 = vmatpush3.bf16.msra.mxu1 %v853_v23 }
  0x2a   :  { %377 = vmatmul.mubr.bf16.gmra.mrb[4].mxu0 %v851_v24  ;;  %425 = vmatmul.mubr.bf16.gmra.mrb[4].mxu1 %v852_v25 }
  0x2b   :  { %384 = vmatprep.mubr.bf16.mxu0 %v854_v26  ;;  %791 = vmatprep.mubr.msk.bf16.mxu1 %vm311_vm0, %v856_v27 }
  0x32   :  { %385 = vmatmul.mubr.bf16.gmra.mrb[8].mxu0 %v857_v28  ;;  %792 = vmatmul.mubr.msk.bf16.vlgmr.msra.gmra.mrb[8].mxu1 %vm311_vm0, %v858_v29 }
  0x33   :  { %392 = vmatprep.mubr.bf16.mxu0 %v859_v30  ;;  %795 = vmatprep.mubr.msk.bf16.mxu1 %vm311_vm0, %v861_v31 }
  0x3a   :  { %393 = vmatmul.mubr.bf16.gmra.mrb[12].mxu0 %v862_v32  ;;  %796 = vmatmul.mubr.msk.bf16.gmra.mrb[12].mxu1 %vm311_vm0, %v863_v33 }
  0x3b   :  { %400 = vmatprep.mubr.bf16.mxu0 %v864_v34  ;;  %799 = vmatprep.mubr.msk.bf16.mxu1 %vm311_vm0, %v866_v35 }
  0x42   :  { %401 = vmatmul.mubr.bf16.gmra.mrb[16].mxu0 %v867_v36  ;;  %800 = vmatmul.mubr.msk.bf16.gmra.mrb[16].mxu1 %vm311_vm0, %v868_v37 }
  0x43   :  { %408 = vmatprep.mubr.bf16.mxu0 %v869_v38  ;;  %803 = vmatprep.mubr.msk.bf16.mxu1 %vm311_vm0, %v871_v39 }
  0x4a   :  { %409 = vmatmul.mubr.bf16.gmra.mrb[20].mxu0 %v872_v40  ;;  %804 = vmatmul.mubr.msk.bf16.gmra.mrb[20].mxu1 %vm311_vm0, %v873_v41 }
  0xf5   :  { %v729_v43 = vpop.f32.mrb[0].mxu0  ;;  %v765_v44 = vpop.f32.mrb[0].mxu1 }
  0xf6   :  { %v730_v45 = vpop.f32.mrb[1].mxu0  ;;  %v766_v46 = vpop.f32.mrb[1].mxu1 }
  0xf7   :  { %v731_v47 = vadd.f32 %v730_v45, %v729_v43  ;;  %v732_v48 = vpop.f32.mrb[2].mxu0  ;;  %v1042_v49 = vadd.f32 %v766_v46, %v765_v44  ;;  %v768_v50 = vpop.f32.mrb[2].mxu1 }
  0xf8   :  { %v733_v51 = vpop.f32.mrb[3].mxu0  ;;  %v769_v52 = vpop.f32.mrb[3].mxu1 }
  0xf9   :  { %v734_v53 = vadd.f32 %v733_v51, %v732_v48  ;;  %v1044_v54 = vadd.f32 %v769_v52, %v768_v50 }
  0xfd   :  { %v735_v55 = vpop.f32.mrb[4].mxu0  ;;  %v771_v56 = vpop.f32.mrb[4].mxu1 }
  0xfe   :  { %v736_v57 = vpop.f32.mrb[5].mxu0  ;;  %v772_v58 = vpop.f32.mrb[5].mxu1 }
  0xff   :  { %v737_v59 = vadd.f32 %v736_v57, %v735_v55  ;;  %v738_v60 = vpop.f32.mrb[6].mxu0  ;;  %v1046_v61 = vadd.f32 %v772_v58, %v771_v56  ;;  %v774_v62 = vpop.f32.mrb[6].mxu1 }
 0x100   :  { %v739_v63 = vpop.f32.mrb[7].mxu0  ;;  %v775_v0 = vpop.f32.mrb[7].mxu1 }
 0x101   :  { %v740_v1 = vadd.f32 %v739_v63, %v738_v60  ;;  %v1048_v2 = vadd.f32 %v775_v0, %v774_v62 }
 0x105   :  { %v741_v3 = vpop.f32.mrb[8].mxu0  ;;  %v793_v4 = vpop.f32.mrb[8].mxu1 }
 0x106   :  { %v476_v5 = vadd.f32 %v793_v4, %v737_v59  ;;  %v742_v6 = vpop.f32.mrb[9].mxu0  ;;  %v467_v7 = vpop.f32.mrb[9].mxu1 }
 0x107   :  { %v743_v8 = vadd.f32 %v742_v6, %v741_v3  ;;  %v468_v9 = vadd.f32 %v731_v47, %v467_v7  ;;  %v744_v10 = vpop.f32.mrb[10].mxu0  ;;  %v794_v11 = vpop.f32.mrb[10].mxu1 }
 0x108   :  { %533 = vst.msk [vmem:[%s1168_s2 + $0x10] sm:$0xff] %vm530_vm2, %v476_v5  ;;  %v479_v12 = vadd.f32 %v794_v11, %v740_v1  ;;  %v745_v13 = vpop.f32.mrb[11].mxu0  ;;  %v470_v14 = vpop.f32.mrb[11].mxu1  ;;  %v598_v18 = vmul.f32 %v476_v5, %v476_v5  ;;  %v558_v24 = vsel %vm530_vm2, %v476_v5, 0.0 }
 0x109   :  { %531 = vst.msk [vmem:[%s1168_s2] sm:$0xff] %vm530_vm2, %v468_v9  ;;  %v596_v15 = vmul.f32 %v468_v9, %v468_v9  ;;  %v746_v16 = vadd.f32 %v745_v13, %v744_v10  ;;  %v471_v17 = vadd.f32 %v734_v53, %v470_v14  ;;  %v555_v19 = vsel %vm530_vm2, %v468_v9, 0.0 }
 0x10a   :  { %534 = vst.msk [vmem:[%s1168_s2 + $0x18] sm:$0xff] %vm530_vm2, %v479_v12  ;;  %v599_v22 = vmul.f32 %v479_v12, %v479_v12  ;;  %v615_v33 = vsel %vm530_vm2, %v598_v18, 0.0  ;;  %v560_v34 = vsel %vm530_vm2, %v479_v12, 0.0 }
 0x10b   :  { %532 = vst.msk [vmem:[%s1168_s2 + $0x8] sm:$0xff] %vm530_vm2, %v471_v17  ;;  %v556_v20 = vsel %vm530_vm2, %v471_v17, 0.0  ;;  %v597_v21 = vmul.f32 %v471_v17, %v471_v17  ;;  %v612_v25 = vsel %vm530_vm2, %v596_v15, 0.0 }
 0x10c   :  { %v557_v23 = vadd.f32 %v556_v20, %v555_v19  ;;  %v617_v39 = vsel %vm530_vm2, %v599_v22, 0.0 }
 0x10d   :  { %v613_v26 = vsel %vm530_vm2, %v597_v21, 0.0  ;;  %v747_v27 = vpop.f32.mrb[12].mxu0  ;;  %v797_v28 = vpop.f32.mrb[12].mxu1 }
 0x10e   :  { %v559_v29 = vadd.f32 %v558_v24, %v557_v23  ;;  %v614_v30 = vadd.f32 %v613_v26, %v612_v25  ;;  %v748_v31 = vpop.f32.mrb[13].mxu0  ;;  %v483_v32 = vpop.f32.mrb[13].mxu1 }
 0x10f   :  { %v749_v35 = vadd.f32 %v748_v31, %v747_v27  ;;  %v484_v36 = vadd.f32 %v743_v8, %v483_v32  ;;  %v750_v37 = vpop.f32.mrb[14].mxu0  ;;  %v798_v38 = vpop.f32.mrb[14].mxu1 }
 0x110   :  { %v616_v40 = vadd.f32 %v615_v33, %v614_v30  ;;  %v561_v41 = vadd.f32 %v560_v34, %v559_v29  ;;  %v751_v42 = vpop.f32.mrb[15].mxu0  ;;  %v486_v43 = vpop.f32.mrb[15].mxu1 }
 0x111   :  { %v492_v44 = vadd.f32 %v797_v28, %v749_v35  ;;  %535 = vst.msk [vmem:[%s1168_s2 + $0x20] sm:$0xff] %vm530_vm2, %v484_v36  ;;  %v562_v45 = vsel %vm530_vm2, %v484_v36, 0.0  ;;  %v600_v46 = vmul.f32 %v484_v36, %v484_v36  ;;  %v752_v47 = vadd.f32 %v751_v42, %v750_v37 }
 0x112   :  { %v563_v48 = vadd.f32 %v562_v45, %v561_v41  ;;  %v618_v50 = vadd.f32 %v617_v39, %v616_v40  ;;  %v487_v51 = vadd.f32 %v746_v16, %v486_v43 }
 0x113   :  { %537 = vst.msk [vmem:[%s1168_s2 + $0x30] sm:$0xff] %vm530_vm2, %v492_v44  ;;  %v619_v52 = vsel %vm530_vm2, %v600_v46, 0.0  ;;  %v495_v53 = vadd.f32 %v798_v38, %v752_v47  ;;  %v602_v55 = vmul.f32 %v492_v44, %v492_v44  ;;  %v566_v63 = vsel %vm530_vm2, %v492_v44, 0.0 }
 0x114   :  { %v620_v56 = vadd.f32 %v619_v52, %v618_v50  ;;  %536 = vst.msk [vmem:[%s1168_s2 + $0x28] sm:$0xff] %vm530_vm2, %v487_v51  ;;  %v564_v57 = vsel %vm530_vm2, %v487_v51, 0.0  ;;  %v601_v58 = vmul.f32 %v487_v51, %v487_v51 }
 0x115   :  { %538 = vst.msk [vmem:[%s1168_s2 + $0x38] sm:$0xff] %vm530_vm2, %v495_v53  ;;  %v565_v59 = vadd.f32 %v564_v57, %v563_v48  ;;  %v753_v60 = vpop.f32.mrb[16].mxu0  ;;  %v801_v62 = vpop.f32.mrb[16].mxu1  ;;  %v603_v0 = vmul.f32 %v495_v53, %v495_v53  ;;  %v623_v10 = vsel %vm530_vm2, %v602_v55, 0.0  ;;  %v568_v11 = vsel %vm530_vm2, %v495_v53, 0.0 }
 0x116   :  { %v621_v1 = vsel %vm530_vm2, %v601_v58, 0.0  ;;  %v754_v3 = vpop.f32.mrb[17].mxu0  ;;  %v499_v4 = vpop.f32.mrb[17].mxu1 }
 0x117   :  { %v567_v5 = vadd.f32 %v566_v63, %v565_v59  ;;  %v622_v6 = vadd.f32 %v621_v1, %v620_v56  ;;  %v755_v7 = vadd.f32 %v754_v3, %v753_v60  ;;  %v756_v8 = vpop.f32.mrb[18].mxu0  ;;  %v802_v9 = vpop.f32.mrb[18].mxu1  ;;  %v625_v18 = vsel %vm530_vm2, %v603_v0, 0.0 }
 0x118   :  { %v757_v12 = vpop.f32.mrb[19].mxu0  ;;  %v502_v13 = vpop.f32.mrb[19].mxu1 }
 0x119   :  { %v624_v14 = vadd.f32 %v623_v10, %v622_v6  ;;  %v758_v15 = vadd.f32 %v757_v12, %v756_v8  ;;  %v500_v16 = vadd.f32 %v755_v7, %v499_v4  ;;  %v569_v17 = vadd.f32 %v568_v11, %v567_v5 }
 0x11b   :  { %539 = vst.msk [vmem:[%s1168_s2 + $0x40] sm:$0xff] %vm530_vm2, %v500_v16  ;;  %v570_v19 = vsel %vm530_vm2, %v500_v16, 0.0  ;;  %v604_v20 = vmul.f32 %v500_v16, %v500_v16  ;;  %v626_v21 = vadd.f32 %v625_v18, %v624_v14  ;;  %v503_v22 = vadd.f32 %v758_v15, %v502_v13 }
 0x11c   :  { %v571_v23 = vadd.f32 %v570_v19, %v569_v17 }
 0x11d   :  { %v627_v24 = vsel %vm530_vm2, %v604_v20, 0.0  ;;  %540 = vst.msk [vmem:[%s1168_s2 + $0x48] sm:$0xff] %vm530_vm2, %v503_v22  ;;  %v572_v25 = vsel %vm530_vm2, %v503_v22, 0.0  ;;  %v605_v26 = vmul.f32 %v503_v22, %v503_v22  ;;  %v759_v27 = vpop.f32.mrb[20].mxu0  ;;  %v805_v28 = vpop.f32.mrb[20].mxu1 }
 0x11e   :  { %v628_v29 = vadd.f32 %v627_v24, %v626_v21  ;;  %v573_v30 = vadd.f32 %v572_v25, %v571_v23  ;;  %v524_v31 = vadd.f32 %v805_v28, %v1046_v61  ;;  %v760_v32 = vpop.f32.mrb[21].mxu0  ;;  %v515_v33 = vpop.f32.mrb[21].mxu1  ;;  %v554_v22 = vld [vmem:[%s1166_s3] sm:$0x1] }
 0x11f   :  { %v629_v34 = vsel %vm530_vm2, %v605_v26, 0.0  ;;  %v761_v35 = vadd.f32 %v760_v32, %v759_v27  ;;  %v516_v36 = vadd.f32 %v1042_v49, %v515_v33  ;;  %v762_v37 = vpop.f32.mrb[22].mxu0  ;;  %v806_v38 = vpop.f32.mrb[22].mxu1  ;;  %v595_v25 = vld [vmem:[%s1167_s4] sm:$0x1] }
 0x120   :  { %v630_v39 = vadd.f32 %v629_v34, %v628_v29  ;;  %545 = vst.msk [vmem:[%s1168_s2 + $0x70] sm:$0xff] %vm530_vm2, %v524_v31  ;;  %v527_v40 = vadd.f32 %v806_v38, %v1048_v2  ;;  %v763_v41 = vpop.f32.mrb[23].mxu0  ;;  %v518_v42 = vpop.f32.mrb[23].mxu1  ;;  %v610_v59 = vmul.f32 %v524_v31, %v524_v31  ;;  %v582_v1 = vsel %vm530_vm2, %v524_v31, 0.0 }
 0x121   :  { %v508_v61 = vadd.f32 %v801_v62, %v761_v35  ;;  %543 = vst.msk [vmem:[%s1168_s2 + $0x60] sm:$0xff] %vm530_vm2, %v516_v36  ;;  %v764_v43 = vadd.f32 %v763_v41, %v762_v37  ;;  %v519_v49 = vadd.f32 %v1044_v54, %v518_v42  ;;  %v608_v48 = vmul.f32 %v516_v36, %v516_v36 }
 0x122   :  { %546 = vst.msk [vmem:[%s1168_s2 + $0x78] sm:$0xff] %vm530_vm2, %v527_v40  ;;  %v578_v53 = vsel %vm530_vm2, %v516_v36, 0.0  ;;  %v611_v3 = vmul.f32 %v527_v40, %v527_v40  ;;  %v639_v7 = vsel %vm530_vm2, %v610_v59, 0.0  ;;  %v584_v8 = vsel %vm530_vm2, %v527_v40, 0.0 }
 0x123   :  { %541 = vst.msk [vmem:[%s1168_s2 + $0x50] sm:$0xff] %vm530_vm2, %v508_v61  ;;  %v574_v2 = vsel %vm530_vm2, %v508_v61, 0.0  ;;  %v606_v44 = vmul.f32 %v508_v61, %v508_v61  ;;  %v511_v45 = vadd.f32 %v802_v9, %v764_v43  ;;  %544 = vst.msk [vmem:[%s1168_s2 + $0x68] sm:$0xff] %vm530_vm2, %v519_v49  ;;  %v609_v56 = vmul.f32 %v519_v49, %v519_v49 }
 0x124   :  { %v575_v46 = vadd.f32 %v574_v2, %v573_v30  ;;  %v635_v60 = vsel %vm530_vm2, %v608_v48, 0.0  ;;  %v580_v62 = vsel %vm530_vm2, %v519_v49, 0.0  ;;  %v641_v11 = vsel %vm530_vm2, %v611_v3, 0.0 }
 0x125   :  { %v631_v47 = vsel %vm530_vm2, %v606_v44, 0.0  ;;  %542 = vst.msk [vmem:[%s1168_s2 + $0x58] sm:$0xff] %vm530_vm2, %v511_v45  ;;  %v576_v54 = vsel %vm530_vm2, %v511_v45, 0.0  ;;  %v607_v50 = vmul.f32 %v511_v45, %v511_v45  ;;  %v637_v4 = vsel %vm530_vm2, %v609_v56, 0.0 }
 0x126   :  { %v632_v51 = vadd.f32 %v631_v47, %v630_v39  ;;  %v577_v52 = vadd.f32 %v576_v54, %v575_v46 }
 0x127   :  { %v633_v55 = vsel %vm530_vm2, %v607_v50, 0.0 }
 0x128   :  { %v634_v57 = vadd.f32 %v633_v55, %v632_v51  ;;  %v579_v58 = vadd.f32 %v578_v53, %v577_v52 }
 0x12a   :  { %v581_v63 = vadd.f32 %v580_v62, %v579_v58  ;;  %v636_v0 = vadd.f32 %v635_v60, %v634_v57 }
 0x12c   :  { %v583_v5 = vadd.f32 %v582_v1, %v581_v63  ;;  %v638_v6 = vadd.f32 %v637_v4, %v636_v0 }
 0x12e   :  { %v585_v9 = vadd.f32 %v584_v8, %v583_v5  ;;  %v640_v10 = vadd.f32 %v639_v7, %v638_v6 }
 0x130   :  { %v586_v12 = vrot.slane %v585_v9, 4  ;;  %v642_v13 = vadd.f32 %v641_v11, %v640_v10 }
 0x132   :  { %v587_v14 = vadd.f32 %v586_v12, %v585_v9  ;;  %v643_v15 = vrot.slane %v642_v13, 4 }
 0x134   :  { %v588_v16 = vrot.slane %v587_v14, 2  ;;  %v644_v17 = vadd.f32 %v643_v15, %v642_v13 }
 0x136   :  { %v589_v18 = vadd.f32 %v588_v16, %v587_v14  ;;  %v645_v19 = vrot.slane %v644_v17, 2 }
 0x138   :  { %v590_v20 = vrot.slane %v589_v18, 1  ;;  %v646_v21 = vadd.f32 %v645_v19, %v644_v17 }
 0x13a   :  { %v591_v23 = vadd.f32 %v590_v20, %v589_v18  ;;  %v647_v24 = vrot.slane %v646_v21, 1 }
 0x13c   :  { %v592_v26 = vadd.f32 %v591_v23, %v554_v22  ;;  %v648_v27 = vadd.f32 %v647_v24, %v646_v21 }
 0x13e   :  { %594 = vst.msk [vmem:[%s1166_s3] sm:$0x1] %vm551_vm1, %v592_v26  ;;  %v649_v28 = vadd.f32 %v648_v27, %v595_v25 }
 0x140   :  { %650 = vst.msk [vmem:[%s1167_s4] sm:$0x1] %vm551_vm1, %v649_v28 }

// kernel: stem_forward.21
= control target key start
LH: loop header
LB: loop body
LE: loop exit
PB: predicated region body
PF: predicated region fallthrough
CT: control target
= control target key end

     0   :  { %v24_v0 = vlaneseq  ;;  %s548_s1 = inlined_call_operand.vmem [shape: f32[1,512], index: 1, kind: input, shape index: {}]   ;;  %s549_s2 = inlined_call_operand.vmem [shape: f32[1,512], index: 2, kind: input, shape index: {}]   ;;  %s550_s0 = inlined_call_operand.vmem [shape: f32[16,512], index: 0, kind: input, shape index: {}]   ;;  %s551_s3 = inlined_call_operand.vmem [shape: f32[16,512], index: 3, kind: output, shape index: {}]  }
   0x1   :  { %v22_v2 = vld [vmem:[%s548_s1] sm:$0xf]  ;;  %v15_v9 = vld [vmem:[%s550_s0 + $0x8] sm:$0xff]  ;;  %v16_v14 = vld [vmem:[%s550_s0 + $0x10] sm:$0xff] }
   0x2   :  { %v25_v1 = vshrl.u32 %v24_v0, 7  ;;  %v52_v3 = vld [vmem:[%s549_s2] sm:$0xf]  ;;  %v17_v15 = vld [vmem:[%s550_s0 + $0x18] sm:$0xff]  ;;  %v19_v29 = vld [vmem:[%s550_s0 + $0x28] sm:$0xff] }
   0x3   :  { %v14_v8 = vld [vmem:[%s550_s0] sm:$0xff]  ;;  %v20_v32 = vld [vmem:[%s550_s0 + $0x30] sm:$0xff]  ;;  %v21_v46 = vld [vmem:[%s550_s0 + $0x38] sm:$0xff] }
   0x4   :  { %v26_v4 = vsub.s32 0, %v25_v1  ;;  %v30_v5 = vsub.s32 1, %v25_v1  ;;  %v34_v6 = vsub.s32 2, %v25_v1  ;;  %v38_v7 = vsub.s32 3, %v25_v1  ;;  %v18_v26 = vld [vmem:[%s550_s0 + $0x20] sm:$0xff] }
   0x6   :  { %v27_v10 = vrot.slane %v22_v2, %v26_v4  ;;  %v57_v11 = vrot.slane %v52_v3, %v26_v4  ;;  %v31_v12 = vrot.slane %v22_v2, %v30_v5  ;;  %v61_v13 = vrot.slane %v52_v3, %v30_v5 }
   0x7   :  { %v35_v16 = vrot.slane %v22_v2, %v34_v6  ;;  %v65_v17 = vrot.slane %v52_v3, %v34_v6  ;;  %v39_v18 = vrot.slane %v22_v2, %v38_v7  ;;  %v69_v19 = vrot.slane %v52_v3, %v38_v7 }
   0x8   :  { %v44_v20 = vmul.f32 %v27_v10, %v14_v8  ;;  %v45_v21 = vmul.f32 %v31_v12, %v15_v9  ;;  %v48_v35 = vmul.f32 %v27_v10, %v18_v26  ;;  %v49_v38 = vmul.f32 %v31_v12, %v19_v29 }
   0x9   :  { %v46_v22 = vmul.f32 %v35_v16, %v16_v14  ;;  %v47_v23 = vmul.f32 %v39_v18, %v17_v15  ;;  %v50_v41 = vmul.f32 %v35_v16, %v20_v32  ;;  %v51_v53 = vmul.f32 %v39_v18, %v21_v46 }
   0xa   :  { %v74_v24 = vadd.f32 %v57_v11, %v44_v20  ;;  %v75_v25 = vadd.f32 %v61_v13, %v45_v21  ;;  %v407_v45 = vadd.f32 %v57_v11, %v48_v35  ;;  %v412_v50 = vadd.f32 %v61_v13, %v49_v38 }
   0xb   :  { %v383_v27 = vadd.f32 %v65_v17, %v46_v22  ;;  %v385_v28 = vadd.f32 %v69_v19, %v47_v23  ;;  %v414_v51 = vadd.f32 %v65_v17, %v50_v41  ;;  %v427_v61 = vadd.f32 %v69_v19, %v51_v53 }
   0xc   :  { %v390_v30 = vmul.f32 0.70710677, %v74_v24  ;;  %v392_v31 = vmul.f32 0.70710677, %v75_v25  ;;  %v417_v54 = vmul.f32 0.70710677, %v407_v45 }
   0xd   :  { %v398_v33 = vmul.f32 0.70710677, %v383_v27  ;;  %v401_v34 = vmul.f32 0.70710677, %v385_v28  ;;  %v420_v56 = vmul.f32 0.70710677, %v412_v50 }
   0xe   :  { %v98_v36 = vand.u32 2147483647, %v390_v30  ;;  %v99_v37 = vand.u32 2147483647, %v392_v31  ;;  %v102_v58 = vand.u32 2147483647, %v417_v54 }
   0xf   :  { %v100_v39 = vand.u32 2147483647, %v398_v33  ;;  %v101_v40 = vand.u32 2147483647, %v401_v34  ;;  %v424_v59 = vmul.f32 0.70710677, %v414_v51 }
  0x10   :  { %v106_v42 = vmul.f32 0.3275911, %v98_v36  ;;  %v107_v43 = vmul.f32 0.3275911, %v99_v37  ;;  %v210_v57 = vsub.f32 0.0, %v98_v36  ;;  %v211_v62 = vsub.f32 0.0, %v99_v37 }
  0x11   :  { %v108_v44 = vmul.f32 0.3275911, %v100_v39  ;;  %v109_v49 = vmul.f32 0.3275911, %v101_v40  ;;  %v103_v60 = vand.u32 2147483647, %v420_v56 }
  0x12   :  { %v114_v47 = vadd.f32 1.0, %v106_v42  ;;  %v115_v48 = vadd.f32 1.0, %v107_v43  ;;  %v212_v63 = vsub.f32 0.0, %v100_v39  ;;  %v110_v0 = vmul.f32 0.3275911, %v102_v58 }
  0x13   :  { %v116_v52 = vadd.f32 1.0, %v108_v44  ;;  %v117_v55 = vadd.f32 1.0, %v109_v49  ;;  %v104_v1 = vand.u32 2147483647, %v424_v59  ;;  %v111_v2 = vmul.f32 0.3275911, %v103_v60 }
  0x14   :  { %310 = vrcp.f32 %v114_v47  ;;  %v218_v3 = vmul.f32 %v210_v57, %v98_v36  ;;  %v213_v4 = vsub.f32 0.0, %v101_v40  ;;  %v118_v5 = vadd.f32 1.0, %v110_v0 }
  0x15   :  { %312 = vrcp.f32 %v115_v48  ;;  %v112_v6 = vmul.f32 0.3275911, %v104_v1  ;;  %v430_v7 = vmul.f32 0.5, %v74_v24  ;;  %v214_v8 = vsub.f32 0.0, %v102_v58 }
  0x16   :  { %314 = vrcp.f32 %v116_v52  ;;  %v119_v9 = vadd.f32 1.0, %v111_v2  ;;  %v433_v10 = vmul.f32 0.70710677, %v427_v61  ;;  %v219_v11 = vmul.f32 %v211_v62, %v99_v37 }
  0x17   :  { %316 = vrcp.f32 %v117_v55  ;;  %v220_v12 = vmul.f32 %v212_v63, %v100_v39  ;;  %v120_v13 = vadd.f32 1.0, %v112_v6  ;;  %v437_v15 = vmul.f32 0.5, %v75_v25 }
  0x18   :  { %318 = vrcp.f32 %v118_v5  ;;  %v215_v16 = vsub.f32 0.0, %v103_v60  ;;  %v105_v17 = vand.u32 2147483647, %v433_v10  ;;  %v226_v20 = vmul.f32 1.442695, %v218_v3 }
  0x19   :  { %320 = vrcp.f32 %v119_v9  ;;  %v444_v21 = vmul.f32 0.5, %v383_v27  ;;  %v221_v22 = vmul.f32 %v213_v4, %v101_v40  ;;  %v448_v24 = vmul.f32 0.5, %v385_v28 }
  0x1a   :  { %v222_v25 = vmul.f32 %v214_v8, %v102_v58  ;;  %v113_v26 = vmul.f32 0.3275911, %v105_v17  ;;  %v228_v32 = vmul.f32 1.442695, %v219_v11  ;;  %v230_v35 = vmul.f32 1.442695, %v220_v12 }
  0x1b   :  { %322 = vrcp.f32 %v120_v13  ;;  %v223_v38 = vmul.f32 %v215_v16, %v103_v60  ;;  %v216_v39 = vsub.f32 0.0, %v104_v1  ;;  %v232_v42 = vmul.f32 1.442695, %v221_v22 }
  0x1c   :  { %v121_v41 = vadd.f32 1.0, %v113_v26  ;;  %324 = vpow2.f32 %v226_v20  ;;  %v234_v44 = vmul.f32 1.442695, %v222_v25  ;;  %v217_v46 = vsub.f32 0.0, %v105_v17 }
  0x1d   :  { %v236_v53 = vmul.f32 1.442695, %v223_v38  ;;  %v224_v55 = vmul.f32 %v216_v39, %v104_v1  ;;  %vm258_vm0 = vcmp.lt.f32.partialorder %v390_v30, 0.0  ;;  %vm259_vm1 = vcmp.lt.f32.partialorder %v392_v31, 0.0 }
  0x1e   :  { %v435_v14 = vpop.eup %310  ;;  %326 = vrcp.f32 %v121_v41  ;;  %v225_v3 = vmul.f32 %v217_v46, %v105_v17  ;;  %vm260_vm2 = vcmp.lt.f32.partialorder %v398_v33, 0.0  ;;  %vm261_vm3 = vcmp.lt.f32.partialorder %v401_v34, 0.0 }
  0x1f   :  { %v440_v18 = vpop.eup %312  ;;  %v138_v19 = vmul.f32 1.0614054, %v435_v14  ;;  %328 = vpow2.f32 %v228_v32  ;;  %v238_v11 = vmul.f32 1.442695, %v224_v55  ;;  %vm262_vm4 = vcmp.lt.f32.partialorder %v417_v54, 0.0 }
  0x20   :  { %v139_v23 = vmul.f32 1.0614054, %v440_v18  ;;  %v450_v36 = vpop.eup %314  ;;  %330 = vpow2.f32 %v230_v35  ;;  %v240_v25 = vmul.f32 1.442695, %v225_v3  ;;  %vm263_vm5 = vcmp.lt.f32.partialorder %v420_v56, 0.0 }
  0x21   :  { %v146_v29 = vadd.f32 -1.4531521, %v138_v19  ;;  %v140_v40 = vmul.f32 1.0614054, %v450_v36  ;;  %v454_v28 = vpop.eup %316  ;;  %332 = vpow2.f32 %v232_v42  ;;  %vm264_vm6 = vcmp.lt.f32.partialorder %v424_v59, 0.0 }
  0x22   :  { %v147_v37 = vadd.f32 -1.4531521, %v139_v23  ;;  %v141_v49 = vmul.f32 1.0614054, %v454_v28  ;;  %v458_v57 = vpop.eup %318  ;;  %334 = vpow2.f32 %v234_v44  ;;  %vm265_vm7 = vcmp.lt.f32.partialorder %v433_v10, 0.0 }
  0x23   :  { %v154_v27 = vmul.f32 %v435_v14, %v146_v29  ;;  %v148_v48 = vadd.f32 -1.4531521, %v140_v40  ;;  %v462_v63 = vpop.eup %320  ;;  %v142_v2 = vmul.f32 1.0614054, %v458_v57  ;;  %336 = vpow2.f32 %v236_v53 }
  0x24   :  { %v155_v43 = vmul.f32 %v440_v18, %v147_v37  ;;  %v149_v62 = vadd.f32 -1.4531521, %v141_v49  ;;  %v143_v6 = vmul.f32 1.0614054, %v462_v63  ;;  %338 = vpow2.f32 %v238_v11 }
  0x25   :  { %v162_v47 = vadd.f32 1.4214138, %v154_v27  ;;  %v156_v60 = vmul.f32 %v450_v36, %v148_v48  ;;  %v150_v9 = vadd.f32 -1.4531521, %v142_v2  ;;  %v468_v12 = vpop.eup %322  ;;  %340 = vpow2.f32 %v240_v25 }
  0x26   :  { %v163_v52 = vadd.f32 1.4214138, %v155_v43  ;;  %v157_v1 = vmul.f32 %v454_v28, %v149_v62  ;;  %v151_v20 = vadd.f32 -1.4531521, %v143_v6  ;;  %v144_v23 = vmul.f32 1.0614054, %v468_v12  ;;  %v325_v26 = vpop.eup %324 }
  0x27   :  { %v170_v58 = vmul.f32 %v435_v14, %v162_v47  ;;  %v164_v5 = vadd.f32 1.4214138, %v156_v60  ;;  %v158_v22 = vmul.f32 %v458_v57, %v150_v9 }
  0x28   :  { %v171_v0 = vmul.f32 %v440_v18, %v163_v52  ;;  %v165_v19 = vadd.f32 1.4214138, %v157_v1  ;;  %v159_v37 = vmul.f32 %v462_v63, %v151_v20  ;;  %v479_v38 = vpop.eup %326  ;;  %v152_v27 = vadd.f32 -1.4531521, %v144_v23 }
  0x29   :  { %v178_v4 = vadd.f32 -0.28449672, %v170_v58  ;;  %v172_v16 = vmul.f32 %v450_v36, %v164_v5  ;;  %v166_v41 = vadd.f32 1.4214138, %v158_v22  ;;  %v329_v40 = vpop.eup %328  ;;  %v145_v53 = vmul.f32 1.0614054, %v479_v38 }
  0x2a   :  { %v179_v8 = vadd.f32 -0.28449672, %v171_v0  ;;  %v173_v35 = vmul.f32 %v454_v28, %v165_v19  ;;  %v167_v46 = vadd.f32 1.4214138, %v159_v37  ;;  %v331_v47 = vpop.eup %330  ;;  %v160_v52 = vmul.f32 %v468_v12, %v152_v27 }
  0x2b   :  { %v186_v13 = vmul.f32 %v435_v14, %v178_v4  ;;  %v180_v32 = vadd.f32 -0.28449672, %v172_v16  ;;  %v174_v49 = vmul.f32 %v458_v57, %v166_v41  ;;  %v333_v55 = vpop.eup %332  ;;  %v153_v4 = vadd.f32 -1.4531521, %v145_v53 }
  0x2c   :  { %v187_v17 = vmul.f32 %v440_v18, %v179_v8  ;;  %v181_v44 = vadd.f32 -0.28449672, %v173_v35  ;;  %v175_v62 = vmul.f32 %v462_v63, %v167_v46  ;;  %v335_v0 = vpop.eup %334  ;;  %v168_v3 = vadd.f32 1.4214138, %v160_v52 }
  0x2d   :  { %v194_v29 = vadd.f32 0.2548296, %v186_v13  ;;  %v188_v43 = vmul.f32 %v450_v36, %v180_v32  ;;  %v337_v9 = vpop.eup %336 }
  0x2e   :  { %v195_v39 = vadd.f32 0.2548296, %v187_v17  ;;  %v183_v8 = vadd.f32 -0.28449672, %v175_v62  ;;  %v176_v16 = vmul.f32 %v468_v12, %v168_v3  ;;  %v339_v41 = vpop.eup %338 }
  0x2f   :  { %v202_v42 = vmul.f32 %v435_v14, %v194_v29  ;;  %v196_v60 = vadd.f32 0.2548296, %v188_v43  ;;  %v189_v14 = vmul.f32 %v454_v28, %v181_v44 }
  0x30   :  { %v203_v48 = vmul.f32 %v440_v18, %v195_v39  ;;  %v182_v18 = vadd.f32 -0.28449672, %v174_v49  ;;  %v191_v22 = vmul.f32 %v462_v63, %v183_v8  ;;  %v184_v29 = vadd.f32 -0.28449672, %v176_v16 }
  0x31   :  { %v242_v58 = vmul.f32 %v325_v26, %v202_v42  ;;  %v204_v1 = vmul.f32 %v450_v36, %v196_v60  ;;  %v197_v6 = vadd.f32 0.2548296, %v189_v14  ;;  %v161_v36 = vmul.f32 %v479_v38, %v153_v4  ;;  %v341_v60 = vpop.eup %340 }
  0x32   :  { %v243_v2 = vmul.f32 %v329_v40, %v203_v48  ;;  %v190_v13 = vmul.f32 %v458_v57, %v182_v18  ;;  %v199_v39 = vadd.f32 0.2548296, %v191_v22  ;;  %v192_v40 = vmul.f32 %v468_v12, %v184_v29 }
  0x33   :  { %v250_v5 = vsub.f32 1.0, %v242_v58  ;;  %v244_v20 = vmul.f32 %v331_v47, %v204_v1  ;;  %v205_v17 = vmul.f32 %v454_v28, %v197_v6  ;;  %v169_v49 = vadd.f32 1.4214138, %v161_v36 }
  0x34   :  { %v251_v11 = vsub.f32 1.0, %v243_v2  ;;  %v198_v26 = vadd.f32 0.2548296, %v190_v13  ;;  %v207_v46 = vmul.f32 %v462_v63, %v199_v39  ;;  %v200_v48 = vadd.f32 0.2548296, %v192_v40 }
  0x35   :  { %v266_v19 = vsub.f32 0.0, %v250_v5  ;;  %v252_v35 = vsub.f32 1.0, %v244_v20  ;;  %v245_v37 = vmul.f32 %v333_v55, %v205_v17  ;;  %v86_v2 = vmul.f32 0.5, %v407_v45 }
  0x36   :  { %v267_v23 = vsub.f32 0.0, %v251_v11  ;;  %v206_v28 = vmul.f32 %v458_v57, %v198_v26  ;;  %v247_v55 = vmul.f32 %v337_v9, %v207_v46  ;;  %v208_v63 = vmul.f32 %v468_v12, %v200_v48 }
  0x37   :  { %v274_v32 = vsel %vm258_vm0, %v266_v19, %v250_v5  ;;  %v268_v43 = vsub.f32 0.0, %v252_v35  ;;  %v253_v44 = vsub.f32 1.0, %v245_v37  ;;  %v87_v4 = vmul.f32 0.5, %v412_v50 }
  0x38   :  { %v282_v27 = vadd.f32 1.0, %v274_v32  ;;  %v275_v25 = vsel %vm259_vm1, %v267_v23, %v251_v11  ;;  %v246_v47 = vmul.f32 %v335_v0, %v206_v28  ;;  %v248_v12 = vmul.f32 %v339_v41, %v208_v63 }
  0x39   :  { %v283_v42 = vadd.f32 1.0, %v275_v25  ;;  %v276_v31 = vsel %vm260_vm2, %v268_v43, %v252_v35  ;;  %v269_v53 = vsub.f32 0.0, %v253_v44  ;;  %v88_v9 = vmul.f32 0.5, %v414_v51 }
  0x3a   :  { %v290_v30 = vmul.f32 %v282_v27, %v430_v7  ;;  %v284_v57 = vadd.f32 1.0, %v276_v31  ;;  %v254_v58 = vsub.f32 1.0, %v246_v47  ;;  %v177_v7 = vmul.f32 %v479_v38, %v169_v49 }
  0x3b   :  { %v291_v52 = vmul.f32 %v283_v42, %v437_v15  ;;  %v277_v33 = vsel %vm261_vm3, %v269_v53, %v253_v44  ;;  %v255_v15 = vsub.f32 1.0, %v247_v55  ;;  %v256_v56 = vsub.f32 1.0, %v248_v12 }
  0x3c   :  { %298 = vst [vmem:[%s551_s3] sm:$0xff] %v290_v30  ;;  %v292_v14 = vmul.f32 %v284_v57, %v444_v21  ;;  %v285_v62 = vadd.f32 1.0, %v277_v33  ;;  %v270_v0 = vsub.f32 0.0, %v254_v58  ;;  %v185_v3 = vadd.f32 -0.28449672, %v177_v7 }
  0x3d   :  { %299 = vst [vmem:[%s551_s3 + $0x8] sm:$0xff] %v291_v52  ;;  %v271_v18 = vsub.f32 0.0, %v255_v15  ;;  %v272_v6 = vsub.f32 0.0, %v256_v56  ;;  %v89_v17 = vmul.f32 0.5, %v427_v61 }
  0x3e   :  { %300 = vst [vmem:[%s551_s3 + $0x10] sm:$0xff] %v292_v14  ;;  %v293_v34 = vmul.f32 %v285_v62, %v448_v24  ;;  %v278_v54 = vsel %vm262_vm4, %v270_v0, %v254_v58  ;;  %v193_v21 = vmul.f32 %v479_v38, %v185_v3 }
  0x3f   :  { %v286_v5 = vadd.f32 1.0, %v278_v54  ;;  %v279_v1 = vsel %vm263_vm5, %v271_v18, %v255_v15  ;;  %v280_v13 = vsel %vm264_vm6, %v272_v6, %v256_v56 }
  0x40   :  { %301 = vst [vmem:[%s551_s3 + $0x18] sm:$0xff] %v293_v34  ;;  %v287_v45 = vadd.f32 1.0, %v279_v1  ;;  %v201_v24 = vadd.f32 0.2548296, %v193_v21  ;;  %v288_v50 = vadd.f32 1.0, %v280_v13 }
  0x41   :  { %v294_v8 = vmul.f32 %v286_v5, %v86_v2 }
  0x42   :  { %v295_v11 = vmul.f32 %v287_v45, %v87_v4  ;;  %v209_v59 = vmul.f32 %v479_v38, %v201_v24  ;;  %v296_v16 = vmul.f32 %v288_v50, %v88_v9 }
  0x43   :  { %302 = vst [vmem:[%s551_s3 + $0x20] sm:$0xff] %v294_v8 }
  0x44   :  { %303 = vst [vmem:[%s551_s3 + $0x28] sm:$0xff] %v295_v11  ;;  %v249_v19 = vmul.f32 %v341_v60, %v209_v59  ;;  %304 = vst [vmem:[%s551_s3 + $0x30] sm:$0xff] %v296_v16 }
  0x46   :  { %v257_v51 = vsub.f32 1.0, %v249_v19 }
  0x48   :  { %v273_v20 = vsub.f32 0.0, %v257_v51 }
  0x4a   :  { %v281_v22 = vsel %vm265_vm7, %v273_v20, %v257_v51 }
  0x4b   :  { %v289_v23 = vadd.f32 1.0, %v281_v22 }
  0x4d   :  { %v297_v26 = vmul.f32 %v289_v23, %v89_v17 }
  0x4f   :  { %305 = vst [vmem:[%s551_s3 + $0x38] sm:$0xff] %v297_v26 }

// kernel: stem_forward.25
= control target key start
LH: loop header
LB: loop body
LE: loop exit
PB: predicated region body
PF: predicated region fallthrough
CT: control target
= control target key end

     0   :  { %v27_v0 = vlaneseq  ;;  %s216_s1 = inlined_call_operand.vmem [shape: f32[1,512], index: 1, kind: input, shape index: {}]   ;;  %s217_s2 = inlined_call_operand.vmem [shape: f32[1,512], index: 2, kind: input, shape index: {}]   ;;  %s218_s0 = inlined_call_operand.vmem [shape: f32[16,512], index: 0, kind: input, shape index: {}]   ;;  %s219_s3 = inlined_call_operand.vmem [shape: f32[16,512], index: 3, kind: input, shape index: {}]   ;;  %s220_s4 = inlined_call_operand.vmem [shape: f32[16,512], index: 4, kind: output, shape index: {}]  }
   0x1   :  { %v25_v2 = vld [vmem:[%s216_s1] sm:$0xf]  ;;  %v18_v6 = vld [vmem:[%s218_s0 + $0x8] sm:$0xff]  ;;  %v19_v10 = vld [vmem:[%s218_s0 + $0x10] sm:$0xff] }
   0x2   :  { %v28_v1 = vshrl.u32 %v27_v0, 7  ;;  %v55_v3 = vld [vmem:[%s217_s2] sm:$0xf]  ;;  %v22_v12 = vld [vmem:[%s218_s0 + $0x28] sm:$0xff]  ;;  %v20_v17 = vld [vmem:[%s218_s0 + $0x18] sm:$0xff] }
   0x3   :  { %v17_v4 = vld [vmem:[%s218_s0] sm:$0xff]  ;;  %v23_v18 = vld [vmem:[%s218_s0 + $0x30] sm:$0xff]  ;;  %v24_v19 = vld [vmem:[%s218_s0 + $0x38] sm:$0xff] }
   0x4   :  { %v29_v5 = vsub.s32 0, %v28_v1  ;;  %v33_v7 = vsub.s32 1, %v28_v1  ;;  %v37_v8 = vsub.s32 2, %v28_v1  ;;  %v41_v9 = vsub.s32 3, %v28_v1  ;;  %v21_v11 = vld [vmem:[%s218_s0 + $0x20] sm:$0xff]  ;;  %v86_v27 = vld [vmem:[%s219_s3 + $0x8] sm:$0xff] }
   0x5   :  { %v85_v25 = vld [vmem:[%s219_s3] sm:$0xff]  ;;  %v87_v31 = vld [vmem:[%s219_s3 + $0x10] sm:$0xff]  ;;  %v90_v34 = vld [vmem:[%s219_s3 + $0x28] sm:$0xff] }
   0x6   :  { %v30_v13 = vrot.slane %v25_v2, %v29_v5  ;;  %v60_v14 = vrot.slane %v55_v3, %v29_v5  ;;  %v34_v15 = vrot.slane %v25_v2, %v33_v7  ;;  %v64_v16 = vrot.slane %v55_v3, %v33_v7  ;;  %v89_v33 = vld [vmem:[%s219_s3 + $0x20] sm:$0xff]  ;;  %v88_v39 = vld [vmem:[%s219_s3 + $0x18] sm:$0xff]  ;;  %v91_v42 = vld [vmem:[%s219_s3 + $0x30] sm:$0xff] }
   0x7   :  { %v38_v20 = vrot.slane %v25_v2, %v37_v8  ;;  %v68_v21 = vrot.slane %v55_v3, %v37_v8  ;;  %v42_v22 = vrot.slane %v25_v2, %v41_v9  ;;  %v72_v23 = vrot.slane %v55_v3, %v41_v9  ;;  %v92_v43 = vld [vmem:[%s219_s3 + $0x38] sm:$0xff] }
   0x8   :  { %v47_v24 = vmul.f32 %v30_v13, %v17_v4  ;;  %v48_v26 = vmul.f32 %v34_v15, %v18_v6  ;;  %v51_v28 = vmul.f32 %v30_v13, %v21_v11  ;;  %v52_v29 = vmul.f32 %v34_v15, %v22_v12 }
   0x9   :  { %v49_v30 = vmul.f32 %v38_v20, %v19_v10  ;;  %v50_v32 = vmul.f32 %v42_v22, %v20_v17  ;;  %v53_v35 = vmul.f32 %v38_v20, %v23_v18  ;;  %v54_v36 = vmul.f32 %v42_v22, %v24_v19 }
   0xa   :  { %v77_v37 = vadd.f32 %v60_v14, %v47_v24  ;;  %v78_v38 = vadd.f32 %v64_v16, %v48_v26  ;;  %v81_v40 = vadd.f32 %v60_v14, %v51_v28  ;;  %v82_v41 = vadd.f32 %v64_v16, %v52_v29 }
   0xb   :  { %v79_v44 = vadd.f32 %v68_v21, %v49_v30  ;;  %v80_v45 = vadd.f32 %v72_v23, %v50_v32  ;;  %v83_v46 = vadd.f32 %v68_v21, %v53_v35  ;;  %v84_v47 = vadd.f32 %v72_v23, %v54_v36 }
   0xc   :  { %v93_v48 = vadd.f32 %v85_v25, %v77_v37  ;;  %v94_v49 = vadd.f32 %v86_v27, %v78_v38  ;;  %v97_v50 = vadd.f32 %v89_v33, %v81_v40  ;;  %v98_v51 = vadd.f32 %v90_v34, %v82_v41 }
   0xd   :  { %v95_v52 = vadd.f32 %v87_v31, %v79_v44  ;;  %v96_v53 = vadd.f32 %v88_v39, %v80_v45  ;;  %v99_v54 = vadd.f32 %v91_v42, %v83_v46  ;;  %v100_v55 = vadd.f32 %v92_v43, %v84_v47 }
   0xe   :  { %101 = vst [vmem:[%s220_s4] sm:$0xff] %v93_v48  ;;  %102 = vst [vmem:[%s220_s4 + $0x8] sm:$0xff] %v94_v49 }
   0xf   :  { %105 = vst [vmem:[%s220_s4 + $0x20] sm:$0xff] %v97_v50  ;;  %106 = vst [vmem:[%s220_s4 + $0x28] sm:$0xff] %v98_v51 }
  0x10   :  { %103 = vst [vmem:[%s220_s4 + $0x10] sm:$0xff] %v95_v52  ;;  %104 = vst [vmem:[%s220_s4 + $0x18] sm:$0xff] %v96_v53 }
  0x11   :  { %107 = vst [vmem:[%s220_s4 + $0x30] sm:$0xff] %v99_v54  ;;  %108 = vst [vmem:[%s220_s4 + $0x38] sm:$0xff] %v100_v55 }

// kernel: stem_forward.24
= control target key start
LH: loop header
LB: loop body
LE: loop exit
PB: predicated region body
PF: predicated region fallthrough
CT: control target
= control target key end

     0   :  { %vm87_vm0 = vcmask 261120   ;;  %vm230_vm1 = vcmask 516096   ;;  %v405_v10 = vmov 0.0   ;;  %vm209_vm2 = vcmask 523264   ;;  %s605_s1 = inlined_call_operand.vmem [shape: bf16[32,64], index: 1, kind: input, shape index: {}]   ;;  %s606_s0 = inlined_call_operand.vmem [shape: bf16[128,32], index: 0, kind: input, shape index: {}]   ;;  %s607_s3 = inlined_call_operand.vmem [shape: f32[1,64], index: 3, kind: output, shape index: {1}]   ;;  %s608_s4 = inlined_call_operand.vmem [shape: f32[1,64], index: 4, kind: output, shape index: {2}]   ;;  %s609_s2 = inlined_call_operand.vmem [shape: f32[128,64], index: 2, kind: output, shape index: {0}]  }
   0x1   :  { %v395_v0 = vld [vmem:[%s605_s1] sm:$0xff]   ;;  %v396_v1 = vld [vmem:[%s605_s1 + $0x8] sm:$0xff]   ;;  %v399_v4 = vld [vmem:[%s606_s0 + $0x10] sm:$0xff]   ;;  %231 = vst.msk [vmem:[%s607_s3] sm:$0x1] %vm230_vm1, %v405_v10 }
   0x2   :  { %370 = vmatprep.subr.bf16.mxu0 %v395_v0  ;;  %v397_v2 = vld [vmem:[%s606_s0] sm:$0xff]   ;;  %390 = vmatprep.subr.bf16.mxu1 %v395_v0  ;;  %v398_v3 = vld [vmem:[%s606_s0 + $0x8] sm:$0xff]   ;;  %v403_v7 = vld [vmem:[%s606_s0 + $0x30] sm:$0xff]   ;;  %232 = vst.msk [vmem:[%s608_s4] sm:$0x1] %vm230_vm1, %v405_v10 }
   0x3   :  { %371 = vmatpush3.bf16.msra.mxu0 %v395_v0  ;;  %392 = vmatpush3.bf16.msra.mxu1 %v395_v0  ;;  %v401_v5 = vld [vmem:[%s606_s0 + $0x20] sm:$0xff]   ;;  %v402_v6 = vld [vmem:[%s606_s0 + $0x28] sm:$0xff]   ;;  %v400_v8 = vld [vmem:[%s606_s0 + $0x18] sm:$0xff]  }
   0x4   :  { %372 = vmatprep.subr.bf16.mxu0 %v396_v1  ;;  %374 = vmatprep.mubr.msk.bf16.mxu0 %vm87_vm0, %v397_v2  ;;  %v404_v9 = vld [vmem:[%s606_s0 + $0x38] sm:$0xff]  }
   0x5   :  { %391 = vmatprep.subr.bf16.mxu1 %v396_v1  ;;  %382 = vmatprep.mubr.msk.bf16.mxu1 %vm87_vm0, %v401_v5 }
   0x7   :  { %373 = vmatpush3.bf16.msra.mxu0 %v396_v1  ;;  %393 = vmatpush3.bf16.msra.mxu1 %v396_v1 }
   0xa   :  { %375 = vmatmul.mubr.msk.bf16.vlgmr.msra.gmra.mrb[0].mxu0 %vm87_vm0, %v398_v3  ;;  %383 = vmatmul.mubr.msk.bf16.vlgmr.msra.gmra.mrb[0].mxu1 %vm87_vm0, %v402_v6 }
   0xb   :  { %378 = vmatprep.mubr.msk.bf16.mxu0 %vm87_vm0, %v399_v4  ;;  %386 = vmatprep.mubr.msk.bf16.mxu1 %vm87_vm0, %v403_v7 }
  0x12   :  { %379 = vmatmul.mubr.msk.bf16.gmra.mrb[4].mxu0 %vm87_vm0, %v400_v8  ;;  %387 = vmatmul.mubr.msk.bf16.gmra.mrb[4].mxu1 %vm87_vm0, %v404_v9 }
  0xdd   :  { %v376_v11 = vpop.f32.mrb[0].mxu0  ;;  %v477_v12 = vpop.f32.mrb[0].mxu1 }
  0xde   :  { %212 = vst.msk [vmem:[%s609_s2 + $0x10] sm:$0xff] %vm209_vm2, %v376_v11  ;;  %v146_v13 = vpop.f32.mrb[1].mxu0  ;;  %220 = vst.msk [vmem:[%s609_s2 + $0x50] sm:$0xff] %vm209_vm2, %v477_v12  ;;  %v178_v14 = vpop.f32.mrb[1].mxu1  ;;  %v277_v20 = vmul.f32 %v376_v11, %v376_v11  ;;  %v237_v25 = vsel %vm209_vm2, %v376_v11, 0.0  ;;  %v285_v6 = vmul.f32 %v477_v12, %v477_v12  ;;  %v253_v10 = vsel %vm209_vm2, %v477_v12, 0.0 }
  0xdf   :  { %210 = vst.msk [vmem:[%s609_s2] sm:$0xff] %vm209_vm2, %v146_v13  ;;  %v275_v15 = vmul.f32 %v146_v13, %v146_v13  ;;  %v377_v16 = vpop.f32.mrb[2].mxu0  ;;  %218 = vst.msk [vmem:[%s609_s2 + $0x40] sm:$0xff] %vm209_vm2, %v178_v14  ;;  %v496_v17 = vpop.f32.mrb[2].mxu1  ;;  %v234_v21 = vsel %vm209_vm2, %v146_v13, 0.0  ;;  %v283_v57 = vmul.f32 %v178_v14, %v178_v14  ;;  %v249_v62 = vsel %vm209_vm2, %v178_v14, 0.0 }
  0xe0   :  { %213 = vst.msk [vmem:[%s609_s2 + $0x18] sm:$0xff] %vm209_vm2, %v377_v16  ;;  %v149_v18 = vpop.f32.mrb[3].mxu0  ;;  %221 = vst.msk [vmem:[%s609_s2 + $0x58] sm:$0xff] %vm209_vm2, %v496_v17  ;;  %v181_v19 = vpop.f32.mrb[3].mxu1  ;;  %v278_v27 = vmul.f32 %v377_v16, %v377_v16  ;;  %v294_v31 = vsel %vm209_vm2, %v277_v20, 0.0  ;;  %v239_v32 = vsel %vm209_vm2, %v377_v16, 0.0  ;;  %v286_v11 = vmul.f32 %v496_v17, %v496_v17 }
  0xe1   :  { %211 = vst.msk [vmem:[%s609_s2 + $0x8] sm:$0xff] %vm209_vm2, %v149_v18  ;;  %v235_v22 = vsel %vm209_vm2, %v149_v18, 0.0  ;;  %v276_v23 = vmul.f32 %v149_v18, %v149_v18  ;;  %219 = vst.msk [vmem:[%s609_s2 + $0x48] sm:$0xff] %vm209_vm2, %v181_v19  ;;  %v291_v26 = vsel %vm209_vm2, %v275_v15, 0.0  ;;  %v306_v2 = vsel %vm209_vm2, %v283_v57, 0.0 }
  0xe2   :  { %v236_v24 = vadd.f32 %v235_v22, %v234_v21  ;;  %v296_v39 = vsel %vm209_vm2, %v278_v27, 0.0  ;;  %v284_v3 = vmul.f32 %v181_v19, %v181_v19  ;;  %v251_v7 = vsel %vm209_vm2, %v181_v19, 0.0 }
  0xe3   :  { %v292_v28 = vsel %vm209_vm2, %v276_v23, 0.0  ;;  %v310_v18 = vsel %vm209_vm2, %v285_v6, 0.0  ;;  %v255_v20 = vsel %vm209_vm2, %v496_v17, 0.0  ;;  %v312_v23 = vsel %vm209_vm2, %v286_v11, 0.0 }
  0xe4   :  { %v238_v29 = vadd.f32 %v237_v25, %v236_v24  ;;  %v293_v30 = vadd.f32 %v292_v28, %v291_v26  ;;  %v308_v13 = vsel %vm209_vm2, %v284_v3, 0.0 }
  0xe5   :  { %v380_v33 = vpop.f32.mrb[4].mxu0  ;;  %v522_v34 = vpop.f32.mrb[4].mxu1 }
  0xe6   :  { %v295_v35 = vadd.f32 %v294_v31, %v293_v30  ;;  %216 = vst.msk [vmem:[%s609_s2 + $0x30] sm:$0xff] %vm209_vm2, %v380_v33  ;;  %v162_v36 = vpop.f32.mrb[5].mxu0  ;;  %v240_v37 = vadd.f32 %v239_v32, %v238_v29  ;;  %224 = vst.msk [vmem:[%s609_s2 + $0x70] sm:$0xff] %vm209_vm2, %v522_v34  ;;  %v194_v38 = vpop.f32.mrb[5].mxu1  ;;  %v281_v48 = vmul.f32 %v380_v33, %v380_v33  ;;  %v245_v54 = vsel %vm209_vm2, %v380_v33, 0.0 }
  0xe7   :  { %214 = vst.msk [vmem:[%s609_s2 + $0x20] sm:$0xff] %vm209_vm2, %v162_v36  ;;  %v241_v40 = vsel %vm209_vm2, %v162_v36, 0.0  ;;  %v279_v41 = vmul.f32 %v162_v36, %v162_v36  ;;  %v381_v42 = vpop.f32.mrb[6].mxu0  ;;  %222 = vst.msk [vmem:[%s609_s2 + $0x60] sm:$0xff] %vm209_vm2, %v194_v38  ;;  %v389_v43 = vpop.f32.mrb[6].mxu1  ;;  %v287_v14 = vmul.f32 %v194_v38, %v194_v38  ;;  %v257_v19 = vsel %vm209_vm2, %v194_v38, 0.0 }
  0xe8   :  { %v242_v44 = vadd.f32 %v241_v40, %v240_v37  ;;  %v297_v45 = vadd.f32 %v296_v39, %v295_v35  ;;  %217 = vst.msk [vmem:[%s609_s2 + $0x38] sm:$0xff] %vm209_vm2, %v381_v42  ;;  %v165_v46 = vpop.f32.mrb[7].mxu0  ;;  %225 = vst.msk [vmem:[%s609_s2 + $0x78] sm:$0xff] %vm209_vm2, %v389_v43  ;;  %v197_v47 = vpop.f32.mrb[7].mxu1  ;;  %v282_v55 = vmul.f32 %v381_v42, %v381_v42  ;;  %v302_v60 = vsel %vm209_vm2, %v281_v48, 0.0 }
  0xe9   :  { %v298_v49 = vsel %vm209_vm2, %v279_v41, 0.0  ;;  %215 = vst.msk [vmem:[%s609_s2 + $0x28] sm:$0xff] %vm209_vm2, %v165_v46  ;;  %v243_v50 = vsel %vm209_vm2, %v165_v46, 0.0  ;;  %v280_v51 = vmul.f32 %v165_v46, %v165_v46  ;;  %223 = vst.msk [vmem:[%s609_s2 + $0x68] sm:$0xff] %vm209_vm2, %v197_v47  ;;  %v247_v61 = vsel %vm209_vm2, %v381_v42, 0.0 }
  0xea   :  { %v299_v52 = vadd.f32 %v298_v49, %v297_v45  ;;  %v244_v53 = vadd.f32 %v243_v50, %v242_v44  ;;  %v304_v1 = vsel %vm209_vm2, %v282_v55, 0.0  ;;  %v314_v12 = vsel %vm209_vm2, %v287_v14, 0.0 }
  0xeb   :  { %v300_v56 = vsel %vm209_vm2, %v280_v51, 0.0  ;;  %v288_v24 = vmul.f32 %v197_v47, %v197_v47  ;;  %v289_v27 = vmul.f32 %v522_v34, %v522_v34  ;;  %v259_v28 = vsel %vm209_vm2, %v197_v47, 0.0  ;;  %v233_v51 = vld [vmem:[%s607_s3] sm:$0x1] }
  0xec   :  { %v246_v58 = vadd.f32 %v245_v54, %v244_v53  ;;  %v301_v59 = vadd.f32 %v300_v56, %v299_v52  ;;  %v261_v17 = vsel %vm209_vm2, %v522_v34, 0.0  ;;  %v290_v31 = vmul.f32 %v389_v43, %v389_v43  ;;  %v274_v53 = vld [vmem:[%s608_s4] sm:$0x1] }
  0xed   :  { %v316_v32 = vsel %vm209_vm2, %v288_v24, 0.0  ;;  %v318_v36 = vsel %vm209_vm2, %v289_v27, 0.0  ;;  %v263_v37 = vsel %vm209_vm2, %v389_v43, 0.0 }
  0xee   :  { %v303_v63 = vadd.f32 %v302_v60, %v301_v59  ;;  %v248_v0 = vadd.f32 %v247_v61, %v246_v58  ;;  %v320_v40 = vsel %vm209_vm2, %v290_v31, 0.0 }
  0xf0   :  { %v250_v4 = vadd.f32 %v249_v62, %v248_v0  ;;  %v305_v5 = vadd.f32 %v304_v1, %v303_v63 }
  0xf2   :  { %v307_v8 = vadd.f32 %v306_v2, %v305_v5  ;;  %v252_v9 = vadd.f32 %v251_v7, %v250_v4 }
  0xf4   :  { %v254_v15 = vadd.f32 %v253_v10, %v252_v9  ;;  %v309_v16 = vadd.f32 %v308_v13, %v307_v8 }
  0xf6   :  { %v311_v21 = vadd.f32 %v310_v18, %v309_v16  ;;  %v256_v22 = vadd.f32 %v255_v20, %v254_v15 }
  0xf8   :  { %v258_v25 = vadd.f32 %v257_v19, %v256_v22  ;;  %v313_v26 = vadd.f32 %v312_v23, %v311_v21 }
  0xfa   :  { %v315_v29 = vadd.f32 %v314_v12, %v313_v26  ;;  %v260_v30 = vadd.f32 %v259_v28, %v258_v25 }
  0xfc   :  { %v262_v33 = vadd.f32 %v261_v17, %v260_v30  ;;  %v317_v35 = vadd.f32 %v316_v32, %v315_v29 }
  0xfe   :  { %v264_v38 = vadd.f32 %v263_v37, %v262_v33  ;;  %v319_v39 = vadd.f32 %v318_v36, %v317_v35 }
 0x100   :  { %v265_v41 = vrot.slane %v264_v38, 4  ;;  %v321_v42 = vadd.f32 %v320_v40, %v319_v39 }
 0x102   :  { %v266_v44 = vadd.f32 %v265_v41, %v264_v38  ;;  %v322_v45 = vrot.slane %v321_v42, 4 }
 0x104   :  { %v267_v46 = vrot.slane %v266_v44, 2  ;;  %v323_v47 = vadd.f32 %v322_v45, %v321_v42 }
 0x106   :  { %v268_v34 = vadd.f32 %v267_v46, %v266_v44  ;;  %v324_v48 = vrot.slane %v323_v47, 2 }
 0x108   :  { %v269_v49 = vrot.slane %v268_v34, 1  ;;  %v325_v50 = vadd.f32 %v324_v48, %v323_v47 }
 0x10a   :  { %v270_v52 = vadd.f32 %v269_v49, %v268_v34  ;;  %v326_v43 = vrot.slane %v325_v50, 1 }
 0x10c   :  { %v271_v54 = vadd.f32 %v270_v52, %v233_v51  ;;  %v327_v55 = vadd.f32 %v326_v43, %v325_v50 }
 0x10e   :  { %273 = vst.msk [vmem:[%s607_s3] sm:$0x1] %vm230_vm1, %v271_v54  ;;  %v328_v56 = vadd.f32 %v327_v55, %v274_v53 }
 0x110   :  { %329 = vst.msk [vmem:[%s608_s4] sm:$0x1] %vm230_vm1, %v328_v56 }

// kernel: stem_forward.22
= control target key start
LH: loop header
LB: loop body
LE: loop exit
PB: predicated region body
PF: predicated region fallthrough
CT: control target
= control target key end

     0   :  { %vm551_vm0 = vcmask 523264   ;;  %vm887_vm1 = vcmask 516096   ;;  %s1791_s1 = inlined_call_operand.vmem [shape: bf16[576,64], index: 1, kind: input, shape index: {}]   ;;  %s1792_s0 = inlined_call_operand.vmem [shape: bf16[128,576], index: 0, kind: input, shape index: {}]   ;;  %s1793_s3 = inlined_call_operand.vmem [shape: f32[1,64], index: 3, kind: output, shape index: {1}]   ;;  %s1794_s4 = inlined_call_operand.vmem [shape: f32[1,64], index: 4, kind: output, shape index: {2}]   ;;  %s1795_s2 = inlined_call_operand.vmem [shape: f32[128,64], index: 2, kind: output, shape index: {0}]  }
   0x1   :  { %v1256_v0 = vld [vmem:[%s1791_s1 + $0x40] sm:$0xff]   ;;  %v1260_v4 = vld [vmem:[%s1791_s1 + $0x48] sm:$0xff]   ;;  %v1264_v8 = vld [vmem:[%s1791_s1 + $0x50] sm:$0xff]  }
   0x2   :  { %v1257_v1 = vld [vmem:[%s1791_s1 + $0xc0] sm:$0xff]   ;;  %1083 = vmatprep.subr.bf16.mxu0 %v1256_v0  ;;  %v1261_v5 = vld [vmem:[%s1791_s1 + $0xc8] sm:$0xff]   ;;  %v1265_v9 = vld [vmem:[%s1791_s1 + $0xd0] sm:$0xff]  }
   0x3   :  { %v1258_v2 = vld [vmem:[%s1791_s1] sm:$0xff]   ;;  %1147 = vmatprep.subr.bf16.mxu1 %v1257_v1  ;;  %v1262_v6 = vld [vmem:[%s1791_s1 + $0x8] sm:$0xff]   ;;  %v1266_v10 = vld [vmem:[%s1791_s1 + $0x10] sm:$0xff]  }
   0x4   :  { %v1259_v3 = vld [vmem:[%s1791_s1 + $0x80] sm:$0xff]   ;;  %1084 = vmatpush3.bf16.msra.mxu0 %v1258_v2  ;;  %v1263_v7 = vld [vmem:[%s1791_s1 + $0x88] sm:$0xff]   ;;  %v1267_v11 = vld [vmem:[%s1791_s1 + $0x90] sm:$0xff]  }
   0x5   :  { %1148 = vmatpush3.bf16.msra.mxu1 %v1259_v3  ;;  %1085 = vmatprep.subr.bf16.mxu0 %v1260_v4  ;;  %v1268_v12 = vld [vmem:[%s1791_s1 + $0x58] sm:$0xff]   ;;  %v1272_v16 = vld [vmem:[%s1791_s1 + $0x60] sm:$0xff]   ;;  %v1276_v20 = vld [vmem:[%s1791_s1 + $0x68] sm:$0xff]  }
   0x6   :  { %1149 = vmatprep.subr.bf16.mxu1 %v1261_v5  ;;  %v1269_v13 = vld [vmem:[%s1791_s1 + $0xd8] sm:$0xff]   ;;  %v1273_v17 = vld [vmem:[%s1791_s1 + $0xe0] sm:$0xff]   ;;  %v1277_v21 = vld [vmem:[%s1791_s1 + $0xe8] sm:$0xff]  }
   0x7   :  { %v1270_v14 = vld [vmem:[%s1791_s1 + $0x18] sm:$0xff]   ;;  %v1274_v18 = vld [vmem:[%s1791_s1 + $0x20] sm:$0xff]   ;;  %v1278_v22 = vld [vmem:[%s1791_s1 + $0x28] sm:$0xff]  }
   0x8   :  { %1086 = vmatpush3.bf16.msra.mxu0 %v1262_v6  ;;  %v1271_v15 = vld [vmem:[%s1791_s1 + $0x98] sm:$0xff]   ;;  %v1275_v19 = vld [vmem:[%s1791_s1 + $0xa0] sm:$0xff]   ;;  %v1279_v23 = vld [vmem:[%s1791_s1 + $0xa8] sm:$0xff]  }
   0x9   :  { %1150 = vmatpush3.bf16.msra.mxu1 %v1263_v7  ;;  %1087 = vmatprep.subr.bf16.mxu0 %v1264_v8  ;;  %v1280_v24 = vld [vmem:[%s1791_s1 + $0x70] sm:$0xff]   ;;  %v1284_v28 = vld [vmem:[%s1791_s1 + $0x78] sm:$0xff]   ;;  %v1293_v35 = vld [vmem:[%s1792_s0 + $0xc] ss:$20 sps:$4 sm:$0xff]  }
   0xa   :  { %1151 = vmatprep.subr.bf16.mxu1 %v1265_v9  ;;  %v1281_v25 = vld [vmem:[%s1791_s1 + $0xf0] sm:$0xff]   ;;  %v1285_v29 = vld [vmem:[%s1791_s1 + $0xf8] sm:$0xff]   ;;  %v1294_v36 = vld [vmem:[%s1791_s1 + $0x100] sm:$0xff]   ;;  %705 = vmatprep.mubr.bf16.mxu1 %v1293_v35 }
   0xb   :  { %v1282_v26 = vld [vmem:[%s1791_s1 + $0x30] sm:$0xff]   ;;  %v1286_v30 = vld [vmem:[%s1791_s1 + $0x38] sm:$0xff]   ;;  %v1295_v37 = vld [vmem:[%s1792_s0 + $0x2c] ss:$20 sps:$4 sm:$0xff]  }
   0xc   :  { %1088 = vmatpush3.bf16.msra.mxu0 %v1266_v10  ;;  %v1283_v27 = vld [vmem:[%s1791_s1 + $0xb0] sm:$0xff]   ;;  %v1287_v31 = vld [vmem:[%s1791_s1 + $0xb8] sm:$0xff]   ;;  %v1307_v42 = vld [vmem:[%s1791_s1 + $0x108] sm:$0xff]  }
   0xd   :  { %1152 = vmatpush3.bf16.msra.mxu1 %v1267_v11  ;;  %1089 = vmatprep.subr.bf16.mxu0 %v1268_v12  ;;  %v1288_v32 = vld [vmem:[%s1792_s0] ss:$20 sps:$4 sm:$0xff]   ;;  %v1290_v33 = vld [vmem:[%s1792_s0 + $0x4] ss:$20 sps:$4 sm:$0xff]   ;;  %v1291_v34 = vld [vmem:[%s1792_s0 + $0x8] ss:$20 sps:$4 sm:$0xff]  }
   0xe   :  { %1153 = vmatprep.subr.bf16.mxu1 %v1269_v13  ;;  %608 = vmatprep.mubr.bf16.mxu0 %v1290_v33  ;;  %v1297_v38 = vld [vmem:[%s1792_s0 + $0x34] ss:$20 sps:$4 sm:$0xff]   ;;  %v1300_v40 = vld [vmem:[%s1792_s0 + $0x30] ss:$20 sps:$4 sm:$0xff]   ;;  %v1306_v45 = vld [vmem:[%s1792_s0 + $0x58] ss:$20 sps:$4 sm:$0xff]  }
   0xf   :  { %v1299_v39 = vld [vmem:[%s1792_s0 + $0x28] ss:$20 sps:$4 sm:$0xff]   ;;  %v1305_v44 = vld [vmem:[%s1792_s0 + $0x50] ss:$20 sps:$4 sm:$0xff]   ;;  %v1312_v50 = vld [vmem:[%s1792_s0 + $0x78] ss:$20 sps:$4 sm:$0xff]  }
  0x10   :  { %1090 = vmatpush3.bf16.msra.mxu0 %v1270_v14  ;;  %v1301_v41 = vld [vmem:[%s1792_s0 + $0x54] ss:$20 sps:$4 sm:$0xff]   ;;  %v1303_v43 = vld [vmem:[%s1792_s0 + $0x5c] ss:$20 sps:$4 sm:$0xff]   ;;  %v1310_v48 = vld [vmem:[%s1792_s0 + $0x84] ss:$20 sps:$4 sm:$0xff]  }
  0x11   :  { %1154 = vmatpush3.bf16.msra.mxu1 %v1271_v15  ;;  %1091 = vmatprep.subr.bf16.mxu0 %v1272_v16  ;;  %v1320_v46 = vld [vmem:[%s1791_s1 + $0x110] sm:$0xff]   ;;  %v1333_v49 = vld [vmem:[%s1791_s1 + $0x118] sm:$0xff]   ;;  %v1316_v53 = vld [vmem:[%s1792_s0 + $0xac] ss:$20 sps:$4 sm:$0xff]   ;;  %v1348_v12 = vmov 0.0  }
  0x12   :  { %1155 = vmatprep.subr.bf16.mxu1 %v1273_v17  ;;  %v1308_v47 = vld [vmem:[%s1792_s0 + $0x7c] ss:$20 sps:$4 sm:$0xff]   ;;  %v1313_v51 = vld [vmem:[%s1792_s0 + $0x80] ss:$20 sps:$4 sm:$0xff]   ;;  %v1314_v52 = vld [vmem:[%s1792_s0 + $0xa4] ss:$20 sps:$4 sm:$0xff]  }
  0x13   :  { %v1318_v54 = vld [vmem:[%s1792_s0 + $0xa0] ss:$20 sps:$4 sm:$0xff]   ;;  %v1319_v55 = vld [vmem:[%s1792_s0 + $0xa8] ss:$20 sps:$4 sm:$0xff]   ;;  %v1326_v59 = vld [vmem:[%s1792_s0 + $0xd0] ss:$20 sps:$4 sm:$0xff]  }
  0x14   :  { %1092 = vmatpush3.bf16.msra.mxu0 %v1274_v18  ;;  %v1321_v56 = vld [vmem:[%s1792_s0 + $0xcc] ss:$20 sps:$4 sm:$0xff]   ;;  %v1323_v57 = vld [vmem:[%s1792_s0 + $0xd4] ss:$20 sps:$4 sm:$0xff]   ;;  %v1329_v61 = vld [vmem:[%s1792_s0 + $0xfc] ss:$20 sps:$4 sm:$0xff]  }
  0x15   :  { %1156 = vmatpush3.bf16.msra.mxu1 %v1275_v19  ;;  %1093 = vmatprep.subr.bf16.mxu0 %v1276_v20  ;;  %v1325_v58 = vld [vmem:[%s1792_s0 + $0xc8] ss:$20 sps:$4 sm:$0xff]   ;;  %v1331_v62 = vld [vmem:[%s1792_s0 + $0xf0] ss:$20 sps:$4 sm:$0xff]   ;;  %v1332_v63 = vld [vmem:[%s1792_s0 + $0xf8] ss:$20 sps:$4 sm:$0xff]  }
  0x16   :  { %1157 = vmatprep.subr.bf16.mxu1 %v1277_v21  ;;  %v1327_v60 = vld [vmem:[%s1792_s0 + $0xf4] ss:$20 sps:$4 sm:$0xff]   ;;  %v1334_v0 = vld [vmem:[%s1792_s0 + $0x11c] ss:$20 sps:$4 sm:$0xff]   ;;  %v1336_v1 = vld [vmem:[%s1792_s0 + $0x124] ss:$20 sps:$4 sm:$0xff]  }
  0x17   :  { %v1338_v2 = vld [vmem:[%s1792_s0 + $0x118] ss:$20 sps:$4 sm:$0xff]   ;;  %v1339_v3 = vld [vmem:[%s1792_s0 + $0x120] ss:$20 sps:$4 sm:$0xff]   ;;  %v1340_v4 = vld [vmem:[%s1792_s0 + $0x10] ss:$20 sps:$4 sm:$0xff]  }
  0x18   :  { %1094 = vmatpush3.bf16.msra.mxu0 %v1278_v22  ;;  %v1341_v5 = vld [vmem:[%s1792_s0 + $0xb0] ss:$20 sps:$4 sm:$0xff]   ;;  %v1342_v6 = vld [vmem:[%s1792_s0 + $0x38] ss:$20 sps:$4 sm:$0xff]   ;;  %v1344_v8 = vld [vmem:[%s1792_s0 + $0x60] ss:$20 sps:$4 sm:$0xff]  }
  0x19   :  { %1158 = vmatpush3.bf16.msra.mxu1 %v1279_v23  ;;  %1095 = vmatprep.subr.bf16.mxu0 %v1280_v24  ;;  %v1343_v7 = vld [vmem:[%s1792_s0 + $0xd8] ss:$20 sps:$4 sm:$0xff]   ;;  %v1345_v9 = vld [vmem:[%s1792_s0 + $0x100] ss:$20 sps:$4 sm:$0xff]   ;;  %v1346_v10 = vld [vmem:[%s1792_s0 + $0x88] ss:$20 sps:$4 sm:$0xff]  }
  0x1a   :  { %1159 = vmatprep.subr.bf16.mxu1 %v1281_v25  ;;  %v1347_v11 = vld [vmem:[%s1792_s0 + $0x128] ss:$20 sps:$4 sm:$0xff]   ;;  %888 = vst.msk [vmem:[%s1793_s3] sm:$0x1] %vm887_vm1, %v1348_v12  ;;  %889 = vst.msk [vmem:[%s1794_s4] sm:$0x1] %vm887_vm1, %v1348_v12 }
  0x1c   :  { %1096 = vmatpush3.bf16.msra.mxu0 %v1282_v26 }
  0x1d   :  { %1160 = vmatpush3.bf16.msra.mxu1 %v1283_v27  ;;  %1097 = vmatprep.subr.bf16.mxu0 %v1284_v28 }
  0x1e   :  { %1161 = vmatprep.subr.bf16.mxu1 %v1285_v29 }
  0x20   :  { %1098 = vmatpush3.bf16.msra.mxu0 %v1286_v30 }
  0x21   :  { %1162 = vmatpush3.bf16.msra.mxu1 %v1287_v31  ;;  %1223 = vmatprep.subr.bf16.mxu0 %v1294_v36 }
  0x22   :  { %1247 = vmatprep.subr.bf16.mxu1 %v1294_v36 }
  0x23   :  { %609 = vmatmul.mubr.bf16.vlgmr.msra.gmra.mrb[0].mxu0 %v1288_v32 }
  0x24   :  { %706 = vmatmul.mubr.bf16.vlgmr.msra.gmra.mrb[0].mxu1 %v1291_v34  ;;  %1224 = vmatpush3.bf16.msra.mxu0 %v1294_v36 }
  0x25   :  { %616 = vmatprep.mubr.bf16.mxu0 %v1295_v37  ;;  %713 = vmatprep.mubr.bf16.mxu1 %v1297_v38 }
  0x26   :  { %1251 = vmatpush3.bf16.msra.mxu1 %v1294_v36  ;;  %1225 = vmatprep.subr.bf16.mxu0 %v1307_v42 }
  0x27   :  { %1248 = vmatprep.subr.bf16.mxu1 %v1307_v42 }
  0x28   :  { %1226 = vmatpush3.bf16.msra.mxu0 %v1307_v42 }
  0x29   :  { %1227 = vmatprep.subr.bf16.mxu0 %v1320_v46 }
  0x2a   :  { %1252 = vmatpush3.bf16.msra.mxu1 %v1307_v42 }
  0x2b   :  { %617 = vmatmul.mubr.bf16.gmra.mrb[4].mxu0 %v1299_v39  ;;  %1249 = vmatprep.subr.bf16.mxu1 %v1320_v46 }
  0x2c   :  { %714 = vmatmul.mubr.bf16.gmra.mrb[4].mxu1 %v1300_v40  ;;  %624 = vmatprep.mubr.bf16.mxu0 %v1301_v41 }
  0x2d   :  { %721 = vmatprep.mubr.bf16.mxu1 %v1303_v43  ;;  %1228 = vmatpush3.bf16.msra.mxu0 %v1320_v46 }
  0x2e   :  { %1253 = vmatpush3.bf16.msra.mxu1 %v1320_v46  ;;  %1229 = vmatprep.subr.bf16.mxu0 %v1333_v49 }
  0x2f   :  { %1250 = vmatprep.subr.bf16.mxu1 %v1333_v49 }
  0x31   :  { %1230 = vmatpush3.bf16.msra.mxu0 %v1333_v49 }
  0x32   :  { %1254 = vmatpush3.bf16.msra.mxu1 %v1333_v49 }
  0x33   :  { %625 = vmatmul.mubr.bf16.gmra.mrb[8].mxu0 %v1305_v44 }
  0x34   :  { %722 = vmatmul.mubr.bf16.gmra.mrb[8].mxu1 %v1306_v45  ;;  %632 = vmatprep.mubr.bf16.mxu0 %v1308_v47 }
  0x35   :  { %729 = vmatprep.mubr.bf16.mxu1 %v1310_v48 }
  0x3b   :  { %633 = vmatmul.mubr.bf16.gmra.mrb[12].mxu0 %v1312_v50 }
  0x3c   :  { %730 = vmatmul.mubr.bf16.gmra.mrb[12].mxu1 %v1313_v51  ;;  %640 = vmatprep.mubr.bf16.mxu0 %v1314_v52 }
  0x3d   :  { %737 = vmatprep.mubr.bf16.mxu1 %v1316_v53 }
  0x43   :  { %641 = vmatmul.mubr.bf16.gmra.mrb[16].mxu0 %v1318_v54 }
  0x44   :  { %738 = vmatmul.mubr.bf16.gmra.mrb[16].mxu1 %v1319_v55  ;;  %648 = vmatprep.mubr.bf16.mxu0 %v1321_v56 }
  0x45   :  { %745 = vmatprep.mubr.bf16.mxu1 %v1323_v57 }
  0x4b   :  { %649 = vmatmul.mubr.bf16.gmra.mrb[20].mxu0 %v1325_v58 }
  0x4c   :  { %746 = vmatmul.mubr.bf16.gmra.mrb[20].mxu1 %v1326_v59  ;;  %656 = vmatprep.mubr.bf16.mxu0 %v1327_v60 }
  0x4d   :  { %753 = vmatprep.mubr.bf16.mxu1 %v1329_v61 }
  0x53   :  { %657 = vmatmul.mubr.bf16.gmra.mrb[24].mxu0 %v1331_v62 }
  0x54   :  { %754 = vmatmul.mubr.bf16.gmra.mrb[24].mxu1 %v1332_v63  ;;  %664 = vmatprep.mubr.bf16.mxu0 %v1334_v0 }
  0x55   :  { %761 = vmatprep.mubr.bf16.mxu1 %v1336_v1 }
  0x5b   :  { %665 = vmatmul.mubr.bf16.gmra.mrb[28].mxu0 %v1338_v2 }
  0x5c   :  { %762 = vmatmul.mubr.bf16.gmra.mrb[28].mxu1 %v1339_v3  ;;  %1231 = vmatprep.mubr.msk.bf16.mxu0 %vm551_vm0, %v1340_v4 }
  0x5d   :  { %1239 = vmatprep.mubr.msk.bf16.mxu1 %vm551_vm0, %v1341_v5 }
  0x63   :  { %1232 = vmatmul.mubr.msk.bf16.vlgmr.msra.gmra.mrb[32].mxu0 %vm551_vm0, %v1342_v6 }
  0x64   :  { %1240 = vmatmul.mubr.msk.bf16.vlgmr.msra.gmra.mrb[32].mxu1 %vm551_vm0, %v1343_v7  ;;  %1235 = vmatprep.mubr.msk.bf16.mxu0 %vm551_vm0, %v1344_v8 }
  0x65   :  { %1243 = vmatprep.mubr.msk.bf16.mxu1 %vm551_vm0, %v1345_v9 }
  0x6b   :  { %1236 = vmatmul.mubr.msk.bf16.gmra.mrb[36].mxu0 %vm551_vm0, %v1346_v10 }
  0x6c   :  { %1244 = vmatmul.mubr.msk.bf16.gmra.mrb[36].mxu1 %vm551_vm0, %v1347_v11 }
  0xf6   :  { %v1099_v13 = vpop.f32.mrb[0].mxu0 }
  0xf7   :  { %v1163_v14 = vpop.f32.mrb[0].mxu1  ;;  %v1100_v15 = vpop.f32.mrb[1].mxu0 }
  0xf8   :  { %v1101_v16 = vadd.f32 %v1100_v15, %v1099_v13  ;;  %v1164_v17 = vpop.f32.mrb[1].mxu1  ;;  %v1102_v18 = vpop.f32.mrb[2].mxu0 }
  0xf9   :  { %v1165_v19 = vadd.f32 %v1164_v17, %v1163_v14  ;;  %v1166_v20 = vpop.f32.mrb[2].mxu1  ;;  %v1103_v21 = vpop.f32.mrb[3].mxu0 }
  0xfa   :  { %v1104_v22 = vadd.f32 %v1103_v21, %v1102_v18  ;;  %v1167_v23 = vpop.f32.mrb[3].mxu1 }
  0xfb   :  { %v1168_v24 = vadd.f32 %v1167_v23, %v1166_v20  ;;  %v1618_v25 = vadd.f32 %v1165_v19, %v1101_v16 }
  0xfd   :  { %v1620_v26 = vadd.f32 %v1168_v24, %v1104_v22 }
  0xfe   :  { %v1105_v27 = vpop.f32.mrb[4].mxu0 }
  0xff   :  { %v1169_v28 = vpop.f32.mrb[4].mxu1  ;;  %v1106_v29 = vpop.f32.mrb[5].mxu0 }
 0x100   :  { %v1107_v30 = vadd.f32 %v1106_v29, %v1105_v27  ;;  %v1170_v31 = vpop.f32.mrb[5].mxu1  ;;  %v1108_v32 = vpop.f32.mrb[6].mxu0 }
 0x101   :  { %v1171_v33 = vadd.f32 %v1170_v31, %v1169_v28  ;;  %v1172_v34 = vpop.f32.mrb[6].mxu1  ;;  %v1109_v35 = vpop.f32.mrb[7].mxu0 }
 0x102   :  { %v1110_v36 = vadd.f32 %v1109_v35, %v1108_v32  ;;  %v1173_v37 = vpop.f32.mrb[7].mxu1 }
 0x103   :  { %v1174_v38 = vadd.f32 %v1173_v37, %v1172_v34  ;;  %v1622_v39 = vadd.f32 %v1171_v33, %v1107_v30 }
 0x105   :  { %v1624_v40 = vadd.f32 %v1174_v38, %v1110_v36 }
 0x106   :  { %v1111_v41 = vpop.f32.mrb[8].mxu0 }
 0x107   :  { %v1175_v42 = vpop.f32.mrb[8].mxu1  ;;  %v1112_v43 = vpop.f32.mrb[9].mxu0 }
 0x108   :  { %v1113_v44 = vadd.f32 %v1112_v43, %v1111_v41  ;;  %v1176_v45 = vpop.f32.mrb[9].mxu1  ;;  %v1114_v46 = vpop.f32.mrb[10].mxu0 }
 0x109   :  { %v1177_v47 = vadd.f32 %v1176_v45, %v1175_v42  ;;  %v1178_v48 = vpop.f32.mrb[10].mxu1  ;;  %v1115_v49 = vpop.f32.mrb[11].mxu0 }
 0x10a   :  { %v1116_v50 = vadd.f32 %v1115_v49, %v1114_v46  ;;  %v1179_v51 = vpop.f32.mrb[11].mxu1 }
 0x10b   :  { %v1180_v52 = vadd.f32 %v1179_v51, %v1178_v48  ;;  %v1626_v53 = vadd.f32 %v1177_v47, %v1113_v44 }
 0x10d   :  { %v1628_v54 = vadd.f32 %v1180_v52, %v1116_v50 }
 0x10e   :  { %v1117_v55 = vpop.f32.mrb[12].mxu0 }
 0x10f   :  { %v1181_v56 = vpop.f32.mrb[12].mxu1  ;;  %v1118_v57 = vpop.f32.mrb[13].mxu0 }
 0x110   :  { %v1119_v58 = vadd.f32 %v1118_v57, %v1117_v55  ;;  %v1182_v59 = vpop.f32.mrb[13].mxu1  ;;  %v1120_v60 = vpop.f32.mrb[14].mxu0 }
 0x111   :  { %v1183_v61 = vadd.f32 %v1182_v59, %v1181_v56  ;;  %v1184_v62 = vpop.f32.mrb[14].mxu1  ;;  %v1121_v63 = vpop.f32.mrb[15].mxu0 }
 0x112   :  { %v1122_v0 = vadd.f32 %v1121_v63, %v1120_v60  ;;  %v1185_v1 = vpop.f32.mrb[15].mxu1 }
 0x113   :  { %v1186_v2 = vadd.f32 %v1185_v1, %v1184_v62  ;;  %v1630_v3 = vadd.f32 %v1183_v61, %v1119_v58 }
 0x115   :  { %v1632_v4 = vadd.f32 %v1186_v2, %v1122_v0 }
 0x116   :  { %v1123_v5 = vpop.f32.mrb[16].mxu0 }
 0x117   :  { %v1187_v6 = vpop.f32.mrb[16].mxu1  ;;  %v1124_v7 = vpop.f32.mrb[17].mxu0 }
 0x118   :  { %v1125_v8 = vadd.f32 %v1124_v7, %v1123_v5  ;;  %v1188_v9 = vpop.f32.mrb[17].mxu1  ;;  %v1126_v10 = vpop.f32.mrb[18].mxu0 }
 0x119   :  { %v1189_v11 = vadd.f32 %v1188_v9, %v1187_v6  ;;  %v1190_v12 = vpop.f32.mrb[18].mxu1  ;;  %v1127_v13 = vpop.f32.mrb[19].mxu0 }
 0x11a   :  { %v1128_v14 = vadd.f32 %v1127_v13, %v1126_v10  ;;  %v1191_v15 = vpop.f32.mrb[19].mxu1 }
 0x11b   :  { %v1192_v16 = vadd.f32 %v1191_v15, %v1190_v12  ;;  %v740_v17 = vadd.f32 %v1189_v11, %v1125_v8 }
 0x11d   :  { %v1634_v18 = vadd.f32 %v1192_v16, %v1128_v14 }
 0x11e   :  { %v1129_v19 = vpop.f32.mrb[20].mxu0 }
 0x11f   :  { %v1193_v20 = vpop.f32.mrb[20].mxu1  ;;  %v1130_v21 = vpop.f32.mrb[21].mxu0 }
 0x120   :  { %v1131_v22 = vadd.f32 %v1130_v21, %v1129_v19  ;;  %v1194_v23 = vpop.f32.mrb[21].mxu1  ;;  %v1132_v24 = vpop.f32.mrb[22].mxu0 }
 0x121   :  { %v1195_v27 = vadd.f32 %v1194_v23, %v1193_v20  ;;  %v1196_v28 = vpop.f32.mrb[22].mxu1  ;;  %v1133_v29 = vpop.f32.mrb[23].mxu0 }
 0x122   :  { %v1134_v30 = vadd.f32 %v1133_v29, %v1132_v24  ;;  %v1197_v31 = vpop.f32.mrb[23].mxu1 }
 0x123   :  { %v1198_v32 = vadd.f32 %v1197_v31, %v1196_v28  ;;  %v748_v33 = vadd.f32 %v1195_v27, %v1131_v22 }
 0x125   :  { %v751_v34 = vadd.f32 %v1198_v32, %v1134_v30 }
 0x126   :  { %v1135_v35 = vpop.f32.mrb[24].mxu0 }
 0x127   :  { %v1199_v36 = vpop.f32.mrb[24].mxu1  ;;  %v1136_v37 = vpop.f32.mrb[25].mxu0 }
 0x128   :  { %v1137_v38 = vadd.f32 %v1136_v37, %v1135_v35  ;;  %v1200_v41 = vpop.f32.mrb[25].mxu1  ;;  %v1138_v42 = vpop.f32.mrb[26].mxu0 }
 0x129   :  { %v1201_v43 = vadd.f32 %v1200_v41, %v1199_v36  ;;  %v1202_v44 = vpop.f32.mrb[26].mxu1  ;;  %v1139_v45 = vpop.f32.mrb[27].mxu0 }
 0x12a   :  { %v1140_v46 = vadd.f32 %v1139_v45, %v1138_v42  ;;  %v1203_v47 = vpop.f32.mrb[27].mxu1 }
 0x12b   :  { %v1204_v48 = vadd.f32 %v1203_v47, %v1202_v44  ;;  %v756_v49 = vadd.f32 %v1201_v43, %v1137_v38 }
 0x12d   :  { %v1636_v50 = vadd.f32 %v1204_v48, %v1140_v46 }
 0x12e   :  { %v1141_v51 = vpop.f32.mrb[28].mxu0 }
 0x12f   :  { %v1205_v52 = vpop.f32.mrb[28].mxu1  ;;  %v1142_v55 = vpop.f32.mrb[29].mxu0 }
 0x130   :  { %v1143_v56 = vadd.f32 %v1142_v55, %v1141_v51  ;;  %v1206_v57 = vpop.f32.mrb[29].mxu1  ;;  %v1144_v58 = vpop.f32.mrb[30].mxu0 }
 0x131   :  { %v1207_v59 = vadd.f32 %v1206_v57, %v1205_v52  ;;  %v1208_v60 = vpop.f32.mrb[30].mxu1  ;;  %v1145_v61 = vpop.f32.mrb[31].mxu0 }
 0x132   :  { %v1146_v62 = vadd.f32 %v1145_v61, %v1144_v58  ;;  %v1209_v63 = vpop.f32.mrb[31].mxu1 }
 0x133   :  { %v1210_v0 = vadd.f32 %v1209_v63, %v1208_v60  ;;  %v764_v1 = vadd.f32 %v1207_v59, %v1143_v56 }
 0x135   :  { %v1638_v2 = vadd.f32 %v1210_v0, %v1146_v62 }
 0x136   :  { %v1233_v5 = vpop.f32.mrb[32].mxu0 }
 0x137   :  { %v813_v6 = vadd.f32 %v1233_v5, %v1622_v39  ;;  %v1241_v7 = vpop.f32.mrb[32].mxu1  ;;  %v804_v8 = vpop.f32.mrb[33].mxu0 }
 0x138   :  { %v1641_v9 = vadd.f32 %v1241_v7, %v748_v33  ;;  %v805_v10 = vadd.f32 %v804_v8, %v1618_v25  ;;  %v836_v11 = vpop.f32.mrb[33].mxu1  ;;  %v1234_v12 = vpop.f32.mrb[34].mxu0 }
 0x139   :  { %869 = vst.msk [vmem:[%s1795_s2 + $0x10] sm:$0xff] %vm551_vm0, %v813_v6  ;;  %v1648_v13 = vadd.f32 %v836_v11, %v740_v17  ;;  %v816_v14 = vadd.f32 %v1234_v12, %v1624_v40  ;;  %v1242_v15 = vpop.f32.mrb[34].mxu1  ;;  %v807_v16 = vpop.f32.mrb[35].mxu0  ;;  %v894_v20 = vsel %vm551_vm0, %v813_v6, 0.0  ;;  %v934_v22 = vmul.f32 %v813_v6, %v813_v6 }
 0x13a   :  { %877 = vst.msk [vmem:[%s1795_s2 + $0x50] sm:$0xff] %vm551_vm0, %v1641_v9  ;;  %867 = vst.msk [vmem:[%s1795_s2] sm:$0xff] %vm551_vm0, %v805_v10  ;;  %v839_v25 = vpop.f32.mrb[35].mxu1  ;;  %v932_v39 = vmul.f32 %v805_v10, %v805_v10  ;;  %v1669_v40 = vadd.f32 %v1242_v15, %v751_v34  ;;  %v808_v17 = vadd.f32 %v807_v16, %v1620_v26  ;;  %v891_v23 = vsel %vm551_vm0, %v805_v10, 0.0 }
 0x13b   :  { %875 = vst.msk [vmem:[%s1795_s2 + $0x40] sm:$0xff] %vm551_vm0, %v1648_v13  ;;  %870 = vst.msk [vmem:[%s1795_s2 + $0x18] sm:$0xff] %vm551_vm0, %v816_v14  ;;  %v1673_v19 = vadd.f32 %v839_v25, %v1634_v18  ;;  %v935_v34 = vmul.f32 %v816_v14, %v816_v14  ;;  %v951_v44 = vsel %vm551_vm0, %v934_v22, 0.0  ;;  %v940_v6 = vmul.f32 %v1648_v13, %v1648_v13 }
 0x13c   :  { %878 = vst.msk [vmem:[%s1795_s2 + $0x58] sm:$0xff] %vm551_vm0, %v1669_v40  ;;  %868 = vst.msk [vmem:[%s1795_s2 + $0x8] sm:$0xff] %vm551_vm0, %v808_v17  ;;  %v892_v26 = vsel %vm551_vm0, %v808_v17, 0.0  ;;  %v933_v18 = vmul.f32 %v808_v17, %v808_v17  ;;  %v948_v28 = vsel %vm551_vm0, %v932_v39, 0.0  ;;  %v906_v10 = vsel %vm551_vm0, %v1648_v13, 0.0 }
 0x13d   :  { %876 = vst.msk [vmem:[%s1795_s2 + $0x48] sm:$0xff] %vm551_vm0, %v1673_v19  ;;  %v893_v29 = vadd.f32 %v892_v26, %v891_v23  ;;  %v941_v12 = vmul.f32 %v1673_v19, %v1673_v19  ;;  %v908_v16 = vsel %vm551_vm0, %v1673_v19, 0.0  ;;  %v942_v39 = vmul.f32 %v1641_v9, %v1641_v9 }
 0x13e   :  { %v1237_v21 = vpop.f32.mrb[36].mxu0  ;;  %v949_v35 = vsel %vm551_vm0, %v933_v18, 0.0  ;;  %v963_v17 = vsel %vm551_vm0, %v940_v6, 0.0  ;;  %v910_v13 = vsel %vm551_vm0, %v1641_v9, 0.0  ;;  %v943_v22 = vmul.f32 %v1669_v40, %v1669_v40 }
 0x13f   :  { %v1245_v24 = vpop.f32.mrb[36].mxu1  ;;  %v820_v27 = vpop.f32.mrb[37].mxu0  ;;  %v829_v30 = vadd.f32 %v1237_v21, %v1630_v3  ;;  %v895_v42 = vadd.f32 %v894_v20, %v893_v29  ;;  %v950_v43 = vadd.f32 %v949_v35, %v948_v28  ;;  %v965_v23 = vsel %vm551_vm0, %v941_v12, 0.0 }
 0x140   :  { %v1694_v31 = vadd.f32 %v1245_v24, %v764_v1  ;;  %v852_v32 = vpop.f32.mrb[37].mxu1  ;;  %v1238_v33 = vpop.f32.mrb[38].mxu0  ;;  %v821_v36 = vadd.f32 %v820_v27, %v1626_v53  ;;  %v896_v53 = vsel %vm551_vm0, %v816_v14, 0.0  ;;  %v912_v19 = vsel %vm551_vm0, %v1669_v40, 0.0 }
 0x141   :  { %v853_v37 = vadd.f32 %v852_v32, %v756_v49  ;;  %v1246_v38 = vpop.f32.mrb[38].mxu1  ;;  %v823_v41 = vpop.f32.mrb[39].mxu0  ;;  %873 = vst.msk [vmem:[%s1795_s2 + $0x30] sm:$0xff] %vm551_vm0, %v829_v30  ;;  %v952_v47 = vadd.f32 %v951_v44, %v950_v43  ;;  %v897_v48 = vadd.f32 %v896_v53, %v895_v42  ;;  %v953_v49 = vsel %vm551_vm0, %v935_v34, 0.0 }
 0x142   :  { %881 = vst.msk [vmem:[%s1795_s2 + $0x70] sm:$0xff] %vm551_vm0, %v1694_v31  ;;  %v855_v3 = vpop.f32.mrb[39].mxu1  ;;  %871 = vst.msk [vmem:[%s1795_s2 + $0x20] sm:$0xff] %vm551_vm0, %v821_v36  ;;  %v898_v45 = vsel %vm551_vm0, %v821_v36, 0.0  ;;  %v936_v46 = vmul.f32 %v821_v36, %v821_v36  ;;  %v832_v52 = vadd.f32 %v1238_v33, %v1632_v4  ;;  %v864_v57 = vadd.f32 %v1246_v38, %v1638_v2 }
 0x143   :  { %879 = vst.msk [vmem:[%s1795_s2 + $0x60] sm:$0xff] %vm551_vm0, %v853_v37  ;;  %v899_v55 = vadd.f32 %v898_v45, %v897_v48  ;;  %v954_v56 = vadd.f32 %v953_v49, %v952_v47  ;;  %v824_v58 = vadd.f32 %v823_v41, %v1628_v54  ;;  %v856_v59 = vadd.f32 %v855_v3, %v1636_v50 }
 0x144   :  { %v955_v51 = vsel %vm551_vm0, %v936_v46, 0.0  ;;  %874 = vst.msk [vmem:[%s1795_s2 + $0x38] sm:$0xff] %vm551_vm0, %v832_v52  ;;  %882 = vst.msk [vmem:[%s1795_s2 + $0x78] sm:$0xff] %vm551_vm0, %v864_v57  ;;  %v938_v4 = vmul.f32 %v829_v30, %v829_v30  ;;  %v902_v50 = vsel %vm551_vm0, %v829_v30, 0.0  ;;  %v939_v63 = vmul.f32 %v832_v52, %v832_v52 }
 0x145   :  { %v956_v60 = vadd.f32 %v955_v51, %v954_v56  ;;  %872 = vst.msk [vmem:[%s1795_s2 + $0x28] sm:$0xff] %vm551_vm0, %v824_v58  ;;  %v900_v54 = vsel %vm551_vm0, %v824_v58, 0.0  ;;  %v937_v62 = vmul.f32 %v824_v58, %v824_v58  ;;  %880 = vst.msk [vmem:[%s1795_s2 + $0x68] sm:$0xff] %vm551_vm0, %v856_v59  ;;  %v904_v2 = vsel %vm551_vm0, %v832_v52, 0.0 }
 0x146   :  { %v901_v61 = vadd.f32 %v900_v54, %v899_v55  ;;  %v959_v7 = vsel %vm551_vm0, %v938_v4, 0.0  ;;  %v961_v14 = vsel %vm551_vm0, %v939_v63, 0.0  ;;  %v967_v24 = vsel %vm551_vm0, %v942_v39, 0.0 }
 0x147   :  { %v957_v1 = vsel %vm551_vm0, %v937_v62, 0.0  ;;  %v944_v27 = vmul.f32 %v853_v37, %v853_v37  ;;  %v914_v29 = vsel %vm551_vm0, %v853_v37, 0.0  ;;  %v969_v9 = vsel %vm551_vm0, %v943_v22, 0.0 }
 0x148   :  { %v903_v0 = vadd.f32 %v902_v50, %v901_v61  ;;  %v958_v5 = vadd.f32 %v957_v1, %v956_v60  ;;  %v945_v33 = vmul.f32 %v856_v59, %v856_v59  ;;  %v916_v34 = vsel %vm551_vm0, %v856_v59, 0.0  ;;  %v931_v50 = vld [vmem:[%s1794_s4] sm:$0x1] }
 0x149   :  { %v946_v36 = vmul.f32 %v1694_v31, %v1694_v31  ;;  %v971_v40 = vsel %vm551_vm0, %v944_v27, 0.0  ;;  %v918_v41 = vsel %vm551_vm0, %v1694_v31, 0.0  ;;  %v947_v43 = vmul.f32 %v864_v57, %v864_v57 }
 0x14a   :  { %v905_v8 = vadd.f32 %v904_v2, %v903_v0  ;;  %v960_v11 = vadd.f32 %v959_v7, %v958_v5  ;;  %v973_v3 = vsel %vm551_vm0, %v945_v33, 0.0  ;;  %v920_v44 = vsel %vm551_vm0, %v864_v57, 0.0  ;;  %v890_v57 = vld [vmem:[%s1793_s3] sm:$0x1] }
 0x14b   :  { %v975_v45 = vsel %vm551_vm0, %v946_v36, 0.0  ;;  %v977_v48 = vsel %vm551_vm0, %v947_v43, 0.0 }
 0x14c   :  { %v907_v15 = vadd.f32 %v906_v10, %v905_v8  ;;  %v962_v25 = vadd.f32 %v961_v14, %v960_v11 }
 0x14e   :  { %v909_v20 = vadd.f32 %v908_v16, %v907_v15  ;;  %v964_v21 = vadd.f32 %v963_v17, %v962_v25 }
 0x150   :  { %v911_v26 = vadd.f32 %v910_v13, %v909_v20  ;;  %v966_v18 = vadd.f32 %v965_v23, %v964_v21 }
 0x152   :  { %v913_v28 = vadd.f32 %v912_v19, %v911_v26  ;;  %v968_v30 = vadd.f32 %v967_v24, %v966_v18 }
 0x154   :  { %v915_v32 = vadd.f32 %v914_v29, %v913_v28  ;;  %v970_v35 = vadd.f32 %v969_v9, %v968_v30 }
 0x156   :  { %v917_v38 = vadd.f32 %v916_v34, %v915_v32  ;;  %v972_v42 = vadd.f32 %v971_v40, %v970_v35 }
 0x158   :  { %v919_v37 = vadd.f32 %v918_v41, %v917_v38  ;;  %v974_v53 = vadd.f32 %v973_v3, %v972_v42 }
 0x15a   :  { %v921_v46 = vadd.f32 %v920_v44, %v919_v37  ;;  %v976_v47 = vadd.f32 %v975_v45, %v974_v53 }
 0x15c   :  { %v922_v49 = vrot.slane %v921_v46, 4  ;;  %v978_v51 = vadd.f32 %v977_v48, %v976_v47 }
 0x15e   :  { %v923_v52 = vadd.f32 %v922_v49, %v921_v46  ;;  %v979_v55 = vrot.slane %v978_v51, 4 }
 0x160   :  { %v924_v56 = vrot.slane %v923_v52, 2  ;;  %v980_v31 = vadd.f32 %v979_v55, %v978_v51 }
 0x162   :  { %v925_v58 = vadd.f32 %v924_v56, %v923_v52  ;;  %v981_v59 = vrot.slane %v980_v31, 2 }
 0x164   :  { %v926_v60 = vrot.slane %v925_v58, 1  ;;  %v982_v54 = vadd.f32 %v981_v59, %v980_v31 }
 0x166   :  { %v927_v4 = vadd.f32 %v926_v60, %v925_v58  ;;  %v983_v61 = vrot.slane %v982_v54, 1 }
 0x168   :  { %v928_v62 = vadd.f32 %v927_v4, %v890_v57  ;;  %v984_v63 = vadd.f32 %v983_v61, %v982_v54 }
 0x16a   :  { %930 = vst.msk [vmem:[%s1793_s3] sm:$0x1] %vm887_vm1, %v928_v62  ;;  %v985_v0 = vadd.f32 %v984_v63, %v931_v50 }
 0x16c   :  { %986 = vst.msk [vmem:[%s1794_s4] sm:$0x1] %vm887_vm1, %v985_v0 }

// kernel: stem_forward.26
= control target key start
LH: loop header
LB: loop body
LE: loop exit
PB: predicated region body
PF: predicated region fallthrough
CT: control target
= control target key end

     0   :  { %vm365_vm0 = vcmask 523264   ;;  %v742_v46 = vmov 0.0   ;;  %s936_s1 = inlined_call_operand.vmem [shape: bf16[576,128], index: 1, kind: input, shape index: {}]   ;;  %s937_s0 = inlined_call_operand.vmem [shape: bf16[32,576], index: 0, kind: input, shape index: {}]   ;;  %s938_s3 = inlined_call_operand.vmem [shape: f32[1,128], index: 3, kind: output, shape index: {1}]   ;;  %s939_s4 = inlined_call_operand.vmem [shape: f32[1,128], index: 4, kind: output, shape index: {2}]   ;;  %s940_s2 = inlined_call_operand.vmem [shape: f32[32,128], index: 2, kind: output, shape index: {0}]  }
   0x1   :  { %v692_v0 = vld [vmem:[%s936_s1 + $0x40] sm:$0xff]   ;;  %v696_v4 = vld [vmem:[%s936_s1 + $0x48] sm:$0xff]   ;;  %v700_v8 = vld [vmem:[%s936_s1 + $0x50] sm:$0xff]   ;;  %527 = vst [vmem:[%s938_s3] sm:$0x1] %v742_v46 }
   0x2   :  { %v693_v1 = vld [vmem:[%s936_s1 + $0xc0] sm:$0xff]   ;;  %617 = vmatprep.subr.bf16.mxu0 %v692_v0  ;;  %v697_v5 = vld [vmem:[%s936_s1 + $0xc8] sm:$0xff]   ;;  %v701_v9 = vld [vmem:[%s936_s1 + $0xd0] sm:$0xff]   ;;  %528 = vst [vmem:[%s939_s4] sm:$0x1] %v742_v46 }
   0x3   :  { %v694_v2 = vld [vmem:[%s936_s1] sm:$0xff]   ;;  %645 = vmatprep.subr.bf16.mxu1 %v693_v1  ;;  %v698_v6 = vld [vmem:[%s936_s1 + $0x8] sm:$0xff]   ;;  %v702_v10 = vld [vmem:[%s936_s1 + $0x10] sm:$0xff]  }
   0x4   :  { %v695_v3 = vld [vmem:[%s936_s1 + $0x80] sm:$0xff]   ;;  %618 = vmatpush3.bf16.msra.mxu0 %v694_v2  ;;  %v699_v7 = vld [vmem:[%s936_s1 + $0x88] sm:$0xff]   ;;  %v703_v11 = vld [vmem:[%s936_s1 + $0x90] sm:$0xff]  }
   0x5   :  { %646 = vmatpush3.bf16.msra.mxu1 %v695_v3  ;;  %619 = vmatprep.subr.bf16.mxu0 %v696_v4  ;;  %v704_v12 = vld [vmem:[%s936_s1 + $0x58] sm:$0xff]   ;;  %v708_v16 = vld [vmem:[%s936_s1 + $0x60] sm:$0xff]   ;;  %v712_v20 = vld [vmem:[%s936_s1 + $0x68] sm:$0xff]  }
   0x6   :  { %647 = vmatprep.subr.bf16.mxu1 %v697_v5  ;;  %v705_v13 = vld [vmem:[%s936_s1 + $0xd8] sm:$0xff]   ;;  %v709_v17 = vld [vmem:[%s936_s1 + $0xe0] sm:$0xff]   ;;  %v713_v21 = vld [vmem:[%s936_s1 + $0xe8] sm:$0xff]  }
   0x7   :  { %v706_v14 = vld [vmem:[%s936_s1 + $0x18] sm:$0xff]   ;;  %v710_v18 = vld [vmem:[%s936_s1 + $0x20] sm:$0xff]   ;;  %v714_v22 = vld [vmem:[%s936_s1 + $0x28] sm:$0xff]  }
   0x8   :  { %620 = vmatpush3.bf16.msra.mxu0 %v698_v6  ;;  %v707_v15 = vld [vmem:[%s936_s1 + $0x98] sm:$0xff]   ;;  %v711_v19 = vld [vmem:[%s936_s1 + $0xa0] sm:$0xff]   ;;  %v715_v23 = vld [vmem:[%s936_s1 + $0xa8] sm:$0xff]  }
   0x9   :  { %648 = vmatpush3.bf16.msra.mxu1 %v699_v7  ;;  %621 = vmatprep.subr.bf16.mxu0 %v700_v8  ;;  %v716_v24 = vld [vmem:[%s936_s1 + $0x70] sm:$0xff]   ;;  %v720_v28 = vld [vmem:[%s936_s1 + $0x78] sm:$0xff]   ;;  %v729_v35 = vld [vmem:[%s937_s0 + $0xc] ss:$20 sps:$4 sm:$0xff]  }
   0xa   :  { %649 = vmatprep.subr.bf16.mxu1 %v701_v9  ;;  %v717_v25 = vld [vmem:[%s936_s1 + $0xf0] sm:$0xff]   ;;  %v721_v29 = vld [vmem:[%s936_s1 + $0xf8] sm:$0xff]   ;;  %v730_v36 = vld [vmem:[%s936_s1 + $0x100] sm:$0xff]   ;;  %453 = vmatprep.mubr.bf16.mxu1 %v729_v35 }
   0xb   :  { %v718_v26 = vld [vmem:[%s936_s1 + $0x30] sm:$0xff]   ;;  %v722_v30 = vld [vmem:[%s936_s1 + $0x38] sm:$0xff]   ;;  %v731_v37 = vld [vmem:[%s936_s1 + $0x108] sm:$0xff]  }
   0xc   :  { %622 = vmatpush3.bf16.msra.mxu0 %v702_v10  ;;  %v719_v27 = vld [vmem:[%s936_s1 + $0xb0] sm:$0xff]   ;;  %v723_v31 = vld [vmem:[%s936_s1 + $0xb8] sm:$0xff]   ;;  %v732_v38 = vld [vmem:[%s937_s0 + $0x2c] ss:$20 sps:$4 sm:$0xff]  }
   0xd   :  { %650 = vmatpush3.bf16.msra.mxu1 %v703_v11  ;;  %623 = vmatprep.subr.bf16.mxu0 %v704_v12  ;;  %v724_v32 = vld [vmem:[%s937_s0] ss:$20 sps:$4 sm:$0xff]   ;;  %v726_v33 = vld [vmem:[%s937_s0 + $0x4] ss:$20 sps:$4 sm:$0xff]   ;;  %v727_v34 = vld [vmem:[%s937_s0 + $0x8] ss:$20 sps:$4 sm:$0xff]  }
   0xe   :  { %651 = vmatprep.subr.bf16.mxu1 %v705_v13  ;;  %404 = vmatprep.mubr.bf16.mxu0 %v726_v33  ;;  %v734_v39 = vld [vmem:[%s937_s0 + $0x34] ss:$20 sps:$4 sm:$0xff]   ;;  %v737_v42 = vld [vmem:[%s937_s0 + $0x30] ss:$20 sps:$4 sm:$0xff]   ;;  %v739_v44 = vld [vmem:[%s936_s1 + $0x118] sm:$0xff]  }
   0xf   :  { %v736_v40 = vld [vmem:[%s937_s0 + $0x28] ss:$20 sps:$4 sm:$0xff]   ;;  %v738_v41 = vld [vmem:[%s936_s1 + $0x110] sm:$0xff]   ;;  %v741_v45 = vld [vmem:[%s937_s0 + $0x38] ss:$20 sps:$4 sm:$0xff]  }
  0x10   :  { %624 = vmatpush3.bf16.msra.mxu0 %v706_v14  ;;  %v740_v43 = vld [vmem:[%s937_s0 + $0x10] ss:$20 sps:$4 sm:$0xff]  }
  0x11   :  { %652 = vmatpush3.bf16.msra.mxu1 %v707_v15  ;;  %625 = vmatprep.subr.bf16.mxu0 %v708_v16 }
  0x12   :  { %653 = vmatprep.subr.bf16.mxu1 %v709_v17 }
  0x14   :  { %626 = vmatpush3.bf16.msra.mxu0 %v710_v18 }
  0x15   :  { %654 = vmatpush3.bf16.msra.mxu1 %v711_v19  ;;  %627 = vmatprep.subr.bf16.mxu0 %v712_v20 }
  0x16   :  { %655 = vmatprep.subr.bf16.mxu1 %v713_v21 }
  0x18   :  { %628 = vmatpush3.bf16.msra.mxu0 %v714_v22 }
  0x19   :  { %656 = vmatpush3.bf16.msra.mxu1 %v715_v23  ;;  %629 = vmatprep.subr.bf16.mxu0 %v716_v24 }
  0x1a   :  { %657 = vmatprep.subr.bf16.mxu1 %v717_v25 }
  0x1c   :  { %630 = vmatpush3.bf16.msra.mxu0 %v718_v26 }
  0x1d   :  { %658 = vmatpush3.bf16.msra.mxu1 %v719_v27  ;;  %631 = vmatprep.subr.bf16.mxu0 %v720_v28 }
  0x1e   :  { %659 = vmatprep.subr.bf16.mxu1 %v721_v29 }
  0x20   :  { %632 = vmatpush3.bf16.msra.mxu0 %v722_v30 }
  0x21   :  { %660 = vmatpush3.bf16.msra.mxu1 %v723_v31  ;;  %679 = vmatprep.subr.bf16.mxu0 %v730_v36 }
  0x23   :  { %405 = vmatmul.mubr.bf16.vlgmr.msra.gmra.mrb[0].mxu0 %v724_v32 }
  0x24   :  { %454 = vmatmul.mubr.bf16.vlgmr.msra.gmra.mrb[0].mxu1 %v727_v34  ;;  %680 = vmatpush3.bf16.msra.mxu0 %v730_v36 }
  0x25   :  { %681 = vmatprep.subr.bf16.mxu0 %v731_v37  ;;  %412 = vmatprep.mubr.bf16.mxu0 %v732_v38  ;;  %v529_v38 = vld [vmem:[%s938_s3] sm:$0x1] }
  0x26   :  { %461 = vmatprep.mubr.bf16.mxu1 %v734_v39 }
  0x28   :  { %682 = vmatpush3.bf16.msra.mxu0 %v731_v37 }
  0x29   :  { %683 = vmatprep.subr.bf16.mxu0 %v738_v41 }
  0x2b   :  { %413 = vmatmul.mubr.bf16.gmra.mrb[4].mxu0 %v736_v40 }
  0x2c   :  { %462 = vmatmul.mubr.bf16.gmra.mrb[4].mxu1 %v737_v42  ;;  %687 = vmatprep.mubr.msk.bf16.mxu0 %vm365_vm0, %v740_v43 }
  0x2d   :  { %684 = vmatpush3.bf16.msra.mxu0 %v738_v41  ;;  %v541_v41 = vld [vmem:[%s939_s4] sm:$0x1] }
  0x2e   :  { %685 = vmatprep.subr.bf16.mxu0 %v739_v44 }
  0x31   :  { %686 = vmatpush3.bf16.msra.mxu0 %v739_v44 }
  0x34   :  { %688 = vmatmul.mubr.msk.bf16.vlgmr.msra.gmra.mrb[8].mxu0 %vm365_vm0, %v741_v45 }
  0xf6   :  { %v633_v47 = vpop.f32.mrb[0].mxu0 }
  0xf7   :  { %v661_v48 = vpop.f32.mrb[0].mxu1  ;;  %v634_v49 = vpop.f32.mrb[1].mxu0 }
  0xf8   :  { %v635_v50 = vadd.f32 %v634_v49, %v633_v47  ;;  %v662_v51 = vpop.f32.mrb[1].mxu1  ;;  %v636_v52 = vpop.f32.mrb[2].mxu0 }
  0xf9   :  { %v663_v53 = vadd.f32 %v662_v51, %v661_v48  ;;  %v664_v54 = vpop.f32.mrb[2].mxu1  ;;  %v637_v55 = vpop.f32.mrb[3].mxu0 }
  0xfa   :  { %v638_v56 = vadd.f32 %v637_v55, %v636_v52  ;;  %v665_v57 = vpop.f32.mrb[3].mxu1 }
  0xfb   :  { %v666_v58 = vadd.f32 %v665_v57, %v664_v54  ;;  %v456_v59 = vadd.f32 %v663_v53, %v635_v50 }
  0xfd   :  { %v459_v60 = vadd.f32 %v666_v58, %v638_v56 }
  0xfe   :  { %v639_v61 = vpop.f32.mrb[4].mxu0 }
  0xff   :  { %v667_v62 = vpop.f32.mrb[4].mxu1  ;;  %v640_v63 = vpop.f32.mrb[5].mxu0 }
 0x100   :  { %v641_v0 = vadd.f32 %v640_v63, %v639_v61  ;;  %v668_v1 = vpop.f32.mrb[5].mxu1  ;;  %v642_v2 = vpop.f32.mrb[6].mxu0 }
 0x101   :  { %v669_v3 = vadd.f32 %v668_v1, %v667_v62  ;;  %v670_v4 = vpop.f32.mrb[6].mxu1  ;;  %v643_v5 = vpop.f32.mrb[7].mxu0 }
 0x102   :  { %v644_v6 = vadd.f32 %v643_v5, %v642_v2  ;;  %v671_v7 = vpop.f32.mrb[7].mxu1 }
 0x103   :  { %v672_v8 = vadd.f32 %v671_v7, %v670_v4  ;;  %v464_v9 = vadd.f32 %v669_v3, %v641_v0 }
 0x105   :  { %v467_v10 = vadd.f32 %v672_v8, %v644_v6 }
 0x107   :  { %v689_v11 = vpop.f32.mrb[8].mxu0 }
 0x108   :  { %v513_v12 = vadd.f32 %v689_v11, %v464_v9  ;;  %v504_v13 = vpop.f32.mrb[9].mxu0 }
 0x109   :  { %v505_v14 = vadd.f32 %v504_v13, %v456_v59  ;;  %v690_v15 = vpop.f32.mrb[10].mxu0 }
 0x10a   :  { %521 = vst [vmem:[%s940_s2 + $0x10] sm:$0xff] %v513_v12  ;;  %v516_v16 = vadd.f32 %v690_v15, %v467_v10  ;;  %v507_v17 = vpop.f32.mrb[11].mxu0  ;;  %v544_v22 = vmul.f32 %v513_v12, %v513_v12 }
 0x10b   :  { %519 = vst [vmem:[%s940_s2] sm:$0xff] %v505_v14  ;;  %v508_v18 = vadd.f32 %v507_v17, %v459_v60  ;;  %v542_v19 = vmul.f32 %v505_v14, %v505_v14 }
 0x10c   :  { %522 = vst [vmem:[%s940_s2 + $0x18] sm:$0xff] %v516_v16  ;;  %v545_v25 = vmul.f32 %v516_v16, %v516_v16 }
 0x10d   :  { %520 = vst [vmem:[%s940_s2 + $0x8] sm:$0xff] %v508_v18  ;;  %v530_v20 = vadd.f32 %v508_v18, %v505_v14  ;;  %v543_v21 = vmul.f32 %v508_v18, %v508_v18 }
 0x10f   :  { %v531_v23 = vadd.f32 %v530_v20, %v513_v12  ;;  %v546_v24 = vadd.f32 %v543_v21, %v542_v19 }
 0x111   :  { %v532_v26 = vadd.f32 %v531_v23, %v516_v16  ;;  %v547_v27 = vadd.f32 %v546_v24, %v544_v22 }
 0x113   :  { %v533_v28 = vrot.slane %v532_v26, 4  ;;  %v548_v29 = vadd.f32 %v547_v27, %v545_v25 }
 0x115   :  { %v534_v30 = vadd.f32 %v533_v28, %v532_v26  ;;  %v549_v31 = vrot.slane %v548_v29, 4 }
 0x117   :  { %v535_v32 = vrot.slane %v534_v30, 2  ;;  %v550_v33 = vadd.f32 %v549_v31, %v548_v29 }
 0x119   :  { %v536_v34 = vadd.f32 %v535_v32, %v534_v30  ;;  %v551_v35 = vrot.slane %v550_v33, 2 }
 0x11b   :  { %v537_v36 = vrot.slane %v536_v34, 1  ;;  %v552_v37 = vadd.f32 %v551_v35, %v550_v33 }
 0x11d   :  { %v538_v39 = vadd.f32 %v537_v36, %v536_v34  ;;  %v553_v40 = vrot.slane %v552_v37, 1 }
 0x11f   :  { %v539_v42 = vadd.f32 %v538_v39, %v529_v38  ;;  %v554_v43 = vadd.f32 %v553_v40, %v552_v37 }
 0x121   :  { %540 = vst [vmem:[%s938_s3] sm:$0x1] %v539_v42  ;;  %v555_v44 = vadd.f32 %v554_v43, %v541_v41 }
 0x123   :  { %556 = vst [vmem:[%s939_s4] sm:$0x1] %v555_v44 }

// kernel: stem_forward.27
= control target key start
LH: loop header
LB: loop body
LE: loop exit
PB: predicated region body
PF: predicated region fallthrough
CT: control target
= control target key end

     0   :  { %v20_v0 = vlaneseq  ;;  %s284_s1 = inlined_call_operand.vmem [shape: f32[1,512], index: 1, kind: input, shape index: {}]   ;;  %s285_s2 = inlined_call_operand.vmem [shape: f32[1,512], index: 2, kind: input, shape index: {}]   ;;  %s286_s0 = inlined_call_operand.vmem [shape: f32[8,512], index: 0, kind: input, shape index: {}]   ;;  %s287_s3 = inlined_call_operand.vmem [shape: f32[8,512], index: 3, kind: output, shape index: {}]  }
   0x1   :  { %v18_v2 = vld [vmem:[%s284_s1] sm:$0xf]  ;;  %v15_v9 = vld [vmem:[%s286_s0 + $0x8] sm:$0xff]  ;;  %v16_v14 = vld [vmem:[%s286_s0 + $0x10] sm:$0xff] }
   0x2   :  { %v21_v1 = vshrl.u32 %v20_v0, 7  ;;  %v44_v3 = vld [vmem:[%s285_s2] sm:$0xf]  ;;  %v17_v15 = vld [vmem:[%s286_s0 + $0x18] sm:$0xff] }
   0x3   :  { %v14_v8 = vld [vmem:[%s286_s0] sm:$0xff] }
   0x4   :  { %v22_v4 = vsub.s32 0, %v21_v1  ;;  %v26_v5 = vsub.s32 1, %v21_v1  ;;  %v30_v6 = vsub.s32 2, %v21_v1  ;;  %v34_v7 = vsub.s32 3, %v21_v1 }
   0x6   :  { %v23_v10 = vrot.slane %v18_v2, %v22_v4  ;;  %v49_v11 = vrot.slane %v44_v3, %v22_v4  ;;  %v27_v12 = vrot.slane %v18_v2, %v26_v5  ;;  %v53_v13 = vrot.slane %v44_v3, %v26_v5 }
   0x7   :  { %v31_v16 = vrot.slane %v18_v2, %v30_v6  ;;  %v57_v17 = vrot.slane %v44_v3, %v30_v6  ;;  %v35_v18 = vrot.slane %v18_v2, %v34_v7  ;;  %v61_v19 = vrot.slane %v44_v3, %v34_v7 }
   0x8   :  { %v40_v20 = vmul.f32 %v23_v10, %v14_v8  ;;  %v41_v21 = vmul.f32 %v27_v12, %v15_v9 }
   0x9   :  { %v42_v22 = vmul.f32 %v31_v16, %v16_v14  ;;  %v43_v23 = vmul.f32 %v35_v18, %v17_v15 }
   0xa   :  { %v240_v24 = vadd.f32 %v49_v11, %v40_v20  ;;  %v242_v25 = vadd.f32 %v53_v13, %v41_v21 }
   0xb   :  { %v244_v26 = vadd.f32 %v57_v17, %v42_v22  ;;  %v246_v27 = vadd.f32 %v61_v19, %v43_v23 }
   0xc   :  { %v249_v28 = vmul.f32 0.70710677, %v240_v24  ;;  %v252_v29 = vmul.f32 0.70710677, %v242_v25 }
   0xd   :  { %v255_v30 = vmul.f32 0.70710677, %v244_v26  ;;  %v258_v31 = vmul.f32 0.70710677, %v246_v27 }
   0xe   :  { %v78_v32 = vand.u32 2147483647, %v249_v28  ;;  %v79_v33 = vand.u32 2147483647, %v252_v29  ;;  %vm158_vm0 = vcmp.lt.f32.partialorder %v249_v28, 0.0  ;;  %vm159_vm1 = vcmp.lt.f32.partialorder %v252_v29, 0.0 }
   0xf   :  { %v80_v34 = vand.u32 2147483647, %v255_v30  ;;  %v81_v35 = vand.u32 2147483647, %v258_v31  ;;  %vm160_vm2 = vcmp.lt.f32.partialorder %v255_v30, 0.0  ;;  %v72_v29 = vmul.f32 0.5, %v244_v26 }
  0x10   :  { %v82_v36 = vmul.f32 0.3275911, %v78_v32  ;;  %v83_v37 = vmul.f32 0.3275911, %v79_v33  ;;  %v134_v44 = vsub.f32 0.0, %v78_v32  ;;  %v135_v45 = vsub.f32 0.0, %v79_v33 }
  0x11   :  { %v84_v38 = vmul.f32 0.3275911, %v80_v34  ;;  %v85_v41 = vmul.f32 0.3275911, %v81_v35  ;;  %v136_v47 = vsub.f32 0.0, %v80_v34  ;;  %v137_v50 = vsub.f32 0.0, %v81_v35 }
  0x12   :  { %v86_v39 = vadd.f32 1.0, %v82_v36  ;;  %v87_v40 = vadd.f32 1.0, %v83_v37  ;;  %v138_v46 = vmul.f32 %v134_v44, %v78_v32  ;;  %v139_v48 = vmul.f32 %v135_v45, %v79_v33 }
  0x13   :  { %v88_v42 = vadd.f32 1.0, %v84_v38  ;;  %v89_v43 = vadd.f32 1.0, %v85_v41  ;;  %v140_v55 = vmul.f32 %v136_v47, %v80_v34  ;;  %v141_v60 = vmul.f32 %v137_v50, %v81_v35 }
  0x14   :  { %186 = vrcp.f32 %v86_v39  ;;  %v142_v53 = vmul.f32 1.442695, %v138_v46  ;;  %v144_v57 = vmul.f32 1.442695, %v139_v48  ;;  %v70_v50 = vmul.f32 0.5, %v240_v24 }
  0x15   :  { %188 = vrcp.f32 %v87_v40  ;;  %v146_v1 = vmul.f32 1.442695, %v140_v55  ;;  %v148_v6 = vmul.f32 1.442695, %v141_v60  ;;  %vm161_vm3 = vcmp.lt.f32.partialorder %v258_v31, 0.0 }
  0x16   :  { %190 = vrcp.f32 %v88_v42 }
  0x17   :  { %192 = vrcp.f32 %v89_v43 }
  0x18   :  { %194 = vpow2.f32 %v142_v53  ;;  %v71_v53 = vmul.f32 0.5, %v242_v25 }
  0x19   :  { %196 = vpow2.f32 %v144_v57 }
  0x1a   :  { %198 = vpow2.f32 %v146_v1 }
  0x1b   :  { %200 = vpow2.f32 %v148_v6 }
  0x1e   :  { %v187_v49 = vpop.eup %186 }
  0x1f   :  { %v189_v51 = vpop.eup %188  ;;  %v98_v52 = vmul.f32 1.0614054, %v187_v49 }
  0x20   :  { %v99_v54 = vmul.f32 1.0614054, %v189_v51  ;;  %v191_v58 = vpop.eup %190 }
  0x21   :  { %v102_v56 = vadd.f32 -1.4531521, %v98_v52  ;;  %v100_v62 = vmul.f32 1.0614054, %v191_v58  ;;  %v193_v63 = vpop.eup %192 }
  0x22   :  { %v103_v59 = vadd.f32 -1.4531521, %v99_v54  ;;  %v101_v4 = vmul.f32 1.0614054, %v193_v63  ;;  %v195_v22 = vpop.eup %194 }
  0x23   :  { %v106_v61 = vmul.f32 %v187_v49, %v102_v56  ;;  %v104_v3 = vadd.f32 -1.4531521, %v100_v62  ;;  %v197_v32 = vpop.eup %196 }
  0x24   :  { %v107_v0 = vmul.f32 %v189_v51, %v103_v59  ;;  %v105_v9 = vadd.f32 -1.4531521, %v101_v4  ;;  %v199_v40 = vpop.eup %198 }
  0x25   :  { %v110_v2 = vadd.f32 1.4214138, %v106_v61  ;;  %v108_v8 = vmul.f32 %v191_v58, %v104_v3  ;;  %v201_v45 = vpop.eup %200 }
  0x26   :  { %v111_v5 = vadd.f32 1.4214138, %v107_v0  ;;  %v109_v13 = vmul.f32 %v193_v63, %v105_v9 }
  0x27   :  { %v114_v7 = vmul.f32 %v187_v49, %v110_v2  ;;  %v112_v12 = vadd.f32 1.4214138, %v108_v8 }
  0x28   :  { %v115_v10 = vmul.f32 %v189_v51, %v111_v5  ;;  %v113_v17 = vadd.f32 1.4214138, %v109_v13 }
  0x29   :  { %v118_v11 = vadd.f32 -0.28449672, %v114_v7  ;;  %v116_v16 = vmul.f32 %v191_v58, %v112_v12 }
  0x2a   :  { %v119_v14 = vadd.f32 -0.28449672, %v115_v10  ;;  %v117_v21 = vmul.f32 %v193_v63, %v113_v17 }
  0x2b   :  { %v122_v15 = vmul.f32 %v187_v49, %v118_v11  ;;  %v120_v20 = vadd.f32 -0.28449672, %v116_v16 }
  0x2c   :  { %v123_v18 = vmul.f32 %v189_v51, %v119_v14  ;;  %v121_v35 = vadd.f32 -0.28449672, %v117_v21 }
  0x2d   :  { %v126_v19 = vadd.f32 0.2548296, %v122_v15  ;;  %v124_v34 = vmul.f32 %v191_v58, %v120_v20 }
  0x2e   :  { %v127_v23 = vadd.f32 0.2548296, %v123_v18  ;;  %v125_v39 = vmul.f32 %v193_v63, %v121_v35 }
  0x2f   :  { %v130_v33 = vmul.f32 %v187_v49, %v126_v19  ;;  %v128_v38 = vadd.f32 0.2548296, %v124_v34 }
  0x30   :  { %v131_v36 = vmul.f32 %v189_v51, %v127_v23  ;;  %v129_v44 = vadd.f32 0.2548296, %v125_v39 }
  0x31   :  { %v150_v37 = vmul.f32 %v195_v22, %v130_v33  ;;  %v132_v43 = vmul.f32 %v191_v58, %v128_v38 }
  0x32   :  { %v151_v41 = vmul.f32 %v197_v32, %v131_v36  ;;  %v133_v49 = vmul.f32 %v193_v63, %v129_v44  ;;  %v73_v63 = vmul.f32 0.5, %v246_v27 }
  0x33   :  { %v154_v42 = vsub.f32 1.0, %v150_v37  ;;  %v152_v48 = vmul.f32 %v199_v40, %v132_v43 }
  0x34   :  { %v155_v46 = vsub.f32 1.0, %v151_v41  ;;  %v153_v55 = vmul.f32 %v201_v45, %v133_v49 }
  0x35   :  { %v162_v47 = vsub.f32 0.0, %v154_v42  ;;  %v156_v54 = vsub.f32 1.0, %v152_v48 }
  0x36   :  { %v163_v51 = vsub.f32 0.0, %v155_v46  ;;  %v157_v59 = vsub.f32 1.0, %v153_v55 }
  0x37   :  { %v166_v52 = vsel %vm158_vm0, %v162_v47, %v154_v42  ;;  %v164_v28 = vsub.f32 0.0, %v156_v54 }
  0x38   :  { %v170_v56 = vadd.f32 1.0, %v166_v52  ;;  %v167_v57 = vsel %vm159_vm1, %v163_v51, %v155_v46  ;;  %v165_v62 = vsub.f32 0.0, %v157_v59 }
  0x39   :  { %v171_v58 = vadd.f32 1.0, %v167_v57  ;;  %v168_v24 = vsel %vm160_vm2, %v164_v28, %v156_v54 }
  0x3a   :  { %v174_v60 = vmul.f32 %v170_v56, %v70_v50  ;;  %v172_v25 = vadd.f32 1.0, %v168_v24  ;;  %v169_v30 = vsel %vm161_vm3, %v165_v62, %v157_v59 }
  0x3b   :  { %v175_v61 = vmul.f32 %v171_v58, %v71_v53  ;;  %v173_v1 = vadd.f32 1.0, %v169_v30 }
  0x3c   :  { %178 = vst [vmem:[%s287_s3] sm:$0xff] %v174_v60  ;;  %v176_v0 = vmul.f32 %v172_v25, %v72_v29 }
  0x3d   :  { %179 = vst [vmem:[%s287_s3 + $0x8] sm:$0xff] %v175_v61  ;;  %v177_v26 = vmul.f32 %v173_v1, %v73_v63 }
  0x3e   :  { %180 = vst [vmem:[%s287_s3 + $0x10] sm:$0xff] %v176_v0 }
  0x3f   :  { %181 = vst [vmem:[%s287_s3 + $0x18] sm:$0xff] %v177_v26 }

// kernel: stem_forward.30
= control target key start
LH: loop header
LB: loop body
LE: loop exit
PB: predicated region body
PF: predicated region fallthrough
CT: control target
= control target key end

     0   :  { %vm61_vm0 = vcmask 523264   ;;  %v200_v6 = vmov 0.0   ;;  %s274_s1 = inlined_call_operand.vmem [shape: bf16[64,128], index: 1, kind: input, shape index: {}]   ;;  %s275_s0 = inlined_call_operand.vmem [shape: bf16[32,64], index: 0, kind: input, shape index: {}]   ;;  %s276_s3 = inlined_call_operand.vmem [shape: f32[1,128], index: 3, kind: output, shape index: {1}]   ;;  %s277_s4 = inlined_call_operand.vmem [shape: f32[1,128], index: 4, kind: output, shape index: {2}]   ;;  %s278_s2 = inlined_call_operand.vmem [shape: f32[32,128], index: 2, kind: output, shape index: {0}]  }
   0x1   :  { %v194_v0 = vld [vmem:[%s274_s1] sm:$0xff]   ;;  %v195_v1 = vld [vmem:[%s274_s1 + $0x8] sm:$0xff]   ;;  %v196_v2 = vld [vmem:[%s274_s1 + $0x10] sm:$0xff]   ;;  %125 = vst [vmem:[%s276_s3] sm:$0x1] %v200_v6 }
   0x2   :  { %181 = vmatprep.subr.bf16.mxu0 %v194_v0  ;;  %v198_v3 = vld [vmem:[%s275_s0] sm:$0xff]   ;;  %v197_v4 = vld [vmem:[%s274_s1 + $0x18] sm:$0xff]   ;;  %v199_v5 = vld [vmem:[%s275_s0 + $0x8] sm:$0xff]   ;;  %126 = vst [vmem:[%s277_s4] sm:$0x1] %v200_v6 }
   0x3   :  { %182 = vmatpush3.bf16.msra.mxu0 %v194_v0  ;;  %189 = vmatprep.mubr.msk.bf16.mxu0 %vm61_vm0, %v198_v3 }
   0x4   :  { %183 = vmatprep.subr.bf16.mxu0 %v195_v1 }
   0x7   :  { %184 = vmatpush3.bf16.msra.mxu0 %v195_v1 }
   0x8   :  { %185 = vmatprep.subr.bf16.mxu0 %v196_v2  ;;  %v127_v30 = vld [vmem:[%s276_s3] sm:$0x1] }
   0x9   :  { %v139_v33 = vld [vmem:[%s277_s4] sm:$0x1] }
   0xb   :  { %186 = vmatpush3.bf16.msra.mxu0 %v196_v2 }
   0xc   :  { %187 = vmatprep.subr.bf16.mxu0 %v197_v4 }
   0xf   :  { %188 = vmatpush3.bf16.msra.mxu0 %v197_v4 }
  0x12   :  { %190 = vmatmul.mubr.msk.bf16.vlgmr.msra.gmra.mrb[0].mxu0 %vm61_vm0, %v199_v5 }
  0xe5   :  { %v191_v7 = vpop.f32.mrb[0].mxu0 }
  0xe6   :  { %119 = vst [vmem:[%s278_s2 + $0x10] sm:$0xff] %v191_v7  ;;  %v102_v8 = vpop.f32.mrb[1].mxu0  ;;  %v142_v14 = vmul.f32 %v191_v7, %v191_v7 }
  0xe7   :  { %117 = vst [vmem:[%s278_s2] sm:$0xff] %v102_v8  ;;  %v192_v9 = vpop.f32.mrb[2].mxu0  ;;  %v140_v11 = vmul.f32 %v102_v8, %v102_v8 }
  0xe8   :  { %120 = vst [vmem:[%s278_s2 + $0x18] sm:$0xff] %v192_v9  ;;  %v105_v10 = vpop.f32.mrb[3].mxu0  ;;  %v143_v17 = vmul.f32 %v192_v9, %v192_v9 }
  0xe9   :  { %118 = vst [vmem:[%s278_s2 + $0x8] sm:$0xff] %v105_v10  ;;  %v128_v12 = vadd.f32 %v105_v10, %v102_v8  ;;  %v141_v13 = vmul.f32 %v105_v10, %v105_v10 }
  0xeb   :  { %v129_v15 = vadd.f32 %v191_v7, %v128_v12  ;;  %v144_v16 = vadd.f32 %v141_v13, %v140_v11 }
  0xed   :  { %v130_v18 = vadd.f32 %v192_v9, %v129_v15  ;;  %v145_v19 = vadd.f32 %v144_v16, %v142_v14 }
  0xef   :  { %v131_v20 = vrot.slane %v130_v18, 4  ;;  %v146_v21 = vadd.f32 %v145_v19, %v143_v17 }
  0xf1   :  { %v132_v22 = vadd.f32 %v131_v20, %v130_v18  ;;  %v147_v23 = vrot.slane %v146_v21, 4 }
  0xf3   :  { %v133_v24 = vrot.slane %v132_v22, 2  ;;  %v148_v25 = vadd.f32 %v147_v23, %v146_v21 }
  0xf5   :  { %v134_v26 = vadd.f32 %v133_v24, %v132_v22  ;;  %v149_v27 = vrot.slane %v148_v25, 2 }
  0xf7   :  { %v135_v28 = vrot.slane %v134_v26, 1  ;;  %v150_v29 = vadd.f32 %v149_v27, %v148_v25 }
  0xf9   :  { %v136_v31 = vadd.f32 %v135_v28, %v134_v26  ;;  %v151_v32 = vrot.slane %v150_v29, 1 }
  0xfb   :  { %v137_v34 = vadd.f32 %v136_v31, %v127_v30  ;;  %v152_v35 = vadd.f32 %v151_v32, %v150_v29 }
  0xfd   :  { %138 = vst [vmem:[%s276_s3] sm:$0x1] %v137_v34  ;;  %v153_v36 = vadd.f32 %v152_v35, %v139_v33 }
  0xff   :  { %154 = vst [vmem:[%s277_s4] sm:$0x1] %v153_v36 }

// kernel: stem_forward.31
= control target key start
LH: loop header
LB: loop body
LE: loop exit
PB: predicated region body
PF: predicated region fallthrough
CT: control target
= control target key end

     0   :  { %v23_v0 = vlaneseq  ;;  %s156_s1 = inlined_call_operand.vmem [shape: f32[1,512], index: 1, kind: input, shape index: {}]   ;;  %s157_s2 = inlined_call_operand.vmem [shape: f32[1,512], index: 2, kind: input, shape index: {}]   ;;  %s158_s0 = inlined_call_operand.vmem [shape: f32[8,512], index: 0, kind: input, shape index: {}]   ;;  %s159_s3 = inlined_call_operand.vmem [shape: f32[8,512], index: 3, kind: input, shape index: {}]   ;;  %s160_s4 = inlined_call_operand.vmem [shape: f32[8,512], index: 4, kind: output, shape index: {}]  }
   0x1   :  { %v21_v2 = vld [vmem:[%s156_s1] sm:$0xf]  ;;  %v18_v9 = vld [vmem:[%s158_s0 + $0x8] sm:$0xff]  ;;  %v19_v14 = vld [vmem:[%s158_s0 + $0x10] sm:$0xff] }
   0x2   :  { %v24_v1 = vshrl.u32 %v23_v0, 7  ;;  %v47_v3 = vld [vmem:[%s157_s2] sm:$0xf]  ;;  %v20_v15 = vld [vmem:[%s158_s0 + $0x18] sm:$0xff]  ;;  %v74_v23 = vld [vmem:[%s159_s3 + $0x8] sm:$0xff] }
   0x3   :  { %v17_v8 = vld [vmem:[%s158_s0] sm:$0xff]  ;;  %v75_v28 = vld [vmem:[%s159_s3 + $0x10] sm:$0xff]  ;;  %v76_v29 = vld [vmem:[%s159_s3 + $0x18] sm:$0xff] }
   0x4   :  { %v25_v4 = vsub.s32 0, %v24_v1  ;;  %v29_v5 = vsub.s32 1, %v24_v1  ;;  %v33_v6 = vsub.s32 2, %v24_v1  ;;  %v37_v7 = vsub.s32 3, %v24_v1  ;;  %v73_v22 = vld [vmem:[%s159_s3] sm:$0xff] }
   0x6   :  { %v26_v10 = vrot.slane %v21_v2, %v25_v4  ;;  %v52_v11 = vrot.slane %v47_v3, %v25_v4  ;;  %v30_v12 = vrot.slane %v21_v2, %v29_v5  ;;  %v56_v13 = vrot.slane %v47_v3, %v29_v5 }
   0x7   :  { %v34_v16 = vrot.slane %v21_v2, %v33_v6  ;;  %v60_v17 = vrot.slane %v47_v3, %v33_v6  ;;  %v38_v18 = vrot.slane %v21_v2, %v37_v7  ;;  %v64_v19 = vrot.slane %v47_v3, %v37_v7 }
   0x8   :  { %v43_v20 = vmul.f32 %v26_v10, %v17_v8  ;;  %v44_v21 = vmul.f32 %v30_v12, %v18_v9 }
   0x9   :  { %v45_v24 = vmul.f32 %v34_v16, %v19_v14  ;;  %v46_v25 = vmul.f32 %v38_v18, %v20_v15 }
   0xa   :  { %v69_v26 = vadd.f32 %v52_v11, %v43_v20  ;;  %v70_v27 = vadd.f32 %v56_v13, %v44_v21 }
   0xb   :  { %v71_v30 = vadd.f32 %v60_v17, %v45_v24  ;;  %v72_v31 = vadd.f32 %v64_v19, %v46_v25 }
   0xc   :  { %v77_v32 = vadd.f32 %v73_v22, %v69_v26  ;;  %v78_v33 = vadd.f32 %v74_v23, %v70_v27 }
   0xd   :  { %v79_v34 = vadd.f32 %v75_v28, %v71_v30  ;;  %v80_v35 = vadd.f32 %v76_v29, %v72_v31 }
   0xe   :  { %81 = vst [vmem:[%s160_s4] sm:$0xff] %v77_v32  ;;  %82 = vst [vmem:[%s160_s4 + $0x8] sm:$0xff] %v78_v33 }
   0xf   :  { %83 = vst [vmem:[%s160_s4 + $0x10] sm:$0xff] %v79_v34  ;;  %84 = vst [vmem:[%s160_s4 + $0x18] sm:$0xff] %v80_v35 }

// kernel: stem_forward.28
= control target key start
LH: loop header
LB: loop body
LE: loop exit
PB: predicated region body
PF: predicated region fallthrough
CT: control target
= control target key end

     0   :  { %s1655_s1 = inlined_call_operand.vmem [shape: bf16[1152,128], index: 1, kind: input, shape index: {}]   ;;  %s1656_s0 = inlined_call_operand.vmem [shape: bf16[32,1152], index: 0, kind: input, shape index: {}]   ;;  %s1657_s3 = inlined_call_operand.vmem [shape: f32[1,128], index: 3, kind: output, shape index: {1}]   ;;  %s1658_s4 = inlined_call_operand.vmem [shape: f32[1,128], index: 4, kind: output, shape index: {2}]   ;;  %s1659_s2 = inlined_call_operand.vmem [shape: f32[32,128], index: 2, kind: output, shape index: {0}]  }
   0x1   :  { %v1231_v0 = vld [vmem:[%s1655_s1 + $0x40] sm:$0xff]   ;;  %v1235_v4 = vld [vmem:[%s1655_s1 + $0x48] sm:$0xff]   ;;  %v1239_v8 = vld [vmem:[%s1655_s1 + $0x50] sm:$0xff]  }
   0x2   :  { %v1232_v1 = vld [vmem:[%s1655_s1 + $0xc0] sm:$0xff]   ;;  %1088 = vmatprep.subr.bf16.mxu0 %v1231_v0  ;;  %v1236_v5 = vld [vmem:[%s1655_s1 + $0xc8] sm:$0xff]   ;;  %v1240_v9 = vld [vmem:[%s1655_s1 + $0xd0] sm:$0xff]  }
   0x3   :  { %v1233_v2 = vld [vmem:[%s1655_s1] sm:$0xff]   ;;  %1116 = vmatprep.subr.bf16.mxu1 %v1232_v1  ;;  %v1237_v6 = vld [vmem:[%s1655_s1 + $0x8] sm:$0xff]   ;;  %v1241_v10 = vld [vmem:[%s1655_s1 + $0x10] sm:$0xff]  }
   0x4   :  { %v1234_v3 = vld [vmem:[%s1655_s1 + $0x80] sm:$0xff]   ;;  %1089 = vmatpush3.bf16.msra.mxu0 %v1233_v2  ;;  %v1238_v7 = vld [vmem:[%s1655_s1 + $0x88] sm:$0xff]   ;;  %v1242_v11 = vld [vmem:[%s1655_s1 + $0x90] sm:$0xff]  }
   0x5   :  { %1117 = vmatpush3.bf16.msra.mxu1 %v1234_v3  ;;  %1090 = vmatprep.subr.bf16.mxu0 %v1235_v4  ;;  %v1243_v12 = vld [vmem:[%s1655_s1 + $0x58] sm:$0xff]   ;;  %v1247_v16 = vld [vmem:[%s1655_s1 + $0x60] sm:$0xff]   ;;  %v1251_v20 = vld [vmem:[%s1655_s1 + $0x68] sm:$0xff]  }
   0x6   :  { %1118 = vmatprep.subr.bf16.mxu1 %v1236_v5  ;;  %v1244_v13 = vld [vmem:[%s1655_s1 + $0xd8] sm:$0xff]   ;;  %v1248_v17 = vld [vmem:[%s1655_s1 + $0xe0] sm:$0xff]   ;;  %v1252_v21 = vld [vmem:[%s1655_s1 + $0xe8] sm:$0xff]  }
   0x7   :  { %v1245_v14 = vld [vmem:[%s1655_s1 + $0x18] sm:$0xff]   ;;  %v1249_v18 = vld [vmem:[%s1655_s1 + $0x20] sm:$0xff]   ;;  %v1253_v22 = vld [vmem:[%s1655_s1 + $0x28] sm:$0xff]  }
   0x8   :  { %1091 = vmatpush3.bf16.msra.mxu0 %v1237_v6  ;;  %v1246_v15 = vld [vmem:[%s1655_s1 + $0x98] sm:$0xff]   ;;  %v1250_v19 = vld [vmem:[%s1655_s1 + $0xa0] sm:$0xff]   ;;  %v1254_v23 = vld [vmem:[%s1655_s1 + $0xa8] sm:$0xff]  }
   0x9   :  { %1119 = vmatpush3.bf16.msra.mxu1 %v1238_v7  ;;  %1092 = vmatprep.subr.bf16.mxu0 %v1239_v8  ;;  %v1255_v24 = vld [vmem:[%s1655_s1 + $0x70] sm:$0xff]   ;;  %v1259_v28 = vld [vmem:[%s1655_s1 + $0x78] sm:$0xff]   ;;  %v1263_v32 = vld [vmem:[%s1656_s0] ss:$36 sps:$4 sm:$0xff]  }
   0xa   :  { %1120 = vmatprep.subr.bf16.mxu1 %v1240_v9  ;;  %v1256_v25 = vld [vmem:[%s1655_s1 + $0xf0] sm:$0xff]   ;;  %v1260_v29 = vld [vmem:[%s1655_s1 + $0xf8] sm:$0xff]   ;;  %v1265_v33 = vld [vmem:[%s1656_s0 + $0x4] ss:$36 sps:$4 sm:$0xff]  }
   0xb   :  { %v1257_v26 = vld [vmem:[%s1655_s1 + $0x30] sm:$0xff]   ;;  %v1261_v30 = vld [vmem:[%s1655_s1 + $0x38] sm:$0xff]   ;;  %v1266_v34 = vld [vmem:[%s1656_s0 + $0x8] ss:$36 sps:$4 sm:$0xff]   ;;  %735 = vmatprep.mubr.bf16.mxu0 %v1265_v33 }
   0xc   :  { %1093 = vmatpush3.bf16.msra.mxu0 %v1241_v10  ;;  %v1258_v27 = vld [vmem:[%s1655_s1 + $0xb0] sm:$0xff]   ;;  %v1262_v31 = vld [vmem:[%s1655_s1 + $0xb8] sm:$0xff]   ;;  %v1269_v36 = vld [vmem:[%s1655_s1 + $0x140] sm:$0xff]  }
   0xd   :  { %1121 = vmatpush3.bf16.msra.mxu1 %v1242_v11  ;;  %1094 = vmatprep.subr.bf16.mxu0 %v1243_v12  ;;  %v1268_v35 = vld [vmem:[%s1656_s0 + $0xc] ss:$36 sps:$4 sm:$0xff]   ;;  %v1270_v37 = vld [vmem:[%s1655_s1 + $0x100] sm:$0xff]   ;;  %v1281_v48 = vld [vmem:[%s1655_s1 + $0x158] sm:$0xff]  }
   0xe   :  { %1122 = vmatprep.subr.bf16.mxu1 %v1244_v13  ;;  %784 = vmatprep.mubr.bf16.mxu1 %v1268_v35  ;;  %v1271_v38 = vld [vmem:[%s1655_s1 + $0x1c0] sm:$0xff]   ;;  %v1273_v40 = vld [vmem:[%s1655_s1 + $0x148] sm:$0xff]   ;;  %v1277_v44 = vld [vmem:[%s1655_s1 + $0x150] sm:$0xff]  }
   0xf   :  { %v1272_v39 = vld [vmem:[%s1655_s1 + $0x180] sm:$0xff]   ;;  %v1274_v41 = vld [vmem:[%s1655_s1 + $0x108] sm:$0xff]   ;;  %v1278_v45 = vld [vmem:[%s1655_s1 + $0x110] sm:$0xff]  }
  0x10   :  { %1095 = vmatpush3.bf16.msra.mxu0 %v1245_v14  ;;  %v1275_v42 = vld [vmem:[%s1655_s1 + $0x1c8] sm:$0xff]   ;;  %v1279_v46 = vld [vmem:[%s1655_s1 + $0x1d0] sm:$0xff]   ;;  %v1282_v49 = vld [vmem:[%s1655_s1 + $0x118] sm:$0xff]  }
  0x11   :  { %1123 = vmatpush3.bf16.msra.mxu1 %v1246_v15  ;;  %1096 = vmatprep.subr.bf16.mxu0 %v1247_v16  ;;  %v1276_v43 = vld [vmem:[%s1655_s1 + $0x188] sm:$0xff]   ;;  %v1280_v47 = vld [vmem:[%s1655_s1 + $0x190] sm:$0xff]   ;;  %v1283_v50 = vld [vmem:[%s1655_s1 + $0x1d8] sm:$0xff]  }
  0x12   :  { %1124 = vmatprep.subr.bf16.mxu1 %v1248_v17  ;;  %v1284_v51 = vld [vmem:[%s1655_s1 + $0x198] sm:$0xff]   ;;  %v1285_v52 = vld [vmem:[%s1655_s1 + $0x160] sm:$0xff]   ;;  %v1289_v56 = vld [vmem:[%s1655_s1 + $0x168] sm:$0xff]  }
  0x13   :  { %v1286_v53 = vld [vmem:[%s1655_s1 + $0x120] sm:$0xff]   ;;  %v1290_v57 = vld [vmem:[%s1656_s0 + $0x4c] ss:$36 sps:$4 sm:$0xff]   ;;  %v1292_v58 = vld [vmem:[%s1656_s0 + $0x54] ss:$36 sps:$4 sm:$0xff]  }
  0x14   :  { %1097 = vmatpush3.bf16.msra.mxu0 %v1249_v18  ;;  %v1287_v54 = vld [vmem:[%s1655_s1 + $0x1e0] sm:$0xff]   ;;  %v1294_v59 = vld [vmem:[%s1655_s1 + $0x128] sm:$0xff]   ;;  %v1296_v61 = vld [vmem:[%s1656_s0 + $0x50] ss:$36 sps:$4 sm:$0xff]  }
  0x15   :  { %1125 = vmatpush3.bf16.msra.mxu1 %v1250_v19  ;;  %1098 = vmatprep.subr.bf16.mxu0 %v1251_v20  ;;  %v1288_v55 = vld [vmem:[%s1655_s1 + $0x1a0] sm:$0xff]   ;;  %v1295_v60 = vld [vmem:[%s1656_s0 + $0x48] ss:$36 sps:$4 sm:$0xff]   ;;  %v1299_v0 = vld [vmem:[%s1655_s1 + $0x170] sm:$0xff]  }
  0x16   :  { %1126 = vmatprep.subr.bf16.mxu1 %v1252_v21  ;;  %v1297_v62 = vld [vmem:[%s1655_s1 + $0x1e8] sm:$0xff]   ;;  %v1300_v1 = vld [vmem:[%s1655_s1 + $0x130] sm:$0xff]   ;;  %v1303_v4 = vld [vmem:[%s1655_s1 + $0x178] sm:$0xff]  }
  0x17   :  { %v1298_v63 = vld [vmem:[%s1655_s1 + $0x1a8] sm:$0xff]   ;;  %v1301_v2 = vld [vmem:[%s1655_s1 + $0x1f0] sm:$0xff]   ;;  %v1304_v5 = vld [vmem:[%s1655_s1 + $0x138] sm:$0xff]  }
  0x18   :  { %1099 = vmatpush3.bf16.msra.mxu0 %v1253_v22  ;;  %v1302_v3 = vld [vmem:[%s1655_s1 + $0x1b0] sm:$0xff]   ;;  %v1305_v6 = vld [vmem:[%s1655_s1 + $0x1f8] sm:$0xff]   ;;  %v1310_v10 = vld [vmem:[%s1655_s1 + $0x200] sm:$0xff]  }
  0x19   :  { %1127 = vmatpush3.bf16.msra.mxu1 %v1254_v23  ;;  %1100 = vmatprep.subr.bf16.mxu0 %v1255_v24  ;;  %v1306_v7 = vld [vmem:[%s1656_s0 + $0x10] ss:$36 sps:$4 sm:$0xff]   ;;  %v1309_v9 = vld [vmem:[%s1655_s1 + $0x1b8] sm:$0xff]   ;;  %v1314_v13 = vld [vmem:[%s1655_s1 + $0x208] sm:$0xff]  }
  0x1a   :  { %1128 = vmatprep.subr.bf16.mxu1 %v1256_v25  ;;  %v1308_v8 = vld [vmem:[%s1656_s0 + $0x14] ss:$36 sps:$4 sm:$0xff]   ;;  %v1313_v12 = vld [vmem:[%s1656_s0 + $0x1c] ss:$36 sps:$4 sm:$0xff]   ;;  %v1319_v17 = vld [vmem:[%s1656_s0 + $0x64] ss:$36 sps:$4 sm:$0xff]  }
  0x1b   :  { %v1311_v11 = vld [vmem:[%s1656_s0 + $0x18] ss:$36 sps:$4 sm:$0xff]   ;;  %v1318_v16 = vld [vmem:[%s1655_s1 + $0x210] sm:$0xff]   ;;  %v1321_v18 = vld [vmem:[%s1656_s0 + $0x60] ss:$36 sps:$4 sm:$0xff]  }
  0x1c   :  { %1101 = vmatpush3.bf16.msra.mxu0 %v1257_v26  ;;  %v1315_v14 = vld [vmem:[%s1656_s0 + $0x5c] ss:$36 sps:$4 sm:$0xff]   ;;  %v1324_v22 = vld [vmem:[%s1655_s1 + $0x228] sm:$0xff]   ;;  %v1325_v23 = vld [vmem:[%s1655_s1 + $0x230] sm:$0xff]   ;;  %v1329_v26 = vmov 0.0  }
  0x1d   :  { %1129 = vmatpush3.bf16.msra.mxu1 %v1258_v27  ;;  %1102 = vmatprep.subr.bf16.mxu0 %v1259_v28  ;;  %v1317_v15 = vld [vmem:[%s1656_s0 + $0x58] ss:$36 sps:$4 sm:$0xff]   ;;  %v1323_v20 = vld [vmem:[%s1655_s1 + $0x220] sm:$0xff]   ;;  %v1328_v25 = vld [vmem:[%s1656_s0 + $0x68] ss:$36 sps:$4 sm:$0xff]   ;;  %956 = vst [vmem:[%s1657_s3] sm:$0x1] %v1329_v26 }
  0x1e   :  { %1130 = vmatprep.subr.bf16.mxu1 %v1260_v29  ;;  %v1322_v19 = vld [vmem:[%s1655_s1 + $0x218] sm:$0xff]   ;;  %v1327_v21 = vld [vmem:[%s1656_s0 + $0x20] ss:$36 sps:$4 sm:$0xff]   ;;  %957 = vst [vmem:[%s1658_s4] sm:$0x1] %v1329_v26 }
  0x1f   :  { %v1326_v24 = vld [vmem:[%s1655_s1 + $0x238] sm:$0xff]  }
  0x20   :  { %1103 = vmatpush3.bf16.msra.mxu0 %v1261_v30 }
  0x21   :  { %1131 = vmatpush3.bf16.msra.mxu1 %v1262_v31  ;;  %1144 = vmatprep.subr.bf16.mxu0 %v1269_v36 }
  0x22   :  { %1172 = vmatprep.subr.bf16.mxu1 %v1271_v38 }
  0x23   :  { %736 = vmatmul.mubr.bf16.vlgmr.msra.gmra.mrb[0].mxu0 %v1263_v32 }
  0x24   :  { %785 = vmatmul.mubr.bf16.vlgmr.msra.gmra.mrb[0].mxu1 %v1266_v34  ;;  %1145 = vmatpush3.bf16.msra.mxu0 %v1270_v37 }
  0x25   :  { %1173 = vmatpush3.bf16.msra.mxu1 %v1272_v39  ;;  %1146 = vmatprep.subr.bf16.mxu0 %v1273_v40 }
  0x26   :  { %1174 = vmatprep.subr.bf16.mxu1 %v1275_v42  ;;  %743 = vmatprep.mubr.bf16.mxu0 %v1290_v57 }
  0x27   :  { %792 = vmatprep.mubr.bf16.mxu1 %v1292_v58 }
  0x28   :  { %1147 = vmatpush3.bf16.msra.mxu0 %v1274_v41 }
  0x29   :  { %1175 = vmatpush3.bf16.msra.mxu1 %v1276_v43  ;;  %1148 = vmatprep.subr.bf16.mxu0 %v1277_v44 }
  0x2a   :  { %1176 = vmatprep.subr.bf16.mxu1 %v1279_v46 }
  0x2b   :  { %744 = vmatmul.mubr.bf16.gmra.mrb[4].mxu0 %v1295_v60 }
  0x2c   :  { %1149 = vmatpush3.bf16.msra.mxu0 %v1278_v45  ;;  %793 = vmatmul.mubr.bf16.gmra.mrb[4].mxu1 %v1296_v61 }
  0x2d   :  { %1177 = vmatpush3.bf16.msra.mxu1 %v1280_v47  ;;  %1150 = vmatprep.subr.bf16.mxu0 %v1281_v48 }
  0x2e   :  { %1178 = vmatprep.subr.bf16.mxu1 %v1283_v50  ;;  %833 = vmatprep.mubr.bf16.mxu0 %v1308_v8 }
  0x2f   :  { %882 = vmatprep.mubr.bf16.mxu1 %v1313_v12 }
  0x30   :  { %1151 = vmatpush3.bf16.msra.mxu0 %v1282_v49 }
  0x31   :  { %1179 = vmatpush3.bf16.msra.mxu1 %v1284_v51  ;;  %1152 = vmatprep.subr.bf16.mxu0 %v1285_v52 }
  0x32   :  { %1180 = vmatprep.subr.bf16.mxu1 %v1287_v54 }
  0x34   :  { %1153 = vmatpush3.bf16.msra.mxu0 %v1286_v53 }
  0x35   :  { %1181 = vmatpush3.bf16.msra.mxu1 %v1288_v55  ;;  %1154 = vmatprep.subr.bf16.mxu0 %v1289_v56 }
  0x36   :  { %1182 = vmatprep.subr.bf16.mxu1 %v1297_v62 }
  0x38   :  { %1155 = vmatpush3.bf16.msra.mxu0 %v1294_v59 }
  0x39   :  { %1183 = vmatpush3.bf16.msra.mxu1 %v1298_v63  ;;  %1156 = vmatprep.subr.bf16.mxu0 %v1299_v0 }
  0x3a   :  { %1184 = vmatprep.subr.bf16.mxu1 %v1301_v2 }
  0x3c   :  { %1157 = vmatpush3.bf16.msra.mxu0 %v1300_v1 }
  0x3d   :  { %1185 = vmatpush3.bf16.msra.mxu1 %v1302_v3  ;;  %1158 = vmatprep.subr.bf16.mxu0 %v1303_v4 }
  0x3e   :  { %1186 = vmatprep.subr.bf16.mxu1 %v1305_v6 }
  0x40   :  { %1159 = vmatpush3.bf16.msra.mxu0 %v1304_v5 }
  0x41   :  { %1187 = vmatpush3.bf16.msra.mxu1 %v1309_v9  ;;  %1210 = vmatprep.subr.bf16.mxu0 %v1310_v10 }
  0x43   :  { %834 = vmatmul.mubr.bf16.vlgmr.msra.gmra.mrb[8].mxu0 %v1306_v7 }
  0x44   :  { %1211 = vmatpush3.bf16.msra.mxu0 %v1310_v10  ;;  %883 = vmatmul.mubr.bf16.vlgmr.msra.gmra.mrb[8].mxu1 %v1311_v11 }
  0x45   :  { %1212 = vmatprep.subr.bf16.mxu0 %v1314_v13  ;;  %841 = vmatprep.mubr.bf16.mxu0 %v1315_v14 }
  0x46   :  { %890 = vmatprep.mubr.bf16.mxu1 %v1319_v17 }
  0x48   :  { %1213 = vmatpush3.bf16.msra.mxu0 %v1314_v13 }
  0x49   :  { %1214 = vmatprep.subr.bf16.mxu0 %v1318_v16 }
  0x4b   :  { %842 = vmatmul.mubr.bf16.gmra.mrb[12].mxu0 %v1317_v15 }
  0x4c   :  { %1215 = vmatpush3.bf16.msra.mxu0 %v1318_v16  ;;  %891 = vmatmul.mubr.bf16.gmra.mrb[12].mxu1 %v1321_v18 }
  0x4d   :  { %1216 = vmatprep.subr.bf16.mxu0 %v1322_v19  ;;  %1226 = vmatprep.mubr.bf16.mxu0 %v1327_v21 }
  0x50   :  { %1217 = vmatpush3.bf16.msra.mxu0 %v1322_v19 }
  0x51   :  { %1218 = vmatprep.subr.bf16.mxu0 %v1323_v20 }
  0x54   :  { %1219 = vmatpush3.bf16.msra.mxu0 %v1323_v20 }
  0x55   :  { %1220 = vmatprep.subr.bf16.mxu0 %v1324_v22 }
  0x58   :  { %1221 = vmatpush3.bf16.msra.mxu0 %v1324_v22 }
  0x59   :  { %1222 = vmatprep.subr.bf16.mxu0 %v1325_v23 }
  0x5c   :  { %1223 = vmatpush3.bf16.msra.mxu0 %v1325_v23 }
  0x5d   :  { %1224 = vmatprep.subr.bf16.mxu0 %v1326_v24 }
  0x60   :  { %1225 = vmatpush3.bf16.msra.mxu0 %v1326_v24 }
  0x63   :  { %1227 = vmatmul.mubr.bf16.vlgmr.msra.gmra.mrb[16].mxu0 %v1328_v25 }
  0xf6   :  { %v1104_v27 = vpop.f32.mrb[0].mxu0 }
  0xf7   :  { %v1132_v28 = vpop.f32.mrb[0].mxu1  ;;  %v1105_v29 = vpop.f32.mrb[1].mxu0 }
  0xf8   :  { %v1106_v30 = vadd.f32 %v1105_v29, %v1104_v27  ;;  %v1133_v31 = vpop.f32.mrb[1].mxu1  ;;  %v1107_v32 = vpop.f32.mrb[2].mxu0 }
  0xf9   :  { %v1134_v33 = vadd.f32 %v1133_v31, %v1132_v28  ;;  %v1135_v34 = vpop.f32.mrb[2].mxu1  ;;  %v1108_v35 = vpop.f32.mrb[3].mxu0 }
  0xfa   :  { %v1109_v36 = vadd.f32 %v1108_v35, %v1107_v32  ;;  %v1136_v37 = vpop.f32.mrb[3].mxu1 }
  0xfb   :  { %v787_v38 = vadd.f32 %v1134_v33, %v1106_v30  ;;  %v1137_v39 = vadd.f32 %v1136_v37, %v1135_v34 }
  0xfd   :  { %v790_v40 = vadd.f32 %v1137_v39, %v1109_v36 }
  0xfe   :  { %v1110_v41 = vpop.f32.mrb[4].mxu0 }
  0xff   :  { %v1138_v42 = vpop.f32.mrb[4].mxu1  ;;  %v1111_v43 = vpop.f32.mrb[5].mxu0 }
 0x100   :  { %v1139_v44 = vpop.f32.mrb[5].mxu1  ;;  %v1112_v45 = vadd.f32 %v1111_v43, %v1110_v41  ;;  %v1113_v47 = vpop.f32.mrb[6].mxu0 }
 0x101   :  { %v1140_v46 = vadd.f32 %v1139_v44, %v1138_v42  ;;  %v1141_v48 = vpop.f32.mrb[6].mxu1  ;;  %v1114_v49 = vpop.f32.mrb[7].mxu0 }
 0x102   :  { %v1142_v50 = vpop.f32.mrb[7].mxu1  ;;  %v1115_v52 = vadd.f32 %v1114_v49, %v1113_v47 }
 0x103   :  { %v795_v51 = vadd.f32 %v1140_v46, %v1112_v45  ;;  %v1143_v53 = vadd.f32 %v1142_v50, %v1141_v48  ;;  %v958_v50 = vld [vmem:[%s1657_s3] sm:$0x1] }
 0x105   :  { %v798_v54 = vadd.f32 %v1143_v53, %v1115_v52  ;;  %v970_v53 = vld [vmem:[%s1658_s4] sm:$0x1] }
 0x116   :  { %v1160_v55 = vpop.f32.mrb[8].mxu0 }
 0x117   :  { %v1161_v56 = vpop.f32.mrb[9].mxu0  ;;  %v1188_v59 = vpop.f32.mrb[8].mxu1 }
 0x118   :  { %v1162_v57 = vadd.f32 %v1161_v56, %v1160_v55  ;;  %v1163_v58 = vpop.f32.mrb[10].mxu0  ;;  %v1189_v63 = vpop.f32.mrb[9].mxu1 }
 0x119   :  { %v1164_v60 = vpop.f32.mrb[11].mxu0  ;;  %v1190_v0 = vadd.f32 %v1189_v63, %v1188_v59  ;;  %v1191_v1 = vpop.f32.mrb[10].mxu1 }
 0x11a   :  { %v836_v61 = vadd.f32 %v1162_v57, %v787_v38  ;;  %v1165_v62 = vadd.f32 %v1164_v60, %v1163_v58  ;;  %v1192_v3 = vpop.f32.mrb[11].mxu1 }
 0x11b   :  { %v1193_v4 = vadd.f32 %v1192_v3, %v1191_v1 }
 0x11c   :  { %v839_v2 = vadd.f32 %v1165_v62, %v790_v40  ;;  %v885_v5 = vadd.f32 %v1190_v0, %v836_v61 }
 0x11e   :  { %v1166_v6 = vpop.f32.mrb[12].mxu0  ;;  %v888_v8 = vadd.f32 %v1193_v4, %v839_v2 }
 0x11f   :  { %v1167_v7 = vpop.f32.mrb[13].mxu0  ;;  %v1194_v11 = vpop.f32.mrb[12].mxu1 }
 0x120   :  { %v1168_v9 = vadd.f32 %v1167_v7, %v1166_v6  ;;  %v1169_v10 = vpop.f32.mrb[14].mxu0  ;;  %v1195_v15 = vpop.f32.mrb[13].mxu1 }
 0x121   :  { %v1170_v12 = vpop.f32.mrb[15].mxu0  ;;  %v1196_v16 = vadd.f32 %v1195_v15, %v1194_v11  ;;  %v1197_v17 = vpop.f32.mrb[14].mxu1 }
 0x122   :  { %v844_v13 = vadd.f32 %v1168_v9, %v795_v51  ;;  %v1171_v14 = vadd.f32 %v1170_v12, %v1169_v10  ;;  %v1198_v19 = vpop.f32.mrb[15].mxu1 }
 0x123   :  { %v1199_v20 = vadd.f32 %v1198_v19, %v1197_v17 }
 0x124   :  { %v847_v18 = vadd.f32 %v1171_v14, %v798_v54  ;;  %v893_v21 = vadd.f32 %v1196_v16, %v844_v13 }
 0x126   :  { %v896_v22 = vadd.f32 %v1199_v20, %v847_v18 }
 0x136   :  { %v1228_v23 = vpop.f32.mrb[16].mxu0 }
 0x137   :  { %v942_v24 = vadd.f32 %v1228_v23, %v893_v21  ;;  %v933_v25 = vpop.f32.mrb[17].mxu0 }
 0x138   :  { %v934_v26 = vadd.f32 %v933_v25, %v885_v5  ;;  %v1229_v27 = vpop.f32.mrb[18].mxu0 }
 0x139   :  { %950 = vst [vmem:[%s1659_s2 + $0x10] sm:$0xff] %v942_v24  ;;  %v945_v28 = vadd.f32 %v1229_v27, %v896_v22  ;;  %v936_v29 = vpop.f32.mrb[19].mxu0  ;;  %v973_v34 = vmul.f32 %v942_v24, %v942_v24 }
 0x13a   :  { %948 = vst [vmem:[%s1659_s2] sm:$0xff] %v934_v26  ;;  %v937_v30 = vadd.f32 %v936_v29, %v888_v8  ;;  %v971_v31 = vmul.f32 %v934_v26, %v934_v26 }
 0x13b   :  { %951 = vst [vmem:[%s1659_s2 + $0x18] sm:$0xff] %v945_v28  ;;  %v974_v37 = vmul.f32 %v945_v28, %v945_v28 }
 0x13c   :  { %949 = vst [vmem:[%s1659_s2 + $0x8] sm:$0xff] %v937_v30  ;;  %v959_v32 = vadd.f32 %v937_v30, %v934_v26  ;;  %v972_v33 = vmul.f32 %v937_v30, %v937_v30 }
 0x13e   :  { %v960_v35 = vadd.f32 %v959_v32, %v942_v24  ;;  %v975_v36 = vadd.f32 %v972_v33, %v971_v31 }
 0x140   :  { %v961_v38 = vadd.f32 %v960_v35, %v945_v28  ;;  %v976_v39 = vadd.f32 %v975_v36, %v973_v34 }
 0x142   :  { %v962_v40 = vrot.slane %v961_v38, 4  ;;  %v977_v41 = vadd.f32 %v976_v39, %v974_v37 }
 0x144   :  { %v963_v42 = vadd.f32 %v962_v40, %v961_v38  ;;  %v978_v43 = vrot.slane %v977_v41, 4 }
 0x146   :  { %v964_v44 = vrot.slane %v963_v42, 2  ;;  %v979_v45 = vadd.f32 %v978_v43, %v977_v41 }
 0x148   :  { %v965_v46 = vadd.f32 %v964_v44, %v963_v42  ;;  %v980_v47 = vrot.slane %v979_v45, 2 }
 0x14a   :  { %v966_v48 = vrot.slane %v965_v46, 1  ;;  %v981_v49 = vadd.f32 %v980_v47, %v979_v45 }
 0x14c   :  { %v967_v51 = vadd.f32 %v966_v48, %v965_v46  ;;  %v982_v52 = vrot.slane %v981_v49, 1 }
 0x14e   :  { %v968_v54 = vadd.f32 %v967_v51, %v958_v50  ;;  %v983_v55 = vadd.f32 %v982_v52, %v981_v49 }
 0x150   :  { %969 = vst [vmem:[%s1657_s3] sm:$0x1] %v968_v54  ;;  %v984_v56 = vadd.f32 %v983_v55, %v970_v53 }
 0x152   :  { %985 = vst [vmem:[%s1658_s4] sm:$0x1] %v984_v56 }

</bundles_post_ra>
